<compile_context>
chip_gen: v7x
topology: tpu7x:2x2x1
jax: 0.10.0
libtpu: 0.0.40
codegen_flags: <defaults>
</compile_context>

<pallas_src>
import math
import functools

import jax
import jax.numpy as jnp
from jax.experimental import pallas as pl
from jax.experimental.pallas import tpu as pltpu


# (cin, cout, kernel, stride) for the 8 Conv1d layers of DiscriminatorLinear (all bias=False).
CONV_CFG = [
    (1, 4, 8, 4),
    (4, 8, 8, 4),
    (8, 16, 5, 3),
    (16, 16, 5, 2),
    (16, 32, 5, 2),
    (32, 64, 3, 2),
    (64, 64, 3, 2),
    (64, 64, 3, 2),
]
FC_IN = 64 * 20          # nn.Linear(64 * 20, 64) -> final conv length must be exactly 20
FC_HID = 64
BN_EPS = 1e-5
LRELU_SLOPE = 0.2


# --------------------------------------------------------------------------------------
# Pallas kernels
# --------------------------------------------------------------------------------------
def _conv_bn_lrelu_kernel(p_ref, w_ref, g_ref, b_ref, o_ref, *, inv_n, eps, slope):
    """Fused Conv1d (matmul on im2col patches) + BatchNorm1d(train stats) + LeakyReLU.

    p_ref: (Cin*k, B*Lout)  bf16   im2col patches (lanes = batch*length)
    w_ref: (Cout, Cin*k)    bf16   conv weight (PyTorch (Cout,Cin,k) flattened c-major)
    g_ref, b_ref: (Cout, 1) f32    BN affine parameters
    o_ref: (Cout, B*Lout)   bf16
    """
    # bf16 MXU matmul, f32 accumulation.
    y = jnp.dot(w_ref[...], p_ref[...], preferred_element_type=jnp.float32)
    # BatchNorm1d training-mode statistics: per-channel over (batch, length) = lane axis.
    mean = jnp.sum(y, axis=1, keepdims=True) * inv_n
    d = y - mean
    var = jnp.sum(d * d, axis=1, keepdims=True) * inv_n        # biased variance (PyTorch)
    yn = d * jax.lax.rsqrt(var + eps) * g_ref[...] + b_ref[...]
    # LeakyReLU(slope) == max(y, slope*y) for 0 < slope < 1.
    o_ref[...] = jnp.maximum(yn, slope * yn).astype(o_ref.dtype)


def conv_bn_lrelu(patches, w, gamma, beta):
    K, N = patches.shape
    Cout = w.shape[0]
    kern = functools.partial(
        _conv_bn_lrelu_kernel, inv_n=1.0 / float(N), eps=BN_EPS, slope=LRELU_SLOPE
    )
    return pl.pallas_call(
        kern,
        out_shape=jax.ShapeDtypeStruct((Cout, N), jnp.bfloat16),
        grid=(1,),
        in_specs=[
            pl.BlockSpec((K, N), lambda i: (0, 0)),
            pl.BlockSpec((Cout, K), lambda i: (0, 0)),
            pl.BlockSpec((Cout, 1), lambda i: (0, 0)),
            pl.BlockSpec((Cout, 1), lambda i: (0, 0)),
        ],
        out_specs=pl.BlockSpec((Cout, N), lambda i: (0, 0)),
        compiler_params=pltpu.CompilerParams(dimension_semantics=("arbitrary",)),
    )(patches, w, gamma, beta)


def _head_kernel(x_ref, w1_ref, b1_ref, w2_ref, b2_ref, o_ref, *, slope):
    """Fused Flattened-head: Linear(1280,64)+bias -> LeakyReLU -> Linear(64,1)+bias."""
    h = jnp.dot(x_ref[...], w1_ref[...], preferred_element_type=jnp.float32) + b1_ref[...]
    h = jnp.maximum(h, slope * h)
    # Final 64 -> 1 projection as VPU multiply + lane reduce (avoids an N=1 matmul).
    o_ref[...] = jnp.sum(h * w2_ref[...], axis=1, keepdims=True) + b2_ref[...]


def mlp_head(x_flat, w1t, b1, w2, b2):
    B, K = x_flat.shape
    H = w1t.shape[1]
    kern = functools.partial(_head_kernel, slope=LRELU_SLOPE)
    return pl.pallas_call(
        kern,
        out_shape=jax.ShapeDtypeStruct((B, 1), jnp.float32),
        grid=(1,),
        in_specs=[
            pl.BlockSpec((B, K), lambda i: (0, 0)),
            pl.BlockSpec((K, H), lambda i: (0, 0)),
            pl.BlockSpec((1, H), lambda i: (0, 0)),
            pl.BlockSpec((1, H), lambda i: (0, 0)),
            pl.BlockSpec((1, 1), lambda i: (0, 0)),
        ],
        out_specs=pl.BlockSpec((B, 1), lambda i: (0, 0)),
        compiler_params=pltpu.CompilerParams(dimension_semantics=("arbitrary",)),
    )(x_flat, w1t, b1, w2, b2)


# --------------------------------------------------------------------------------------
# Plain-JAX layout glue (im2col, flatten) — pure data movement, no compute
# --------------------------------------------------------------------------------------
def im2col(a, batch, k, s):
    """a: (C, B*L) channels-major activation -> patches (C*k, B*Lout), Lout.

    patches[c*k + j, b*Lout + l] = a[c, b*L + l*s + j]  (matches PyTorch conv weight flatten).
    """
    C, BL = a.shape
    L = BL // batch
    Lout = (L - k) // s + 1
    a3 = a.reshape(C, batch, L)
    cols = [a3[:, :, j: j + s * (Lout - 1) + 1: s] for j in range(k)]  # k x (C, B, Lout)
    p = jnp.stack(cols, axis=1)                                        # (C, k, B, Lout)
    return p.reshape(C * k, batch * Lout), Lout


# --------------------------------------------------------------------------------------
# Parameters & forward pass
# --------------------------------------------------------------------------------------
def init_params(key):
    p = {"conv_w": [], "bn_g": [], "bn_b": []}
    for (cin, cout, k, _s) in CONV_CFG:
        key, k1, k2, k3 = jax.random.split(key, 4)
        w = jax.random.normal(k1, (cout, cin, k), jnp.float32) / math.sqrt(cin * k)
        p["conv_w"].append(w.reshape(cout, cin * k).astype(jnp.bfloat16))
        p["bn_g"].append(1.0 + 0.1 * jax.random.normal(k2, (cout, 1), jnp.float32))
        p["bn_b"].append(0.1 * jax.random.normal(k3, (cout, 1), jnp.float32))
    key, k1, k2, k3, k4 = jax.random.split(key, 5)
    p["w1t"] = (jax.random.normal(k1, (FC_IN, FC_HID), jnp.float32)
                / math.sqrt(FC_IN)).astype(jnp.bfloat16)               # Linear1 weight^T
    p["b1"] = 0.1 * jax.random.normal(k2, (1, FC_HID), jnp.float32)
    p["w2"] = jax.random.normal(k3, (1, FC_HID), jnp.float32) / math.sqrt(FC_HID)
    p["b2"] = 0.1 * jax.random.normal(k4, (1, 1), jnp.float32)
    return p


def discriminator_forward(x, params):
    """x: (B, 1, L) f32, PyTorch NCL layout. Returns (B, 1) f32 logits."""
    B, Cin, L = x.shape
    # -> channels-major, lane-dense layout A[c, b*L + l], bf16 for the MXU.
    a = x.transpose(1, 0, 2).reshape(Cin, B * L).astype(jnp.bfloat16)

    for i, (_cin, _cout, k, s) in enumerate(CONV_CFG):
        patches, _ = im2col(a, B, k, s)
        a = conv_bn_lrelu(patches, params["conv_w"][i],
                          params["bn_g"][i], params["bn_b"][i])

    # Flatten exactly like PyTorch: (B, C, Lf) -> (B, C*Lf), channel-major.
    C, BLf = a.shape
    Lf = BLf // B
    assert C * Lf == FC_IN, f"final conv output {C}x{Lf} does not match Linear({FC_IN}, ...)"
    x_flat = a.reshape(C, B, Lf).transpose(1, 0, 2).reshape(B, C * Lf)

    return mlp_head(x_flat, params["w1t"], params["b1"], params["w2"], params["b2"])


# --------------------------------------------------------------------------------------
if __name__ == "__main__":
    # The architecture hard-codes Linear(64*20, 64), so the input length must map to a
    # final conv length of exactly 20.  L_IN = 32768 (the natural power-of-two choice in
    # that preimage) does:  32768 -> 8191 -> 2046 -> 681 -> 339 -> 168 -> 83 -> 41 -> 20.
    B = 2
    L_IN = 32768

    key = jax.random.PRNGKey(0)
    key, xk = jax.random.split(key)
    x = jax.random.normal(xk, (B, 1, L_IN), jnp.float32)
    params = init_params(key)

    fwd = jax.jit(discriminator_forward)
    out = jax.block_until_ready(fwd(x, params))

    assert out.shape == (B, 1)
    assert bool(jnp.all(jnp.isfinite(out)))
    print("KERNEL_OK")
</pallas_src>

<mosaic_0001>
module attributes {stable_mosaic.version = 11 : i64} {
  func.func @_conv_bn_lrelu_kernel(%arg0: i32, %arg1: memref<8x16382xbf16, #tpu.memory_space<vmem>>, %arg2: memref<4x8xbf16, #tpu.memory_space<vmem>>, %arg3: memref<4x1xf32, #tpu.memory_space<vmem>>, %arg4: memref<4x1xf32, #tpu.memory_space<vmem>>, %arg5: memref<4x16382xbf16, #tpu.memory_space<vmem>>) attributes {dimension_semantics = [#tpu.dimension_semantics<arbitrary>], iteration_bounds = array<i64: 1>, scalar_prefetch = 0 : i64, scratch_operands = 0 : i64, tpu.core_type = #tpu.core_type<tc>, window_params = [{pipeline_mode = #tpu.pipeline_mode<synchronous>, transform_indices = @transform_0, window_bounds = array<i64: 8, 16382>}, {pipeline_mode = #tpu.pipeline_mode<synchronous>, transform_indices = @transform_1, window_bounds = array<i64: 4, 8>}, {pipeline_mode = #tpu.pipeline_mode<synchronous>, transform_indices = @transform_2, window_bounds = array<i64: 4, 1>}, {pipeline_mode = #tpu.pipeline_mode<synchronous>, transform_indices = @transform_3, window_bounds = array<i64: 4, 1>}, {pipeline_mode = #tpu.pipeline_mode<synchronous>, transform_indices = @transform_4, window_bounds = array<i64: 4, 16382>}]} {
    %c0 = arith.constant 0 : index
    %c0_0 = arith.constant 0 : index
    %0 = vector.load %arg2[%c0, %c0_0] : memref<4x8xbf16, #tpu.memory_space<vmem>>, vector<4x8xbf16>
    %c0_1 = arith.constant 0 : index
    %c0_2 = arith.constant 0 : index
    %1 = vector.load %arg1[%c0_1, %c0_2] : memref<8x16382xbf16, #tpu.memory_space<vmem>>, vector<8x16382xbf16>
    %cst = arith.constant dense<0.000000e+00> : vector<4x16382xf32>
    %2 = tpu.matmul %0, %1, %cst {dimension_numbers = #tpu.dot_dimension_numbers<[1], [0], [0], [1], [0, 0, 1, 1], [], []>} : vector<4x8xbf16>, vector<8x16382xbf16>, vector<4x16382xf32> -> vector<4x16382xf32>
    %cst_3 = arith.constant dense<0.000000e+00> : vector<4xf32>
    %3 = vector.multi_reduction <add>, %2, %cst_3 [1] : vector<4x16382xf32> to vector<4xf32>
    %4 = vector.shape_cast %3 : vector<4xf32> to vector<4x1xf32>
    %cst_4 = arith.constant 6.10426068E-5 : f32
    %5 = vector.broadcast %cst_4 : f32 to vector<4x1xf32>
    %6 = arith.mulf %4, %5 : vector<4x1xf32>
    %7 = vector.broadcast %6 : vector<4x1xf32> to vector<4x16382xf32>
    %8 = arith.subf %2, %7 : vector<4x16382xf32>
    %9 = arith.mulf %8, %8 : vector<4x16382xf32>
    %cst_5 = arith.constant dense<0.000000e+00> : vector<4xf32>
    %10 = vector.multi_reduction <add>, %9, %cst_5 [1] : vector<4x16382xf32> to vector<4xf32>
    %11 = vector.shape_cast %10 : vector<4xf32> to vector<4x1xf32>
    %cst_6 = arith.constant 6.10426068E-5 : f32
    %12 = vector.broadcast %cst_6 : f32 to vector<4x1xf32>
    %13 = arith.mulf %11, %12 : vector<4x1xf32>
    %cst_7 = arith.constant 9.99999974E-6 : f32
    %14 = vector.broadcast %cst_7 : f32 to vector<4x1xf32>
    %15 = arith.addf %13, %14 : vector<4x1xf32>
    %16 = math.rsqrt %15 : vector<4x1xf32>
    %17 = vector.broadcast %16 : vector<4x1xf32> to vector<4x16382xf32>
    %18 = arith.mulf %8, %17 : vector<4x16382xf32>
    %c0_8 = arith.constant 0 : index
    %c0_9 = arith.constant 0 : index
    %19 = vector.load %arg3[%c0_8, %c0_9] : memref<4x1xf32, #tpu.memory_space<vmem>>, vector<4x1xf32>
    %20 = vector.broadcast %19 : vector<4x1xf32> to vector<4x16382xf32>
    %21 = arith.mulf %18, %20 : vector<4x16382xf32>
    %c0_10 = arith.constant 0 : index
    %c0_11 = arith.constant 0 : index
    %22 = vector.load %arg4[%c0_10, %c0_11] : memref<4x1xf32, #tpu.memory_space<vmem>>, vector<4x1xf32>
    %23 = vector.broadcast %22 : vector<4x1xf32> to vector<4x16382xf32>
    %24 = arith.addf %21, %23 : vector<4x16382xf32>
    %cst_12 = arith.constant 2.000000e-01 : f32
    %25 = vector.broadcast %cst_12 : f32 to vector<4x16382xf32>
    %26 = arith.mulf %25, %24 : vector<4x16382xf32>
    %27 = arith.maximumf %24, %26 : vector<4x16382xf32>
    %28 = arith.truncf %27 : vector<4x16382xf32> to vector<4x16382xbf16>
    %c0_13 = arith.constant 0 : index
    %c0_14 = arith.constant 0 : index
    %29 = vector.load %arg5[%c0_13, %c0_14] : memref<4x16382xbf16, #tpu.memory_space<vmem>>, vector<4x16382xbf16>
    tpu.vector_store %arg5[%c0_13, %c0_14], %28 {strides = array<i32>} : memref<4x16382xbf16, #tpu.memory_space<vmem>>, vector<4x16382xbf16>,
    return
  }
  func.func @transform_0(%arg0: i32) -> (i32, i32) {
    %c0_i32 = arith.constant 0 : i32
    %c0_i32_0 = arith.constant 0 : i32
    %c0_i32_1 = arith.constant 0 : i32
    return %c0_i32, %c0_i32_0 : i32, i32
  }
  func.func @transform_1(%arg0: i32) -> (i32, i32) {
    %c0_i32 = arith.constant 0 : i32
    %c0_i32_0 = arith.constant 0 : i32
    %c0_i32_1 = arith.constant 0 : i32
    return %c0_i32, %c0_i32_0 : i32, i32
  }
  func.func @transform_2(%arg0: i32) -> (i32, i32) {
    %c0_i32 = arith.constant 0 : i32
    %c0_i32_0 = arith.constant 0 : i32
    %c0_i32_1 = arith.constant 0 : i32
    return %c0_i32, %c0_i32_0 : i32, i32
  }
  func.func @transform_3(%arg0: i32) -> (i32, i32) {
    %c0_i32 = arith.constant 0 : i32
    %c0_i32_0 = arith.constant 0 : i32
    %c0_i32_1 = arith.constant 0 : i32
    return %c0_i32, %c0_i32_0 : i32, i32
  }
  func.func @transform_4(%arg0: i32) -> (i32, i32) {
    %c0_i32 = arith.constant 0 : i32
    %c0_i32_0 = arith.constant 0 : i32
    %c0_i32_1 = arith.constant 0 : i32
    return %c0_i32, %c0_i32_0 : i32, i32
  }
}

module attributes {stable_mosaic.version = 11 : i64} {
  func.func @_conv_bn_lrelu_kernel(%arg0: i32, %arg1: memref<32x4092xbf16, #tpu.memory_space<vmem>>, %arg2: memref<8x32xbf16, #tpu.memory_space<vmem>>, %arg3: memref<8x1xf32, #tpu.memory_space<vmem>>, %arg4: memref<8x1xf32, #tpu.memory_space<vmem>>, %arg5: memref<8x4092xbf16, #tpu.memory_space<vmem>>) attributes {dimension_semantics = [#tpu.dimension_semantics<arbitrary>], iteration_bounds = array<i64: 1>, scalar_prefetch = 0 : i64, scratch_operands = 0 : i64, tpu.core_type = #tpu.core_type<tc>, window_params = [{pipeline_mode = #tpu.pipeline_mode<synchronous>, transform_indices = @transform_0, window_bounds = array<i64: 32, 4092>}, {pipeline_mode = #tpu.pipeline_mode<synchronous>, transform_indices = @transform_1, window_bounds = array<i64: 8, 32>}, {pipeline_mode = #tpu.pipeline_mode<synchronous>, transform_indices = @transform_2, window_bounds = array<i64: 8, 1>}, {pipeline_mode = #tpu.pipeline_mode<synchronous>, transform_indices = @transform_3, window_bounds = array<i64: 8, 1>}, {pipeline_mode = #tpu.pipeline_mode<synchronous>, transform_indices = @transform_4, window_bounds = array<i64: 8, 4092>}]} {
    %c0 = arith.constant 0 : index
    %c0_0 = arith.constant 0 : index
    %0 = vector.load %arg2[%c0, %c0_0] : memref<8x32xbf16, #tpu.memory_space<vmem>>, vector<8x32xbf16>
    %c0_1 = arith.constant 0 : index
    %c0_2 = arith.constant 0 : index
    %1 = vector.load %arg1[%c0_1, %c0_2] : memref<32x4092xbf16, #tpu.memory_space<vmem>>, vector<32x4092xbf16>
    %cst = arith.constant dense<0.000000e+00> : vector<8x4092xf32>
    %2 = tpu.matmul %0, %1, %cst {dimension_numbers = #tpu.dot_dimension_numbers<[1], [0], [0], [1], [0, 0, 1, 1], [], []>} : vector<8x32xbf16>, vector<32x4092xbf16>, vector<8x4092xf32> -> vector<8x4092xf32>
    %cst_3 = arith.constant dense<0.000000e+00> : vector<8xf32>
    %3 = vector.multi_reduction <add>, %2, %cst_3 [1] : vector<8x4092xf32> to vector<8xf32>
    %4 = vector.shape_cast %3 : vector<8xf32> to vector<8x1xf32>
    %cst_4 = arith.constant 2.44379276E-4 : f32
    %5 = vector.broadcast %cst_4 : f32 to vector<8x1xf32>
    %6 = arith.mulf %4, %5 : vector<8x1xf32>
    %7 = vector.broadcast %6 : vector<8x1xf32> to vector<8x4092xf32>
    %8 = arith.subf %2, %7 : vector<8x4092xf32>
    %9 = arith.mulf %8, %8 : vector<8x4092xf32>
    %cst_5 = arith.constant dense<0.000000e+00> : vector<8xf32>
    %10 = vector.multi_reduction <add>, %9, %cst_5 [1] : vector<8x4092xf32> to vector<8xf32>
    %11 = vector.shape_cast %10 : vector<8xf32> to vector<8x1xf32>
    %cst_6 = arith.constant 2.44379276E-4 : f32
    %12 = vector.broadcast %cst_6 : f32 to vector<8x1xf32>
    %13 = arith.mulf %11, %12 : vector<8x1xf32>
    %cst_7 = arith.constant 9.99999974E-6 : f32
    %14 = vector.broadcast %cst_7 : f32 to vector<8x1xf32>
    %15 = arith.addf %13, %14 : vector<8x1xf32>
    %16 = math.rsqrt %15 : vector<8x1xf32>
    %17 = vector.broadcast %16 : vector<8x1xf32> to vector<8x4092xf32>
    %18 = arith.mulf %8, %17 : vector<8x4092xf32>
    %c0_8 = arith.constant 0 : index
    %c0_9 = arith.constant 0 : index
    %19 = vector.load %arg3[%c0_8, %c0_9] : memref<8x1xf32, #tpu.memory_space<vmem>>, vector<8x1xf32>
    %20 = vector.broadcast %19 : vector<8x1xf32> to vector<8x4092xf32>
    %21 = arith.mulf %18, %20 : vector<8x4092xf32>
    %c0_10 = arith.constant 0 : index
    %c0_11 = arith.constant 0 : index
    %22 = vector.load %arg4[%c0_10, %c0_11] : memref<8x1xf32, #tpu.memory_space<vmem>>, vector<8x1xf32>
    %23 = vector.broadcast %22 : vector<8x1xf32> to vector<8x4092xf32>
    %24 = arith.addf %21, %23 : vector<8x4092xf32>
    %cst_12 = arith.constant 2.000000e-01 : f32
    %25 = vector.broadcast %cst_12 : f32 to vector<8x4092xf32>
    %26 = arith.mulf %25, %24 : vector<8x4092xf32>
    %27 = arith.maximumf %24, %26 : vector<8x4092xf32>
    %28 = arith.truncf %27 : vector<8x4092xf32> to vector<8x4092xbf16>
    %c0_13 = arith.constant 0 : index
    %c0_14 = arith.constant 0 : index
    %29 = vector.load %arg5[%c0_13, %c0_14] : memref<8x4092xbf16, #tpu.memory_space<vmem>>, vector<8x4092xbf16>
    tpu.vector_store %arg5[%c0_13, %c0_14], %28 {strides = array<i32>} : memref<8x4092xbf16, #tpu.memory_space<vmem>>, vector<8x4092xbf16>,
    return
  }
  func.func @transform_0(%arg0: i32) -> (i32, i32) {
    %c0_i32 = arith.constant 0 : i32
    %c0_i32_0 = arith.constant 0 : i32
    %c0_i32_1 = arith.constant 0 : i32
    return %c0_i32, %c0_i32_0 : i32, i32
  }
  func.func @transform_1(%arg0: i32) -> (i32, i32) {
    %c0_i32 = arith.constant 0 : i32
    %c0_i32_0 = arith.constant 0 : i32
    %c0_i32_1 = arith.constant 0 : i32
    return %c0_i32, %c0_i32_0 : i32, i32
  }
  func.func @transform_2(%arg0: i32) -> (i32, i32) {
    %c0_i32 = arith.constant 0 : i32
    %c0_i32_0 = arith.constant 0 : i32
    %c0_i32_1 = arith.constant 0 : i32
    return %c0_i32, %c0_i32_0 : i32, i32
  }
  func.func @transform_3(%arg0: i32) -> (i32, i32) {
    %c0_i32 = arith.constant 0 : i32
    %c0_i32_0 = arith.constant 0 : i32
    %c0_i32_1 = arith.constant 0 : i32
    return %c0_i32, %c0_i32_0 : i32, i32
  }
  func.func @transform_4(%arg0: i32) -> (i32, i32) {
    %c0_i32 = arith.constant 0 : i32
    %c0_i32_0 = arith.constant 0 : i32
    %c0_i32_1 = arith.constant 0 : i32
    return %c0_i32, %c0_i32_0 : i32, i32
  }
}

module attributes {stable_mosaic.version = 11 : i64} {
  func.func @_conv_bn_lrelu_kernel(%arg0: i32, %arg1: memref<40x1362xbf16, #tpu.memory_space<vmem>>, %arg2: memref<16x40xbf16, #tpu.memory_space<vmem>>, %arg3: memref<16x1xf32, #tpu.memory_space<vmem>>, %arg4: memref<16x1xf32, #tpu.memory_space<vmem>>, %arg5: memref<16x1362xbf16, #tpu.memory_space<vmem>>) attributes {dimension_semantics = [#tpu.dimension_semantics<arbitrary>], iteration_bounds = array<i64: 1>, scalar_prefetch = 0 : i64, scratch_operands = 0 : i64, tpu.core_type = #tpu.core_type<tc>, window_params = [{pipeline_mode = #tpu.pipeline_mode<synchronous>, transform_indices = @transform_0, window_bounds = array<i64: 40, 1362>}, {pipeline_mode = #tpu.pipeline_mode<synchronous>, transform_indices = @transform_1, window_bounds = array<i64: 16, 40>}, {pipeline_mode = #tpu.pipeline_mode<synchronous>, transform_indices = @transform_2, window_bounds = array<i64: 16, 1>}, {pipeline_mode = #tpu.pipeline_mode<synchronous>, transform_indices = @transform_3, window_bounds = array<i64: 16, 1>}, {pipeline_mode = #tpu.pipeline_mode<synchronous>, transform_indices = @transform_4, window_bounds = array<i64: 16, 1362>}]} {
    %c0 = arith.constant 0 : index
    %c0_0 = arith.constant 0 : index
    %0 = vector.load %arg2[%c0, %c0_0] : memref<16x40xbf16, #tpu.memory_space<vmem>>, vector<16x40xbf16>
    %c0_1 = arith.constant 0 : index
    %c0_2 = arith.constant 0 : index
    %1 = vector.load %arg1[%c0_1, %c0_2] : memref<40x1362xbf16, #tpu.memory_space<vmem>>, vector<40x1362xbf16>
    %cst = arith.constant dense<0.000000e+00> : vector<16x1362xf32>
    %2 = tpu.matmul %0, %1, %cst {dimension_numbers = #tpu.dot_dimension_numbers<[1], [0], [0], [1], [0, 0, 1, 1], [], []>} : vector<16x40xbf16>, vector<40x1362xbf16>, vector<16x1362xf32> -> vector<16x1362xf32>
    %cst_3 = arith.constant dense<0.000000e+00> : vector<16xf32>
    %3 = vector.multi_reduction <add>, %2, %cst_3 [1] : vector<16x1362xf32> to vector<16xf32>
    %4 = vector.shape_cast %3 : vector<16xf32> to vector<16x1xf32>
    %cst_4 = arith.constant 7.3421438E-4 : f32
    %5 = vector.broadcast %cst_4 : f32 to vector<16x1xf32>
    %6 = arith.mulf %4, %5 : vector<16x1xf32>
    %7 = vector.broadcast %6 : vector<16x1xf32> to vector<16x1362xf32>
    %8 = arith.subf %2, %7 : vector<16x1362xf32>
    %9 = arith.mulf %8, %8 : vector<16x1362xf32>
    %cst_5 = arith.constant dense<0.000000e+00> : vector<16xf32>
    %10 = vector.multi_reduction <add>, %9, %cst_5 [1] : vector<16x1362xf32> to vector<16xf32>
    %11 = vector.shape_cast %10 : vector<16xf32> to vector<16x1xf32>
    %cst_6 = arith.constant 7.3421438E-4 : f32
    %12 = vector.broadcast %cst_6 : f32 to vector<16x1xf32>
    %13 = arith.mulf %11, %12 : vector<16x1xf32>
    %cst_7 = arith.constant 9.99999974E-6 : f32
    %14 = vector.broadcast %cst_7 : f32 to vector<16x1xf32>
    %15 = arith.addf %13, %14 : vector<16x1xf32>
    %16 = math.rsqrt %15 : vector<16x1xf32>
    %17 = vector.broadcast %16 : vector<16x1xf32> to vector<16x1362xf32>
    %18 = arith.mulf %8, %17 : vector<16x1362xf32>
    %c0_8 = arith.constant 0 : index
    %c0_9 = arith.constant 0 : index
    %19 = vector.load %arg3[%c0_8, %c0_9] : memref<16x1xf32, #tpu.memory_space<vmem>>, vector<16x1xf32>
    %20 = vector.broadcast %19 : vector<16x1xf32> to vector<16x1362xf32>
    %21 = arith.mulf %18, %20 : vector<16x1362xf32>
    %c0_10 = arith.constant 0 : index
    %c0_11 = arith.constant 0 : index
    %22 = vector.load %arg4[%c0_10, %c0_11] : memref<16x1xf32, #tpu.memory_space<vmem>>, vector<16x1xf32>
    %23 = vector.broadcast %22 : vector<16x1xf32> to vector<16x1362xf32>
    %24 = arith.addf %21, %23 : vector<16x1362xf32>
    %cst_12 = arith.constant 2.000000e-01 : f32
    %25 = vector.broadcast %cst_12 : f32 to vector<16x1362xf32>
    %26 = arith.mulf %25, %24 : vector<16x1362xf32>
    %27 = arith.maximumf %24, %26 : vector<16x1362xf32>
    %28 = arith.truncf %27 : vector<16x1362xf32> to vector<16x1362xbf16>
    %c0_13 = arith.constant 0 : index
    %c0_14 = arith.constant 0 : index
    %29 = vector.load %arg5[%c0_13, %c0_14] : memref<16x1362xbf16, #tpu.memory_space<vmem>>, vector<16x1362xbf16>
    tpu.vector_store %arg5[%c0_13, %c0_14], %28 {strides = array<i32>} : memref<16x1362xbf16, #tpu.memory_space<vmem>>, vector<16x1362xbf16>,
    return
  }
  func.func @transform_0(%arg0: i32) -> (i32, i32) {
    %c0_i32 = arith.constant 0 : i32
    %c0_i32_0 = arith.constant 0 : i32
    %c0_i32_1 = arith.constant 0 : i32
    return %c0_i32, %c0_i32_0 : i32, i32
  }
  func.func @transform_1(%arg0: i32) -> (i32, i32) {
    %c0_i32 = arith.constant 0 : i32
    %c0_i32_0 = arith.constant 0 : i32
    %c0_i32_1 = arith.constant 0 : i32
    return %c0_i32, %c0_i32_0 : i32, i32
  }
  func.func @transform_2(%arg0: i32) -> (i32, i32) {
    %c0_i32 = arith.constant 0 : i32
    %c0_i32_0 = arith.constant 0 : i32
    %c0_i32_1 = arith.constant 0 : i32
    return %c0_i32, %c0_i32_0 : i32, i32
  }
  func.func @transform_3(%arg0: i32) -> (i32, i32) {
    %c0_i32 = arith.constant 0 : i32
    %c0_i32_0 = arith.constant 0 : i32
    %c0_i32_1 = arith.constant 0 : i32
    return %c0_i32, %c0_i32_0 : i32, i32
  }
  func.func @transform_4(%arg0: i32) -> (i32, i32) {
    %c0_i32 = arith.constant 0 : i32
    %c0_i32_0 = arith.constant 0 : i32
    %c0_i32_1 = arith.constant 0 : i32
    return %c0_i32, %c0_i32_0 : i32, i32
  }
}

module attributes {stable_mosaic.version = 11 : i64} {
  func.func @_conv_bn_lrelu_kernel(%arg0: i32, %arg1: memref<80x678xbf16, #tpu.memory_space<vmem>>, %arg2: memref<16x80xbf16, #tpu.memory_space<vmem>>, %arg3: memref<16x1xf32, #tpu.memory_space<vmem>>, %arg4: memref<16x1xf32, #tpu.memory_space<vmem>>, %arg5: memref<16x678xbf16, #tpu.memory_space<vmem>>) attributes {dimension_semantics = [#tpu.dimension_semantics<arbitrary>], iteration_bounds = array<i64: 1>, scalar_prefetch = 0 : i64, scratch_operands = 0 : i64, tpu.core_type = #tpu.core_type<tc>, window_params = [{pipeline_mode = #tpu.pipeline_mode<synchronous>, transform_indices = @transform_0, window_bounds = array<i64: 80, 678>}, {pipeline_mode = #tpu.pipeline_mode<synchronous>, transform_indices = @transform_1, window_bounds = array<i64: 16, 80>}, {pipeline_mode = #tpu.pipeline_mode<synchronous>, transform_indices = @transform_2, window_bounds = array<i64: 16, 1>}, {pipeline_mode = #tpu.pipeline_mode<synchronous>, transform_indices = @transform_3, window_bounds = array<i64: 16, 1>}, {pipeline_mode = #tpu.pipeline_mode<synchronous>, transform_indices = @transform_4, window_bounds = array<i64: 16, 678>}]} {
    %c0 = arith.constant 0 : index
    %c0_0 = arith.constant 0 : index
    %0 = vector.load %arg2[%c0, %c0_0] : memref<16x80xbf16, #tpu.memory_space<vmem>>, vector<16x80xbf16>
    %c0_1 = arith.constant 0 : index
    %c0_2 = arith.constant 0 : index
    %1 = vector.load %arg1[%c0_1, %c0_2] : memref<80x678xbf16, #tpu.memory_space<vmem>>, vector<80x678xbf16>
    %cst = arith.constant dense<0.000000e+00> : vector<16x678xf32>
    %2 = tpu.matmul %0, %1, %cst {dimension_numbers = #tpu.dot_dimension_numbers<[1], [0], [0], [1], [0, 0, 1, 1], [], []>} : vector<16x80xbf16>, vector<80x678xbf16>, vector<16x678xf32> -> vector<16x678xf32>
    %cst_3 = arith.constant dense<0.000000e+00> : vector<16xf32>
    %3 = vector.multi_reduction <add>, %2, %cst_3 [1] : vector<16x678xf32> to vector<16xf32>
    %4 = vector.shape_cast %3 : vector<16xf32> to vector<16x1xf32>
    %cst_4 = arith.constant 0.00147492625 : f32
    %5 = vector.broadcast %cst_4 : f32 to vector<16x1xf32>
    %6 = arith.mulf %4, %5 : vector<16x1xf32>
    %7 = vector.broadcast %6 : vector<16x1xf32> to vector<16x678xf32>
    %8 = arith.subf %2, %7 : vector<16x678xf32>
    %9 = arith.mulf %8, %8 : vector<16x678xf32>
    %cst_5 = arith.constant dense<0.000000e+00> : vector<16xf32>
    %10 = vector.multi_reduction <add>, %9, %cst_5 [1] : vector<16x678xf32> to vector<16xf32>
    %11 = vector.shape_cast %10 : vector<16xf32> to vector<16x1xf32>
    %cst_6 = arith.constant 0.00147492625 : f32
    %12 = vector.broadcast %cst_6 : f32 to vector<16x1xf32>
    %13 = arith.mulf %11, %12 : vector<16x1xf32>
    %cst_7 = arith.constant 9.99999974E-6 : f32
    %14 = vector.broadcast %cst_7 : f32 to vector<16x1xf32>
    %15 = arith.addf %13, %14 : vector<16x1xf32>
    %16 = math.rsqrt %15 : vector<16x1xf32>
    %17 = vector.broadcast %16 : vector<16x1xf32> to vector<16x678xf32>
    %18 = arith.mulf %8, %17 : vector<16x678xf32>
    %c0_8 = arith.constant 0 : index
    %c0_9 = arith.constant 0 : index
    %19 = vector.load %arg3[%c0_8, %c0_9] : memref<16x1xf32, #tpu.memory_space<vmem>>, vector<16x1xf32>
    %20 = vector.broadcast %19 : vector<16x1xf32> to vector<16x678xf32>
    %21 = arith.mulf %18, %20 : vector<16x678xf32>
    %c0_10 = arith.constant 0 : index
    %c0_11 = arith.constant 0 : index
    %22 = vector.load %arg4[%c0_10, %c0_11] : memref<16x1xf32, #tpu.memory_space<vmem>>, vector<16x1xf32>
    %23 = vector.broadcast %22 : vector<16x1xf32> to vector<16x678xf32>
    %24 = arith.addf %21, %23 : vector<16x678xf32>
    %cst_12 = arith.constant 2.000000e-01 : f32
    %25 = vector.broadcast %cst_12 : f32 to vector<16x678xf32>
    %26 = arith.mulf %25, %24 : vector<16x678xf32>
    %27 = arith.maximumf %24, %26 : vector<16x678xf32>
    %28 = arith.truncf %27 : vector<16x678xf32> to vector<16x678xbf16>
    %c0_13 = arith.constant 0 : index
    %c0_14 = arith.constant 0 : index
    %29 = vector.load %arg5[%c0_13, %c0_14] : memref<16x678xbf16, #tpu.memory_space<vmem>>, vector<16x678xbf16>
    tpu.vector_store %arg5[%c0_13, %c0_14], %28 {strides = array<i32>} : memref<16x678xbf16, #tpu.memory_space<vmem>>, vector<16x678xbf16>,
    return
  }
  func.func @transform_0(%arg0: i32) -> (i32, i32) {
    %c0_i32 = arith.constant 0 : i32
    %c0_i32_0 = arith.constant 0 : i32
    %c0_i32_1 = arith.constant 0 : i32
    return %c0_i32, %c0_i32_0 : i32, i32
  }
  func.func @transform_1(%arg0: i32) -> (i32, i32) {
    %c0_i32 = arith.constant 0 : i32
    %c0_i32_0 = arith.constant 0 : i32
    %c0_i32_1 = arith.constant 0 : i32
    return %c0_i32, %c0_i32_0 : i32, i32
  }
  func.func @transform_2(%arg0: i32) -> (i32, i32) {
    %c0_i32 = arith.constant 0 : i32
    %c0_i32_0 = arith.constant 0 : i32
    %c0_i32_1 = arith.constant 0 : i32
    return %c0_i32, %c0_i32_0 : i32, i32
  }
  func.func @transform_3(%arg0: i32) -> (i32, i32) {
    %c0_i32 = arith.constant 0 : i32
    %c0_i32_0 = arith.constant 0 : i32
    %c0_i32_1 = arith.constant 0 : i32
    return %c0_i32, %c0_i32_0 : i32, i32
  }
  func.func @transform_4(%arg0: i32) -> (i32, i32) {
    %c0_i32 = arith.constant 0 : i32
    %c0_i32_0 = arith.constant 0 : i32
    %c0_i32_1 = arith.constant 0 : i32
    return %c0_i32, %c0_i32_0 : i32, i32
  }
}

module attributes {stable_mosaic.version = 11 : i64} {
  func.func @_conv_bn_lrelu_kernel(%arg0: i32, %arg1: memref<80x336xbf16, #tpu.memory_space<vmem>>, %arg2: memref<32x80xbf16, #tpu.memory_space<vmem>>, %arg3: memref<32x1xf32, #tpu.memory_space<vmem>>, %arg4: memref<32x1xf32, #tpu.memory_space<vmem>>, %arg5: memref<32x336xbf16, #tpu.memory_space<vmem>>) attributes {dimension_semantics = [#tpu.dimension_semantics<arbitrary>], iteration_bounds = array<i64: 1>, scalar_prefetch = 0 : i64, scratch_operands = 0 : i64, tpu.core_type = #tpu.core_type<tc>, window_params = [{pipeline_mode = #tpu.pipeline_mode<synchronous>, transform_indices = @transform_0, window_bounds = array<i64: 80, 336>}, {pipeline_mode = #tpu.pipeline_mode<synchronous>, transform_indices = @transform_1, window_bounds = array<i64: 32, 80>}, {pipeline_mode = #tpu.pipeline_mode<synchronous>, transform_indices = @transform_2, window_bounds = array<i64: 32, 1>}, {pipeline_mode = #tpu.pipeline_mode<synchronous>, transform_indices = @transform_3, window_bounds = array<i64: 32, 1>}, {pipeline_mode = #tpu.pipeline_mode<synchronous>, transform_indices = @transform_4, window_bounds = array<i64: 32, 336>}]} {
    %c0 = arith.constant 0 : index
    %c0_0 = arith.constant 0 : index
    %0 = vector.load %arg2[%c0, %c0_0] : memref<32x80xbf16, #tpu.memory_space<vmem>>, vector<32x80xbf16>
    %c0_1 = arith.constant 0 : index
    %c0_2 = arith.constant 0 : index
    %1 = vector.load %arg1[%c0_1, %c0_2] : memref<80x336xbf16, #tpu.memory_space<vmem>>, vector<80x336xbf16>
    %cst = arith.constant dense<0.000000e+00> : vector<32x336xf32>
    %2 = tpu.matmul %0, %1, %cst {dimension_numbers = #tpu.dot_dimension_numbers<[1], [0], [0], [1], [0, 0, 1, 1], [], []>} : vector<32x80xbf16>, vector<80x336xbf16>, vector<32x336xf32> -> vector<32x336xf32>
    %cst_3 = arith.constant dense<0.000000e+00> : vector<32xf32>
    %3 = vector.multi_reduction <add>, %2, %cst_3 [1] : vector<32x336xf32> to vector<32xf32>
    %4 = vector.shape_cast %3 : vector<32xf32> to vector<32x1xf32>
    %cst_4 = arith.constant 0.00297619053 : f32
    %5 = vector.broadcast %cst_4 : f32 to vector<32x1xf32>
    %6 = arith.mulf %4, %5 : vector<32x1xf32>
    %7 = vector.broadcast %6 : vector<32x1xf32> to vector<32x336xf32>
    %8 = arith.subf %2, %7 : vector<32x336xf32>
    %9 = arith.mulf %8, %8 : vector<32x336xf32>
    %cst_5 = arith.constant dense<0.000000e+00> : vector<32xf32>
    %10 = vector.multi_reduction <add>, %9, %cst_5 [1] : vector<32x336xf32> to vector<32xf32>
    %11 = vector.shape_cast %10 : vector<32xf32> to vector<32x1xf32>
    %cst_6 = arith.constant 0.00297619053 : f32
    %12 = vector.broadcast %cst_6 : f32 to vector<32x1xf32>
    %13 = arith.mulf %11, %12 : vector<32x1xf32>
    %cst_7 = arith.constant 9.99999974E-6 : f32
    %14 = vector.broadcast %cst_7 : f32 to vector<32x1xf32>
    %15 = arith.addf %13, %14 : vector<32x1xf32>
    %16 = math.rsqrt %15 : vector<32x1xf32>
    %17 = vector.broadcast %16 : vector<32x1xf32> to vector<32x336xf32>
    %18 = arith.mulf %8, %17 : vector<32x336xf32>
    %c0_8 = arith.constant 0 : index
    %c0_9 = arith.constant 0 : index
    %19 = vector.load %arg3[%c0_8, %c0_9] : memref<32x1xf32, #tpu.memory_space<vmem>>, vector<32x1xf32>
    %20 = vector.broadcast %19 : vector<32x1xf32> to vector<32x336xf32>
    %21 = arith.mulf %18, %20 : vector<32x336xf32>
    %c0_10 = arith.constant 0 : index
    %c0_11 = arith.constant 0 : index
    %22 = vector.load %arg4[%c0_10, %c0_11] : memref<32x1xf32, #tpu.memory_space<vmem>>, vector<32x1xf32>
    %23 = vector.broadcast %22 : vector<32x1xf32> to vector<32x336xf32>
    %24 = arith.addf %21, %23 : vector<32x336xf32>
    %cst_12 = arith.constant 2.000000e-01 : f32
    %25 = vector.broadcast %cst_12 : f32 to vector<32x336xf32>
    %26 = arith.mulf %25, %24 : vector<32x336xf32>
    %27 = arith.maximumf %24, %26 : vector<32x336xf32>
    %28 = arith.truncf %27 : vector<32x336xf32> to vector<32x336xbf16>
    %c0_13 = arith.constant 0 : index
    %c0_14 = arith.constant 0 : index
    %29 = vector.load %arg5[%c0_13, %c0_14] : memref<32x336xbf16, #tpu.memory_space<vmem>>, vector<32x336xbf16>
    tpu.vector_store %arg5[%c0_13, %c0_14], %28 {strides = array<i32>} : memref<32x336xbf16, #tpu.memory_space<vmem>>, vector<32x336xbf16>,
    return
  }
  func.func @transform_0(%arg0: i32) -> (i32, i32) {
    %c0_i32 = arith.constant 0 : i32
    %c0_i32_0 = arith.constant 0 : i32
    %c0_i32_1 = arith.constant 0 : i32
    return %c0_i32, %c0_i32_0 : i32, i32
  }
  func.func @transform_1(%arg0: i32) -> (i32, i32) {
    %c0_i32 = arith.constant 0 : i32
    %c0_i32_0 = arith.constant 0 : i32
    %c0_i32_1 = arith.constant 0 : i32
    return %c0_i32, %c0_i32_0 : i32, i32
  }
  func.func @transform_2(%arg0: i32) -> (i32, i32) {
    %c0_i32 = arith.constant 0 : i32
    %c0_i32_0 = arith.constant 0 : i32
    %c0_i32_1 = arith.constant 0 : i32
    return %c0_i32, %c0_i32_0 : i32, i32
  }
  func.func @transform_3(%arg0: i32) -> (i32, i32) {
    %c0_i32 = arith.constant 0 : i32
    %c0_i32_0 = arith.constant 0 : i32
    %c0_i32_1 = arith.constant 0 : i32
    return %c0_i32, %c0_i32_0 : i32, i32
  }
  func.func @transform_4(%arg0: i32) -> (i32, i32) {
    %c0_i32 = arith.constant 0 : i32
    %c0_i32_0 = arith.constant 0 : i32
    %c0_i32_1 = arith.constant 0 : i32
    return %c0_i32, %c0_i32_0 : i32, i32
  }
}

module attributes {stable_mosaic.version = 11 : i64} {
  func.func @_conv_bn_lrelu_kernel(%arg0: i32, %arg1: memref<96x166xbf16, #tpu.memory_space<vmem>>, %arg2: memref<64x96xbf16, #tpu.memory_space<vmem>>, %arg3: memref<64x1xf32, #tpu.memory_space<vmem>>, %arg4: memref<64x1xf32, #tpu.memory_space<vmem>>, %arg5: memref<64x166xbf16, #tpu.memory_space<vmem>>) attributes {dimension_semantics = [#tpu.dimension_semantics<arbitrary>], iteration_bounds = array<i64: 1>, scalar_prefetch = 0 : i64, scratch_operands = 0 : i64, tpu.core_type = #tpu.core_type<tc>, window_params = [{pipeline_mode = #tpu.pipeline_mode<synchronous>, transform_indices = @transform_0, window_bounds = array<i64: 96, 166>}, {pipeline_mode = #tpu.pipeline_mode<synchronous>, transform_indices = @transform_1, window_bounds = array<i64: 64, 96>}, {pipeline_mode = #tpu.pipeline_mode<synchronous>, transform_indices = @transform_2, window_bounds = array<i64: 64, 1>}, {pipeline_mode = #tpu.pipeline_mode<synchronous>, transform_indices = @transform_3, window_bounds = array<i64: 64, 1>}, {pipeline_mode = #tpu.pipeline_mode<synchronous>, transform_indices = @transform_4, window_bounds = array<i64: 64, 166>}]} {
    %c0 = arith.constant 0 : index
    %c0_0 = arith.constant 0 : index
    %0 = vector.load %arg2[%c0, %c0_0] : memref<64x96xbf16, #tpu.memory_space<vmem>>, vector<64x96xbf16>
    %c0_1 = arith.constant 0 : index
    %c0_2 = arith.constant 0 : index
    %1 = vector.load %arg1[%c0_1, %c0_2] : memref<96x166xbf16, #tpu.memory_space<vmem>>, vector<96x166xbf16>
    %cst = arith.constant dense<0.000000e+00> : vector<64x166xf32>
    %2 = tpu.matmul %0, %1, %cst {dimension_numbers = #tpu.dot_dimension_numbers<[1], [0], [0], [1], [0, 0, 1, 1], [], []>} : vector<64x96xbf16>, vector<96x166xbf16>, vector<64x166xf32> -> vector<64x166xf32>
    %cst_3 = arith.constant dense<0.000000e+00> : vector<64xf32>
    %3 = vector.multi_reduction <add>, %2, %cst_3 [1] : vector<64x166xf32> to vector<64xf32>
    %4 = vector.shape_cast %3 : vector<64xf32> to vector<64x1xf32>
    %cst_4 = arith.constant 0.00602409616 : f32
    %5 = vector.broadcast %cst_4 : f32 to vector<64x1xf32>
    %6 = arith.mulf %4, %5 : vector<64x1xf32>
    %7 = vector.broadcast %6 : vector<64x1xf32> to vector<64x166xf32>
    %8 = arith.subf %2, %7 : vector<64x166xf32>
    %9 = arith.mulf %8, %8 : vector<64x166xf32>
    %cst_5 = arith.constant dense<0.000000e+00> : vector<64xf32>
    %10 = vector.multi_reduction <add>, %9, %cst_5 [1] : vector<64x166xf32> to vector<64xf32>
    %11 = vector.shape_cast %10 : vector<64xf32> to vector<64x1xf32>
    %cst_6 = arith.constant 0.00602409616 : f32
    %12 = vector.broadcast %cst_6 : f32 to vector<64x1xf32>
    %13 = arith.mulf %11, %12 : vector<64x1xf32>
    %cst_7 = arith.constant 9.99999974E-6 : f32
    %14 = vector.broadcast %cst_7 : f32 to vector<64x1xf32>
    %15 = arith.addf %13, %14 : vector<64x1xf32>
    %16 = math.rsqrt %15 : vector<64x1xf32>
    %17 = vector.broadcast %16 : vector<64x1xf32> to vector<64x166xf32>
    %18 = arith.mulf %8, %17 : vector<64x166xf32>
    %c0_8 = arith.constant 0 : index
    %c0_9 = arith.constant 0 : index
    %19 = vector.load %arg3[%c0_8, %c0_9] : memref<64x1xf32, #tpu.memory_space<vmem>>, vector<64x1xf32>
    %20 = vector.broadcast %19 : vector<64x1xf32> to vector<64x166xf32>
    %21 = arith.mulf %18, %20 : vector<64x166xf32>
    %c0_10 = arith.constant 0 : index
    %c0_11 = arith.constant 0 : index
    %22 = vector.load %arg4[%c0_10, %c0_11] : memref<64x1xf32, #tpu.memory_space<vmem>>, vector<64x1xf32>
    %23 = vector.broadcast %22 : vector<64x1xf32> to vector<64x166xf32>
    %24 = arith.addf %21, %23 : vector<64x166xf32>
    %cst_12 = arith.constant 2.000000e-01 : f32
    %25 = vector.broadcast %cst_12 : f32 to vector<64x166xf32>
    %26 = arith.mulf %25, %24 : vector<64x166xf32>
    %27 = arith.maximumf %24, %26 : vector<64x166xf32>
    %28 = arith.truncf %27 : vector<64x166xf32> to vector<64x166xbf16>
    %c0_13 = arith.constant 0 : index
    %c0_14 = arith.constant 0 : index
    %29 = vector.load %arg5[%c0_13, %c0_14] : memref<64x166xbf16, #tpu.memory_space<vmem>>, vector<64x166xbf16>
    tpu.vector_store %arg5[%c0_13, %c0_14], %28 {strides = array<i32>} : memref<64x166xbf16, #tpu.memory_space<vmem>>, vector<64x166xbf16>,
    return
  }
  func.func @transform_0(%arg0: i32) -> (i32, i32) {
    %c0_i32 = arith.constant 0 : i32
    %c0_i32_0 = arith.constant 0 : i32
    %c0_i32_1 = arith.constant 0 : i32
    return %c0_i32, %c0_i32_0 : i32, i32
  }
  func.func @transform_1(%arg0: i32) -> (i32, i32) {
    %c0_i32 = arith.constant 0 : i32
    %c0_i32_0 = arith.constant 0 : i32
    %c0_i32_1 = arith.constant 0 : i32
    return %c0_i32, %c0_i32_0 : i32, i32
  }
  func.func @transform_2(%arg0: i32) -> (i32, i32) {
    %c0_i32 = arith.constant 0 : i32
    %c0_i32_0 = arith.constant 0 : i32
    %c0_i32_1 = arith.constant 0 : i32
    return %c0_i32, %c0_i32_0 : i32, i32
  }
  func.func @transform_3(%arg0: i32) -> (i32, i32) {
    %c0_i32 = arith.constant 0 : i32
    %c0_i32_0 = arith.constant 0 : i32
    %c0_i32_1 = arith.constant 0 : i32
    return %c0_i32, %c0_i32_0 : i32, i32
  }
  func.func @transform_4(%arg0: i32) -> (i32, i32) {
    %c0_i32 = arith.constant 0 : i32
    %c0_i32_0 = arith.constant 0 : i32
    %c0_i32_1 = arith.constant 0 : i32
    return %c0_i32, %c0_i32_0 : i32, i32
  }
}

module attributes {stable_mosaic.version = 11 : i64} {
  func.func @_conv_bn_lrelu_kernel(%arg0: i32, %arg1: memref<192x82xbf16, #tpu.memory_space<vmem>>, %arg2: memref<64x192xbf16, #tpu.memory_space<vmem>>, %arg3: memref<64x1xf32, #tpu.memory_space<vmem>>, %arg4: memref<64x1xf32, #tpu.memory_space<vmem>>, %arg5: memref<64x82xbf16, #tpu.memory_space<vmem>>) attributes {dimension_semantics = [#tpu.dimension_semantics<arbitrary>], iteration_bounds = array<i64: 1>, scalar_prefetch = 0 : i64, scratch_operands = 0 : i64, tpu.core_type = #tpu.core_type<tc>, window_params = [{pipeline_mode = #tpu.pipeline_mode<synchronous>, transform_indices = @transform_0, window_bounds = array<i64: 192, 82>}, {pipeline_mode = #tpu.pipeline_mode<synchronous>, transform_indices = @transform_1, window_bounds = array<i64: 64, 192>}, {pipeline_mode = #tpu.pipeline_mode<synchronous>, transform_indices = @transform_2, window_bounds = array<i64: 64, 1>}, {pipeline_mode = #tpu.pipeline_mode<synchronous>, transform_indices = @transform_3, window_bounds = array<i64: 64, 1>}, {pipeline_mode = #tpu.pipeline_mode<synchronous>, transform_indices = @transform_4, window_bounds = array<i64: 64, 82>}]} {
    %c0 = arith.constant 0 : index
    %c0_0 = arith.constant 0 : index
    %0 = vector.load %arg2[%c0, %c0_0] : memref<64x192xbf16, #tpu.memory_space<vmem>>, vector<64x192xbf16>
    %c0_1 = arith.constant 0 : index
    %c0_2 = arith.constant 0 : index
    %1 = vector.load %arg1[%c0_1, %c0_2] : memref<192x82xbf16, #tpu.memory_space<vmem>>, vector<192x82xbf16>
    %cst = arith.constant dense<0.000000e+00> : vector<64x82xf32>
    %2 = tpu.matmul %0, %1, %cst {dimension_numbers = #tpu.dot_dimension_numbers<[1], [0], [0], [1], [0, 0, 1, 1], [], []>} : vector<64x192xbf16>, vector<192x82xbf16>, vector<64x82xf32> -> vector<64x82xf32>
    %cst_3 = arith.constant dense<0.000000e+00> : vector<64xf32>
    %3 = vector.multi_reduction <add>, %2, %cst_3 [1] : vector<64x82xf32> to vector<64xf32>
    %4 = vector.shape_cast %3 : vector<64xf32> to vector<64x1xf32>
    %cst_4 = arith.constant 0.0121951215 : f32
    %5 = vector.broadcast %cst_4 : f32 to vector<64x1xf32>
    %6 = arith.mulf %4, %5 : vector<64x1xf32>
    %7 = vector.broadcast %6 : vector<64x1xf32> to vector<64x82xf32>
    %8 = arith.subf %2, %7 : vector<64x82xf32>
    %9 = arith.mulf %8, %8 : vector<64x82xf32>
    %cst_5 = arith.constant dense<0.000000e+00> : vector<64xf32>
    %10 = vector.multi_reduction <add>, %9, %cst_5 [1] : vector<64x82xf32> to vector<64xf32>
    %11 = vector.shape_cast %10 : vector<64xf32> to vector<64x1xf32>
    %cst_6 = arith.constant 0.0121951215 : f32
    %12 = vector.broadcast %cst_6 : f32 to vector<64x1xf32>
    %13 = arith.mulf %11, %12 : vector<64x1xf32>
    %cst_7 = arith.constant 9.99999974E-6 : f32
    %14 = vector.broadcast %cst_7 : f32 to vector<64x1xf32>
    %15 = arith.addf %13, %14 : vector<64x1xf32>
    %16 = math.rsqrt %15 : vector<64x1xf32>
    %17 = vector.broadcast %16 : vector<64x1xf32> to vector<64x82xf32>
    %18 = arith.mulf %8, %17 : vector<64x82xf32>
    %c0_8 = arith.constant 0 : index
    %c0_9 = arith.constant 0 : index
    %19 = vector.load %arg3[%c0_8, %c0_9] : memref<64x1xf32, #tpu.memory_space<vmem>>, vector<64x1xf32>
    %20 = vector.broadcast %19 : vector<64x1xf32> to vector<64x82xf32>
    %21 = arith.mulf %18, %20 : vector<64x82xf32>
    %c0_10 = arith.constant 0 : index
    %c0_11 = arith.constant 0 : index
    %22 = vector.load %arg4[%c0_10, %c0_11] : memref<64x1xf32, #tpu.memory_space<vmem>>, vector<64x1xf32>
    %23 = vector.broadcast %22 : vector<64x1xf32> to vector<64x82xf32>
    %24 = arith.addf %21, %23 : vector<64x82xf32>
    %cst_12 = arith.constant 2.000000e-01 : f32
    %25 = vector.broadcast %cst_12 : f32 to vector<64x82xf32>
    %26 = arith.mulf %25, %24 : vector<64x82xf32>
    %27 = arith.maximumf %24, %26 : vector<64x82xf32>
    %28 = arith.truncf %27 : vector<64x82xf32> to vector<64x82xbf16>
    %c0_13 = arith.constant 0 : index
    %c0_14 = arith.constant 0 : index
    %29 = vector.load %arg5[%c0_13, %c0_14] : memref<64x82xbf16, #tpu.memory_space<vmem>>, vector<64x82xbf16>
    tpu.vector_store %arg5[%c0_13, %c0_14], %28 {strides = array<i32>} : memref<64x82xbf16, #tpu.memory_space<vmem>>, vector<64x82xbf16>,
    return
  }
  func.func @transform_0(%arg0: i32) -> (i32, i32) {
    %c0_i32 = arith.constant 0 : i32
    %c0_i32_0 = arith.constant 0 : i32
    %c0_i32_1 = arith.constant 0 : i32
    return %c0_i32, %c0_i32_0 : i32, i32
  }
  func.func @transform_1(%arg0: i32) -> (i32, i32) {
    %c0_i32 = arith.constant 0 : i32
    %c0_i32_0 = arith.constant 0 : i32
    %c0_i32_1 = arith.constant 0 : i32
    return %c0_i32, %c0_i32_0 : i32, i32
  }
  func.func @transform_2(%arg0: i32) -> (i32, i32) {
    %c0_i32 = arith.constant 0 : i32
    %c0_i32_0 = arith.constant 0 : i32
    %c0_i32_1 = arith.constant 0 : i32
    return %c0_i32, %c0_i32_0 : i32, i32
  }
  func.func @transform_3(%arg0: i32) -> (i32, i32) {
    %c0_i32 = arith.constant 0 : i32
    %c0_i32_0 = arith.constant 0 : i32
    %c0_i32_1 = arith.constant 0 : i32
    return %c0_i32, %c0_i32_0 : i32, i32
  }
  func.func @transform_4(%arg0: i32) -> (i32, i32) {
    %c0_i32 = arith.constant 0 : i32
    %c0_i32_0 = arith.constant 0 : i32
    %c0_i32_1 = arith.constant 0 : i32
    return %c0_i32, %c0_i32_0 : i32, i32
  }
}

module attributes {stable_mosaic.version = 11 : i64} {
  func.func @_conv_bn_lrelu_kernel(%arg0: i32, %arg1: memref<192x40xbf16, #tpu.memory_space<vmem>>, %arg2: memref<64x192xbf16, #tpu.memory_space<vmem>>, %arg3: memref<64x1xf32, #tpu.memory_space<vmem>>, %arg4: memref<64x1xf32, #tpu.memory_space<vmem>>, %arg5: memref<64x40xbf16, #tpu.memory_space<vmem>>) attributes {dimension_semantics = [#tpu.dimension_semantics<arbitrary>], iteration_bounds = array<i64: 1>, scalar_prefetch = 0 : i64, scratch_operands = 0 : i64, tpu.core_type = #tpu.core_type<tc>, window_params = [{pipeline_mode = #tpu.pipeline_mode<synchronous>, transform_indices = @transform_0, window_bounds = array<i64: 192, 40>}, {pipeline_mode = #tpu.pipeline_mode<synchronous>, transform_indices = @transform_1, window_bounds = array<i64: 64, 192>}, {pipeline_mode = #tpu.pipeline_mode<synchronous>, transform_indices = @transform_2, window_bounds = array<i64: 64, 1>}, {pipeline_mode = #tpu.pipeline_mode<synchronous>, transform_indices = @transform_3, window_bounds = array<i64: 64, 1>}, {pipeline_mode = #tpu.pipeline_mode<synchronous>, transform_indices = @transform_4, window_bounds = array<i64: 64, 40>}]} {
    %c0 = arith.constant 0 : index
    %c0_0 = arith.constant 0 : index
    %0 = vector.load %arg2[%c0, %c0_0] : memref<64x192xbf16, #tpu.memory_space<vmem>>, vector<64x192xbf16>
    %c0_1 = arith.constant 0 : index
    %c0_2 = arith.constant 0 : index
    %1 = vector.load %arg1[%c0_1, %c0_2] : memref<192x40xbf16, #tpu.memory_space<vmem>>, vector<192x40xbf16>
    %cst = arith.constant dense<0.000000e+00> : vector<64x40xf32>
    %2 = tpu.matmul %0, %1, %cst {dimension_numbers = #tpu.dot_dimension_numbers<[1], [0], [0], [1], [0, 0, 1, 1], [], []>} : vector<64x192xbf16>, vector<192x40xbf16>, vector<64x40xf32> -> vector<64x40xf32>
    %cst_3 = arith.constant dense<0.000000e+00> : vector<64xf32>
    %3 = vector.multi_reduction <add>, %2, %cst_3 [1] : vector<64x40xf32> to vector<64xf32>
    %4 = vector.shape_cast %3 : vector<64xf32> to vector<64x1xf32>
    %cst_4 = arith.constant 2.500000e-02 : f32
    %5 = vector.broadcast %cst_4 : f32 to vector<64x1xf32>
    %6 = arith.mulf %4, %5 : vector<64x1xf32>
    %7 = vector.broadcast %6 : vector<64x1xf32> to vector<64x40xf32>
    %8 = arith.subf %2, %7 : vector<64x40xf32>
    %9 = arith.mulf %8, %8 : vector<64x40xf32>
    %cst_5 = arith.constant dense<0.000000e+00> : vector<64xf32>
    %10 = vector.multi_reduction <add>, %9, %cst_5 [1] : vector<64x40xf32> to vector<64xf32>
    %11 = vector.shape_cast %10 : vector<64xf32> to vector<64x1xf32>
    %cst_6 = arith.constant 2.500000e-02 : f32
    %12 = vector.broadcast %cst_6 : f32 to vector<64x1xf32>
    %13 = arith.mulf %11, %12 : vector<64x1xf32>
    %cst_7 = arith.constant 9.99999974E-6 : f32
    %14 = vector.broadcast %cst_7 : f32 to vector<64x1xf32>
    %15 = arith.addf %13, %14 : vector<64x1xf32>
    %16 = math.rsqrt %15 : vector<64x1xf32>
    %17 = vector.broadcast %16 : vector<64x1xf32> to vector<64x40xf32>
    %18 = arith.mulf %8, %17 : vector<64x40xf32>
    %c0_8 = arith.constant 0 : index
    %c0_9 = arith.constant 0 : index
    %19 = vector.load %arg3[%c0_8, %c0_9] : memref<64x1xf32, #tpu.memory_space<vmem>>, vector<64x1xf32>
    %20 = vector.broadcast %19 : vector<64x1xf32> to vector<64x40xf32>
    %21 = arith.mulf %18, %20 : vector<64x40xf32>
    %c0_10 = arith.constant 0 : index
    %c0_11 = arith.constant 0 : index
    %22 = vector.load %arg4[%c0_10, %c0_11] : memref<64x1xf32, #tpu.memory_space<vmem>>, vector<64x1xf32>
    %23 = vector.broadcast %22 : vector<64x1xf32> to vector<64x40xf32>
    %24 = arith.addf %21, %23 : vector<64x40xf32>
    %cst_12 = arith.constant 2.000000e-01 : f32
    %25 = vector.broadcast %cst_12 : f32 to vector<64x40xf32>
    %26 = arith.mulf %25, %24 : vector<64x40xf32>
    %27 = arith.maximumf %24, %26 : vector<64x40xf32>
    %28 = arith.truncf %27 : vector<64x40xf32> to vector<64x40xbf16>
    %c0_13 = arith.constant 0 : index
    %c0_14 = arith.constant 0 : index
    %29 = vector.load %arg5[%c0_13, %c0_14] : memref<64x40xbf16, #tpu.memory_space<vmem>>, vector<64x40xbf16>
    tpu.vector_store %arg5[%c0_13, %c0_14], %28 {strides = array<i32>} : memref<64x40xbf16, #tpu.memory_space<vmem>>, vector<64x40xbf16>,
    return
  }
  func.func @transform_0(%arg0: i32) -> (i32, i32) {
    %c0_i32 = arith.constant 0 : i32
    %c0_i32_0 = arith.constant 0 : i32
    %c0_i32_1 = arith.constant 0 : i32
    return %c0_i32, %c0_i32_0 : i32, i32
  }
  func.func @transform_1(%arg0: i32) -> (i32, i32) {
    %c0_i32 = arith.constant 0 : i32
    %c0_i32_0 = arith.constant 0 : i32
    %c0_i32_1 = arith.constant 0 : i32
    return %c0_i32, %c0_i32_0 : i32, i32
  }
  func.func @transform_2(%arg0: i32) -> (i32, i32) {
    %c0_i32 = arith.constant 0 : i32
    %c0_i32_0 = arith.constant 0 : i32
    %c0_i32_1 = arith.constant 0 : i32
    return %c0_i32, %c0_i32_0 : i32, i32
  }
  func.func @transform_3(%arg0: i32) -> (i32, i32) {
    %c0_i32 = arith.constant 0 : i32
    %c0_i32_0 = arith.constant 0 : i32
    %c0_i32_1 = arith.constant 0 : i32
    return %c0_i32, %c0_i32_0 : i32, i32
  }
  func.func @transform_4(%arg0: i32) -> (i32, i32) {
    %c0_i32 = arith.constant 0 : i32
    %c0_i32_0 = arith.constant 0 : i32
    %c0_i32_1 = arith.constant 0 : i32
    return %c0_i32, %c0_i32_0 : i32, i32
  }
}

module attributes {stable_mosaic.version = 11 : i64} {
  func.func @_head_kernel(%arg0: i32, %arg1: memref<2x1280xbf16, #tpu.memory_space<vmem>>, %arg2: memref<1280x64xbf16, #tpu.memory_space<vmem>>, %arg3: memref<1x64xf32, #tpu.memory_space<vmem>>, %arg4: memref<1x64xf32, #tpu.memory_space<vmem>>, %arg5: memref<1x1xf32, #tpu.memory_space<vmem>>, %arg6: memref<2x1xf32, #tpu.memory_space<vmem>>) attributes {dimension_semantics = [#tpu.dimension_semantics<arbitrary>], iteration_bounds = array<i64: 1>, scalar_prefetch = 0 : i64, scratch_operands = 0 : i64, tpu.core_type = #tpu.core_type<tc>, window_params = [{pipeline_mode = #tpu.pipeline_mode<synchronous>, transform_indices = @transform_0, window_bounds = array<i64: 2, 1280>}, {pipeline_mode = #tpu.pipeline_mode<synchronous>, transform_indices = @transform_1, window_bounds = array<i64: 1280, 64>}, {pipeline_mode = #tpu.pipeline_mode<synchronous>, transform_indices = @transform_2, window_bounds = array<i64: 1, 64>}, {pipeline_mode = #tpu.pipeline_mode<synchronous>, transform_indices = @transform_3, window_bounds = array<i64: 1, 64>}, {pipeline_mode = #tpu.pipeline_mode<synchronous>, transform_indices = @transform_4, window_bounds = array<i64: 1, 1>}, {pipeline_mode = #tpu.pipeline_mode<synchronous>, transform_indices = @transform_5, window_bounds = array<i64: 2, 1>}]} {
    %c0 = arith.constant 0 : index
    %c0_0 = arith.constant 0 : index
    %0 = vector.load %arg1[%c0, %c0_0] : memref<2x1280xbf16, #tpu.memory_space<vmem>>, vector<2x1280xbf16>
    %c0_1 = arith.constant 0 : index
    %c0_2 = arith.constant 0 : index
    %1 = vector.load %arg2[%c0_1, %c0_2] : memref<1280x64xbf16, #tpu.memory_space<vmem>>, vector<1280x64xbf16>
    %cst = arith.constant dense<0.000000e+00> : vector<2x64xf32>
    %2 = tpu.matmul %0, %1, %cst {dimension_numbers = #tpu.dot_dimension_numbers<[1], [0], [0], [1], [0, 0, 1, 1], [], []>} : vector<2x1280xbf16>, vector<1280x64xbf16>, vector<2x64xf32> -> vector<2x64xf32>
    %c0_3 = arith.constant 0 : index
    %c0_4 = arith.constant 0 : index
    %3 = vector.load %arg3[%c0_3, %c0_4] : memref<1x64xf32, #tpu.memory_space<vmem>>, vector<1x64xf32>
    %4 = vector.broadcast %3 : vector<1x64xf32> to vector<2x64xf32>
    %5 = arith.addf %2, %4 : vector<2x64xf32>
    %cst_5 = arith.constant 2.000000e-01 : f32
    %6 = vector.broadcast %cst_5 : f32 to vector<2x64xf32>
    %7 = arith.mulf %6, %5 : vector<2x64xf32>
    %8 = arith.maximumf %5, %7 : vector<2x64xf32>
    %c0_6 = arith.constant 0 : index
    %c0_7 = arith.constant 0 : index
    %9 = vector.load %arg4[%c0_6, %c0_7] : memref<1x64xf32, #tpu.memory_space<vmem>>, vector<1x64xf32>
    %10 = vector.broadcast %9 : vector<1x64xf32> to vector<2x64xf32>
    %11 = arith.mulf %8, %10 : vector<2x64xf32>
    %cst_8 = arith.constant dense<0.000000e+00> : vector<2xf32>
    %12 = vector.multi_reduction <add>, %11, %cst_8 [1] : vector<2x64xf32> to vector<2xf32>
    %13 = vector.shape_cast %12 : vector<2xf32> to vector<2x1xf32>
    %c0_9 = arith.constant 0 : index
    %c0_10 = arith.constant 0 : index
    %14 = vector.load %arg5[%c0_9, %c0_10] : memref<1x1xf32, #tpu.memory_space<vmem>>, vector<1x1xf32>
    %15 = vector.broadcast %14 : vector<1x1xf32> to vector<2x1xf32>
    %16 = arith.addf %13, %15 : vector<2x1xf32>
    %c0_11 = arith.constant 0 : index
    %c0_12 = arith.constant 0 : index
    %17 = vector.load %arg6[%c0_11, %c0_12] : memref<2x1xf32, #tpu.memory_space<vmem>>, vector<2x1xf32>
    tpu.vector_store %arg6[%c0_11, %c0_12], %16 {strides = array<i32>} : memref<2x1xf32, #tpu.memory_space<vmem>>, vector<2x1xf32>,
    return
  }
  func.func @transform_0(%arg0: i32) -> (i32, i32) {
    %c0_i32 = arith.constant 0 : i32
    %c0_i32_0 = arith.constant 0 : i32
    %c0_i32_1 = arith.constant 0 : i32
    return %c0_i32, %c0_i32_0 : i32, i32
  }
  func.func @transform_1(%arg0: i32) -> (i32, i32) {
    %c0_i32 = arith.constant 0 : i32
    %c0_i32_0 = arith.constant 0 : i32
    %c0_i32_1 = arith.constant 0 : i32
    return %c0_i32, %c0_i32_0 : i32, i32
  }
  func.func @transform_2(%arg0: i32) -> (i32, i32) {
    %c0_i32 = arith.constant 0 : i32
    %c0_i32_0 = arith.constant 0 : i32
    %c0_i32_1 = arith.constant 0 : i32
    return %c0_i32, %c0_i32_0 : i32, i32
  }
  func.func @transform_3(%arg0: i32) -> (i32, i32) {
    %c0_i32 = arith.constant 0 : i32
    %c0_i32_0 = arith.constant 0 : i32
    %c0_i32_1 = arith.constant 0 : i32
    return %c0_i32, %c0_i32_0 : i32, i32
  }
  func.func @transform_4(%arg0: i32) -> (i32, i32) {
    %c0_i32 = arith.constant 0 : i32
    %c0_i32_0 = arith.constant 0 : i32
    %c0_i32_1 = arith.constant 0 : i32
    return %c0_i32, %c0_i32_0 : i32, i32
  }
  func.func @transform_5(%arg0: i32) -> (i32, i32) {
    %c0_i32 = arith.constant 0 : i32
    %c0_i32_0 = arith.constant 0 : i32
    %c0_i32_1 = arith.constant 0 : i32
    return %c0_i32, %c0_i32_0 : i32, i32
  }
}

</mosaic_0001>

<bundles_post_ra>
// kernel: discriminator_forward.9
= control target key start
LH: loop header
LB: loop body
LE: loop exit
PB: predicated region body
PF: predicated region fallthrough
CT: control target
= control target key end

     0   :  { %vm407_vm0 = vcmask 1043456   ;;  %v6173_v2 = vmov 0   ;;  %vm403_vm1 = vcmask 64512   ;;  %vm3669_vm2 = vcmask 1027072   ;;  %s10870_s0 = inlined_call_operand.vmem [shape: bf16[8,16382], index: 0, kind: input, shape index: {}]   ;;  %s10871_s1 = inlined_call_operand.vmem [shape: bf16[4,8], index: 1, kind: input, shape index: {}]   ;;  %s10872_s2 = inlined_call_operand.vmem [shape: f32[4,1], index: 2, kind: input, shape index: {}]   ;;  %s10873_s3 = inlined_call_operand.vmem [shape: f32[4,1], index: 3, kind: input, shape index: {}]   ;;  %s10874_s4 = inlined_call_operand.vmem [shape: bf16[4,16382], index: 4, kind: output, shape index: {}]  }
   0x1   :  { %v19_v0 = vld [vmem:[%s10870_s0] sm:$0xff]  ;;  %v20_v1 = vld [vmem:[%s10870_s0 + $0x8] sm:$0xff]  ;;  %824 = vmatprep.mubr.bf16.mxu0 %v6173_v2  ;;  %865 = vmatprep.mubr.bf16.mxu1 %v6173_v2  ;;  %v21_v7 = vld [vmem:[%s10870_s0 + $0x10] sm:$0xff]  ;;  %vm5706_vm3 = vcmask 1041408   ;;  %vm5707_vm4 = vcmask 1043458   ;;  %vm5709_vm5 = vcmask 1045508  }
   0x2   :  { %v5719_v3 = vcombine.high %v19_v0, %v19_v0  ;;  %v5718_v4 = vcombine.low %v19_v0, %v19_v0  ;;  %v5721_v5 = vcombine.high %v20_v1, %v20_v1  ;;  %v5720_v6 = vcombine.low %v20_v1, %v20_v1  ;;  %v22_v8 = vld [vmem:[%s10870_s0 + $0x18] sm:$0xff]  ;;  %6040 = vset.pattern.permute.xlu1 %v6173_v2  ;;  %v23_v13 = vld [vmem:[%s10870_s0 + $0x20] sm:$0xff]  ;;  %v24_v16 = vld [vmem:[%s10870_s0 + $0x28] sm:$0xff] }
   0x3   :  { %v5723_v9 = vcombine.high %v21_v7, %v21_v7  ;;  %v5722_v10 = vcombine.low %v21_v7, %v21_v7  ;;  %v5725_v11 = vcombine.high %v22_v8, %v22_v8  ;;  %v5724_v12 = vcombine.low %v22_v8, %v22_v8  ;;  %6041 = vset.pattern.permute.xlu0 %v6173_v2  ;;  %v6229_v17 = vld [vmem:[%s10871_s1] sm:$0x3]  ;;  %v25_v24 = vld [vmem:[%s10870_s0 + $0x30] sm:$0xff]  ;;  %v26_v25 = vld [vmem:[%s10870_s0 + $0x38] sm:$0xff] }
   0x4   :  { %5846 = vmatprep.subr.msk.bf16.mxu0 %vm407_vm0, %v5719_v3  ;;  %v409_v14 = vsel %vm407_vm0, %v5718_v4, 0  ;;  %5848 = vmatprep.subr.msk.bf16.mxu1 %vm407_vm0, %v5721_v5  ;;  %v415_v15 = vsel %vm407_vm0, %v5720_v6, 0  ;;  %v5727_v20 = vcombine.high %v23_v13, %v23_v13  ;;  %v5729_v21 = vcombine.high %v24_v16, %v24_v16  ;;  %v27_v32 = vld [vmem:[%s10870_s0 + $0x40] sm:$0xff]  ;;  %v28_v33 = vld [vmem:[%s10870_s0 + $0x48] sm:$0xff]  ;;  %v29_v40 = vld [vmem:[%s10870_s0 + $0x50] sm:$0xff] }
   0x5   :  { %793 = vmatpush1.bf16.msra.mxu0 %v409_v14  ;;  %834 = vmatpush1.bf16.msra.mxu1 %v415_v15  ;;  %v421_v18 = vsel %vm407_vm0, %v5722_v10, 0  ;;  %v427_v19 = vsel %vm407_vm0, %v5724_v12, 0  ;;  %v5726_v22 = vcombine.low %v23_v13, %v23_v13  ;;  %v5728_v23 = vcombine.low %v24_v16, %v24_v16  ;;  %v30_v41 = vld [vmem:[%s10870_s0 + $0x58] sm:$0xff]  ;;  %v31_v48 = vld [vmem:[%s10870_s0 + $0x60] sm:$0xff]  ;;  %v32_v49 = vld [vmem:[%s10870_s0 + $0x68] sm:$0xff] }
   0x6   :  { %5850 = vmatprep.subr.msk.bf16.mxu0 %vm407_vm0, %v5723_v9  ;;  %5852 = vmatprep.subr.msk.bf16.mxu1 %vm407_vm0, %v5725_v11  ;;  %v5731_v28 = vcombine.high %v25_v24, %v25_v24  ;;  %v5733_v29 = vcombine.high %v26_v25, %v26_v25  ;;  %v5730_v30 = vcombine.low %v25_v24, %v25_v24  ;;  %v33_v56 = vld [vmem:[%s10870_s0 + $0x70] sm:$0xff]  ;;  %v34_v57 = vld [vmem:[%s10870_s0 + $0x78] sm:$0xff]  ;;  %v35_v0 = vld [vmem:[%s10870_s0 + $0x80] sm:$0xff]  ;;  %vm5711_vm6 = vcmask 1031174  }
   0x7   :  { %v433_v26 = vsel %vm407_vm0, %v5726_v22, 0  ;;  %v439_v27 = vsel %vm407_vm0, %v5728_v23, 0  ;;  %v5732_v31 = vcombine.low %v26_v25, %v26_v25  ;;  %v5735_v36 = vcombine.high %v27_v32, %v27_v32  ;;  %v36_v1 = vld [vmem:[%s10870_s0 + $0x88] sm:$0xff]  ;;  %v37_v9 = vld [vmem:[%s10870_s0 + $0x90] sm:$0xff]  ;;  %v38_v10 = vld [vmem:[%s10870_s0 + $0x98] sm:$0xff] }
   0x8   :  { %5847 = vmatmul.mubr.msk.bf16.vlgmr.msra.gmra.mrb[0].mxu0 %vm403_vm1, %v6229_v17  ;;  %5849 = vmatmul.mubr.msk.bf16.vlgmr.msra.gmra.mrb[0].mxu1 %vm403_vm1, %v6229_v17  ;;  %v445_v34 = vsel %vm407_vm0, %v5730_v30, 0  ;;  %v5737_v37 = vcombine.high %v28_v33, %v28_v33  ;;  %v5734_v38 = vcombine.low %v27_v32, %v27_v32  ;;  %v5736_v39 = vcombine.low %v28_v33, %v28_v33  ;;  %vm10792_vm7 = vmor %vm5707_vm4, %vm5706_vm3 }
   0x9   :  { %875 = vmatpush1.bf16.msra.mxu0 %v421_v18  ;;  %916 = vmatpush1.bf16.msra.mxu1 %v427_v19  ;;  %v451_v35 = vsel %vm407_vm0, %v5732_v31, 0  ;;  %v5739_v44 = vcombine.high %v29_v40, %v29_v40  ;;  %v5741_v45 = vcombine.high %v30_v41, %v30_v41  ;;  %v5738_v46 = vcombine.low %v29_v40, %v29_v40  ;;  %v39_v18 = vld [vmem:[%s10870_s0 + $0xa0] sm:$0xff]  ;;  %v40_v19 = vld [vmem:[%s10870_s0 + $0xa8] sm:$0xff]  ;;  %vm5710_vm8 = vmor %vm5709_vm5, %vm10792_vm7 }
   0xa   :  { %906 = vmatprep.mubr.bf16.mxu0 %v6173_v2  ;;  %5854 = vmatprep.subr.msk.bf16.mxu0 %vm407_vm0, %v5727_v20  ;;  %v457_v42 = vsel %vm407_vm0, %v5734_v38, 0  ;;  %v463_v43 = vsel %vm407_vm0, %v5736_v39, 0  ;;  %v5740_v47 = vcombine.low %v30_v41, %v30_v41  ;;  %v5743_v52 = vcombine.high %v31_v48, %v31_v48  ;;  %vm5712_vm9 = vmor %vm5711_vm6, %vm5710_vm8 }
   0xb   :  { %947 = vmatprep.mubr.bf16.mxu1 %v6173_v2  ;;  %5856 = vmatprep.subr.msk.bf16.mxu1 %vm407_vm0, %v5729_v21  ;;  %v469_v50 = vsel %vm407_vm0, %v5738_v46, 0  ;;  %v5745_v53 = vcombine.high %v32_v49, %v32_v49  ;;  %v5742_v54 = vcombine.low %v31_v48, %v31_v48  ;;  %v5744_v55 = vcombine.low %v32_v49, %v32_v49 }
   0xc   :  { %v475_v51 = vsel %vm407_vm0, %v5740_v47, 0  ;;  %v5747_v60 = vcombine.high %v33_v56, %v33_v56  ;;  %v5749_v61 = vcombine.high %v34_v57, %v34_v57  ;;  %v5746_v62 = vcombine.low %v33_v56, %v33_v56 }
   0xd   :  { %v481_v58 = vsel %vm407_vm0, %v5742_v54, 0  ;;  %v487_v59 = vsel %vm407_vm0, %v5744_v55, 0  ;;  %v5748_v63 = vcombine.low %v34_v57, %v34_v57  ;;  %v5751_v5 = vcombine.high %v35_v0, %v35_v0 }
   0xe   :  { %v493_v3 = vsel %vm407_vm0, %v5746_v62, 0  ;;  %v5753_v6 = vcombine.high %v36_v1, %v36_v1  ;;  %v5750_v7 = vcombine.low %v35_v0, %v35_v0  ;;  %v5752_v8 = vcombine.low %v36_v1, %v36_v1 }
   0xf   :  { %v499_v4 = vsel %vm407_vm0, %v5748_v63, 0  ;;  %v5755_v13 = vcombine.high %v37_v9, %v37_v9  ;;  %v5757_v14 = vcombine.high %v38_v10, %v38_v10  ;;  %v5754_v15 = vcombine.low %v37_v9, %v37_v9 }
  0x10   :  { %5851 = vmatmul.mubr.msk.bf16.vlgmr.msra.gmra.mrb[4].mxu0 %vm403_vm1, %v6229_v17  ;;  %5853 = vmatmul.mubr.msk.bf16.vlgmr.msra.gmra.mrb[4].mxu1 %vm403_vm1, %v6229_v17  ;;  %v505_v11 = vsel %vm407_vm0, %v5750_v7, 0  ;;  %v511_v12 = vsel %vm407_vm0, %v5752_v8, 0  ;;  %v5756_v16 = vcombine.low %v38_v10, %v38_v10  ;;  %v5759_v22 = vcombine.high %v39_v18, %v39_v18 }
  0x11   :  { %957 = vmatpush1.bf16.msra.mxu0 %v433_v26  ;;  %998 = vmatpush1.bf16.msra.mxu1 %v439_v27  ;;  %v517_v20 = vsel %vm407_vm0, %v5754_v15, 0  ;;  %v5761_v23 = vcombine.high %v40_v19, %v40_v19  ;;  %v5758_v24 = vcombine.low %v39_v18, %v39_v18  ;;  %v5760_v25 = vcombine.low %v40_v19, %v40_v19  ;;  %v41_v26 = vld [vmem:[%s10870_s0 + $0xb0] sm:$0xff]  ;;  %v42_v27 = vld [vmem:[%s10870_s0 + $0xb8] sm:$0xff] }
  0x12   :  { %988 = vmatprep.mubr.bf16.mxu0 %v6173_v2  ;;  %5858 = vmatprep.subr.msk.bf16.mxu0 %vm407_vm0, %v5731_v28  ;;  %v523_v21 = vsel %vm407_vm0, %v5756_v16, 0  ;;  %v5763_v30 = vcombine.high %v41_v26, %v41_v26  ;;  %v5765_v31 = vcombine.high %v42_v27, %v42_v27  ;;  %v5762_v32 = vcombine.low %v41_v26, %v41_v26 }
  0x13   :  { %1029 = vmatprep.mubr.bf16.mxu1 %v6173_v2  ;;  %5860 = vmatprep.subr.msk.bf16.mxu1 %vm407_vm0, %v5733_v29  ;;  %v529_v28 = vsel %vm407_vm0, %v5758_v24, 0  ;;  %v535_v29 = vsel %vm407_vm0, %v5760_v25, 0  ;;  %v5764_v33 = vcombine.low %v42_v27, %v42_v27 }
  0x18   :  { %5855 = vmatmul.mubr.msk.bf16.vlgmr.msra.gmra.mrb[8].mxu0 %vm403_vm1, %v6229_v17  ;;  %5857 = vmatmul.mubr.msk.bf16.vlgmr.msra.gmra.mrb[8].mxu1 %vm403_vm1, %v6229_v17 }
  0x19   :  { %1039 = vmatpush1.bf16.msra.mxu0 %v445_v34  ;;  %1080 = vmatpush1.bf16.msra.mxu1 %v451_v35  ;;  %v43_v34 = vld [vmem:[%s10870_s0 + $0xc0] sm:$0xff]  ;;  %v44_v35 = vld [vmem:[%s10870_s0 + $0xc8] sm:$0xff] }
  0x1a   :  { %1070 = vmatprep.mubr.bf16.mxu0 %v6173_v2  ;;  %5862 = vmatprep.subr.msk.bf16.mxu0 %vm407_vm0, %v5735_v36  ;;  %v541_v36 = vsel %vm407_vm0, %v5762_v32, 0  ;;  %v5767_v38 = vcombine.high %v43_v34, %v43_v34  ;;  %v5769_v39 = vcombine.high %v44_v35, %v44_v35  ;;  %v5766_v40 = vcombine.low %v43_v34, %v43_v34 }
  0x1b   :  { %1111 = vmatprep.mubr.bf16.mxu1 %v6173_v2  ;;  %5864 = vmatprep.subr.msk.bf16.mxu1 %vm407_vm0, %v5737_v37  ;;  %v547_v37 = vsel %vm407_vm0, %v5764_v33, 0  ;;  %v5768_v41 = vcombine.low %v44_v35, %v44_v35 }
  0x20   :  { %5859 = vmatmul.mubr.msk.bf16.vlgmr.msra.gmra.mrb[12].mxu0 %vm403_vm1, %v6229_v17  ;;  %5861 = vmatmul.mubr.msk.bf16.vlgmr.msra.gmra.mrb[12].mxu1 %vm403_vm1, %v6229_v17 }
  0x21   :  { %1121 = vmatpush1.bf16.msra.mxu0 %v457_v42  ;;  %1162 = vmatpush1.bf16.msra.mxu1 %v463_v43  ;;  %v45_v42 = vld [vmem:[%s10870_s0 + $0xd0] sm:$0xff]  ;;  %v46_v43 = vld [vmem:[%s10870_s0 + $0xd8] sm:$0xff] }
  0x22   :  { %1152 = vmatprep.mubr.bf16.mxu0 %v6173_v2  ;;  %5866 = vmatprep.subr.msk.bf16.mxu0 %vm407_vm0, %v5739_v44  ;;  %v553_v44 = vsel %vm407_vm0, %v5766_v40, 0  ;;  %v5771_v46 = vcombine.high %v45_v42, %v45_v42  ;;  %v5773_v47 = vcombine.high %v46_v43, %v46_v43  ;;  %v5770_v48 = vcombine.low %v45_v42, %v45_v42 }
  0x23   :  { %1193 = vmatprep.mubr.bf16.mxu1 %v6173_v2  ;;  %5868 = vmatprep.subr.msk.bf16.mxu1 %vm407_vm0, %v5741_v45  ;;  %v559_v45 = vsel %vm407_vm0, %v5768_v41, 0  ;;  %v5772_v49 = vcombine.low %v46_v43, %v46_v43 }
  0x28   :  { %5863 = vmatmul.mubr.msk.bf16.vlgmr.msra.gmra.mrb[16].mxu0 %vm403_vm1, %v6229_v17  ;;  %5865 = vmatmul.mubr.msk.bf16.vlgmr.msra.gmra.mrb[16].mxu1 %vm403_vm1, %v6229_v17 }
  0x29   :  { %1203 = vmatpush1.bf16.msra.mxu0 %v469_v50  ;;  %1244 = vmatpush1.bf16.msra.mxu1 %v475_v51  ;;  %v47_v50 = vld [vmem:[%s10870_s0 + $0xe0] sm:$0xff]  ;;  %v48_v51 = vld [vmem:[%s10870_s0 + $0xe8] sm:$0xff] }
  0x2a   :  { %1234 = vmatprep.mubr.bf16.mxu0 %v6173_v2  ;;  %5870 = vmatprep.subr.msk.bf16.mxu0 %vm407_vm0, %v5743_v52  ;;  %v565_v52 = vsel %vm407_vm0, %v5770_v48, 0  ;;  %v5775_v54 = vcombine.high %v47_v50, %v47_v50  ;;  %v5777_v55 = vcombine.high %v48_v51, %v48_v51  ;;  %v5774_v56 = vcombine.low %v47_v50, %v47_v50 }
  0x2b   :  { %1275 = vmatprep.mubr.bf16.mxu1 %v6173_v2  ;;  %5872 = vmatprep.subr.msk.bf16.mxu1 %vm407_vm0, %v5745_v53  ;;  %v571_v53 = vsel %vm407_vm0, %v5772_v49, 0  ;;  %v5776_v57 = vcombine.low %v48_v51, %v48_v51 }
  0x30   :  { %5867 = vmatmul.mubr.msk.bf16.vlgmr.msra.gmra.mrb[20].mxu0 %vm403_vm1, %v6229_v17  ;;  %5869 = vmatmul.mubr.msk.bf16.vlgmr.msra.gmra.mrb[20].mxu1 %vm403_vm1, %v6229_v17 }
  0x31   :  { %1285 = vmatpush1.bf16.msra.mxu0 %v481_v58  ;;  %1326 = vmatpush1.bf16.msra.mxu1 %v487_v59  ;;  %v49_v58 = vld [vmem:[%s10870_s0 + $0xf0] sm:$0xff]  ;;  %v50_v59 = vld [vmem:[%s10870_s0 + $0xf8] sm:$0xff] }
  0x32   :  { %1316 = vmatprep.mubr.bf16.mxu0 %v6173_v2  ;;  %5874 = vmatprep.subr.msk.bf16.mxu0 %vm407_vm0, %v5747_v60  ;;  %v577_v60 = vsel %vm407_vm0, %v5774_v56, 0  ;;  %v5779_v62 = vcombine.high %v49_v58, %v49_v58  ;;  %v5781_v63 = vcombine.high %v50_v59, %v50_v59  ;;  %v5778_v0 = vcombine.low %v49_v58, %v49_v58 }
  0x33   :  { %1357 = vmatprep.mubr.bf16.mxu1 %v6173_v2  ;;  %5876 = vmatprep.subr.msk.bf16.mxu1 %vm407_vm0, %v5749_v61  ;;  %v583_v61 = vsel %vm407_vm0, %v5776_v57, 0  ;;  %v5780_v1 = vcombine.low %v50_v59, %v50_v59 }
  0x38   :  { %5871 = vmatmul.mubr.msk.bf16.vlgmr.msra.gmra.mrb[24].mxu0 %vm403_vm1, %v6229_v17  ;;  %5873 = vmatmul.mubr.msk.bf16.vlgmr.msra.gmra.mrb[24].mxu1 %vm403_vm1, %v6229_v17 }
  0x39   :  { %1367 = vmatpush1.bf16.msra.mxu0 %v493_v3  ;;  %1408 = vmatpush1.bf16.msra.mxu1 %v499_v4  ;;  %v51_v3 = vld [vmem:[%s10870_s0 + $0x100] sm:$0xff]  ;;  %v52_v4 = vld [vmem:[%s10870_s0 + $0x108] sm:$0xff] }
  0x3a   :  { %1398 = vmatprep.mubr.bf16.mxu0 %v6173_v2  ;;  %5878 = vmatprep.subr.msk.bf16.mxu0 %vm407_vm0, %v5751_v5  ;;  %v589_v5 = vsel %vm407_vm0, %v5778_v0, 0  ;;  %v5783_v7 = vcombine.high %v51_v3, %v51_v3  ;;  %v5785_v8 = vcombine.high %v52_v4, %v52_v4  ;;  %v5782_v9 = vcombine.low %v51_v3, %v51_v3 }
  0x3b   :  { %1439 = vmatprep.mubr.bf16.mxu1 %v6173_v2  ;;  %5880 = vmatprep.subr.msk.bf16.mxu1 %vm407_vm0, %v5753_v6  ;;  %v595_v6 = vsel %vm407_vm0, %v5780_v1, 0  ;;  %v5784_v10 = vcombine.low %v52_v4, %v52_v4 }
  0x40   :  { %5875 = vmatmul.mubr.msk.bf16.vlgmr.msra.gmra.mrb[28].mxu0 %vm403_vm1, %v6229_v17  ;;  %5877 = vmatmul.mubr.msk.bf16.vlgmr.msra.gmra.mrb[28].mxu1 %vm403_vm1, %v6229_v17 }
  0x41   :  { %1449 = vmatpush1.bf16.msra.mxu0 %v505_v11  ;;  %1490 = vmatpush1.bf16.msra.mxu1 %v511_v12  ;;  %v53_v11 = vld [vmem:[%s10870_s0 + $0x110] sm:$0xff]  ;;  %v54_v12 = vld [vmem:[%s10870_s0 + $0x118] sm:$0xff] }
  0x42   :  { %1480 = vmatprep.mubr.bf16.mxu0 %v6173_v2  ;;  %5882 = vmatprep.subr.msk.bf16.mxu0 %vm407_vm0, %v5755_v13  ;;  %v601_v13 = vsel %vm407_vm0, %v5782_v9, 0  ;;  %v5787_v15 = vcombine.high %v53_v11, %v53_v11  ;;  %v5789_v16 = vcombine.high %v54_v12, %v54_v12  ;;  %v5786_v18 = vcombine.low %v53_v11, %v53_v11 }
  0x43   :  { %1521 = vmatprep.mubr.bf16.mxu1 %v6173_v2  ;;  %5884 = vmatprep.subr.msk.bf16.mxu1 %vm407_vm0, %v5757_v14  ;;  %v607_v14 = vsel %vm407_vm0, %v5784_v10, 0  ;;  %v5788_v19 = vcombine.low %v54_v12, %v54_v12 }
  0x48   :  { %5879 = vmatmul.mubr.msk.bf16.vlgmr.msra.gmra.mrb[32].mxu0 %vm403_vm1, %v6229_v17  ;;  %5881 = vmatmul.mubr.msk.bf16.vlgmr.msra.gmra.mrb[32].mxu1 %vm403_vm1, %v6229_v17 }
  0x49   :  { %1531 = vmatpush1.bf16.msra.mxu0 %v517_v20  ;;  %1572 = vmatpush1.bf16.msra.mxu1 %v523_v21  ;;  %v55_v20 = vld [vmem:[%s10870_s0 + $0x120] sm:$0xff]  ;;  %v56_v21 = vld [vmem:[%s10870_s0 + $0x128] sm:$0xff] }
  0x4a   :  { %1562 = vmatprep.mubr.bf16.mxu0 %v6173_v2  ;;  %5886 = vmatprep.subr.msk.bf16.mxu0 %vm407_vm0, %v5759_v22  ;;  %v613_v22 = vsel %vm407_vm0, %v5786_v18, 0  ;;  %v5791_v24 = vcombine.high %v55_v20, %v55_v20  ;;  %v5793_v25 = vcombine.high %v56_v21, %v56_v21  ;;  %v5790_v26 = vcombine.low %v55_v20, %v55_v20 }
  0x4b   :  { %1603 = vmatprep.mubr.bf16.mxu1 %v6173_v2  ;;  %5888 = vmatprep.subr.msk.bf16.mxu1 %vm407_vm0, %v5761_v23  ;;  %v619_v23 = vsel %vm407_vm0, %v5788_v19, 0  ;;  %v5792_v27 = vcombine.low %v56_v21, %v56_v21 }
  0x50   :  { %5883 = vmatmul.mubr.msk.bf16.vlgmr.msra.gmra.mrb[36].mxu0 %vm403_vm1, %v6229_v17  ;;  %5885 = vmatmul.mubr.msk.bf16.vlgmr.msra.gmra.mrb[36].mxu1 %vm403_vm1, %v6229_v17 }
  0x51   :  { %1613 = vmatpush1.bf16.msra.mxu0 %v529_v28  ;;  %1654 = vmatpush1.bf16.msra.mxu1 %v535_v29  ;;  %v57_v28 = vld [vmem:[%s10870_s0 + $0x130] sm:$0xff]  ;;  %v58_v29 = vld [vmem:[%s10870_s0 + $0x138] sm:$0xff] }
  0x52   :  { %1644 = vmatprep.mubr.bf16.mxu0 %v6173_v2  ;;  %5890 = vmatprep.subr.msk.bf16.mxu0 %vm407_vm0, %v5763_v30  ;;  %v625_v30 = vsel %vm407_vm0, %v5790_v26, 0  ;;  %v5795_v32 = vcombine.high %v57_v28, %v57_v28  ;;  %v5797_v33 = vcombine.high %v58_v29, %v58_v29  ;;  %v5794_v34 = vcombine.low %v57_v28, %v57_v28 }
  0x53   :  { %1685 = vmatprep.mubr.bf16.mxu1 %v6173_v2  ;;  %5892 = vmatprep.subr.msk.bf16.mxu1 %vm407_vm0, %v5765_v31  ;;  %v631_v31 = vsel %vm407_vm0, %v5792_v27, 0  ;;  %v5796_v35 = vcombine.low %v58_v29, %v58_v29 }
  0x58   :  { %5887 = vmatmul.mubr.msk.bf16.vlgmr.msra.gmra.mrb[40].mxu0 %vm403_vm1, %v6229_v17  ;;  %5889 = vmatmul.mubr.msk.bf16.vlgmr.msra.gmra.mrb[40].mxu1 %vm403_vm1, %v6229_v17 }
  0x59   :  { %1695 = vmatpush1.bf16.msra.mxu0 %v541_v36  ;;  %1736 = vmatpush1.bf16.msra.mxu1 %v547_v37  ;;  %v59_v36 = vld [vmem:[%s10870_s0 + $0x140] sm:$0xff]  ;;  %v60_v37 = vld [vmem:[%s10870_s0 + $0x148] sm:$0xff] }
  0x5a   :  { %1726 = vmatprep.mubr.bf16.mxu0 %v6173_v2  ;;  %5894 = vmatprep.subr.msk.bf16.mxu0 %vm407_vm0, %v5767_v38  ;;  %v637_v38 = vsel %vm407_vm0, %v5794_v34, 0  ;;  %v5799_v40 = vcombine.high %v59_v36, %v59_v36  ;;  %v5801_v41 = vcombine.high %v60_v37, %v60_v37  ;;  %v5798_v42 = vcombine.low %v59_v36, %v59_v36 }
  0x5b   :  { %1767 = vmatprep.mubr.bf16.mxu1 %v6173_v2  ;;  %5896 = vmatprep.subr.msk.bf16.mxu1 %vm407_vm0, %v5769_v39  ;;  %v643_v39 = vsel %vm407_vm0, %v5796_v35, 0  ;;  %v5800_v43 = vcombine.low %v60_v37, %v60_v37 }
  0x60   :  { %5891 = vmatmul.mubr.msk.bf16.vlgmr.msra.gmra.mrb[44].mxu0 %vm403_vm1, %v6229_v17  ;;  %5893 = vmatmul.mubr.msk.bf16.vlgmr.msra.gmra.mrb[44].mxu1 %vm403_vm1, %v6229_v17 }
  0x61   :  { %1777 = vmatpush1.bf16.msra.mxu0 %v553_v44  ;;  %1818 = vmatpush1.bf16.msra.mxu1 %v559_v45  ;;  %v61_v44 = vld [vmem:[%s10870_s0 + $0x150] sm:$0xff]  ;;  %v62_v45 = vld [vmem:[%s10870_s0 + $0x158] sm:$0xff] }
  0x62   :  { %1808 = vmatprep.mubr.bf16.mxu0 %v6173_v2  ;;  %5898 = vmatprep.subr.msk.bf16.mxu0 %vm407_vm0, %v5771_v46  ;;  %v649_v46 = vsel %vm407_vm0, %v5798_v42, 0  ;;  %v5803_v48 = vcombine.high %v61_v44, %v61_v44  ;;  %v5805_v49 = vcombine.high %v62_v45, %v62_v45  ;;  %v5802_v50 = vcombine.low %v61_v44, %v61_v44 }
  0x63   :  { %1849 = vmatprep.mubr.bf16.mxu1 %v6173_v2  ;;  %5900 = vmatprep.subr.msk.bf16.mxu1 %vm407_vm0, %v5773_v47  ;;  %v655_v47 = vsel %vm407_vm0, %v5800_v43, 0  ;;  %v5804_v51 = vcombine.low %v62_v45, %v62_v45 }
  0x68   :  { %5895 = vmatmul.mubr.msk.bf16.vlgmr.msra.gmra.mrb[48].mxu0 %vm403_vm1, %v6229_v17  ;;  %5897 = vmatmul.mubr.msk.bf16.vlgmr.msra.gmra.mrb[48].mxu1 %vm403_vm1, %v6229_v17 }
  0x69   :  { %1859 = vmatpush1.bf16.msra.mxu0 %v565_v52  ;;  %1900 = vmatpush1.bf16.msra.mxu1 %v571_v53  ;;  %v63_v52 = vld [vmem:[%s10870_s0 + $0x160] sm:$0xff]  ;;  %v64_v53 = vld [vmem:[%s10870_s0 + $0x168] sm:$0xff] }
  0x6a   :  { %1890 = vmatprep.mubr.bf16.mxu0 %v6173_v2  ;;  %5902 = vmatprep.subr.msk.bf16.mxu0 %vm407_vm0, %v5775_v54  ;;  %v661_v54 = vsel %vm407_vm0, %v5802_v50, 0  ;;  %v5807_v56 = vcombine.high %v63_v52, %v63_v52  ;;  %v5809_v57 = vcombine.high %v64_v53, %v64_v53  ;;  %v5806_v58 = vcombine.low %v63_v52, %v63_v52  ;;  %v78_v52 = vld [vmem:[%s10870_s0 + $0x1d8] sm:$0xff] }
  0x6b   :  { %1931 = vmatprep.mubr.bf16.mxu1 %v6173_v2  ;;  %5904 = vmatprep.subr.msk.bf16.mxu1 %vm407_vm0, %v5777_v55  ;;  %v667_v55 = vsel %vm407_vm0, %v5804_v51, 0  ;;  %v5808_v59 = vcombine.low %v64_v53, %v64_v53 }
  0x70   :  { %5899 = vmatmul.mubr.msk.bf16.vlgmr.msra.gmra.mrb[52].mxu0 %vm403_vm1, %v6229_v17  ;;  %5901 = vmatmul.mubr.msk.bf16.vlgmr.msra.gmra.mrb[52].mxu1 %vm403_vm1, %v6229_v17 }
  0x71   :  { %1941 = vmatpush1.bf16.msra.mxu0 %v577_v60  ;;  %1982 = vmatpush1.bf16.msra.mxu1 %v583_v61  ;;  %v65_v60 = vld [vmem:[%s10870_s0 + $0x170] sm:$0xff]  ;;  %v66_v61 = vld [vmem:[%s10870_s0 + $0x178] sm:$0xff] }
  0x72   :  { %1972 = vmatprep.mubr.bf16.mxu0 %v6173_v2  ;;  %5906 = vmatprep.subr.msk.bf16.mxu0 %vm407_vm0, %v5779_v62  ;;  %v673_v62 = vsel %vm407_vm0, %v5806_v58, 0  ;;  %v5811_v0 = vcombine.high %v65_v60, %v65_v60  ;;  %v5813_v1 = vcombine.high %v66_v61, %v66_v61  ;;  %v5810_v3 = vcombine.low %v65_v60, %v65_v60 }
  0x73   :  { %2013 = vmatprep.mubr.bf16.mxu1 %v6173_v2  ;;  %5908 = vmatprep.subr.msk.bf16.mxu1 %vm407_vm0, %v5781_v63  ;;  %v679_v63 = vsel %vm407_vm0, %v5808_v59, 0  ;;  %v5812_v4 = vcombine.low %v66_v61, %v66_v61 }
  0x78   :  { %5903 = vmatmul.mubr.msk.bf16.vlgmr.msra.gmra.mrb[56].mxu0 %vm403_vm1, %v6229_v17  ;;  %5905 = vmatmul.mubr.msk.bf16.vlgmr.msra.gmra.mrb[56].mxu1 %vm403_vm1, %v6229_v17 }
  0x79   :  { %2023 = vmatpush1.bf16.msra.mxu0 %v589_v5  ;;  %2064 = vmatpush1.bf16.msra.mxu1 %v595_v6  ;;  %v67_v5 = vld [vmem:[%s10870_s0 + $0x180] sm:$0xff]  ;;  %v68_v6 = vld [vmem:[%s10870_s0 + $0x188] sm:$0xff] }
  0x7a   :  { %2054 = vmatprep.mubr.bf16.mxu0 %v6173_v2  ;;  %5910 = vmatprep.subr.msk.bf16.mxu0 %vm407_vm0, %v5783_v7  ;;  %v685_v7 = vsel %vm407_vm0, %v5810_v3, 0  ;;  %v5815_v9 = vcombine.high %v67_v5, %v67_v5  ;;  %v5817_v10 = vcombine.high %v68_v6, %v68_v6  ;;  %v5814_v11 = vcombine.low %v67_v5, %v67_v5 }
  0x7b   :  { %2095 = vmatprep.mubr.bf16.mxu1 %v6173_v2  ;;  %5912 = vmatprep.subr.msk.bf16.mxu1 %vm407_vm0, %v5785_v8  ;;  %v691_v8 = vsel %vm407_vm0, %v5812_v4, 0  ;;  %v5816_v12 = vcombine.low %v68_v6, %v68_v6  ;;  %v5836_v5 = vcombine.low %v78_v52, %v78_v52 }
  0x80   :  { %5907 = vmatmul.mubr.msk.bf16.vlgmr.msra.gmra.mrb[60].mxu0 %vm403_vm1, %v6229_v17  ;;  %5909 = vmatmul.mubr.msk.bf16.vlgmr.msra.gmra.mrb[60].mxu1 %vm403_vm1, %v6229_v17 }
  0x81   :  { %2105 = vmatpush1.bf16.msra.mxu0 %v601_v13  ;;  %2146 = vmatpush1.bf16.msra.mxu1 %v607_v14  ;;  %v69_v13 = vld [vmem:[%s10870_s0 + $0x190] sm:$0xff]  ;;  %v70_v14 = vld [vmem:[%s10870_s0 + $0x198] sm:$0xff] }
  0x82   :  { %2136 = vmatprep.mubr.bf16.mxu0 %v6173_v2  ;;  %5914 = vmatprep.subr.msk.bf16.mxu0 %vm407_vm0, %v5787_v15  ;;  %v697_v15 = vsel %vm407_vm0, %v5814_v11, 0  ;;  %v5819_v18 = vcombine.high %v69_v13, %v69_v13  ;;  %v5821_v19 = vcombine.high %v70_v14, %v70_v14  ;;  %v5818_v20 = vcombine.low %v69_v13, %v69_v13 }
  0x83   :  { %2177 = vmatprep.mubr.bf16.mxu1 %v6173_v2  ;;  %5916 = vmatprep.subr.msk.bf16.mxu1 %vm407_vm0, %v5789_v16  ;;  %v703_v16 = vsel %vm407_vm0, %v5816_v12, 0  ;;  %v5820_v21 = vcombine.low %v70_v14, %v70_v14  ;;  %v80_v12 = vld [vmem:[%s10870_s0 + $0x1e8] sm:$0xff] }
  0x88   :  { %5911 = vmatmul.mubr.msk.bf16.vlgmr.msra.gmra.mrb[64].mxu0 %vm403_vm1, %v6229_v17  ;;  %5913 = vmatmul.mubr.msk.bf16.vlgmr.msra.gmra.mrb[64].mxu1 %vm403_vm1, %v6229_v17 }
  0x89   :  { %2187 = vmatpush1.bf16.msra.mxu0 %v613_v22  ;;  %2228 = vmatpush1.bf16.msra.mxu1 %v619_v23  ;;  %v71_v22 = vld [vmem:[%s10870_s0 + $0x1a0] sm:$0xff]  ;;  %v72_v23 = vld [vmem:[%s10870_s0 + $0x1a8] sm:$0xff] }
  0x8a   :  { %2218 = vmatprep.mubr.bf16.mxu0 %v6173_v2  ;;  %5918 = vmatprep.subr.msk.bf16.mxu0 %vm407_vm0, %v5791_v24  ;;  %v709_v24 = vsel %vm407_vm0, %v5818_v20, 0  ;;  %v5823_v26 = vcombine.high %v71_v22, %v71_v22  ;;  %v5825_v27 = vcombine.high %v72_v23, %v72_v23  ;;  %v5822_v28 = vcombine.low %v71_v22, %v71_v22 }
  0x8b   :  { %2259 = vmatprep.mubr.bf16.mxu1 %v6173_v2  ;;  %5920 = vmatprep.subr.msk.bf16.mxu1 %vm407_vm0, %v5793_v25  ;;  %v715_v25 = vsel %vm407_vm0, %v5820_v21, 0  ;;  %v5824_v29 = vcombine.low %v72_v23, %v72_v23  ;;  %v763_v22 = vsel %vm407_vm0, %v5836_v5, 0 }
  0x90   :  { %5915 = vmatmul.mubr.msk.bf16.vlgmr.msra.gmra.mrb[68].mxu0 %vm403_vm1, %v6229_v17  ;;  %5917 = vmatmul.mubr.msk.bf16.vlgmr.msra.gmra.mrb[68].mxu1 %vm403_vm1, %v6229_v17 }
  0x91   :  { %2269 = vmatpush1.bf16.msra.mxu0 %v625_v30  ;;  %2310 = vmatpush1.bf16.msra.mxu1 %v631_v31  ;;  %v73_v30 = vld [vmem:[%s10870_s0 + $0x1b0] sm:$0xff]  ;;  %v74_v31 = vld [vmem:[%s10870_s0 + $0x1b8] sm:$0xff] }
  0x92   :  { %2300 = vmatprep.mubr.bf16.mxu0 %v6173_v2  ;;  %5922 = vmatprep.subr.msk.bf16.mxu0 %vm407_vm0, %v5795_v32  ;;  %v721_v32 = vsel %vm407_vm0, %v5822_v28, 0  ;;  %v5827_v34 = vcombine.high %v73_v30, %v73_v30  ;;  %v5829_v35 = vcombine.high %v74_v31, %v74_v31  ;;  %v5826_v36 = vcombine.low %v73_v30, %v73_v30 }
  0x93   :  { %2341 = vmatprep.mubr.bf16.mxu1 %v6173_v2  ;;  %5924 = vmatprep.subr.msk.bf16.mxu1 %vm407_vm0, %v5797_v33  ;;  %v727_v33 = vsel %vm407_vm0, %v5824_v29, 0  ;;  %v5828_v37 = vcombine.low %v74_v31, %v74_v31  ;;  %v5840_v29 = vcombine.low %v80_v12, %v80_v12 }
  0x98   :  { %5919 = vmatmul.mubr.msk.bf16.vlgmr.msra.gmra.mrb[72].mxu0 %vm403_vm1, %v6229_v17  ;;  %5921 = vmatmul.mubr.msk.bf16.vlgmr.msra.gmra.mrb[72].mxu1 %vm403_vm1, %v6229_v17 }
  0x99   :  { %2351 = vmatpush1.bf16.msra.mxu0 %v637_v38  ;;  %2392 = vmatpush1.bf16.msra.mxu1 %v643_v39  ;;  %v75_v38 = vld [vmem:[%s10870_s0 + $0x1c0] sm:$0xff]  ;;  %v76_v39 = vld [vmem:[%s10870_s0 + $0x1c8] sm:$0xff] }
  0x9a   :  { %2382 = vmatprep.mubr.bf16.mxu0 %v6173_v2  ;;  %5926 = vmatprep.subr.msk.bf16.mxu0 %vm407_vm0, %v5799_v40  ;;  %v733_v40 = vsel %vm407_vm0, %v5826_v36, 0  ;;  %v5831_v42 = vcombine.high %v75_v38, %v75_v38  ;;  %v5833_v43 = vcombine.high %v76_v39, %v76_v39  ;;  %v5830_v44 = vcombine.low %v75_v38, %v75_v38  ;;  %v82_v36 = vld [vmem:[%s10870_s0 + $0x1f8] sm:$0xff] }
  0x9b   :  { %2423 = vmatprep.mubr.bf16.mxu1 %v6173_v2  ;;  %5928 = vmatprep.subr.msk.bf16.mxu1 %vm407_vm0, %v5801_v41  ;;  %v739_v41 = vsel %vm407_vm0, %v5828_v37, 0  ;;  %v5832_v45 = vcombine.low %v76_v39, %v76_v39 }
  0x9c   :  { %v745_v60 = vsel %vm407_vm0, %v5830_v44, 0 }
  0x9d   :  { %v751_v61 = vsel %vm407_vm0, %v5832_v45, 0  ;;  %v775_v45 = vsel %vm407_vm0, %v5840_v29, 0 }
  0xa0   :  { %5923 = vmatmul.mubr.msk.bf16.vlgmr.msra.gmra.mrb[76].mxu0 %vm403_vm1, %v6229_v17  ;;  %5925 = vmatmul.mubr.msk.bf16.vlgmr.msra.gmra.mrb[76].mxu1 %vm403_vm1, %v6229_v17 }
  0xa1   :  { %2433 = vmatpush1.bf16.msra.mxu0 %v649_v46  ;;  %2474 = vmatpush1.bf16.msra.mxu1 %v655_v47 }
  0xa2   :  { %2464 = vmatprep.mubr.bf16.mxu0 %v6173_v2  ;;  %5930 = vmatprep.subr.msk.bf16.mxu0 %vm407_vm0, %v5803_v48  ;;  %v77_v48 = vld [vmem:[%s10870_s0 + $0x1d0] sm:$0xff] }
  0xa3   :  { %2505 = vmatprep.mubr.bf16.mxu1 %v6173_v2  ;;  %5932 = vmatprep.subr.msk.bf16.mxu1 %vm407_vm0, %v5805_v49  ;;  %v5834_v4 = vcombine.low %v77_v48, %v77_v48 }
  0xa5   :  { %v757_v21 = vsel %vm407_vm0, %v5834_v4, 0 }
  0xa8   :  { %5927 = vmatmul.mubr.msk.bf16.vlgmr.msra.gmra.mrb[80].mxu0 %vm403_vm1, %v6229_v17  ;;  %5929 = vmatmul.mubr.msk.bf16.vlgmr.msra.gmra.mrb[80].mxu1 %vm403_vm1, %v6229_v17 }
  0xa9   :  { %2515 = vmatpush1.bf16.msra.mxu0 %v661_v54  ;;  %2556 = vmatpush1.bf16.msra.mxu1 %v667_v55 }
  0xaa   :  { %2546 = vmatprep.mubr.bf16.mxu0 %v6173_v2  ;;  %5934 = vmatprep.subr.msk.bf16.mxu0 %vm407_vm0, %v5807_v56 }
  0xab   :  { %2587 = vmatprep.mubr.bf16.mxu1 %v6173_v2  ;;  %5936 = vmatprep.subr.msk.bf16.mxu1 %vm407_vm0, %v5809_v57 }
  0xb0   :  { %5931 = vmatmul.mubr.msk.bf16.vlgmr.msra.gmra.mrb[84].mxu0 %vm403_vm1, %v6229_v17  ;;  %5933 = vmatmul.mubr.msk.bf16.vlgmr.msra.gmra.mrb[84].mxu1 %vm403_vm1, %v6229_v17 }
  0xb1   :  { %2597 = vmatpush1.bf16.msra.mxu0 %v673_v62  ;;  %2638 = vmatpush1.bf16.msra.mxu1 %v679_v63  ;;  %v5835_v62 = vcombine.high %v77_v48, %v77_v48 }
  0xb2   :  { %2628 = vmatprep.mubr.bf16.mxu0 %v6173_v2  ;;  %5938 = vmatprep.subr.msk.bf16.mxu0 %vm407_vm0, %v5811_v0  ;;  %v5837_v0 = vcombine.high %v78_v52, %v78_v52  ;;  %v5845_v52 = vcombine.high %v82_v36, %v82_v36 }
  0xb3   :  { %2669 = vmatprep.mubr.bf16.mxu1 %v6173_v2  ;;  %5940 = vmatprep.subr.msk.bf16.mxu1 %vm407_vm0, %v5813_v1 }
  0xb8   :  { %5935 = vmatmul.mubr.msk.bf16.vlgmr.msra.gmra.mrb[88].mxu0 %vm403_vm1, %v6229_v17  ;;  %5937 = vmatmul.mubr.msk.bf16.vlgmr.msra.gmra.mrb[88].mxu1 %vm403_vm1, %v6229_v17 }
  0xb9   :  { %2679 = vmatpush1.bf16.msra.mxu0 %v685_v7  ;;  %2720 = vmatpush1.bf16.msra.mxu1 %v691_v8  ;;  %v79_v8 = vld [vmem:[%s10870_s0 + $0x1e0] sm:$0xff] }
  0xba   :  { %2710 = vmatprep.mubr.bf16.mxu0 %v6173_v2  ;;  %5942 = vmatprep.subr.msk.bf16.mxu0 %vm407_vm0, %v5815_v9  ;;  %v5839_v23 = vcombine.high %v79_v8, %v79_v8  ;;  %v5838_v28 = vcombine.low %v79_v8, %v79_v8 }
  0xbb   :  { %2751 = vmatprep.mubr.bf16.mxu1 %v6173_v2  ;;  %5944 = vmatprep.subr.msk.bf16.mxu1 %vm407_vm0, %v5817_v10 }
  0xbc   :  { %v769_v44 = vsel %vm407_vm0, %v5838_v28, 0 }
  0xc0   :  { %5939 = vmatmul.mubr.msk.bf16.vlgmr.msra.gmra.mrb[92].mxu0 %vm403_vm1, %v6229_v17  ;;  %5941 = vmatmul.mubr.msk.bf16.vlgmr.msra.gmra.mrb[92].mxu1 %vm403_vm1, %v6229_v17 }
  0xc1   :  { %2761 = vmatpush1.bf16.msra.mxu0 %v697_v15  ;;  %2802 = vmatpush1.bf16.msra.mxu1 %v703_v16 }
  0xc2   :  { %2792 = vmatprep.mubr.bf16.mxu0 %v6173_v2  ;;  %5946 = vmatprep.subr.msk.bf16.mxu0 %vm407_vm0, %v5819_v18 }
  0xc3   :  { %2833 = vmatprep.mubr.bf16.mxu1 %v6173_v2  ;;  %5948 = vmatprep.subr.msk.bf16.mxu1 %vm407_vm0, %v5821_v19 }
  0xc8   :  { %5943 = vmatmul.mubr.msk.bf16.vlgmr.msra.gmra.mrb[96].mxu0 %vm403_vm1, %v6229_v17  ;;  %5945 = vmatmul.mubr.msk.bf16.vlgmr.msra.gmra.mrb[96].mxu1 %vm403_vm1, %v6229_v17 }
  0xc9   :  { %2843 = vmatpush1.bf16.msra.mxu0 %v709_v24  ;;  %2884 = vmatpush1.bf16.msra.mxu1 %v715_v25  ;;  %v5841_v25 = vcombine.high %v80_v12, %v80_v12 }
  0xca   :  { %2874 = vmatprep.mubr.bf16.mxu0 %v6173_v2  ;;  %5950 = vmatprep.subr.msk.bf16.mxu0 %vm407_vm0, %v5823_v26 }
  0xcb   :  { %2915 = vmatprep.mubr.bf16.mxu1 %v6173_v2  ;;  %5952 = vmatprep.subr.msk.bf16.mxu1 %vm407_vm0, %v5825_v27 }
  0xd0   :  { %5947 = vmatmul.mubr.msk.bf16.vlgmr.msra.gmra.mrb[100].mxu0 %vm403_vm1, %v6229_v17  ;;  %5949 = vmatmul.mubr.msk.bf16.vlgmr.msra.gmra.mrb[100].mxu1 %vm403_vm1, %v6229_v17 }
  0xd1   :  { %2925 = vmatpush1.bf16.msra.mxu0 %v721_v32  ;;  %2966 = vmatpush1.bf16.msra.mxu1 %v727_v33 }
  0xd2   :  { %2956 = vmatprep.mubr.bf16.mxu0 %v6173_v2  ;;  %5954 = vmatprep.subr.msk.bf16.mxu0 %vm407_vm0, %v5827_v34 }
  0xd3   :  { %2997 = vmatprep.mubr.bf16.mxu1 %v6173_v2  ;;  %5956 = vmatprep.subr.msk.bf16.mxu1 %vm407_vm0, %v5829_v35 }
  0xd8   :  { %5951 = vmatmul.mubr.msk.bf16.vlgmr.msra.gmra.mrb[104].mxu0 %vm403_vm1, %v6229_v17  ;;  %5953 = vmatmul.mubr.msk.bf16.vlgmr.msra.gmra.mrb[104].mxu1 %vm403_vm1, %v6229_v17 }
  0xd9   :  { %3007 = vmatpush1.bf16.msra.mxu0 %v733_v40  ;;  %3048 = vmatpush1.bf16.msra.mxu1 %v739_v41 }
  0xda   :  { %3038 = vmatprep.mubr.bf16.mxu0 %v6173_v2  ;;  %5958 = vmatprep.subr.msk.bf16.mxu0 %vm407_vm0, %v5831_v42 }
  0xdb   :  { %v6657_v46 = vpop.f32.mrb[0].mxu0  ;;  %v6659_v47 = vpop.f32.mrb[0].mxu1  ;;  %3079 = vmatprep.mubr.bf16.mxu1 %v6173_v2  ;;  %5960 = vmatprep.subr.msk.bf16.mxu1 %vm407_vm0, %v5833_v43 }
  0xdc   :  { %11334 = vst [vmem:[#allocation2_spill] sm:$0xff] %v6657_v46  ;;  %11335 = vst [vmem:[#allocation3_spill] sm:$0xff] %v6659_v47  ;;  %v3416_v49 = vsel %vm407_vm0, %v6657_v46, 0.0  ;;  %v6668_v50 = vpop.f32.mrb[1].mxu0  ;;  %v6670_v51 = vpop.f32.mrb[1].mxu1  ;;  %v3419_v55 = vsel %vm407_vm0, %v6659_v47, 0.0 }
  0xdd   :  { %11336 = vst [vmem:[#allocation4_spill] sm:$0xff] %v6668_v50  ;;  %11337 = vst [vmem:[#allocation5_spill] sm:$0xff] %v6670_v51  ;;  %v3417_v53 = vsel %vm407_vm0, %v6668_v50, 0.0  ;;  %v830_v54 = vpop.f32.mrb[2].mxu0  ;;  %v871_v56 = vpop.f32.mrb[2].mxu1  ;;  %v3421_v63 = vsel %vm407_vm0, %v6670_v51, 0.0 }
  0xde   :  { %v3418_v57 = vadd.f32 %v3417_v53, %v3416_v49  ;;  %v831_v58 = vpop.f32.mrb[3].mxu0  ;;  %v872_v59 = vpop.f32.mrb[3].mxu1  ;;  %v6172_v53 = vld [vmem:[%s10871_s1] sm:$0x3] }
  0xe0   :  { %v3420_v1 = vadd.f32 %v3419_v55, %v3418_v57  ;;  %5955 = vmatmul.mubr.msk.bf16.vlgmr.msra.gmra.mrb[108].mxu0 %vm403_vm1, %v6229_v17  ;;  %5957 = vmatmul.mubr.msk.bf16.vlgmr.msra.gmra.mrb[108].mxu1 %vm403_vm1, %v6229_v17  ;;  %v5844_v57 = vcombine.low %v82_v36, %v82_v36 }
  0xe1   :  { %3089 = vmatpush1.bf16.msra.mxu0 %v745_v60  ;;  %3130 = vmatpush1.bf16.msra.mxu1 %v751_v61 }
  0xe2   :  { %v3422_v3 = vadd.f32 %v3421_v63, %v3420_v1  ;;  %3120 = vmatprep.mubr.bf16.mxu0 %v6173_v2  ;;  %5962 = vmatprep.subr.msk.bf16.mxu0 %vm407_vm0, %v5835_v62 }
  0xe3   :  { %v6689_v6 = vpop.f32.mrb[4].mxu0  ;;  %v6691_v7 = vpop.f32.mrb[4].mxu1  ;;  %3161 = vmatprep.mubr.bf16.mxu1 %v6173_v2  ;;  %5964 = vmatprep.subr.msk.bf16.mxu1 %vm407_vm0, %v5837_v0 }
  0xe4   :  { %11338 = vst [vmem:[#allocation6_spill] sm:$0xff] %v6689_v6  ;;  %11339 = vst [vmem:[#allocation7_spill] sm:$0xff] %v6691_v7  ;;  %v3423_v9 = vsel %vm407_vm0, %v6689_v6, 0.0  ;;  %v6700_v10 = vpop.f32.mrb[5].mxu0  ;;  %v6702_v11 = vpop.f32.mrb[5].mxu1  ;;  %v3427_v18 = vsel %vm407_vm0, %v6691_v7, 0.0 }
  0xe5   :  { %11340 = vst [vmem:[#allocation8_spill] sm:$0xff] %v6700_v10  ;;  %11341 = vst [vmem:[#allocation9_spill] sm:$0xff] %v6702_v11  ;;  %v3424_v13 = vadd.f32 %v3423_v9, %v3422_v3  ;;  %v3425_v14 = vsel %vm407_vm0, %v6700_v10, 0.0  ;;  %v912_v15 = vpop.f32.mrb[6].mxu0  ;;  %v953_v16 = vpop.f32.mrb[6].mxu1  ;;  %v3429_v27 = vsel %vm407_vm0, %v6702_v11, 0.0 }
  0xe6   :  { %v913_v19 = vpop.f32.mrb[7].mxu0  ;;  %v954_v20 = vpop.f32.mrb[7].mxu1 }
  0xe7   :  { %v3426_v24 = vadd.f32 %v3425_v14, %v3424_v13  ;;  %v787_v13 = vsel %vm407_vm0, %v5844_v57, 0 }
  0xe8   :  { %5959 = vmatmul.mubr.msk.bf16.vlgmr.msra.gmra.mrb[112].mxu0 %vm403_vm1, %v6229_v17  ;;  %5961 = vmatmul.mubr.msk.bf16.vlgmr.msra.gmra.mrb[112].mxu1 %vm403_vm1, %v6229_v17  ;;  %v81_v17 = vld [vmem:[%s10870_s0 + $0x1f0] sm:$0xff] }
  0xe9   :  { %v3428_v26 = vadd.f32 %v3427_v18, %v3426_v24  ;;  %3171 = vmatpush1.bf16.msra.mxu0 %v757_v21  ;;  %3212 = vmatpush1.bf16.msra.mxu1 %v763_v22  ;;  %v5843_v48 = vcombine.high %v81_v17, %v81_v17  ;;  %v5842_v56 = vcombine.low %v81_v17, %v81_v17 }
  0xea   :  { %3202 = vmatprep.mubr.bf16.mxu0 %v6173_v2  ;;  %5966 = vmatprep.subr.msk.bf16.mxu0 %vm407_vm0, %v5839_v23 }
  0xeb   :  { %v3430_v30 = vadd.f32 %v3429_v27, %v3428_v26  ;;  %v6721_v31 = vpop.f32.mrb[8].mxu0  ;;  %v6723_v32 = vpop.f32.mrb[8].mxu1  ;;  %3243 = vmatprep.mubr.bf16.mxu1 %v6173_v2  ;;  %5968 = vmatprep.subr.msk.bf16.mxu1 %vm407_vm0, %v5841_v25  ;;  %v781_v12 = vsel %vm407_vm0, %v5842_v56, 0 }
  0xec   :  { %11342 = vst [vmem:[#allocation10_spill] sm:$0xff] %v6721_v31  ;;  %11343 = vst [vmem:[#allocation11_spill] sm:$0xff] %v6723_v32  ;;  %v3431_v33 = vsel %vm407_vm0, %v6721_v31, 0.0  ;;  %v6732_v34 = vpop.f32.mrb[9].mxu0  ;;  %v6734_v35 = vpop.f32.mrb[9].mxu1  ;;  %v3435_v41 = vsel %vm407_vm0, %v6723_v32, 0.0 }
  0xed   :  { %11344 = vst [vmem:[#allocation12_spill] sm:$0xff] %v6732_v34  ;;  %11345 = vst [vmem:[#allocation13_spill] sm:$0xff] %v6734_v35  ;;  %v3432_v37 = vadd.f32 %v3431_v33, %v3430_v30  ;;  %v3433_v38 = vsel %vm407_vm0, %v6732_v34, 0.0  ;;  %v994_v39 = vpop.f32.mrb[10].mxu0  ;;  %v1035_v40 = vpop.f32.mrb[10].mxu1  ;;  %v3437_v55 = vsel %vm407_vm0, %v6734_v35, 0.0 }
  0xee   :  { %v995_v42 = vpop.f32.mrb[11].mxu0  ;;  %v1036_v43 = vpop.f32.mrb[11].mxu1 }
  0xef   :  { %v3434_v49 = vadd.f32 %v3433_v38, %v3432_v37 }
  0xf0   :  { %5963 = vmatmul.mubr.msk.bf16.vlgmr.msra.gmra.mrb[116].mxu0 %vm403_vm1, %v6172_v53  ;;  %5965 = vmatmul.mubr.msk.bf16.vlgmr.msra.gmra.mrb[116].mxu1 %vm403_vm1, %v6172_v53 }
  0xf1   :  { %v3436_v54 = vadd.f32 %v3435_v41, %v3434_v49  ;;  %3253 = vmatpush1.bf16.msra.mxu0 %v769_v44  ;;  %3294 = vmatpush1.bf16.msra.mxu1 %v775_v45 }
  0xf2   :  { %3284 = vmatprep.mubr.bf16.mxu0 %v6173_v2  ;;  %5970 = vmatprep.subr.msk.bf16.mxu0 %vm407_vm0, %v5843_v48 }
  0xf3   :  { %v3438_v58 = vadd.f32 %v3437_v55, %v3436_v54  ;;  %v6754_v59 = vpop.f32.mrb[12].mxu0  ;;  %v6756_v60 = vpop.f32.mrb[12].mxu1  ;;  %3325 = vmatprep.mubr.bf16.mxu1 %v6173_v2  ;;  %5972 = vmatprep.subr.msk.bf16.mxu1 %vm407_vm0, %v5845_v52 }
  0xf4   :  { %11346 = vst [vmem:[#allocation14_spill] sm:$0xff] %v6754_v59  ;;  %11347 = vst [vmem:[#allocation15_spill] sm:$0xff] %v6756_v60  ;;  %v3439_v61 = vsel %vm407_vm0, %v6754_v59, 0.0  ;;  %v6762_v62 = vpop.f32.mrb[13].mxu0  ;;  %v6764_v63 = vpop.f32.mrb[13].mxu1  ;;  %v3443_v5 = vsel %vm407_vm0, %v6756_v60, 0.0 }
  0xf5   :  { %11348 = vst [vmem:[#allocation16_spill] sm:$0xff] %v6762_v62  ;;  %11349 = vst [vmem:[#allocation17_spill] sm:$0xff] %v6764_v63  ;;  %v3440_v0 = vadd.f32 %v3439_v61, %v3438_v58  ;;  %v3441_v1 = vsel %vm407_vm0, %v6762_v62, 0.0  ;;  %v1076_v3 = vpop.f32.mrb[14].mxu0  ;;  %v1117_v4 = vpop.f32.mrb[14].mxu1  ;;  %v3445_v16 = vsel %vm407_vm0, %v6764_v63, 0.0 }
  0xf6   :  { %v1077_v8 = vpop.f32.mrb[15].mxu0  ;;  %v1118_v9 = vpop.f32.mrb[15].mxu1 }
  0xf7   :  { %v3442_v14 = vadd.f32 %v3441_v1, %v3440_v0 }
  0xf8   :  { %5967 = vmatmul.mubr.msk.bf16.vlgmr.msra.gmra.mrb[120].mxu0 %vm403_vm1, %v6172_v53  ;;  %5969 = vmatmul.mubr.msk.bf16.vlgmr.msra.gmra.mrb[120].mxu1 %vm403_vm1, %v6172_v53 }
  0xf9   :  { %v3444_v15 = vadd.f32 %v3443_v5, %v3442_v14  ;;  %3335 = vmatpush1.bf16.msra.mxu0 %v781_v12  ;;  %3376 = vmatpush1.bf16.msra.mxu1 %v787_v13 }
  0xfa   :  { %3366 = vmatprep.mubr.bf16.mxu0 %v6173_v2  ;;  %3407 = vmatprep.mubr.bf16.mxu1 %v6173_v2 }
  0xfb   :  { %v3446_v18 = vadd.f32 %v3445_v16, %v3444_v15  ;;  %v6778_v19 = vpop.f32.mrb[16].mxu0  ;;  %v6780_v20 = vpop.f32.mrb[16].mxu1 }
  0xfc   :  { %11350 = vst [vmem:[#allocation18_spill] sm:$0xff] %v6778_v19  ;;  %11351 = vst [vmem:[#allocation19_spill] sm:$0xff] %v6780_v20  ;;  %v3447_v21 = vsel %vm407_vm0, %v6778_v19, 0.0  ;;  %v6784_v22 = vpop.f32.mrb[17].mxu0  ;;  %v6786_v23 = vpop.f32.mrb[17].mxu1  ;;  %v3451_v2 = vsel %vm407_vm0, %v6780_v20, 0.0 }
  0xfd   :  { %11352 = vst [vmem:[#allocation20_spill] sm:$0xff] %v6784_v22  ;;  %11353 = vst [vmem:[#allocation21_spill] sm:$0xff] %v6786_v23  ;;  %v3448_v24 = vadd.f32 %v3447_v21, %v3446_v18  ;;  %v3449_v25 = vsel %vm407_vm0, %v6784_v22, 0.0  ;;  %v1158_v26 = vpop.f32.mrb[18].mxu0  ;;  %v1199_v27 = vpop.f32.mrb[18].mxu1  ;;  %v3453_v33 = vsel %vm407_vm0, %v6786_v23, 0.0 }
  0xfe   :  { %v1159_v28 = vpop.f32.mrb[19].mxu0  ;;  %v1200_v29 = vpop.f32.mrb[19].mxu1 }
  0xff   :  { %v3450_v30 = vadd.f32 %v3449_v25, %v3448_v24 }
 0x100   :  { %5971 = vmatmul.mubr.msk.bf16.vlgmr.msra.gmra.mrb[124].mxu0 %vm403_vm1, %v6172_v53  ;;  %5973 = vmatmul.mubr.msk.bf16.vlgmr.msra.gmra.mrb[124].mxu1 %vm403_vm1, %v6172_v53 }
 0x101   :  { %v3452_v17 = vadd.f32 %v3451_v2, %v3450_v30 }
 0x103   :  { %v3454_v36 = vadd.f32 %v3453_v33, %v3452_v17  ;;  %v6796_v37 = vpop.f32.mrb[20].mxu0  ;;  %v6798_v38 = vpop.f32.mrb[20].mxu1 }
 0x104   :  { %11354 = vst [vmem:[#allocation22_spill] sm:$0xff] %v6796_v37  ;;  %11355 = vst [vmem:[#allocation23_spill] sm:$0xff] %v6798_v38  ;;  %v3455_v39 = vsel %vm407_vm0, %v6796_v37, 0.0  ;;  %v6802_v40 = vpop.f32.mrb[21].mxu0  ;;  %v6804_v41 = vpop.f32.mrb[21].mxu1  ;;  %v3459_v48 = vsel %vm407_vm0, %v6798_v38, 0.0 }
 0x105   :  { %11356 = vst [vmem:[#allocation24_spill] sm:$0xff] %v6802_v40  ;;  %11357 = vst [vmem:[#allocation25_spill] sm:$0xff] %v6804_v41  ;;  %v3456_v42 = vadd.f32 %v3455_v39, %v3454_v36  ;;  %v3457_v43 = vsel %vm407_vm0, %v6802_v40, 0.0  ;;  %v1240_v44 = vpop.f32.mrb[22].mxu0  ;;  %v1281_v45 = vpop.f32.mrb[22].mxu1  ;;  %v3461_v55 = vsel %vm407_vm0, %v6804_v41, 0.0 }
 0x106   :  { %v1241_v49 = vpop.f32.mrb[23].mxu0  ;;  %v1282_v52 = vpop.f32.mrb[23].mxu1 }
 0x107   :  { %v3458_v53 = vadd.f32 %v3457_v43, %v3456_v42 }
 0x109   :  { %v3460_v54 = vadd.f32 %v3459_v48, %v3458_v53 }
 0x10b   :  { %v3462_v56 = vadd.f32 %v3461_v55, %v3460_v54  ;;  %v6812_v57 = vpop.f32.mrb[24].mxu0  ;;  %v6814_v58 = vpop.f32.mrb[24].mxu1 }
 0x10c   :  { %11358 = vst [vmem:[#allocation26_spill] sm:$0xff] %v6812_v57  ;;  %11359 = vst [vmem:[#allocation27_spill] sm:$0xff] %v6814_v58  ;;  %v3463_v61 = vsel %vm407_vm0, %v6812_v57, 0.0  ;;  %v6818_v0 = vpop.f32.mrb[25].mxu0  ;;  %v6820_v1 = vpop.f32.mrb[25].mxu1  ;;  %v3467_v9 = vsel %vm407_vm0, %v6814_v58, 0.0 }
 0x10d   :  { %11360 = vst [vmem:[#allocation28_spill] sm:$0xff] %v6818_v0  ;;  %11361 = vst [vmem:[#allocation29_spill] sm:$0xff] %v6820_v1  ;;  %v3464_v3 = vadd.f32 %v3463_v61, %v3462_v56  ;;  %v3465_v4 = vsel %vm407_vm0, %v6818_v0, 0.0  ;;  %v1322_v5 = vpop.f32.mrb[26].mxu0  ;;  %v1363_v8 = vpop.f32.mrb[26].mxu1  ;;  %v3469_v16 = vsel %vm407_vm0, %v6820_v1, 0.0 }
 0x10e   :  { %v1323_v12 = vpop.f32.mrb[27].mxu0  ;;  %v1364_v13 = vpop.f32.mrb[27].mxu1 }
 0x10f   :  { %v3466_v14 = vadd.f32 %v3465_v4, %v3464_v3 }
 0x111   :  { %v3468_v15 = vadd.f32 %v3467_v9, %v3466_v14 }
 0x113   :  { %v3470_v18 = vadd.f32 %v3469_v16, %v3468_v15  ;;  %v6828_v21 = vpop.f32.mrb[28].mxu0  ;;  %v6830_v24 = vpop.f32.mrb[28].mxu1 }
 0x114   :  { %11362 = vst [vmem:[#allocation30_spill] sm:$0xff] %v6828_v21  ;;  %11363 = vst [vmem:[#allocation31_spill] sm:$0xff] %v6830_v24  ;;  %v3471_v25 = vsel %vm407_vm0, %v6828_v21, 0.0  ;;  %v6834_v26 = vpop.f32.mrb[29].mxu0  ;;  %v6836_v27 = vpop.f32.mrb[29].mxu1  ;;  %v3475_v17 = vsel %vm407_vm0, %v6830_v24, 0.0 }
 0x115   :  { %11364 = vst [vmem:[#allocation32_spill] sm:$0xff] %v6834_v26  ;;  %11365 = vst [vmem:[#allocation33_spill] sm:$0xff] %v6836_v27  ;;  %v3472_v2 = vadd.f32 %v3471_v25, %v3470_v18  ;;  %v3473_v28 = vsel %vm407_vm0, %v6834_v26, 0.0  ;;  %v1404_v29 = vpop.f32.mrb[30].mxu0  ;;  %v1445_v30 = vpop.f32.mrb[30].mxu1  ;;  %v3477_v43 = vsel %vm407_vm0, %v6836_v27, 0.0 }
 0x116   :  { %v1405_v33 = vpop.f32.mrb[31].mxu0  ;;  %v1446_v36 = vpop.f32.mrb[31].mxu1 }
 0x117   :  { %v3474_v39 = vadd.f32 %v3473_v28, %v3472_v2 }
 0x119   :  { %v3476_v42 = vadd.f32 %v3475_v17, %v3474_v39 }
 0x11b   :  { %v3478_v44 = vadd.f32 %v3477_v43, %v3476_v42  ;;  %v6844_v45 = vpop.f32.mrb[32].mxu0  ;;  %v6846_v48 = vpop.f32.mrb[32].mxu1 }
 0x11c   :  { %11366 = vst [vmem:[#allocation34_spill] sm:$0xff] %v6844_v45  ;;  %v3479_v49 = vsel %vm407_vm0, %v6844_v45, 0.0  ;;  %v6850_v52 = vpop.f32.mrb[33].mxu0  ;;  %v6852_v53 = vpop.f32.mrb[33].mxu1  ;;  %v3483_v3 = vsel %vm407_vm0, %v6846_v48, 0.0 }
 0x11d   :  { %v3480_v54 = vadd.f32 %v3479_v49, %v3478_v44  ;;  %v3481_v55 = vsel %vm407_vm0, %v6850_v52, 0.0  ;;  %v1486_v56 = vpop.f32.mrb[34].mxu0  ;;  %v1527_v61 = vpop.f32.mrb[34].mxu1  ;;  %v3485_v12 = vsel %vm407_vm0, %v6852_v53, 0.0 }
 0x11e   :  { %v1487_v4 = vpop.f32.mrb[35].mxu0  ;;  %v1528_v5 = vpop.f32.mrb[35].mxu1 }
 0x11f   :  { %v3482_v8 = vadd.f32 %v3481_v55, %v3480_v54 }
 0x121   :  { %v3484_v9 = vadd.f32 %v3483_v3, %v3482_v8 }
 0x123   :  { %v3486_v13 = vadd.f32 %v3485_v12, %v3484_v9  ;;  %v6860_v14 = vpop.f32.mrb[36].mxu0  ;;  %v6862_v15 = vpop.f32.mrb[36].mxu1 }
 0x124   :  { %v3487_v16 = vsel %vm407_vm0, %v6860_v14, 0.0  ;;  %v6866_v18 = vpop.f32.mrb[37].mxu0  ;;  %v6868_v25 = vpop.f32.mrb[37].mxu1  ;;  %v3491_v17 = vsel %vm407_vm0, %v6862_v15, 0.0 }
 0x125   :  { %v3488_v2 = vadd.f32 %v3487_v16, %v3486_v13  ;;  %v3489_v28 = vsel %vm407_vm0, %v6866_v18, 0.0  ;;  %v1568_v29 = vpop.f32.mrb[38].mxu0  ;;  %v1609_v30 = vpop.f32.mrb[38].mxu1  ;;  %v3493_v43 = vsel %vm407_vm0, %v6868_v25, 0.0 }
 0x126   :  { %v1569_v33 = vpop.f32.mrb[39].mxu0  ;;  %v1610_v36 = vpop.f32.mrb[39].mxu1 }
 0x127   :  { %v3490_v39 = vadd.f32 %v3489_v28, %v3488_v2 }
 0x129   :  { %v3492_v42 = vadd.f32 %v3491_v17, %v3490_v39 }
 0x12b   :  { %v3494_v44 = vadd.f32 %v3493_v43, %v3492_v42  ;;  %v6876_v49 = vpop.f32.mrb[40].mxu0  ;;  %v6878_v54 = vpop.f32.mrb[40].mxu1 }
 0x12c   :  { %v3495_v55 = vsel %vm407_vm0, %v6876_v49, 0.0  ;;  %v6882_v56 = vpop.f32.mrb[41].mxu0  ;;  %v6884_v61 = vpop.f32.mrb[41].mxu1  ;;  %v3499_v9 = vsel %vm407_vm0, %v6878_v54, 0.0 }
 0x12d   :  { %v3496_v3 = vadd.f32 %v3495_v55, %v3494_v44  ;;  %v3497_v4 = vsel %vm407_vm0, %v6882_v56, 0.0  ;;  %v1650_v5 = vpop.f32.mrb[42].mxu0  ;;  %v1691_v8 = vpop.f32.mrb[42].mxu1  ;;  %v3501_v28 = vsel %vm407_vm0, %v6884_v61, 0.0 }
 0x12e   :  { %v1651_v12 = vpop.f32.mrb[43].mxu0  ;;  %v1692_v13 = vpop.f32.mrb[43].mxu1 }
 0x12f   :  { %v3498_v16 = vadd.f32 %v3497_v4, %v3496_v3 }
 0x131   :  { %v3500_v2 = vadd.f32 %v3499_v9, %v3498_v16 }
 0x133   :  { %v3502_v29 = vadd.f32 %v3501_v28, %v3500_v2  ;;  %v6892_v30 = vpop.f32.mrb[44].mxu0  ;;  %v6894_v17 = vpop.f32.mrb[44].mxu1 }
 0x134   :  { %v3503_v33 = vsel %vm407_vm0, %v6892_v30, 0.0  ;;  %v6898_v36 = vpop.f32.mrb[45].mxu0  ;;  %v6900_v39 = vpop.f32.mrb[45].mxu1  ;;  %v3507_v3 = vsel %vm407_vm0, %v6894_v17, 0.0 }
 0x135   :  { %v3504_v42 = vadd.f32 %v3503_v33, %v3502_v29  ;;  %v3505_v43 = vsel %vm407_vm0, %v6898_v36, 0.0  ;;  %v1732_v44 = vpop.f32.mrb[46].mxu0  ;;  %v1773_v55 = vpop.f32.mrb[46].mxu1  ;;  %v3509_v12 = vsel %vm407_vm0, %v6900_v39, 0.0 }
 0x136   :  { %v1733_v4 = vpop.f32.mrb[47].mxu0  ;;  %v1774_v5 = vpop.f32.mrb[47].mxu1 }
 0x137   :  { %v3506_v8 = vadd.f32 %v3505_v43, %v3504_v42 }
 0x139   :  { %v3508_v9 = vadd.f32 %v3507_v3, %v3506_v8 }
 0x13b   :  { %v3510_v13 = vadd.f32 %v3509_v12, %v3508_v9  ;;  %v6908_v16 = vpop.f32.mrb[48].mxu0  ;;  %v6910_v2 = vpop.f32.mrb[48].mxu1 }
 0x13c   :  { %v3511_v28 = vsel %vm407_vm0, %v6908_v16, 0.0  ;;  %v6914_v29 = vpop.f32.mrb[49].mxu0  ;;  %v6916_v33 = vpop.f32.mrb[49].mxu1  ;;  %v3515_v3 = vsel %vm407_vm0, %v6910_v2, 0.0 }
 0x13d   :  { %v3512_v44 = vadd.f32 %v3511_v28, %v3510_v13  ;;  %v3513_v42 = vsel %vm407_vm0, %v6914_v29, 0.0  ;;  %v1814_v43 = vpop.f32.mrb[50].mxu0  ;;  %v1855_v55 = vpop.f32.mrb[50].mxu1  ;;  %v3517_v12 = vsel %vm407_vm0, %v6916_v33, 0.0 }
 0x13e   :  { %v1815_v4 = vpop.f32.mrb[51].mxu0  ;;  %v1856_v5 = vpop.f32.mrb[51].mxu1 }
 0x13f   :  { %v3514_v8 = vadd.f32 %v3513_v42, %v3512_v44 }
 0x141   :  { %v3516_v9 = vadd.f32 %v3515_v3, %v3514_v8 }
 0x143   :  { %v3518_v45 = vadd.f32 %v3517_v12, %v3516_v9  ;;  %v6924_v27 = vpop.f32.mrb[52].mxu0  ;;  %v6926_v24 = vpop.f32.mrb[52].mxu1 }
 0x144   :  { %v3519_v13 = vsel %vm407_vm0, %v6924_v27, 0.0  ;;  %v6930_v28 = vpop.f32.mrb[53].mxu0  ;;  %v6932_v43 = vpop.f32.mrb[53].mxu1  ;;  %v3523_v4 = vsel %vm407_vm0, %v6926_v24, 0.0 }
 0x145   :  { %v3520_v55 = vadd.f32 %v3519_v13, %v3518_v45  ;;  %v3521_v44 = vsel %vm407_vm0, %v6930_v28, 0.0  ;;  %v1896_v42 = vpop.f32.mrb[54].mxu0  ;;  %v1937_v3 = vpop.f32.mrb[54].mxu1  ;;  %v3525_v26 = vsel %vm407_vm0, %v6932_v43, 0.0 }
 0x146   :  { %v1897_v5 = vpop.f32.mrb[55].mxu0  ;;  %v1938_v8 = vpop.f32.mrb[55].mxu1 }
 0x147   :  { %v3522_v9 = vadd.f32 %v3521_v44, %v3520_v55 }
 0x149   :  { %v3524_v12 = vadd.f32 %v3523_v4, %v3522_v9 }
 0x14b   :  { %v3526_v21 = vadd.f32 %v3525_v26, %v3524_v12  ;;  %v6940_v1 = vpop.f32.mrb[56].mxu0  ;;  %v6942_v58 = vpop.f32.mrb[56].mxu1 }
 0x14c   :  { %v3527_v45 = vsel %vm407_vm0, %v6940_v1, 0.0  ;;  %v6946_v13 = vpop.f32.mrb[57].mxu0  ;;  %v6948_v42 = vpop.f32.mrb[57].mxu1  ;;  %v3531_v26 = vsel %vm407_vm0, %v6942_v58, 0.0 }
 0x14d   :  { %v3528_v3 = vadd.f32 %v3527_v45, %v3526_v21  ;;  %v3529_v55 = vsel %vm407_vm0, %v6946_v13, 0.0  ;;  %v1978_v44 = vpop.f32.mrb[58].mxu0  ;;  %v2019_v4 = vpop.f32.mrb[58].mxu1  ;;  %v3533_v0 = vsel %vm407_vm0, %v6948_v42, 0.0 }
 0x14e   :  { %v1979_v5 = vpop.f32.mrb[59].mxu0  ;;  %v2020_v8 = vpop.f32.mrb[59].mxu1 }
 0x14f   :  { %v3530_v9 = vadd.f32 %v3529_v55, %v3528_v3 }
 0x151   :  { %v3532_v12 = vadd.f32 %v3531_v26, %v3530_v9 }
 0x153   :  { %v3534_v57 = vadd.f32 %v3533_v0, %v3532_v12  ;;  %v6956_v41 = vpop.f32.mrb[60].mxu0  ;;  %v6958_v38 = vpop.f32.mrb[60].mxu1 }
 0x154   :  { %v3535_v21 = vsel %vm407_vm0, %v6956_v41, 0.0  ;;  %v6962_v45 = vpop.f32.mrb[61].mxu0  ;;  %v6964_v44 = vpop.f32.mrb[61].mxu1  ;;  %v3539_v0 = vsel %vm407_vm0, %v6958_v38, 0.0 }
 0x155   :  { %v3536_v4 = vadd.f32 %v3535_v21, %v3534_v57  ;;  %v3537_v3 = vsel %vm407_vm0, %v6962_v45, 0.0  ;;  %v2060_v55 = vpop.f32.mrb[62].mxu0  ;;  %v2101_v26 = vpop.f32.mrb[62].mxu1  ;;  %v3541_v40 = vsel %vm407_vm0, %v6964_v44, 0.0 }
 0x156   :  { %v2061_v5 = vpop.f32.mrb[63].mxu0  ;;  %v2102_v8 = vpop.f32.mrb[63].mxu1 }
 0x157   :  { %v3538_v9 = vadd.f32 %v3537_v3, %v3536_v4 }
 0x159   :  { %v3540_v12 = vadd.f32 %v3539_v0, %v3538_v9 }
 0x15b   :  { %v3542_v37 = vadd.f32 %v3541_v40, %v3540_v12  ;;  %v6972_v23 = vpop.f32.mrb[64].mxu0  ;;  %v6974_v20 = vpop.f32.mrb[64].mxu1 }
 0x15c   :  { %v3543_v57 = vsel %vm407_vm0, %v6972_v23, 0.0  ;;  %v6978_v21 = vpop.f32.mrb[65].mxu0  ;;  %v6980_v55 = vpop.f32.mrb[65].mxu1  ;;  %v3547_v40 = vsel %vm407_vm0, %v6974_v20, 0.0 }
 0x15d   :  { %v3544_v26 = vadd.f32 %v3543_v57, %v3542_v37  ;;  %v3545_v4 = vsel %vm407_vm0, %v6978_v21, 0.0  ;;  %v2142_v3 = vpop.f32.mrb[66].mxu0  ;;  %v2183_v0 = vpop.f32.mrb[66].mxu1  ;;  %v3549_v22 = vsel %vm407_vm0, %v6980_v55, 0.0 }
 0x15e   :  { %v2143_v5 = vpop.f32.mrb[67].mxu0  ;;  %v2184_v8 = vpop.f32.mrb[67].mxu1 }
 0x15f   :  { %v3546_v9 = vadd.f32 %v3545_v4, %v3544_v26 }
 0x161   :  { %v3548_v12 = vadd.f32 %v3547_v40, %v3546_v9 }
 0x163   :  { %v3550_v19 = vadd.f32 %v3549_v22, %v3548_v12  ;;  %v6988_v63 = vpop.f32.mrb[68].mxu0  ;;  %v6990_v60 = vpop.f32.mrb[68].mxu1 }
 0x164   :  { %v3551_v37 = vsel %vm407_vm0, %v6988_v63, 0.0  ;;  %v6994_v57 = vpop.f32.mrb[69].mxu0  ;;  %v6996_v3 = vpop.f32.mrb[69].mxu1  ;;  %v3555_v22 = vsel %vm407_vm0, %v6990_v60, 0.0 }
 0x165   :  { %v3552_v0 = vadd.f32 %v3551_v37, %v3550_v19  ;;  %v3553_v26 = vsel %vm407_vm0, %v6994_v57, 0.0  ;;  %v2224_v4 = vpop.f32.mrb[70].mxu0  ;;  %v2265_v40 = vpop.f32.mrb[70].mxu1  ;;  %v3557_v62 = vsel %vm407_vm0, %v6996_v3, 0.0 }
 0x166   :  { %v2225_v5 = vpop.f32.mrb[71].mxu0  ;;  %v2266_v8 = vpop.f32.mrb[71].mxu1 }
 0x167   :  { %v3554_v9 = vadd.f32 %v3553_v26, %v3552_v0 }
 0x169   :  { %v3556_v12 = vadd.f32 %v3555_v22, %v3554_v9 }
 0x16b   :  { %v3558_v59 = vadd.f32 %v3557_v62, %v3556_v12  ;;  %v7004_v35 = vpop.f32.mrb[72].mxu0  ;;  %v7006_v32 = vpop.f32.mrb[72].mxu1 }
 0x16c   :  { %v3559_v19 = vsel %vm407_vm0, %v7004_v35, 0.0  ;;  %v7010_v37 = vpop.f32.mrb[73].mxu0  ;;  %v7012_v4 = vpop.f32.mrb[73].mxu1  ;;  %v3563_v62 = vsel %vm407_vm0, %v7006_v32, 0.0 }
 0x16d   :  { %v3560_v40 = vadd.f32 %v3559_v19, %v3558_v59  ;;  %v3561_v0 = vsel %vm407_vm0, %v7010_v37, 0.0  ;;  %v2306_v26 = vpop.f32.mrb[74].mxu0  ;;  %v2347_v22 = vpop.f32.mrb[74].mxu1  ;;  %v3565_v34 = vsel %vm407_vm0, %v7012_v4, 0.0 }
 0x16e   :  { %v2307_v5 = vpop.f32.mrb[75].mxu0  ;;  %v2348_v8 = vpop.f32.mrb[75].mxu1 }
 0x16f   :  { %v3562_v9 = vadd.f32 %v3561_v0, %v3560_v40 }
 0x171   :  { %v3564_v12 = vadd.f32 %v3563_v62, %v3562_v9 }
 0x173   :  { %v3566_v31 = vadd.f32 %v3565_v34, %v3564_v12  ;;  %v7020_v11 = vpop.f32.mrb[76].mxu0  ;;  %v7022_v7 = vpop.f32.mrb[76].mxu1 }
 0x174   :  { %v3567_v59 = vsel %vm407_vm0, %v7020_v11, 0.0  ;;  %v7026_v19 = vpop.f32.mrb[77].mxu0  ;;  %v7028_v26 = vpop.f32.mrb[77].mxu1  ;;  %v3571_v34 = vsel %vm407_vm0, %v7022_v7, 0.0 }
 0x175   :  { %11367 = vst [vmem:[#allocation35_spill] sm:$0xff] %v7028_v26  ;;  %v3568_v22 = vadd.f32 %v3567_v59, %v3566_v31  ;;  %v3569_v40 = vsel %vm407_vm0, %v7026_v19, 0.0  ;;  %v2388_v0 = vpop.f32.mrb[78].mxu0  ;;  %v2429_v62 = vpop.f32.mrb[78].mxu1  ;;  %v3573_v10 = vsel %vm407_vm0, %v7028_v26, 0.0 }
 0x176   :  { %v2389_v5 = vpop.f32.mrb[79].mxu0  ;;  %v2430_v8 = vpop.f32.mrb[79].mxu1 }
 0x177   :  { %v3570_v9 = vadd.f32 %v3569_v40, %v3568_v22 }
 0x179   :  { %v3572_v12 = vadd.f32 %v3571_v34, %v3570_v9 }
 0x17b   :  { %v3574_v6 = vadd.f32 %v3573_v10, %v3572_v12  ;;  %v7036_v51 = vpop.f32.mrb[80].mxu0  ;;  %v7038_v47 = vpop.f32.mrb[80].mxu1 }
 0x17c   :  { %11368 = vst [vmem:[#allocation36_spill] sm:$0xff] %v7036_v51  ;;  %11369 = vst [vmem:[#allocation37_spill] sm:$0xff] %v7038_v47  ;;  %v3575_v31 = vsel %vm407_vm0, %v7036_v51, 0.0  ;;  %v7042_v59 = vpop.f32.mrb[81].mxu0  ;;  %v7044_v0 = vpop.f32.mrb[81].mxu1  ;;  %v3579_v10 = vsel %vm407_vm0, %v7038_v47, 0.0 }
 0x17d   :  { %11370 = vst [vmem:[#allocation38_spill] sm:$0xff] %v7042_v59  ;;  %11371 = vst [vmem:[#allocation39_spill] sm:$0xff] %v7044_v0  ;;  %v3576_v62 = vadd.f32 %v3575_v31, %v3574_v6  ;;  %v3577_v22 = vsel %vm407_vm0, %v7042_v59, 0.0  ;;  %v2470_v40 = vpop.f32.mrb[82].mxu0  ;;  %v2511_v34 = vpop.f32.mrb[82].mxu1  ;;  %v3581_v50 = vsel %vm407_vm0, %v7044_v0, 0.0 }
 0x17e   :  { %v2471_v5 = vpop.f32.mrb[83].mxu0  ;;  %v2512_v8 = vpop.f32.mrb[83].mxu1 }
 0x17f   :  { %v3578_v9 = vadd.f32 %v3577_v22, %v3576_v62 }
 0x181   :  { %v3580_v12 = vadd.f32 %v3579_v10, %v3578_v9 }
 0x183   :  { %v3582_v46 = vadd.f32 %v3581_v50, %v3580_v12  ;;  %v7052_v51 = vpop.f32.mrb[84].mxu0  ;;  %v7054_v26 = vpop.f32.mrb[84].mxu1 }
 0x184   :  { %11372 = vst [vmem:[#allocation40_spill] sm:$0xff] %v7052_v51  ;;  %11373 = vst [vmem:[#allocation41_spill] sm:$0xff] %v7054_v26  ;;  %v3583_v6 = vsel %vm407_vm0, %v7052_v51, 0.0  ;;  %v7058_v31 = vpop.f32.mrb[85].mxu0  ;;  %v7060_v40 = vpop.f32.mrb[85].mxu1  ;;  %v3587_v50 = vsel %vm407_vm0, %v7054_v26, 0.0 }
 0x185   :  { %11374 = vst [vmem:[#allocation42_spill] sm:$0xff] %v7058_v31  ;;  %11375 = vst [vmem:[#allocation43_spill] sm:$0xff] %v7060_v40  ;;  %v3584_v34 = vadd.f32 %v3583_v6, %v3582_v46  ;;  %v3585_v62 = vsel %vm407_vm0, %v7058_v31, 0.0  ;;  %v2552_v22 = vpop.f32.mrb[86].mxu0  ;;  %v2593_v10 = vpop.f32.mrb[86].mxu1  ;;  %v3589_v51 = vsel %vm407_vm0, %v7060_v40, 0.0 }
 0x186   :  { %v2553_v5 = vpop.f32.mrb[87].mxu0  ;;  %v2594_v8 = vpop.f32.mrb[87].mxu1 }
 0x187   :  { %v3586_v9 = vadd.f32 %v3585_v62, %v3584_v34 }
 0x189   :  { %v3588_v12 = vadd.f32 %v3587_v50, %v3586_v9 }
 0x18b   :  { %v3590_v0 = vadd.f32 %v3589_v51, %v3588_v12  ;;  %v7068_v47 = vpop.f32.mrb[88].mxu0  ;;  %v7070_v59 = vpop.f32.mrb[88].mxu1 }
 0x18c   :  { %11376 = vst [vmem:[#allocation44_spill] sm:$0xff] %v7068_v47  ;;  %11377 = vst [vmem:[#allocation45_spill] sm:$0xff] %v7070_v59  ;;  %v3591_v46 = vsel %vm407_vm0, %v7068_v47, 0.0  ;;  %v7074_v6 = vpop.f32.mrb[89].mxu0  ;;  %v7076_v22 = vpop.f32.mrb[89].mxu1  ;;  %v3595_v51 = vsel %vm407_vm0, %v7070_v59, 0.0 }
 0x18d   :  { %11378 = vst [vmem:[#allocation46_spill] sm:$0xff] %v7074_v6  ;;  %11379 = vst [vmem:[#allocation47_spill] sm:$0xff] %v7076_v22  ;;  %v3592_v10 = vadd.f32 %v3591_v46, %v3590_v0  ;;  %v3593_v34 = vsel %vm407_vm0, %v7074_v6, 0.0  ;;  %v2634_v62 = vpop.f32.mrb[90].mxu0  ;;  %v2675_v50 = vpop.f32.mrb[90].mxu1  ;;  %v3597_v47 = vsel %vm407_vm0, %v7076_v22, 0.0 }
 0x18e   :  { %v2635_v5 = vpop.f32.mrb[91].mxu0  ;;  %v2676_v8 = vpop.f32.mrb[91].mxu1 }
 0x18f   :  { %v3594_v9 = vadd.f32 %v3593_v34, %v3592_v10 }
 0x191   :  { %v3596_v12 = vadd.f32 %v3595_v51, %v3594_v9 }
 0x193   :  { %v3598_v40 = vadd.f32 %v3597_v47, %v3596_v12  ;;  %v7084_v26 = vpop.f32.mrb[92].mxu0  ;;  %v7086_v31 = vpop.f32.mrb[92].mxu1 }
 0x194   :  { %11380 = vst [vmem:[#allocation48_spill] sm:$0xff] %v7084_v26  ;;  %11381 = vst [vmem:[#allocation49_spill] sm:$0xff] %v7086_v31  ;;  %v3599_v0 = vsel %vm407_vm0, %v7084_v26, 0.0  ;;  %v7090_v46 = vpop.f32.mrb[93].mxu0  ;;  %v7092_v62 = vpop.f32.mrb[93].mxu1  ;;  %v3603_v47 = vsel %vm407_vm0, %v7086_v31, 0.0 }
 0x195   :  { %11382 = vst [vmem:[#allocation50_spill] sm:$0xff] %v7090_v46  ;;  %11383 = vst [vmem:[#allocation51_spill] sm:$0xff] %v7092_v62  ;;  %v3600_v50 = vadd.f32 %v3599_v0, %v3598_v40  ;;  %v3601_v10 = vsel %vm407_vm0, %v7090_v46, 0.0  ;;  %v2716_v34 = vpop.f32.mrb[94].mxu0  ;;  %v2757_v51 = vpop.f32.mrb[94].mxu1  ;;  %v3605_v26 = vsel %vm407_vm0, %v7092_v62, 0.0 }
 0x196   :  { %v2717_v5 = vpop.f32.mrb[95].mxu0  ;;  %v2758_v8 = vpop.f32.mrb[95].mxu1 }
 0x197   :  { %v3602_v9 = vadd.f32 %v3601_v10, %v3600_v50 }
 0x199   :  { %v3604_v12 = vadd.f32 %v3603_v47, %v3602_v9 }
 0x19b   :  { %v3606_v22 = vadd.f32 %v3605_v26, %v3604_v12  ;;  %v7100_v59 = vpop.f32.mrb[96].mxu0  ;;  %v7102_v6 = vpop.f32.mrb[96].mxu1 }
 0x19c   :  { %11384 = vst [vmem:[#allocation52_spill] sm:$0xff] %v7100_v59  ;;  %11385 = vst [vmem:[#allocation53_spill] sm:$0xff] %v7102_v6  ;;  %v3607_v40 = vsel %vm407_vm0, %v7100_v59, 0.0  ;;  %v7106_v0 = vpop.f32.mrb[97].mxu0  ;;  %v7108_v34 = vpop.f32.mrb[97].mxu1  ;;  %v3611_v26 = vsel %vm407_vm0, %v7102_v6, 0.0 }
 0x19d   :  { %11386 = vst [vmem:[#allocation54_spill] sm:$0xff] %v7106_v0  ;;  %11387 = vst [vmem:[#allocation55_spill] sm:$0xff] %v7108_v34  ;;  %v3608_v51 = vadd.f32 %v3607_v40, %v3606_v22  ;;  %v3609_v50 = vsel %vm407_vm0, %v7106_v0, 0.0  ;;  %v2798_v10 = vpop.f32.mrb[98].mxu0  ;;  %v2839_v47 = vpop.f32.mrb[98].mxu1  ;;  %v3613_v59 = vsel %vm407_vm0, %v7108_v34, 0.0 }
 0x19e   :  { %v2799_v5 = vpop.f32.mrb[99].mxu0  ;;  %v2840_v8 = vpop.f32.mrb[99].mxu1 }
 0x19f   :  { %v3610_v9 = vadd.f32 %v3609_v50, %v3608_v51 }
 0x1a1   :  { %v3612_v12 = vadd.f32 %v3611_v26, %v3610_v9 }
 0x1a3   :  { %v3614_v62 = vadd.f32 %v3613_v59, %v3612_v12  ;;  %v7116_v31 = vpop.f32.mrb[100].mxu0  ;;  %v7118_v46 = vpop.f32.mrb[100].mxu1 }
 0x1a4   :  { %11388 = vst [vmem:[#allocation56_spill] sm:$0xff] %v7116_v31  ;;  %11389 = vst [vmem:[#allocation57_spill] sm:$0xff] %v7118_v46  ;;  %v3615_v22 = vsel %vm407_vm0, %v7116_v31, 0.0  ;;  %v7122_v40 = vpop.f32.mrb[101].mxu0  ;;  %v7124_v10 = vpop.f32.mrb[101].mxu1  ;;  %v3619_v59 = vsel %vm407_vm0, %v7118_v46, 0.0 }
 0x1a5   :  { %11390 = vst [vmem:[#allocation58_spill] sm:$0xff] %v7122_v40  ;;  %11391 = vst [vmem:[#allocation59_spill] sm:$0xff] %v7124_v10  ;;  %v3616_v47 = vadd.f32 %v3615_v22, %v3614_v62  ;;  %v3617_v51 = vsel %vm407_vm0, %v7122_v40, 0.0  ;;  %v2880_v50 = vpop.f32.mrb[102].mxu0  ;;  %v2921_v26 = vpop.f32.mrb[102].mxu1  ;;  %v3621_v31 = vsel %vm407_vm0, %v7124_v10, 0.0 }
 0x1a6   :  { %v2881_v5 = vpop.f32.mrb[103].mxu0  ;;  %v2922_v8 = vpop.f32.mrb[103].mxu1 }
 0x1a7   :  { %v3618_v9 = vadd.f32 %v3617_v51, %v3616_v47 }
 0x1a9   :  { %v3620_v12 = vadd.f32 %v3619_v59, %v3618_v9 }
 0x1ab   :  { %v3622_v34 = vadd.f32 %v3621_v31, %v3620_v12  ;;  %v7132_v6 = vpop.f32.mrb[104].mxu0  ;;  %v7134_v0 = vpop.f32.mrb[104].mxu1 }
 0x1ac   :  { %11392 = vst [vmem:[#allocation60_spill] sm:$0xff] %v7132_v6  ;;  %11393 = vst [vmem:[#allocation61_spill] sm:$0xff] %v7134_v0  ;;  %v3623_v62 = vsel %vm407_vm0, %v7132_v6, 0.0  ;;  %v7138_v22 = vpop.f32.mrb[105].mxu0  ;;  %v7140_v50 = vpop.f32.mrb[105].mxu1  ;;  %v3627_v31 = vsel %vm407_vm0, %v7134_v0, 0.0 }
 0x1ad   :  { %11394 = vst [vmem:[#allocation62_spill] sm:$0xff] %v7138_v22  ;;  %11395 = vst [vmem:[#allocation63_spill] sm:$0xff] %v7140_v50  ;;  %v3624_v26 = vadd.f32 %v3623_v62, %v3622_v34  ;;  %v3625_v47 = vsel %vm407_vm0, %v7138_v22, 0.0  ;;  %v2962_v51 = vpop.f32.mrb[106].mxu0  ;;  %v3003_v59 = vpop.f32.mrb[106].mxu1  ;;  %v3629_v6 = vsel %vm407_vm0, %v7140_v50, 0.0 }
 0x1ae   :  { %v2963_v5 = vpop.f32.mrb[107].mxu0  ;;  %v3004_v8 = vpop.f32.mrb[107].mxu1 }
 0x1af   :  { %v3626_v9 = vadd.f32 %v3625_v47, %v3624_v26 }
 0x1b1   :  { %v3628_v12 = vadd.f32 %v3627_v31, %v3626_v9 }
 0x1b3   :  { %v3630_v10 = vadd.f32 %v3629_v6, %v3628_v12  ;;  %v7148_v46 = vpop.f32.mrb[108].mxu0  ;;  %v7150_v40 = vpop.f32.mrb[108].mxu1 }
 0x1b4   :  { %11396 = vst [vmem:[#allocation64_spill] sm:$0xff] %v7148_v46  ;;  %11397 = vst [vmem:[#allocation65_spill] sm:$0xff] %v7150_v40  ;;  %v3631_v34 = vsel %vm407_vm0, %v7148_v46, 0.0  ;;  %v7154_v62 = vpop.f32.mrb[109].mxu0  ;;  %v7156_v51 = vpop.f32.mrb[109].mxu1  ;;  %v3635_v6 = vsel %vm407_vm0, %v7150_v40, 0.0 }
 0x1b5   :  { %11398 = vst [vmem:[#allocation66_spill] sm:$0xff] %v7154_v62  ;;  %11399 = vst [vmem:[#allocation67_spill] sm:$0xff] %v7156_v51  ;;  %v3632_v59 = vadd.f32 %v3631_v34, %v3630_v10  ;;  %v3633_v26 = vsel %vm407_vm0, %v7154_v62, 0.0  ;;  %v3044_v47 = vpop.f32.mrb[110].mxu0  ;;  %v3085_v31 = vpop.f32.mrb[110].mxu1  ;;  %v3637_v46 = vsel %vm407_vm0, %v7156_v51, 0.0 }
 0x1b6   :  { %v3045_v5 = vpop.f32.mrb[111].mxu0  ;;  %v3086_v8 = vpop.f32.mrb[111].mxu1 }
 0x1b7   :  { %v3634_v9 = vadd.f32 %v3633_v26, %v3632_v59 }
 0x1b9   :  { %v3636_v12 = vadd.f32 %v3635_v6, %v3634_v9 }
 0x1bb   :  { %v3638_v50 = vadd.f32 %v3637_v46, %v3636_v12  ;;  %v7164_v0 = vpop.f32.mrb[112].mxu0  ;;  %v7166_v22 = vpop.f32.mrb[112].mxu1 }
 0x1bc   :  { %11400 = vst [vmem:[#allocation68_spill] sm:$0xff] %v7164_v0  ;;  %11401 = vst [vmem:[#allocation69_spill] sm:$0xff] %v7166_v22  ;;  %v3639_v10 = vsel %vm407_vm0, %v7164_v0, 0.0  ;;  %v7170_v34 = vpop.f32.mrb[113].mxu0  ;;  %v7172_v47 = vpop.f32.mrb[113].mxu1  ;;  %v3643_v46 = vsel %vm407_vm0, %v7166_v22, 0.0 }
 0x1bd   :  { %11402 = vst [vmem:[#allocation70_spill] sm:$0xff] %v7170_v34  ;;  %11403 = vst [vmem:[#allocation71_spill] sm:$0xff] %v7172_v47  ;;  %v3640_v31 = vadd.f32 %v3639_v10, %v3638_v50  ;;  %v3641_v59 = vsel %vm407_vm0, %v7170_v34, 0.0  ;;  %v3126_v26 = vpop.f32.mrb[114].mxu0  ;;  %v3167_v6 = vpop.f32.mrb[114].mxu1  ;;  %v3645_v0 = vsel %vm407_vm0, %v7172_v47, 0.0 }
 0x1be   :  { %v3127_v5 = vpop.f32.mrb[115].mxu0  ;;  %v3168_v8 = vpop.f32.mrb[115].mxu1 }
 0x1bf   :  { %v3642_v9 = vadd.f32 %v3641_v59, %v3640_v31 }
 0x1c1   :  { %v3644_v12 = vadd.f32 %v3643_v46, %v3642_v9 }
 0x1c3   :  { %v3646_v51 = vadd.f32 %v3645_v0, %v3644_v12  ;;  %v7180_v40 = vpop.f32.mrb[116].mxu0  ;;  %v7182_v62 = vpop.f32.mrb[116].mxu1 }
 0x1c4   :  { %11404 = vst [vmem:[#allocation72_spill] sm:$0xff] %v7180_v40  ;;  %11405 = vst [vmem:[#allocation73_spill] sm:$0xff] %v7182_v62  ;;  %v3647_v50 = vsel %vm407_vm0, %v7180_v40, 0.0  ;;  %v7186_v10 = vpop.f32.mrb[117].mxu0  ;;  %v7188_v26 = vpop.f32.mrb[117].mxu1  ;;  %v3651_v0 = vsel %vm407_vm0, %v7182_v62, 0.0 }
 0x1c5   :  { %11406 = vst [vmem:[#allocation74_spill] sm:$0xff] %v7186_v10  ;;  %11407 = vst [vmem:[#allocation75_spill] sm:$0xff] %v7188_v26  ;;  %v3648_v6 = vadd.f32 %v3647_v50, %v3646_v51  ;;  %v3649_v31 = vsel %vm407_vm0, %v7186_v10, 0.0  ;;  %v3208_v59 = vpop.f32.mrb[118].mxu0  ;;  %v3249_v46 = vpop.f32.mrb[118].mxu1  ;;  %v3653_v40 = vsel %vm407_vm0, %v7188_v26, 0.0 }
 0x1c6   :  { %v3209_v5 = vpop.f32.mrb[119].mxu0  ;;  %v3250_v8 = vpop.f32.mrb[119].mxu1 }
 0x1c7   :  { %v3650_v9 = vadd.f32 %v3649_v31, %v3648_v6 }
 0x1c9   :  { %v3652_v12 = vadd.f32 %v3651_v0, %v3650_v9 }
 0x1cb   :  { %v3654_v47 = vadd.f32 %v3653_v40, %v3652_v12  ;;  %v7196_v22 = vpop.f32.mrb[120].mxu0  ;;  %v7198_v34 = vpop.f32.mrb[120].mxu1 }
 0x1cc   :  { %11408 = vst [vmem:[#allocation76_spill] sm:$0xff] %v7196_v22  ;;  %11409 = vst [vmem:[#allocation77_spill] sm:$0xff] %v7198_v34  ;;  %v3655_v51 = vsel %vm407_vm0, %v7196_v22, 0.0  ;;  %v7202_v50 = vpop.f32.mrb[121].mxu0  ;;  %v7204_v59 = vpop.f32.mrb[121].mxu1  ;;  %v3659_v40 = vsel %vm407_vm0, %v7198_v34, 0.0 }
 0x1cd   :  { %11410 = vst [vmem:[#allocation78_spill] sm:$0xff] %v7204_v59  ;;  %v3656_v46 = vadd.f32 %v3655_v51, %v3654_v47  ;;  %v3657_v6 = vsel %vm407_vm0, %v7202_v50, 0.0  ;;  %v3290_v31 = vpop.f32.mrb[122].mxu0  ;;  %v3331_v0 = vpop.f32.mrb[122].mxu1  ;;  %v3661_v22 = vsel %vm407_vm0, %v7204_v59, 0.0 }
 0x1ce   :  { %v3291_v5 = vpop.f32.mrb[123].mxu0  ;;  %v3332_v8 = vpop.f32.mrb[123].mxu1 }
 0x1cf   :  { %v3658_v9 = vadd.f32 %v3657_v6, %v3656_v46 }
 0x1d1   :  { %v3660_v12 = vadd.f32 %v3659_v40, %v3658_v9 }
 0x1d3   :  { %v3662_v26 = vadd.f32 %v3661_v22, %v3660_v12  ;;  %v7212_v62 = vpop.f32.mrb[124].mxu0  ;;  %v7214_v10 = vpop.f32.mrb[124].mxu1 }
 0x1d4   :  { %11411 = vst [vmem:[#allocation79_spill] sm:$0xff] %v7212_v62  ;;  %v3663_v47 = vsel %vm407_vm0, %v7212_v62, 0.0  ;;  %v7218_v51 = vpop.f32.mrb[125].mxu0  ;;  %v7220_v31 = vpop.f32.mrb[125].mxu1  ;;  %v3667_v22 = vsel %vm407_vm0, %v7214_v10, 0.0 }
 0x1d5   :  { %v3664_v0 = vadd.f32 %v3663_v47, %v3662_v26  ;;  %v3665_v46 = vsel %vm407_vm0, %v7218_v51, 0.0  ;;  %v3372_v6 = vpop.f32.mrb[126].mxu0  ;;  %v3413_v40 = vpop.f32.mrb[126].mxu1  ;;  %v3670_v62 = vsel %vm3669_vm2, %v7220_v31, 0.0 }
 0x1d6   :  { %v3373_v5 = vpop.f32.mrb[127].mxu0  ;;  %v3414_v8 = vpop.f32.mrb[127].mxu1  ;;  %v11420_v40 = vld [vmem:[#allocation38_spill] sm:$0xff] }
 0x1d7   :  { %v3666_v9 = vadd.f32 %v3665_v46, %v3664_v0  ;;  %v11424_v5 = vld [vmem:[#allocation39_spill] sm:$0xff]  ;;  %v11426_v8 = vld [vmem:[#allocation40_spill] sm:$0xff] }
 0x1d9   :  { %v3668_v12 = vadd.f32 %v3667_v22, %v3666_v9  ;;  %v11422_v22 = vld [vmem:[#allocation37_spill] sm:$0xff] }
 0x1db   :  { %v3671_v59 = vadd.f32 %v3670_v62, %v3668_v12  ;;  %v11428_v12 = vld [vmem:[#allocation42_spill] sm:$0xff] }
 0x1dd   :  { %3672 = vadd.xlane.f32.xlu0 %v3671_v59  ;;  %v11418_v59 = vld [vmem:[#allocation36_spill] sm:$0xff] }
 0x26a   :  { %v3673_v34 = vpop.xlane.xlu0 %3672 }
 0x26b   :  { %v7228_v26 = vmul.f32 6.104261e-05, %v3673_v34  ;;  %v11416_v34 = vld [vmem:[#allocation35_spill] sm:$0xff] }
 0x26d   :  { %v7232_v47 = vsub.f32 %v6850_v52, %v7228_v26  ;;  %v7236_v6 = vsub.f32 %v6846_v48, %v7228_v26  ;;  %v7240_v0 = vsub.f32 %v6852_v53, %v7228_v26  ;;  %v7244_v46 = vsub.f32 %v6860_v14, %v7228_v26 }
 0x26e   :  { %v7248_v62 = vsub.f32 %v6866_v18, %v7228_v26  ;;  %v7252_v52 = vsub.f32 %v6862_v15, %v7228_v26  ;;  %v7256_v48 = vsub.f32 %v6868_v25, %v7228_v26  ;;  %v7260_v53 = vsub.f32 %v6876_v49, %v7228_v26 }
 0x26f   :  { %v7264_v14 = vsub.f32 %v6882_v56, %v7228_v26  ;;  %v7268_v18 = vsub.f32 %v6878_v54, %v7228_v26  ;;  %v7272_v15 = vsub.f32 %v6884_v61, %v7228_v26  ;;  %v7276_v25 = vsub.f32 %v6892_v30, %v7228_v26 }
 0x270   :  { %v7280_v49 = vsub.f32 %v6898_v36, %v7228_v26  ;;  %v7284_v56 = vsub.f32 %v6894_v17, %v7228_v26  ;;  %v7288_v54 = vsub.f32 %v6900_v39, %v7228_v26  ;;  %v7292_v61 = vsub.f32 %v6908_v16, %v7228_v26 }
 0x271   :  { %v7296_v30 = vsub.f32 %v6914_v29, %v7228_v26  ;;  %v7300_v36 = vsub.f32 %v6910_v2, %v7228_v26  ;;  %v7304_v17 = vsub.f32 %v6916_v33, %v7228_v26  ;;  %v7308_v39 = vsub.f32 %v6924_v27, %v7228_v26 }
 0x272   :  { %v7312_v16 = vsub.f32 %v6930_v28, %v7228_v26  ;;  %v7316_v29 = vsub.f32 %v6926_v24, %v7228_v26  ;;  %v7320_v2 = vsub.f32 %v6932_v43, %v7228_v26  ;;  %v7324_v33 = vsub.f32 %v6940_v1, %v7228_v26 }
 0x273   :  { %v7328_v27 = vsub.f32 %v6946_v13, %v7228_v26  ;;  %v7332_v28 = vsub.f32 %v6942_v58, %v7228_v26  ;;  %v7336_v24 = vsub.f32 %v6948_v42, %v7228_v26  ;;  %v7340_v43 = vsub.f32 %v6956_v41, %v7228_v26 }
 0x274   :  { %v7344_v1 = vsub.f32 %v6962_v45, %v7228_v26  ;;  %v7348_v13 = vsub.f32 %v6958_v38, %v7228_v26  ;;  %v7352_v58 = vsub.f32 %v6964_v44, %v7228_v26  ;;  %v7356_v42 = vsub.f32 %v6972_v23, %v7228_v26 }
 0x275   :  { %v7360_v41 = vsub.f32 %v6978_v21, %v7228_v26  ;;  %v7364_v45 = vsub.f32 %v6974_v20, %v7228_v26  ;;  %v7368_v38 = vsub.f32 %v6980_v55, %v7228_v26  ;;  %v7372_v44 = vsub.f32 %v6988_v63, %v7228_v26 }
 0x276   :  { %v7376_v23 = vsub.f32 %v6994_v57, %v7228_v26  ;;  %v7380_v21 = vsub.f32 %v6990_v60, %v7228_v26  ;;  %v7384_v20 = vsub.f32 %v6996_v3, %v7228_v26  ;;  %v7388_v55 = vsub.f32 %v7004_v35, %v7228_v26 }
 0x277   :  { %v7392_v63 = vsub.f32 %v7010_v37, %v7228_v26  ;;  %v7396_v57 = vsub.f32 %v7006_v32, %v7228_v26  ;;  %v7400_v60 = vsub.f32 %v7012_v4, %v7228_v26  ;;  %v7404_v3 = vsub.f32 %v7020_v11, %v7228_v26 }
 0x278   :  { %v7408_v35 = vsub.f32 %v7026_v19, %v7228_v26  ;;  %v7412_v37 = vsub.f32 %v7022_v7, %v7228_v26  ;;  %v7416_v32 = vsub.f32 %v11416_v34, %v7228_v26  ;;  %v7420_v4 = vsub.f32 %v11418_v59, %v7228_v26  ;;  %v11430_v59 = vld [vmem:[#allocation41_spill] sm:$0xff] }
 0x279   :  { %11412 = vst [vmem:[#allocation80_spill] sm:$0xff] %v7400_v60  ;;  %11413 = vst [vmem:[#allocation81_spill] sm:$0xff] %v7404_v3  ;;  %v7424_v11 = vsub.f32 %v11420_v40, %v7228_v26  ;;  %v7428_v19 = vsub.f32 %v11422_v22, %v7228_v26  ;;  %v7432_v7 = vsub.f32 %v11424_v5, %v7228_v26 }
 0x27a   :  { %11414 = vst [vmem:[#allocation82_spill] sm:$0xff] %v7408_v35  ;;  %11415 = vst [vmem:[#allocation83_spill] sm:$0xff] %v7412_v37  ;;  %v7436_v9 = vsub.f32 %v11426_v8, %v7228_v26  ;;  %v7440_v34 = vsub.f32 %v11428_v12, %v7228_v26  ;;  %v7444_v40 = vsub.f32 %v11430_v59, %v7228_v26 }
 0x27b   :  { %11417 = vst [vmem:[#allocation35_spill] sm:$0xff] %v7416_v32  ;;  %11419 = vst [vmem:[#allocation36_spill] sm:$0xff] %v7420_v4 }
 0x27c   :  { %11421 = vst [vmem:[#allocation38_spill] sm:$0xff] %v7424_v11  ;;  %11423 = vst [vmem:[#allocation37_spill] sm:$0xff] %v7428_v19  ;;  %v11432_v11 = vld [vmem:[#allocation43_spill] sm:$0xff]  ;;  %v11434_v19 = vld [vmem:[#allocation44_spill] sm:$0xff] }
 0x27d   :  { %11425 = vst [vmem:[#allocation39_spill] sm:$0xff] %v7432_v7  ;;  %11427 = vst [vmem:[#allocation40_spill] sm:$0xff] %v7436_v9  ;;  %v7448_v22 = vsub.f32 %v11432_v11, %v7228_v26  ;;  %v7452_v5 = vsub.f32 %v11434_v19, %v7228_v26  ;;  %v11436_v7 = vld [vmem:[#allocation46_spill] sm:$0xff]  ;;  %v11438_v9 = vld [vmem:[#allocation45_spill] sm:$0xff] }
 0x27e   :  { %11429 = vst [vmem:[#allocation42_spill] sm:$0xff] %v7440_v34  ;;  %11431 = vst [vmem:[#allocation41_spill] sm:$0xff] %v7444_v40  ;;  %v7456_v8 = vsub.f32 %v11436_v7, %v7228_v26  ;;  %v7460_v12 = vsub.f32 %v11438_v9, %v7228_v26  ;;  %v11440_v34 = vld [vmem:[#allocation47_spill] sm:$0xff]  ;;  %v11442_v40 = vld [vmem:[#allocation48_spill] sm:$0xff] }
 0x27f   :  { %11433 = vst [vmem:[#allocation43_spill] sm:$0xff] %v7448_v22  ;;  %11435 = vst [vmem:[#allocation44_spill] sm:$0xff] %v7452_v5  ;;  %v7464_v59 = vsub.f32 %v11440_v34, %v7228_v26  ;;  %v7468_v11 = vsub.f32 %v11442_v40, %v7228_v26  ;;  %v11444_v22 = vld [vmem:[#allocation50_spill] sm:$0xff]  ;;  %v11446_v5 = vld [vmem:[#allocation49_spill] sm:$0xff] }
 0x280   :  { %11437 = vst [vmem:[#allocation46_spill] sm:$0xff] %v7456_v8  ;;  %11439 = vst [vmem:[#allocation45_spill] sm:$0xff] %v7460_v12  ;;  %v7472_v19 = vsub.f32 %v11444_v22, %v7228_v26  ;;  %v7476_v7 = vsub.f32 %v11446_v5, %v7228_v26  ;;  %v11448_v8 = vld [vmem:[#allocation51_spill] sm:$0xff]  ;;  %v11450_v12 = vld [vmem:[#allocation52_spill] sm:$0xff] }
 0x281   :  { %11441 = vst [vmem:[#allocation47_spill] sm:$0xff] %v7464_v59  ;;  %11443 = vst [vmem:[#allocation48_spill] sm:$0xff] %v7468_v11  ;;  %v7480_v9 = vsub.f32 %v11448_v8, %v7228_v26  ;;  %v7484_v34 = vsub.f32 %v11450_v12, %v7228_v26  ;;  %v11452_v59 = vld [vmem:[#allocation54_spill] sm:$0xff]  ;;  %v11454_v11 = vld [vmem:[#allocation53_spill] sm:$0xff] }
 0x282   :  { %11445 = vst [vmem:[#allocation50_spill] sm:$0xff] %v7472_v19  ;;  %11447 = vst [vmem:[#allocation49_spill] sm:$0xff] %v7476_v7  ;;  %v7488_v40 = vsub.f32 %v11452_v59, %v7228_v26  ;;  %v7492_v22 = vsub.f32 %v11454_v11, %v7228_v26  ;;  %v11456_v19 = vld [vmem:[#allocation55_spill] sm:$0xff]  ;;  %v11458_v7 = vld [vmem:[#allocation56_spill] sm:$0xff] }
 0x283   :  { %11449 = vst [vmem:[#allocation51_spill] sm:$0xff] %v7480_v9  ;;  %11451 = vst [vmem:[#allocation52_spill] sm:$0xff] %v7484_v34  ;;  %v7496_v5 = vsub.f32 %v11456_v19, %v7228_v26  ;;  %v7500_v8 = vsub.f32 %v11458_v7, %v7228_v26  ;;  %v11460_v9 = vld [vmem:[#allocation58_spill] sm:$0xff]  ;;  %v11462_v34 = vld [vmem:[#allocation57_spill] sm:$0xff] }
 0x284   :  { %11453 = vst [vmem:[#allocation54_spill] sm:$0xff] %v7488_v40  ;;  %11455 = vst [vmem:[#allocation53_spill] sm:$0xff] %v7492_v22  ;;  %v7504_v12 = vsub.f32 %v11460_v9, %v7228_v26  ;;  %v7508_v59 = vsub.f32 %v11462_v34, %v7228_v26  ;;  %v11464_v40 = vld [vmem:[#allocation59_spill] sm:$0xff]  ;;  %v11466_v22 = vld [vmem:[#allocation60_spill] sm:$0xff] }
 0x285   :  { %11457 = vst [vmem:[#allocation55_spill] sm:$0xff] %v7496_v5  ;;  %11459 = vst [vmem:[#allocation56_spill] sm:$0xff] %v7500_v8  ;;  %v7512_v11 = vsub.f32 %v11464_v40, %v7228_v26  ;;  %v7516_v19 = vsub.f32 %v11466_v22, %v7228_v26  ;;  %v11468_v5 = vld [vmem:[#allocation62_spill] sm:$0xff]  ;;  %v11470_v8 = vld [vmem:[#allocation61_spill] sm:$0xff] }
 0x286   :  { %11461 = vst [vmem:[#allocation58_spill] sm:$0xff] %v7504_v12  ;;  %11463 = vst [vmem:[#allocation57_spill] sm:$0xff] %v7508_v59  ;;  %v7520_v7 = vsub.f32 %v11468_v5, %v7228_v26  ;;  %v7524_v9 = vsub.f32 %v11470_v8, %v7228_v26  ;;  %v11472_v12 = vld [vmem:[#allocation63_spill] sm:$0xff]  ;;  %v11474_v59 = vld [vmem:[#allocation64_spill] sm:$0xff] }
 0x287   :  { %11465 = vst [vmem:[#allocation59_spill] sm:$0xff] %v7512_v11  ;;  %11467 = vst [vmem:[#allocation60_spill] sm:$0xff] %v7516_v19  ;;  %v7528_v34 = vsub.f32 %v11472_v12, %v7228_v26  ;;  %v7532_v40 = vsub.f32 %v11474_v59, %v7228_v26  ;;  %v11476_v11 = vld [vmem:[#allocation66_spill] sm:$0xff]  ;;  %v11478_v19 = vld [vmem:[#allocation65_spill] sm:$0xff] }
 0x288   :  { %11469 = vst [vmem:[#allocation62_spill] sm:$0xff] %v7520_v7  ;;  %11471 = vst [vmem:[#allocation61_spill] sm:$0xff] %v7524_v9  ;;  %v7536_v22 = vsub.f32 %v11476_v11, %v7228_v26  ;;  %v7540_v5 = vsub.f32 %v11478_v19, %v7228_v26  ;;  %v11480_v7 = vld [vmem:[#allocation67_spill] sm:$0xff]  ;;  %v11482_v9 = vld [vmem:[#allocation68_spill] sm:$0xff] }
 0x289   :  { %11473 = vst [vmem:[#allocation63_spill] sm:$0xff] %v7528_v34  ;;  %11475 = vst [vmem:[#allocation64_spill] sm:$0xff] %v7532_v40  ;;  %v7544_v8 = vsub.f32 %v11480_v7, %v7228_v26  ;;  %v7548_v12 = vsub.f32 %v11482_v9, %v7228_v26  ;;  %v11484_v34 = vld [vmem:[#allocation70_spill] sm:$0xff]  ;;  %v11486_v40 = vld [vmem:[#allocation69_spill] sm:$0xff] }
 0x28a   :  { %11477 = vst [vmem:[#allocation66_spill] sm:$0xff] %v7536_v22  ;;  %11479 = vst [vmem:[#allocation65_spill] sm:$0xff] %v7540_v5  ;;  %v7552_v59 = vsub.f32 %v11484_v34, %v7228_v26  ;;  %v7556_v11 = vsub.f32 %v11486_v40, %v7228_v26  ;;  %v11488_v22 = vld [vmem:[#allocation71_spill] sm:$0xff]  ;;  %v11490_v5 = vld [vmem:[#allocation72_spill] sm:$0xff] }
 0x28b   :  { %11481 = vst [vmem:[#allocation67_spill] sm:$0xff] %v7544_v8  ;;  %11483 = vst [vmem:[#allocation68_spill] sm:$0xff] %v7548_v12  ;;  %v7560_v19 = vsub.f32 %v11488_v22, %v7228_v26  ;;  %v7564_v7 = vsub.f32 %v11490_v5, %v7228_v26  ;;  %v11492_v8 = vld [vmem:[#allocation74_spill] sm:$0xff]  ;;  %v11494_v12 = vld [vmem:[#allocation73_spill] sm:$0xff]  ;;  %v7584_v5 = vsub.f32 %v7202_v50, %v7228_v26 }
 0x28c   :  { %11485 = vst [vmem:[#allocation70_spill] sm:$0xff] %v7552_v59  ;;  %11487 = vst [vmem:[#allocation69_spill] sm:$0xff] %v7556_v11  ;;  %v7568_v9 = vsub.f32 %v11492_v8, %v7228_v26  ;;  %v7572_v34 = vsub.f32 %v11494_v12, %v7228_v26  ;;  %v11496_v59 = vld [vmem:[#allocation75_spill] sm:$0xff]  ;;  %v11498_v11 = vld [vmem:[#allocation76_spill] sm:$0xff]  ;;  %v7604_v50 = vsub.f32 %v7214_v10, %v7228_v26 }
 0x28d   :  { %11489 = vst [vmem:[#allocation71_spill] sm:$0xff] %v7560_v19  ;;  %11491 = vst [vmem:[#allocation72_spill] sm:$0xff] %v7564_v7  ;;  %v7576_v40 = vsub.f32 %v11496_v59, %v7228_v26  ;;  %v7580_v22 = vsub.f32 %v11498_v11, %v7228_v26  ;;  %v11501_v7 = vld [vmem:[#allocation77_spill] sm:$0xff]  ;;  %v7600_v11 = vsub.f32 %v7218_v51, %v7228_v26 }
 0x28e   :  { %11493 = vst [vmem:[#allocation74_spill] sm:$0xff] %v7568_v9  ;;  %11495 = vst [vmem:[#allocation73_spill] sm:$0xff] %v7572_v34  ;;  %v7588_v8 = vsub.f32 %v11501_v7, %v7228_v26  ;;  %v11503_v9 = vld [vmem:[#allocation78_spill] sm:$0xff]  ;;  %v11505_v34 = vld [vmem:[#allocation79_spill] sm:$0xff]  ;;  %v7608_v7 = vsub.f32 %v7220_v31, %v7228_v26 }
 0x28f   :  { %11497 = vst [vmem:[#allocation75_spill] sm:$0xff] %v7576_v40  ;;  %11499 = vst [vmem:[#allocation76_spill] sm:$0xff] %v7580_v22  ;;  %v7592_v12 = vsub.f32 %v11503_v9, %v7228_v26  ;;  %v7596_v59 = vsub.f32 %v11505_v34, %v7228_v26 }
 0x290   :  { %11500 = vst [vmem:[#allocation84_spill] sm:$0xff] %v7584_v5  ;;  %11502 = vst [vmem:[#allocation77_spill] sm:$0xff] %v7588_v8  ;;  %v11510_v8 = vld [vmem:[#allocation2_spill] sm:$0xff] }
 0x291   :  { %11504 = vst [vmem:[#allocation78_spill] sm:$0xff] %v7592_v12  ;;  %11506 = vst [vmem:[#allocation79_spill] sm:$0xff] %v7596_v59  ;;  %v7612_v9 = vsub.f32 %v11510_v8, %v7228_v26  ;;  %v11512_v12 = vld [vmem:[#allocation4_spill] sm:$0xff]  ;;  %v11514_v59 = vld [vmem:[#allocation3_spill] sm:$0xff] }
 0x292   :  { %11507 = vst [vmem:[#allocation85_spill] sm:$0xff] %v7600_v11  ;;  %11508 = vst [vmem:[#allocation86_spill] sm:$0xff] %v7604_v50  ;;  %v7616_v34 = vsub.f32 %v11512_v12, %v7228_v26  ;;  %v7620_v51 = vsub.f32 %v11514_v59, %v7228_v26  ;;  %v11516_v11 = vld [vmem:[#allocation5_spill] sm:$0xff]  ;;  %v11518_v8 = vld [vmem:[#allocation6_spill] sm:$0xff] }
 0x293   :  { %11509 = vst [vmem:[#allocation87_spill] sm:$0xff] %v7608_v7  ;;  %11511 = vst [vmem:[#allocation2_spill] sm:$0xff] %v7612_v9  ;;  %v7624_v10 = vsub.f32 %v11516_v11, %v7228_v26  ;;  %v3803_v31 = vmul.f32 %v7612_v9, %v7612_v9  ;;  %v7632_v50 = vsub.f32 %v11518_v8, %v7228_v26  ;;  %v11520_v59 = vld [vmem:[#allocation8_spill] sm:$0xff] }
 0x294   :  { %11513 = vst [vmem:[#allocation4_spill] sm:$0xff] %v7616_v34  ;;  %11515 = vst [vmem:[#allocation3_spill] sm:$0xff] %v7620_v51  ;;  %v3804_v7 = vmul.f32 %v7616_v34, %v7616_v34  ;;  %v3805_v12 = vmul.f32 %v7620_v51, %v7620_v51  ;;  %v7638_v5 = vsub.f32 %v11520_v59, %v7228_v26  ;;  %v11522_v34 = vld [vmem:[#allocation7_spill] sm:$0xff]  ;;  %v11524_v59 = vld [vmem:[#allocation9_spill] sm:$0xff] }
 0x295   :  { %11517 = vst [vmem:[#allocation5_spill] sm:$0xff] %v7624_v10  ;;  %11519 = vst [vmem:[#allocation6_spill] sm:$0xff] %v7632_v50  ;;  %v3806_v11 = vmul.f32 %v7624_v10, %v7624_v10  ;;  %v3931_v22 = vsel %vm407_vm0, %v3803_v31, 0.0  ;;  %v7646_v19 = vsub.f32 %v11522_v34, %v7228_v26  ;;  %v3807_v8 = vmul.f32 %v7632_v50, %v7632_v50 }
 0x296   :  { %11521 = vst [vmem:[#allocation8_spill] sm:$0xff] %v7638_v5  ;;  %v3932_v9 = vsel %vm407_vm0, %v3804_v7, 0.0  ;;  %v3934_v51 = vsel %vm407_vm0, %v3805_v12, 0.0  ;;  %v7653_v32 = vsub.f32 %v11524_v59, %v7228_v26  ;;  %v3808_v31 = vmul.f32 %v7638_v5, %v7638_v5 }
 0x297   :  { %v3933_v40 = vadd.f32 %v3932_v9, %v3931_v22  ;;  %11523 = vst [vmem:[#allocation7_spill] sm:$0xff] %v7646_v19  ;;  %v3936_v7 = vsel %vm407_vm0, %v3806_v11, 0.0  ;;  %v11526_v9 = vld [vmem:[#allocation10_spill] sm:$0xff]  ;;  %v3809_v50 = vmul.f32 %v7646_v19, %v7646_v19  ;;  %v3938_v12 = vsel %vm407_vm0, %v3807_v8, 0.0 }
 0x298   :  { %11525 = vst [vmem:[#allocation9_spill] sm:$0xff] %v7653_v32  ;;  %v7660_v34 = vsub.f32 %v11526_v9, %v7228_v26  ;;  %v3810_v5 = vmul.f32 %v7653_v32, %v7653_v32  ;;  %v3940_v11 = vsel %vm407_vm0, %v3808_v31, 0.0 }
 0x299   :  { %v3935_v4 = vadd.f32 %v3934_v51, %v3933_v40  ;;  %v11528_v51 = vld [vmem:[#allocation12_spill] sm:$0xff]  ;;  %v3942_v8 = vsel %vm407_vm0, %v3809_v50, 0.0 }
 0x29a   :  { %11527 = vst [vmem:[#allocation10_spill] sm:$0xff] %v7660_v34  ;;  %v7667_v59 = vsub.f32 %v11528_v51, %v7228_v26  ;;  %v3811_v19 = vmul.f32 %v7660_v34, %v7660_v34  ;;  %v3944_v31 = vsel %vm407_vm0, %v3810_v5, 0.0 }
 0x29b   :  { %v3937_v22 = vadd.f32 %v3936_v7, %v3935_v4  ;;  %v11530_v7 = vld [vmem:[#allocation11_spill] sm:$0xff] }
 0x29c   :  { %11529 = vst [vmem:[#allocation12_spill] sm:$0xff] %v7667_v59  ;;  %v7674_v9 = vsub.f32 %v11530_v7, %v7228_v26  ;;  %v3812_v32 = vmul.f32 %v7667_v59, %v7667_v59  ;;  %v3946_v50 = vsel %vm407_vm0, %v3811_v19, 0.0 }
 0x29d   :  { %v3939_v40 = vadd.f32 %v3938_v12, %v3937_v22  ;;  %v11532_v12 = vld [vmem:[#allocation13_spill] sm:$0xff] }
 0x29e   :  { %11531 = vst [vmem:[#allocation11_spill] sm:$0xff] %v7674_v9  ;;  %v7681_v51 = vsub.f32 %v11532_v12, %v7228_v26  ;;  %v3813_v34 = vmul.f32 %v7674_v9, %v7674_v9  ;;  %v3948_v5 = vsel %vm407_vm0, %v3812_v32, 0.0 }
 0x29f   :  { %v3941_v4 = vadd.f32 %v3940_v11, %v3939_v40  ;;  %v11534_v11 = vld [vmem:[#allocation14_spill] sm:$0xff] }
 0x2a0   :  { %11533 = vst [vmem:[#allocation13_spill] sm:$0xff] %v7681_v51  ;;  %v7688_v7 = vsub.f32 %v11534_v11, %v7228_v26  ;;  %v3814_v59 = vmul.f32 %v7681_v51, %v7681_v51  ;;  %v3950_v19 = vsel %vm407_vm0, %v3813_v34, 0.0 }
 0x2a1   :  { %v3943_v22 = vadd.f32 %v3942_v8, %v3941_v4  ;;  %v11536_v8 = vld [vmem:[#allocation16_spill] sm:$0xff] }
 0x2a2   :  { %11535 = vst [vmem:[#allocation14_spill] sm:$0xff] %v7688_v7  ;;  %v7695_v12 = vsub.f32 %v11536_v8, %v7228_v26  ;;  %v3815_v9 = vmul.f32 %v7688_v7, %v7688_v7  ;;  %v3952_v32 = vsel %vm407_vm0, %v3814_v59, 0.0 }
 0x2a3   :  { %v3945_v40 = vadd.f32 %v3944_v31, %v3943_v22  ;;  %v11538_v31 = vld [vmem:[#allocation15_spill] sm:$0xff] }
 0x2a4   :  { %11537 = vst [vmem:[#allocation16_spill] sm:$0xff] %v7695_v12  ;;  %v7702_v11 = vsub.f32 %v11538_v31, %v7228_v26  ;;  %v3816_v51 = vmul.f32 %v7695_v12, %v7695_v12  ;;  %v3954_v34 = vsel %vm407_vm0, %v3815_v9, 0.0 }
 0x2a5   :  { %v3947_v4 = vadd.f32 %v3946_v50, %v3945_v40  ;;  %v11540_v50 = vld [vmem:[#allocation17_spill] sm:$0xff] }
 0x2a6   :  { %11539 = vst [vmem:[#allocation15_spill] sm:$0xff] %v7702_v11  ;;  %v7709_v8 = vsub.f32 %v11540_v50, %v7228_v26  ;;  %v3817_v7 = vmul.f32 %v7702_v11, %v7702_v11  ;;  %v3956_v59 = vsel %vm407_vm0, %v3816_v51, 0.0 }
 0x2a7   :  { %v3949_v22 = vadd.f32 %v3948_v5, %v3947_v4  ;;  %v11542_v5 = vld [vmem:[#allocation18_spill] sm:$0xff] }
 0x2a8   :  { %11541 = vst [vmem:[#allocation17_spill] sm:$0xff] %v7709_v8  ;;  %v7716_v31 = vsub.f32 %v11542_v5, %v7228_v26  ;;  %v3818_v12 = vmul.f32 %v7709_v8, %v7709_v8  ;;  %v3958_v9 = vsel %vm407_vm0, %v3817_v7, 0.0 }
 0x2a9   :  { %v3951_v40 = vadd.f32 %v3950_v19, %v3949_v22  ;;  %v11544_v19 = vld [vmem:[#allocation20_spill] sm:$0xff] }
 0x2aa   :  { %11543 = vst [vmem:[#allocation18_spill] sm:$0xff] %v7716_v31  ;;  %v7723_v50 = vsub.f32 %v11544_v19, %v7228_v26  ;;  %v3819_v11 = vmul.f32 %v7716_v31, %v7716_v31  ;;  %v3960_v51 = vsel %vm407_vm0, %v3818_v12, 0.0 }
 0x2ab   :  { %v3953_v4 = vadd.f32 %v3952_v32, %v3951_v40  ;;  %v11546_v32 = vld [vmem:[#allocation19_spill] sm:$0xff] }
 0x2ac   :  { %11545 = vst [vmem:[#allocation20_spill] sm:$0xff] %v7723_v50  ;;  %v7730_v5 = vsub.f32 %v11546_v32, %v7228_v26  ;;  %v3820_v8 = vmul.f32 %v7723_v50, %v7723_v50  ;;  %v3962_v7 = vsel %vm407_vm0, %v3819_v11, 0.0 }
 0x2ad   :  { %v3955_v22 = vadd.f32 %v3954_v34, %v3953_v4  ;;  %v11548_v34 = vld [vmem:[#allocation21_spill] sm:$0xff] }
 0x2ae   :  { %11547 = vst [vmem:[#allocation19_spill] sm:$0xff] %v7730_v5  ;;  %v7737_v19 = vsub.f32 %v11548_v34, %v7228_v26  ;;  %v3821_v31 = vmul.f32 %v7730_v5, %v7730_v5  ;;  %v3964_v12 = vsel %vm407_vm0, %v3820_v8, 0.0 }
 0x2af   :  { %v3957_v40 = vadd.f32 %v3956_v59, %v3955_v22  ;;  %v11550_v59 = vld [vmem:[#allocation22_spill] sm:$0xff] }
 0x2b0   :  { %11549 = vst [vmem:[#allocation21_spill] sm:$0xff] %v7737_v19  ;;  %v7744_v32 = vsub.f32 %v11550_v59, %v7228_v26  ;;  %v3822_v50 = vmul.f32 %v7737_v19, %v7737_v19  ;;  %v3966_v11 = vsel %vm407_vm0, %v3821_v31, 0.0 }
 0x2b1   :  { %v3959_v4 = vadd.f32 %v3958_v9, %v3957_v40  ;;  %v11552_v9 = vld [vmem:[#allocation24_spill] sm:$0xff] }
 0x2b2   :  { %11551 = vst [vmem:[#allocation22_spill] sm:$0xff] %v7744_v32  ;;  %v7751_v34 = vsub.f32 %v11552_v9, %v7228_v26  ;;  %v3823_v5 = vmul.f32 %v7744_v32, %v7744_v32  ;;  %v3968_v8 = vsel %vm407_vm0, %v3822_v50, 0.0 }
 0x2b3   :  { %v3961_v22 = vadd.f32 %v3960_v51, %v3959_v4  ;;  %v11554_v51 = vld [vmem:[#allocation23_spill] sm:$0xff] }
 0x2b4   :  { %11553 = vst [vmem:[#allocation24_spill] sm:$0xff] %v7751_v34  ;;  %v7758_v59 = vsub.f32 %v11554_v51, %v7228_v26  ;;  %v3824_v19 = vmul.f32 %v7751_v34, %v7751_v34  ;;  %v3970_v31 = vsel %vm407_vm0, %v3823_v5, 0.0 }
 0x2b5   :  { %v3963_v40 = vadd.f32 %v3962_v7, %v3961_v22  ;;  %v11556_v7 = vld [vmem:[#allocation25_spill] sm:$0xff] }
 0x2b6   :  { %11555 = vst [vmem:[#allocation23_spill] sm:$0xff] %v7758_v59  ;;  %v7765_v9 = vsub.f32 %v11556_v7, %v7228_v26  ;;  %v3825_v32 = vmul.f32 %v7758_v59, %v7758_v59  ;;  %v3972_v50 = vsel %vm407_vm0, %v3824_v19, 0.0 }
 0x2b7   :  { %v3965_v4 = vadd.f32 %v3964_v12, %v3963_v40  ;;  %v11558_v12 = vld [vmem:[#allocation26_spill] sm:$0xff] }
 0x2b8   :  { %11557 = vst [vmem:[#allocation25_spill] sm:$0xff] %v7765_v9  ;;  %v7772_v51 = vsub.f32 %v11558_v12, %v7228_v26  ;;  %v3826_v34 = vmul.f32 %v7765_v9, %v7765_v9  ;;  %v3974_v5 = vsel %vm407_vm0, %v3825_v32, 0.0 }
 0x2b9   :  { %v3967_v22 = vadd.f32 %v3966_v11, %v3965_v4  ;;  %v11560_v11 = vld [vmem:[#allocation28_spill] sm:$0xff] }
 0x2ba   :  { %11559 = vst [vmem:[#allocation26_spill] sm:$0xff] %v7772_v51  ;;  %v7779_v7 = vsub.f32 %v11560_v11, %v7228_v26  ;;  %v3827_v59 = vmul.f32 %v7772_v51, %v7772_v51  ;;  %v3976_v19 = vsel %vm407_vm0, %v3826_v34, 0.0 }
 0x2bb   :  { %v3969_v40 = vadd.f32 %v3968_v8, %v3967_v22  ;;  %v11562_v8 = vld [vmem:[#allocation27_spill] sm:$0xff] }
 0x2bc   :  { %11561 = vst [vmem:[#allocation28_spill] sm:$0xff] %v7779_v7  ;;  %v7786_v12 = vsub.f32 %v11562_v8, %v7228_v26  ;;  %v3828_v9 = vmul.f32 %v7779_v7, %v7779_v7  ;;  %v3978_v32 = vsel %vm407_vm0, %v3827_v59, 0.0 }
 0x2bd   :  { %v3971_v4 = vadd.f32 %v3970_v31, %v3969_v40  ;;  %v11564_v31 = vld [vmem:[#allocation29_spill] sm:$0xff] }
 0x2be   :  { %11563 = vst [vmem:[#allocation27_spill] sm:$0xff] %v7786_v12  ;;  %v7793_v11 = vsub.f32 %v11564_v31, %v7228_v26  ;;  %v3829_v51 = vmul.f32 %v7786_v12, %v7786_v12  ;;  %v3980_v34 = vsel %vm407_vm0, %v3828_v9, 0.0 }
 0x2bf   :  { %v3973_v22 = vadd.f32 %v3972_v50, %v3971_v4  ;;  %v11566_v50 = vld [vmem:[#allocation30_spill] sm:$0xff] }
 0x2c0   :  { %11565 = vst [vmem:[#allocation29_spill] sm:$0xff] %v7793_v11  ;;  %v7800_v8 = vsub.f32 %v11566_v50, %v7228_v26  ;;  %v3830_v7 = vmul.f32 %v7793_v11, %v7793_v11  ;;  %v3982_v59 = vsel %vm407_vm0, %v3829_v51, 0.0 }
 0x2c1   :  { %v3975_v40 = vadd.f32 %v3974_v5, %v3973_v22  ;;  %v11568_v5 = vld [vmem:[#allocation32_spill] sm:$0xff] }
 0x2c2   :  { %11567 = vst [vmem:[#allocation30_spill] sm:$0xff] %v7800_v8  ;;  %v7807_v31 = vsub.f32 %v11568_v5, %v7228_v26  ;;  %v3831_v12 = vmul.f32 %v7800_v8, %v7800_v8  ;;  %v3984_v9 = vsel %vm407_vm0, %v3830_v7, 0.0 }
 0x2c3   :  { %v3977_v4 = vadd.f32 %v3976_v19, %v3975_v40  ;;  %v11569_v19 = vld [vmem:[#allocation31_spill] sm:$0xff] }
 0x2c4   :  { %v7814_v50 = vsub.f32 %v11569_v19, %v7228_v26  ;;  %v3832_v11 = vmul.f32 %v7807_v31, %v7807_v31  ;;  %v3986_v51 = vsel %vm407_vm0, %v3831_v12, 0.0  ;;  %v3837_v12 = vmul.f32 %v7236_v6, %v7236_v6 }
 0x2c5   :  { %v3979_v22 = vadd.f32 %v3978_v32, %v3977_v4  ;;  %v11571_v32 = vld [vmem:[#allocation33_spill] sm:$0xff] }
 0x2c6   :  { %11570 = vst [vmem:[#allocation32_spill] sm:$0xff] %v7814_v50  ;;  %v7821_v5 = vsub.f32 %v11571_v32, %v7228_v26  ;;  %v3833_v8 = vmul.f32 %v7814_v50, %v7814_v50  ;;  %v3988_v32 = vsel %vm407_vm0, %v3832_v11, 0.0  ;;  %v3838_v11 = vmul.f32 %v7240_v0, %v7240_v0 }
 0x2c7   :  { %v3981_v40 = vadd.f32 %v3980_v34, %v3979_v22  ;;  %v11572_v34 = vld [vmem:[#allocation34_spill] sm:$0xff] }
 0x2c8   :  { %v7828_v19 = vsub.f32 %v11572_v34, %v7228_v26  ;;  %v3836_v26 = vmul.f32 %v7232_v47, %v7232_v47 }
 0x2c9   :  { %v3983_v4 = vadd.f32 %v3982_v59, %v3981_v40  ;;  %v3834_v59 = vmul.f32 %v7821_v5, %v7821_v5 }
 0x2ca   :  { %v3835_v7 = vmul.f32 %v7828_v19, %v7828_v19 }
 0x2cb   :  { %v3985_v22 = vadd.f32 %v3984_v9, %v3983_v4  ;;  %v3990_v4 = vsel %vm407_vm0, %v3833_v8, 0.0  ;;  %v3992_v34 = vsel %vm407_vm0, %v3834_v59, 0.0  ;;  %v3998_v8 = vsel %vm407_vm0, %v3837_v12, 0.0 }
 0x2cc   :  { %v3840_v59 = vmul.f32 %v7248_v62, %v7248_v62  ;;  %v3843_v12 = vmul.f32 %v7260_v53, %v7260_v53 }
 0x2cd   :  { %v3987_v40 = vadd.f32 %v3986_v51, %v3985_v22  ;;  %v3994_v22 = vsel %vm407_vm0, %v3835_v7, 0.0 }
 0x2cf   :  { %v3989_v10 = vadd.f32 %v3988_v32, %v3987_v40  ;;  %v3996_v40 = vsel %vm407_vm0, %v3836_v26, 0.0  ;;  %v3842_v26 = vmul.f32 %v7256_v48, %v7256_v48 }
 0x2d1   :  { %v3991_v9 = vadd.f32 %v3990_v4, %v3989_v10  ;;  %v3839_v10 = vmul.f32 %v7244_v46, %v7244_v46 }
 0x2d3   :  { %v3993_v50 = vadd.f32 %v3992_v34, %v3991_v9  ;;  %v4000_v9 = vsel %vm407_vm0, %v3838_v11, 0.0  ;;  %v4002_v7 = vsel %vm407_vm0, %v3839_v10, 0.0  ;;  %v3844_v11 = vmul.f32 %v7264_v14, %v7264_v14 }
 0x2d4   :  { %v3845_v10 = vmul.f32 %v7268_v18, %v7268_v18 }
 0x2d5   :  { %v3995_v51 = vadd.f32 %v3994_v22, %v3993_v50  ;;  %v3841_v50 = vmul.f32 %v7252_v52, %v7252_v52 }
 0x2d7   :  { %v3997_v32 = vadd.f32 %v3996_v40, %v3995_v51  ;;  %v4004_v51 = vsel %vm407_vm0, %v3840_v59, 0.0  ;;  %v3846_v59 = vmul.f32 %v7272_v15, %v7272_v15 }
 0x2d9   :  { %v3999_v4 = vadd.f32 %v3998_v8, %v3997_v32  ;;  %v4006_v32 = vsel %vm407_vm0, %v3841_v50, 0.0  ;;  %v3847_v50 = vmul.f32 %v7276_v25, %v7276_v25 }
 0x2db   :  { %v4001_v34 = vadd.f32 %v4000_v9, %v3999_v4  ;;  %v4008_v4 = vsel %vm407_vm0, %v3842_v26, 0.0  ;;  %v3848_v26 = vmul.f32 %v7280_v49, %v7280_v49 }
 0x2dd   :  { %v4003_v22 = vadd.f32 %v4002_v7, %v4001_v34  ;;  %v4010_v34 = vsel %vm407_vm0, %v3843_v12, 0.0  ;;  %v3849_v12 = vmul.f32 %v7284_v56, %v7284_v56 }
 0x2df   :  { %v4005_v40 = vadd.f32 %v4004_v51, %v4003_v22  ;;  %v4012_v22 = vsel %vm407_vm0, %v3844_v11, 0.0  ;;  %v3850_v11 = vmul.f32 %v7288_v54, %v7288_v54 }
 0x2e1   :  { %v4007_v8 = vadd.f32 %v4006_v32, %v4005_v40  ;;  %v4014_v40 = vsel %vm407_vm0, %v3845_v10, 0.0  ;;  %v3851_v10 = vmul.f32 %v7292_v61, %v7292_v61 }
 0x2e3   :  { %v4009_v9 = vadd.f32 %v4008_v4, %v4007_v8  ;;  %v4016_v8 = vsel %vm407_vm0, %v3846_v59, 0.0  ;;  %v3852_v59 = vmul.f32 %v7296_v30, %v7296_v30 }
 0x2e5   :  { %v4011_v7 = vadd.f32 %v4010_v34, %v4009_v9  ;;  %v4018_v9 = vsel %vm407_vm0, %v3847_v50, 0.0  ;;  %v3853_v50 = vmul.f32 %v7300_v36, %v7300_v36 }
 0x2e7   :  { %v4013_v51 = vadd.f32 %v4012_v22, %v4011_v7  ;;  %v4020_v7 = vsel %vm407_vm0, %v3848_v26, 0.0  ;;  %v3854_v26 = vmul.f32 %v7304_v17, %v7304_v17 }
 0x2e9   :  { %v4015_v32 = vadd.f32 %v4014_v40, %v4013_v51  ;;  %v4022_v51 = vsel %vm407_vm0, %v3849_v12, 0.0  ;;  %v3855_v12 = vmul.f32 %v7308_v39, %v7308_v39 }
 0x2eb   :  { %v4017_v4 = vadd.f32 %v4016_v8, %v4015_v32  ;;  %v4024_v32 = vsel %vm407_vm0, %v3850_v11, 0.0  ;;  %v3856_v11 = vmul.f32 %v7312_v16, %v7312_v16 }
 0x2ed   :  { %v4019_v34 = vadd.f32 %v4018_v9, %v4017_v4  ;;  %v4026_v4 = vsel %vm407_vm0, %v3851_v10, 0.0  ;;  %v3857_v10 = vmul.f32 %v7316_v29, %v7316_v29 }
 0x2ef   :  { %v4021_v22 = vadd.f32 %v4020_v7, %v4019_v34  ;;  %v4028_v34 = vsel %vm407_vm0, %v3852_v59, 0.0  ;;  %v3858_v59 = vmul.f32 %v7320_v2, %v7320_v2 }
 0x2f1   :  { %v4023_v40 = vadd.f32 %v4022_v51, %v4021_v22  ;;  %v4030_v22 = vsel %vm407_vm0, %v3853_v50, 0.0  ;;  %v3859_v50 = vmul.f32 %v7324_v33, %v7324_v33 }
 0x2f3   :  { %v4025_v8 = vadd.f32 %v4024_v32, %v4023_v40  ;;  %v4032_v40 = vsel %vm407_vm0, %v3854_v26, 0.0  ;;  %v3860_v26 = vmul.f32 %v7328_v27, %v7328_v27 }
 0x2f5   :  { %v4027_v9 = vadd.f32 %v4026_v4, %v4025_v8  ;;  %v4034_v8 = vsel %vm407_vm0, %v3855_v12, 0.0  ;;  %v3861_v12 = vmul.f32 %v7332_v28, %v7332_v28 }
 0x2f7   :  { %v4029_v7 = vadd.f32 %v4028_v34, %v4027_v9  ;;  %v4036_v9 = vsel %vm407_vm0, %v3856_v11, 0.0  ;;  %v3862_v11 = vmul.f32 %v7336_v24, %v7336_v24 }
 0x2f9   :  { %v4031_v51 = vadd.f32 %v4030_v22, %v4029_v7  ;;  %v4038_v7 = vsel %vm407_vm0, %v3857_v10, 0.0  ;;  %v3863_v10 = vmul.f32 %v7340_v43, %v7340_v43 }
 0x2fb   :  { %v4033_v32 = vadd.f32 %v4032_v40, %v4031_v51  ;;  %v4040_v51 = vsel %vm407_vm0, %v3858_v59, 0.0  ;;  %v3864_v59 = vmul.f32 %v7344_v1, %v7344_v1 }
 0x2fd   :  { %v4035_v4 = vadd.f32 %v4034_v8, %v4033_v32  ;;  %v4042_v32 = vsel %vm407_vm0, %v3859_v50, 0.0  ;;  %v3865_v50 = vmul.f32 %v7348_v13, %v7348_v13 }
 0x2ff   :  { %v4037_v34 = vadd.f32 %v4036_v9, %v4035_v4  ;;  %v4044_v4 = vsel %vm407_vm0, %v3860_v26, 0.0  ;;  %v3866_v26 = vmul.f32 %v7352_v58, %v7352_v58 }
 0x301   :  { %v4039_v22 = vadd.f32 %v4038_v7, %v4037_v34  ;;  %v4046_v34 = vsel %vm407_vm0, %v3861_v12, 0.0  ;;  %v3867_v12 = vmul.f32 %v7356_v42, %v7356_v42 }
 0x303   :  { %v4041_v40 = vadd.f32 %v4040_v51, %v4039_v22  ;;  %v4048_v22 = vsel %vm407_vm0, %v3862_v11, 0.0  ;;  %v3868_v11 = vmul.f32 %v7360_v41, %v7360_v41 }
 0x305   :  { %v4043_v8 = vadd.f32 %v4042_v32, %v4041_v40  ;;  %v4050_v40 = vsel %vm407_vm0, %v3863_v10, 0.0  ;;  %v3869_v10 = vmul.f32 %v7364_v45, %v7364_v45 }
 0x307   :  { %v4045_v9 = vadd.f32 %v4044_v4, %v4043_v8  ;;  %v4052_v8 = vsel %vm407_vm0, %v3864_v59, 0.0  ;;  %v3870_v59 = vmul.f32 %v7368_v38, %v7368_v38 }
 0x309   :  { %v4047_v7 = vadd.f32 %v4046_v34, %v4045_v9  ;;  %v4054_v9 = vsel %vm407_vm0, %v3865_v50, 0.0  ;;  %v4319_v50 = vld [vmem:[%s10872_s2] sm:$0xf] }
 0x30a   :  { %4322 = vperm.xlu1 %6040, %v4319_v50  }
 0x30b   :  { %v4049_v51 = vadd.f32 %v4048_v22, %v4047_v7  ;;  %v4056_v7 = vsel %vm407_vm0, %v3866_v26, 0.0  ;;  %v3871_v26 = vmul.f32 %v7372_v44, %v7372_v44 }
 0x30d   :  { %v4051_v32 = vadd.f32 %v4050_v40, %v4049_v51  ;;  %v4058_v51 = vsel %vm407_vm0, %v3867_v12, 0.0  ;;  %v4453_v12 = vld [vmem:[%s10873_s3] sm:$0xf] }
 0x30e   :  { %4456 = vperm.xlu1 %6040, %v4453_v12   ;;  %v3876_v12 = vmul.f32 %v7392_v63, %v7392_v63 }
 0x30f   :  { %v4053_v4 = vadd.f32 %v4052_v8, %v4051_v32  ;;  %v4060_v32 = vsel %vm407_vm0, %v3868_v11, 0.0  ;;  %v4064_v11 = vsel %vm407_vm0, %v3870_v59, 0.0 }
 0x311   :  { %v4055_v34 = vadd.f32 %v4054_v9, %v4053_v4  ;;  %v4062_v4 = vsel %vm407_vm0, %v3869_v10, 0.0  ;;  %v3874_v10 = vmul.f32 %v7384_v20, %v7384_v20 }
 0x313   :  { %v4057_v22 = vadd.f32 %v4056_v7, %v4055_v34  ;;  %v3872_v34 = vmul.f32 %v7376_v23, %v7376_v23 }
 0x315   :  { %v4059_v40 = vadd.f32 %v4058_v51, %v4057_v22  ;;  %v3873_v22 = vmul.f32 %v7380_v21, %v7380_v21  ;;  %v4066_v51 = vsel %vm407_vm0, %v3871_v26, 0.0  ;;  %v3877_v26 = vmul.f32 %v7396_v57, %v7396_v57 }
 0x317   :  { %v4061_v8 = vadd.f32 %v4060_v32, %v4059_v40  ;;  %v4068_v32 = vsel %vm407_vm0, %v3872_v34, 0.0  ;;  %v3878_v34 = vmul.f32 %v7400_v60, %v7400_v60 }
 0x319   :  { %v4063_v9 = vadd.f32 %v4062_v4, %v4061_v8  ;;  %v3875_v8 = vmul.f32 %v7388_v55, %v7388_v55  ;;  %v4070_v4 = vsel %vm407_vm0, %v3873_v22, 0.0  ;;  %v3879_v22 = vmul.f32 %v7404_v3, %v7404_v3 }
 0x31b   :  { %v4065_v7 = vadd.f32 %v4064_v11, %v4063_v9  ;;  %v4072_v9 = vsel %vm407_vm0, %v3874_v10, 0.0  ;;  %v3880_v10 = vmul.f32 %v7408_v35, %v7408_v35 }
 0x31d   :  { %v4067_v40 = vadd.f32 %v4066_v51, %v4065_v7  ;;  %v4074_v7 = vsel %vm407_vm0, %v3875_v8, 0.0  ;;  %v3881_v8 = vmul.f32 %v7412_v37, %v7412_v37 }
 0x31f   :  { %v4069_v50 = vadd.f32 %v4068_v32, %v4067_v40  ;;  %v4076_v40 = vsel %vm407_vm0, %v3876_v12, 0.0  ;;  %v11573_v12 = vld [vmem:[#allocation35_spill] sm:$0xff] }
 0x321   :  { %v4071_v59 = vadd.f32 %v4070_v4, %v4069_v50  ;;  %v4078_v50 = vsel %vm407_vm0, %v3877_v26, 0.0  ;;  %v11574_v26 = vld [vmem:[#allocation36_spill] sm:$0xff] }
 0x323   :  { %v4073_v11 = vadd.f32 %v4072_v9, %v4071_v59  ;;  %v4080_v59 = vsel %vm407_vm0, %v3878_v34, 0.0  ;;  %v11575_v34 = vld [vmem:[#allocation38_spill] sm:$0xff] }
 0x325   :  { %v4075_v51 = vadd.f32 %v4074_v7, %v4073_v11  ;;  %v4082_v11 = vsel %vm407_vm0, %v3879_v22, 0.0  ;;  %v11576_v22 = vld [vmem:[#allocation37_spill] sm:$0xff] }
 0x327   :  { %v4077_v32 = vadd.f32 %v4076_v40, %v4075_v51  ;;  %v3882_v51 = vmul.f32 %v11573_v12, %v11573_v12  ;;  %v4084_v40 = vsel %vm407_vm0, %v3880_v10, 0.0  ;;  %v11577_v10 = vld [vmem:[#allocation39_spill] sm:$0xff] }
 0x329   :  { %v4079_v4 = vadd.f32 %v4078_v50, %v4077_v32  ;;  %v3883_v32 = vmul.f32 %v11574_v26, %v11574_v26  ;;  %v4086_v50 = vsel %vm407_vm0, %v3881_v8, 0.0  ;;  %v11578_v8 = vld [vmem:[#allocation40_spill] sm:$0xff] }
 0x32b   :  { %v4081_v9 = vadd.f32 %v4080_v59, %v4079_v4  ;;  %v3884_v4 = vmul.f32 %v11575_v34, %v11575_v34  ;;  %v4088_v59 = vsel %vm407_vm0, %v3882_v51, 0.0  ;;  %v11579_v51 = vld [vmem:[#allocation42_spill] sm:$0xff] }
 0x32d   :  { %v4083_v7 = vadd.f32 %v4082_v11, %v4081_v9  ;;  %v3885_v9 = vmul.f32 %v11576_v22, %v11576_v22  ;;  %v4090_v11 = vsel %vm407_vm0, %v3883_v32, 0.0  ;;  %v11580_v32 = vld [vmem:[#allocation41_spill] sm:$0xff] }
 0x32f   :  { %v4085_v3 = vadd.f32 %v4084_v40, %v4083_v7  ;;  %v3886_v7 = vmul.f32 %v11577_v10, %v11577_v10  ;;  %v4092_v40 = vsel %vm407_vm0, %v3884_v4, 0.0  ;;  %v11581_v4 = vld [vmem:[#allocation43_spill] sm:$0xff] }
 0x331   :  { %v4087_v35 = vadd.f32 %v4086_v50, %v4085_v3  ;;  %v3887_v3 = vmul.f32 %v11578_v8, %v11578_v8  ;;  %v4094_v50 = vsel %vm407_vm0, %v3885_v9, 0.0  ;;  %v11582_v9 = vld [vmem:[#allocation44_spill] sm:$0xff] }
 0x333   :  { %v4089_v37 = vadd.f32 %v4088_v59, %v4087_v35  ;;  %v3888_v35 = vmul.f32 %v11579_v51, %v11579_v51  ;;  %v4096_v59 = vsel %vm407_vm0, %v3886_v7, 0.0  ;;  %v11583_v7 = vld [vmem:[#allocation46_spill] sm:$0xff] }
 0x335   :  { %v4091_v12 = vadd.f32 %v4090_v11, %v4089_v37  ;;  %v3889_v37 = vmul.f32 %v11580_v32, %v11580_v32  ;;  %v4098_v11 = vsel %vm407_vm0, %v3887_v3, 0.0  ;;  %v11584_v3 = vld [vmem:[#allocation45_spill] sm:$0xff] }
 0x337   :  { %v4093_v26 = vadd.f32 %v4092_v40, %v4091_v12  ;;  %v3890_v12 = vmul.f32 %v11581_v4, %v11581_v4  ;;  %v4100_v40 = vsel %vm407_vm0, %v3888_v35, 0.0  ;;  %v11585_v35 = vld [vmem:[#allocation47_spill] sm:$0xff] }
 0x339   :  { %v4095_v34 = vadd.f32 %v4094_v50, %v4093_v26  ;;  %v3891_v26 = vmul.f32 %v11582_v9, %v11582_v9  ;;  %v4102_v50 = vsel %vm407_vm0, %v3889_v37, 0.0  ;;  %v11586_v37 = vld [vmem:[#allocation48_spill] sm:$0xff] }
 0x33b   :  { %v4097_v22 = vadd.f32 %v4096_v59, %v4095_v34  ;;  %v3892_v34 = vmul.f32 %v11583_v7, %v11583_v7  ;;  %v4104_v59 = vsel %vm407_vm0, %v3890_v12, 0.0  ;;  %v11587_v12 = vld [vmem:[#allocation50_spill] sm:$0xff] }
 0x33d   :  { %v4099_v10 = vadd.f32 %v4098_v11, %v4097_v22  ;;  %v3893_v22 = vmul.f32 %v11584_v3, %v11584_v3  ;;  %v4106_v11 = vsel %vm407_vm0, %v3891_v26, 0.0  ;;  %v11588_v26 = vld [vmem:[#allocation49_spill] sm:$0xff] }
 0x33f   :  { %v4101_v8 = vadd.f32 %v4100_v40, %v4099_v10  ;;  %v3894_v10 = vmul.f32 %v11585_v35, %v11585_v35  ;;  %v4108_v40 = vsel %vm407_vm0, %v3892_v34, 0.0  ;;  %v11589_v34 = vld [vmem:[#allocation51_spill] sm:$0xff] }
 0x341   :  { %v4103_v51 = vadd.f32 %v4102_v50, %v4101_v8  ;;  %v3895_v8 = vmul.f32 %v11586_v37, %v11586_v37  ;;  %v4110_v50 = vsel %vm407_vm0, %v3893_v22, 0.0  ;;  %v11590_v22 = vld [vmem:[#allocation52_spill] sm:$0xff] }
 0x343   :  { %v4105_v32 = vadd.f32 %v4104_v59, %v4103_v51  ;;  %v3896_v51 = vmul.f32 %v11587_v12, %v11587_v12  ;;  %v4112_v59 = vsel %vm407_vm0, %v3894_v10, 0.0  ;;  %v11591_v10 = vld [vmem:[#allocation54_spill] sm:$0xff] }
 0x345   :  { %v4107_v4 = vadd.f32 %v4106_v11, %v4105_v32  ;;  %v3897_v32 = vmul.f32 %v11588_v26, %v11588_v26  ;;  %v4114_v11 = vsel %vm407_vm0, %v3895_v8, 0.0  ;;  %v11592_v8 = vld [vmem:[#allocation53_spill] sm:$0xff] }
 0x347   :  { %v4109_v9 = vadd.f32 %v4108_v40, %v4107_v4  ;;  %v3898_v4 = vmul.f32 %v11589_v34, %v11589_v34  ;;  %v4116_v40 = vsel %vm407_vm0, %v3896_v51, 0.0  ;;  %v11593_v51 = vld [vmem:[#allocation55_spill] sm:$0xff] }
 0x349   :  { %v4111_v7 = vadd.f32 %v4110_v50, %v4109_v9  ;;  %v3899_v9 = vmul.f32 %v11590_v22, %v11590_v22  ;;  %v4118_v50 = vsel %vm407_vm0, %v3897_v32, 0.0  ;;  %v11594_v32 = vld [vmem:[#allocation56_spill] sm:$0xff] }
 0x34b   :  { %v4113_v3 = vadd.f32 %v4112_v59, %v4111_v7  ;;  %v3900_v7 = vmul.f32 %v11591_v10, %v11591_v10  ;;  %v4120_v59 = vsel %vm407_vm0, %v3898_v4, 0.0  ;;  %v11595_v4 = vld [vmem:[#allocation58_spill] sm:$0xff] }
 0x34d   :  { %v4115_v35 = vadd.f32 %v4114_v11, %v4113_v3  ;;  %v3901_v3 = vmul.f32 %v11592_v8, %v11592_v8  ;;  %v4122_v11 = vsel %vm407_vm0, %v3899_v9, 0.0  ;;  %v11596_v9 = vld [vmem:[#allocation57_spill] sm:$0xff] }
 0x34f   :  { %v4117_v37 = vadd.f32 %v4116_v40, %v4115_v35  ;;  %v3902_v35 = vmul.f32 %v11593_v51, %v11593_v51  ;;  %v4124_v40 = vsel %vm407_vm0, %v3900_v7, 0.0  ;;  %v11597_v7 = vld [vmem:[#allocation59_spill] sm:$0xff] }
 0x351   :  { %v4119_v12 = vadd.f32 %v4118_v50, %v4117_v37  ;;  %v3903_v37 = vmul.f32 %v11594_v32, %v11594_v32  ;;  %v4126_v50 = vsel %vm407_vm0, %v3901_v3, 0.0  ;;  %v11598_v3 = vld [vmem:[#allocation60_spill] sm:$0xff] }
 0x353   :  { %v4121_v26 = vadd.f32 %v4120_v59, %v4119_v12  ;;  %v3904_v12 = vmul.f32 %v11595_v4, %v11595_v4  ;;  %v4128_v59 = vsel %vm407_vm0, %v3902_v35, 0.0  ;;  %v11599_v35 = vld [vmem:[#allocation62_spill] sm:$0xff] }
 0x355   :  { %v4123_v34 = vadd.f32 %v4122_v11, %v4121_v26  ;;  %v3905_v26 = vmul.f32 %v11596_v9, %v11596_v9  ;;  %v4130_v11 = vsel %vm407_vm0, %v3903_v37, 0.0  ;;  %v11600_v37 = vld [vmem:[#allocation61_spill] sm:$0xff] }
 0x357   :  { %v4125_v22 = vadd.f32 %v4124_v40, %v4123_v34  ;;  %v3906_v34 = vmul.f32 %v11597_v7, %v11597_v7  ;;  %v4132_v40 = vsel %vm407_vm0, %v3904_v12, 0.0  ;;  %v11601_v12 = vld [vmem:[#allocation63_spill] sm:$0xff] }
 0x359   :  { %v4127_v10 = vadd.f32 %v4126_v50, %v4125_v22  ;;  %v3907_v22 = vmul.f32 %v11598_v3, %v11598_v3  ;;  %v4134_v50 = vsel %vm407_vm0, %v3905_v26, 0.0  ;;  %v11602_v26 = vld [vmem:[#allocation64_spill] sm:$0xff] }
 0x35b   :  { %v4129_v8 = vadd.f32 %v4128_v59, %v4127_v10  ;;  %v3908_v10 = vmul.f32 %v11599_v35, %v11599_v35  ;;  %v4136_v59 = vsel %vm407_vm0, %v3906_v34, 0.0  ;;  %v11603_v34 = vld [vmem:[#allocation66_spill] sm:$0xff] }
 0x35d   :  { %v4131_v51 = vadd.f32 %v4130_v11, %v4129_v8  ;;  %v3909_v8 = vmul.f32 %v11600_v37, %v11600_v37  ;;  %v4138_v11 = vsel %vm407_vm0, %v3907_v22, 0.0  ;;  %v11604_v22 = vld [vmem:[#allocation65_spill] sm:$0xff] }
 0x35f   :  { %v4133_v32 = vadd.f32 %v4132_v40, %v4131_v51  ;;  %v3910_v51 = vmul.f32 %v11601_v12, %v11601_v12  ;;  %v4140_v40 = vsel %vm407_vm0, %v3908_v10, 0.0  ;;  %v11605_v10 = vld [vmem:[#allocation67_spill] sm:$0xff] }
 0x361   :  { %v4135_v4 = vadd.f32 %v4134_v50, %v4133_v32  ;;  %v3911_v32 = vmul.f32 %v11602_v26, %v11602_v26  ;;  %v4142_v50 = vsel %vm407_vm0, %v3909_v8, 0.0  ;;  %v11606_v8 = vld [vmem:[#allocation68_spill] sm:$0xff] }
 0x363   :  { %v4137_v9 = vadd.f32 %v4136_v59, %v4135_v4  ;;  %v3912_v4 = vmul.f32 %v11603_v34, %v11603_v34  ;;  %v4144_v59 = vsel %vm407_vm0, %v3910_v51, 0.0  ;;  %v11607_v51 = vld [vmem:[#allocation70_spill] sm:$0xff] }
 0x365   :  { %v4139_v7 = vadd.f32 %v4138_v11, %v4137_v9  ;;  %v3913_v9 = vmul.f32 %v11604_v22, %v11604_v22  ;;  %v4146_v11 = vsel %vm407_vm0, %v3911_v32, 0.0  ;;  %v11608_v32 = vld [vmem:[#allocation69_spill] sm:$0xff] }
 0x367   :  { %v4141_v3 = vadd.f32 %v4140_v40, %v4139_v7  ;;  %v3914_v7 = vmul.f32 %v11605_v10, %v11605_v10  ;;  %v4148_v40 = vsel %vm407_vm0, %v3912_v4, 0.0  ;;  %v11609_v4 = vld [vmem:[#allocation71_spill] sm:$0xff] }
 0x369   :  { %v4143_v35 = vadd.f32 %v4142_v50, %v4141_v3  ;;  %v3915_v3 = vmul.f32 %v11606_v8, %v11606_v8  ;;  %v4150_v50 = vsel %vm407_vm0, %v3913_v9, 0.0  ;;  %v11610_v9 = vld [vmem:[#allocation72_spill] sm:$0xff] }
 0x36b   :  { %v4145_v37 = vadd.f32 %v4144_v59, %v4143_v35  ;;  %v3916_v35 = vmul.f32 %v11607_v51, %v11607_v51  ;;  %v4152_v59 = vsel %vm407_vm0, %v3914_v7, 0.0  ;;  %v11611_v7 = vld [vmem:[#allocation74_spill] sm:$0xff] }
 0x36d   :  { %v4147_v12 = vadd.f32 %v4146_v11, %v4145_v37  ;;  %v3917_v37 = vmul.f32 %v11608_v32, %v11608_v32  ;;  %v4154_v11 = vsel %vm407_vm0, %v3915_v3, 0.0  ;;  %v11612_v3 = vld [vmem:[#allocation73_spill] sm:$0xff] }
 0x36f   :  { %v4149_v26 = vadd.f32 %v4148_v40, %v4147_v12  ;;  %v3918_v12 = vmul.f32 %v11609_v4, %v11609_v4  ;;  %v4156_v40 = vsel %vm407_vm0, %v3916_v35, 0.0  ;;  %v11613_v35 = vld [vmem:[#allocation75_spill] sm:$0xff] }
 0x371   :  { %v4151_v34 = vadd.f32 %v4150_v50, %v4149_v26  ;;  %v3919_v26 = vmul.f32 %v11610_v9, %v11610_v9  ;;  %v4158_v50 = vsel %vm407_vm0, %v3917_v37, 0.0  ;;  %v11614_v37 = vld [vmem:[#allocation76_spill] sm:$0xff] }
 0x373   :  { %v4153_v22 = vadd.f32 %v4152_v59, %v4151_v34  ;;  %v3920_v34 = vmul.f32 %v11611_v7, %v11611_v7  ;;  %v4160_v59 = vsel %vm407_vm0, %v3918_v12, 0.0  ;;  %v11615_v12 = vld [vmem:[#allocation84_spill] sm:$0xff] }
 0x375   :  { %v4155_v10 = vadd.f32 %v4154_v11, %v4153_v22  ;;  %v3921_v22 = vmul.f32 %v11612_v3, %v11612_v3  ;;  %v4162_v11 = vsel %vm407_vm0, %v3919_v26, 0.0  ;;  %v11616_v26 = vld [vmem:[#allocation77_spill] sm:$0xff] }
 0x377   :  { %v4157_v8 = vadd.f32 %v4156_v40, %v4155_v10  ;;  %v3922_v10 = vmul.f32 %v11613_v35, %v11613_v35  ;;  %v4164_v40 = vsel %vm407_vm0, %v3920_v34, 0.0  ;;  %v11617_v34 = vld [vmem:[#allocation78_spill] sm:$0xff] }
 0x379   :  { %v4159_v51 = vadd.f32 %v4158_v50, %v4157_v8  ;;  %v3923_v8 = vmul.f32 %v11614_v37, %v11614_v37  ;;  %v4166_v50 = vsel %vm407_vm0, %v3921_v22, 0.0  ;;  %v11618_v22 = vld [vmem:[#allocation79_spill] sm:$0xff] }
 0x37b   :  { %v4161_v32 = vadd.f32 %v4160_v59, %v4159_v51  ;;  %v3924_v51 = vmul.f32 %v11615_v12, %v11615_v12  ;;  %v4168_v59 = vsel %vm407_vm0, %v3922_v10, 0.0  ;;  %v11619_v10 = vld [vmem:[#allocation85_spill] sm:$0xff] }
 0x37d   :  { %v4163_v4 = vadd.f32 %v4162_v11, %v4161_v32  ;;  %v3925_v32 = vmul.f32 %v11616_v26, %v11616_v26  ;;  %v4170_v11 = vsel %vm407_vm0, %v3923_v8, 0.0  ;;  %v11620_v8 = vld [vmem:[#allocation86_spill] sm:$0xff] }
 0x37f   :  { %v4165_v9 = vadd.f32 %v4164_v40, %v4163_v4  ;;  %v3926_v4 = vmul.f32 %v11617_v34, %v11617_v34  ;;  %v4172_v40 = vsel %vm407_vm0, %v3924_v51, 0.0  ;;  %v11621_v51 = vld [vmem:[#allocation87_spill] sm:$0xff] }
 0x381   :  { %v4167_v7 = vadd.f32 %v4166_v50, %v4165_v9  ;;  %v3927_v9 = vmul.f32 %v11618_v22, %v11618_v22  ;;  %v4174_v50 = vsel %vm407_vm0, %v3925_v32, 0.0 }
 0x383   :  { %v4169_v3 = vadd.f32 %v4168_v59, %v4167_v7  ;;  %v3928_v7 = vmul.f32 %v11619_v10, %v11619_v10  ;;  %v4176_v59 = vsel %vm407_vm0, %v3926_v4, 0.0 }
 0x385   :  { %v4171_v35 = vadd.f32 %v4170_v11, %v4169_v3  ;;  %v3929_v3 = vmul.f32 %v11620_v8, %v11620_v8  ;;  %v4178_v11 = vsel %vm407_vm0, %v3927_v9, 0.0  ;;  %v6174_v8 = vmov 1983009808  }
 0x386   :  { %v5102_v9 = vunpack.c.l.s4 %v6174_v8  ;;  %v11626_v8 = vld [vmem:[#allocation5_spill] sm:$0xff] }
 0x387   :  { %v4173_v37 = vadd.f32 %v4172_v40, %v4171_v35  ;;  %v3930_v35 = vmul.f32 %v11621_v51, %v11621_v51  ;;  %v4180_v40 = vsel %vm407_vm0, %v3928_v7, 0.0 }
 0x389   :  { %v4175_v12 = vadd.f32 %v4174_v50, %v4173_v37  ;;  %v4182_v37 = vsel %vm407_vm0, %v3929_v3, 0.0  ;;  %v4184_v50 = vsel %vm3669_vm2, %v3930_v35, 0.0  ;;  %v11624_v3 = vld [vmem:[#allocation4_spill] sm:$0xff]  ;;  %v11625_v35 = vld [vmem:[#allocation3_spill] sm:$0xff] }
 0x38b   :  { %v4177_v26 = vadd.f32 %v4176_v59, %v4175_v12 }
 0x38d   :  { %v4179_v34 = vadd.f32 %v4178_v11, %v4177_v26  ;;  %v5104_v26 = vlaneseq  ;;  %v5103_v11 = vunpack.c.0.s8 %v5102_v9  ;;  %v11630_v9 = vld [vmem:[#allocation9_spill] sm:$0xff] }
 0x38f   :  { %v4181_v22 = vadd.f32 %v4180_v40, %v4179_v34  ;;  %v5105_v60 = vshrl.u32 %v5104_v26, 7  ;;  %v11623_v34 = vld [vmem:[#allocation2_spill] sm:$0xff] }
 0x391   :  { %v4183_v32 = vadd.f32 %v4182_v37, %v4181_v22  ;;  %v8134_v7 = vsub.s32 %v5103_v11, %v5105_v60  ;;  %v11632_v11 = vld [vmem:[#allocation10_spill] sm:$0xff] }
 0x393   :  { %v4185_v10 = vadd.f32 %v4184_v50, %v4183_v32  ;;  %11622 = vst [vmem:[#allocation31_spill] sm:$0xff] %v8134_v7  ;;  %v11627_v32 = vld [vmem:[#allocation6_spill] sm:$0xff]  ;;  %v11628_v50 = vld [vmem:[#allocation8_spill] sm:$0xff] }
 0x394   :  { %v11640_v7 = vld [vmem:[#allocation14_spill] sm:$0xff] }
 0x395   :  { %4186 = vadd.xlane.f32.xlu0 %v4185_v10 }
 0x422   :  { %v4187_v12 = vpop.xlane.xlu0 %4186 }
 0x423   :  { %v4188_v4 = vmul.f32 6.104261e-05, %v4187_v12 }
 0x425   :  { %v4189_v59 = vadd.f32 1e-05, %v4188_v4  ;;  %v11629_v4 = vld [vmem:[#allocation7_spill] sm:$0xff] }
 0x427   :  { %6170 = vrsqrt.f32 %v4189_v59 }
 0x431   :  { %v8132_v51 = vpop.eup %6170 }
 0x432   :  { %v8138_v22 = vmul.f32 %v8132_v51, %v11623_v34  ;;  %v8142_v10 = vmul.f32 %v8132_v51, %v11624_v3  ;;  %v8146_v40 = vmul.f32 %v8132_v51, %v11625_v35  ;;  %v8150_v37 = vmul.f32 %v8132_v51, %v11626_v8  ;;  %v11634_v3 = vld [vmem:[#allocation12_spill] sm:$0xff]  ;;  %v11636_v8 = vld [vmem:[#allocation11_spill] sm:$0xff] }
 0x433   :  { %v8154_v60 = vmul.f32 %v8132_v51, %v11627_v32  ;;  %v8158_v12 = vmul.f32 %v8132_v51, %v11628_v50  ;;  %v8162_v59 = vmul.f32 %v8132_v51, %v11629_v4  ;;  %v8166_v26 = vmul.f32 %v8132_v51, %v11630_v9  ;;  %v11638_v50 = vld [vmem:[#allocation13_spill] sm:$0xff] }
 0x434   :  { %v8170_v34 = vmul.f32 %v8132_v51, %v11632_v11  ;;  %v8174_v35 = vmul.f32 %v8132_v51, %v11634_v3  ;;  %v8178_v32 = vmul.f32 %v8132_v51, %v11636_v8  ;;  %v8182_v4 = vmul.f32 %v8132_v51, %v11638_v50 }
 0x435   :  { %11631 = vst [vmem:[#allocation33_spill] sm:$0xff] %v8166_v26  ;;  %v8186_v9 = vmul.f32 %v8132_v51, %v11640_v7  ;;  %v11642_v26 = vld [vmem:[#allocation16_spill] sm:$0xff] }
 0x436   :  { %11633 = vst [vmem:[#allocation34_spill] sm:$0xff] %v8170_v34  ;;  %11635 = vst [vmem:[#allocation2_spill] sm:$0xff] %v8174_v35  ;;  %v8190_v11 = vmul.f32 %v8132_v51, %v11642_v26  ;;  %v11644_v34 = vld [vmem:[#allocation15_spill] sm:$0xff]  ;;  %v11646_v35 = vld [vmem:[#allocation17_spill] sm:$0xff] }
 0x437   :  { %11637 = vst [vmem:[#allocation4_spill] sm:$0xff] %v8178_v32  ;;  %11639 = vst [vmem:[#allocation3_spill] sm:$0xff] %v8182_v4  ;;  %v8194_v3 = vmul.f32 %v8132_v51, %v11644_v34  ;;  %v8198_v8 = vmul.f32 %v8132_v51, %v11646_v35  ;;  %v11648_v32 = vld [vmem:[#allocation18_spill] sm:$0xff]  ;;  %v11650_v4 = vld [vmem:[#allocation20_spill] sm:$0xff] }
 0x438   :  { %11641 = vst [vmem:[#allocation5_spill] sm:$0xff] %v8186_v9  ;;  %11643 = vst [vmem:[#allocation6_spill] sm:$0xff] %v8190_v11  ;;  %v8202_v50 = vmul.f32 %v8132_v51, %v11648_v32  ;;  %v8206_v7 = vmul.f32 %v8132_v51, %v11650_v4  ;;  %v11652_v9 = vld [vmem:[#allocation19_spill] sm:$0xff]  ;;  %v11654_v11 = vld [vmem:[#allocation21_spill] sm:$0xff] }
 0x439   :  { %11645 = vst [vmem:[#allocation8_spill] sm:$0xff] %v8194_v3  ;;  %11647 = vst [vmem:[#allocation7_spill] sm:$0xff] %v8198_v8  ;;  %v8210_v26 = vmul.f32 %v8132_v51, %v11652_v9  ;;  %v8214_v34 = vmul.f32 %v8132_v51, %v11654_v11  ;;  %v11656_v3 = vld [vmem:[#allocation22_spill] sm:$0xff]  ;;  %v11658_v8 = vld [vmem:[#allocation24_spill] sm:$0xff] }
 0x43a   :  { %11649 = vst [vmem:[#allocation9_spill] sm:$0xff] %v8202_v50  ;;  %11651 = vst [vmem:[#allocation10_spill] sm:$0xff] %v8206_v7  ;;  %v8218_v35 = vmul.f32 %v8132_v51, %v11656_v3  ;;  %v8222_v32 = vmul.f32 %v8132_v51, %v11658_v8  ;;  %v11660_v50 = vld [vmem:[#allocation23_spill] sm:$0xff]  ;;  %v11662_v7 = vld [vmem:[#allocation25_spill] sm:$0xff] }
 0x43b   :  { %11653 = vst [vmem:[#allocation12_spill] sm:$0xff] %v8210_v26  ;;  %11655 = vst [vmem:[#allocation11_spill] sm:$0xff] %v8214_v34  ;;  %v8226_v4 = vmul.f32 %v8132_v51, %v11660_v50  ;;  %v8230_v9 = vmul.f32 %v8132_v51, %v11662_v7  ;;  %v11663_v26 = vld [vmem:[#allocation26_spill] sm:$0xff]  ;;  %v11665_v34 = vld [vmem:[#allocation28_spill] sm:$0xff] }
 0x43c   :  { %11657 = vst [vmem:[#allocation13_spill] sm:$0xff] %v8218_v35  ;;  %11659 = vst [vmem:[#allocation14_spill] sm:$0xff] %v8222_v32  ;;  %v8234_v11 = vmul.f32 %v8132_v51, %v11663_v26  ;;  %v8238_v3 = vmul.f32 %v8132_v51, %v11665_v34  ;;  %v11666_v35 = vld [vmem:[#allocation27_spill] sm:$0xff]  ;;  %v11667_v32 = vld [vmem:[#allocation29_spill] sm:$0xff]  ;;  %v8254_v26 = vmul.f32 %v8132_v51, %v7807_v31 }
 0x43d   :  { %11661 = vst [vmem:[#allocation16_spill] sm:$0xff] %v8226_v4  ;;  %v8242_v8 = vmul.f32 %v8132_v51, %v11666_v35  ;;  %v8246_v50 = vmul.f32 %v8132_v51, %v11667_v32  ;;  %v11668_v4 = vld [vmem:[#allocation30_spill] sm:$0xff]  ;;  %v8262_v35 = vmul.f32 %v8132_v51, %v7821_v5  ;;  %v8266_v32 = vmul.f32 %v8132_v51, %v7828_v19 }
 0x43e   :  { %11664 = vst [vmem:[#allocation15_spill] sm:$0xff] %v8234_v11  ;;  %v8250_v7 = vmul.f32 %v8132_v51, %v11668_v4  ;;  %v11669_v11 = vld [vmem:[#allocation32_spill] sm:$0xff]  ;;  %v8270_v4 = vmul.f32 %v8132_v51, %v7232_v47  ;;  %v8274_v31 = vmul.f32 %v8132_v51, %v7236_v6  ;;  %v8282_v5 = vmul.f32 %v8132_v51, %v7244_v46 }
 0x43f   :  { %v8258_v34 = vmul.f32 %v8132_v51, %v11669_v11  ;;  %v8278_v11 = vmul.f32 %v8132_v51, %v7240_v0  ;;  %v8286_v19 = vmul.f32 %v8132_v51, %v7248_v62  ;;  %v8290_v47 = vmul.f32 %v8132_v51, %v7252_v52 }
 0x440   :  { %v8294_v6 = vmul.f32 %v8132_v51, %v7256_v48  ;;  %v8298_v0 = vmul.f32 %v8132_v51, %v7260_v53  ;;  %v8302_v46 = vmul.f32 %v8132_v51, %v7264_v14  ;;  %v8306_v62 = vmul.f32 %v8132_v51, %v7268_v18 }
 0x441   :  { %v8310_v52 = vmul.f32 %v8132_v51, %v7272_v15  ;;  %v8314_v48 = vmul.f32 %v8132_v51, %v7276_v25  ;;  %v8318_v53 = vmul.f32 %v8132_v51, %v7280_v49  ;;  %v8322_v14 = vmul.f32 %v8132_v51, %v7284_v56 }
 0x442   :  { %v8326_v18 = vmul.f32 %v8132_v51, %v7288_v54  ;;  %v8330_v15 = vmul.f32 %v8132_v51, %v7292_v61  ;;  %v8334_v25 = vmul.f32 %v8132_v51, %v7296_v30  ;;  %v8338_v49 = vmul.f32 %v8132_v51, %v7300_v36 }
 0x443   :  { %v8342_v56 = vmul.f32 %v8132_v51, %v7304_v17  ;;  %v8346_v54 = vmul.f32 %v8132_v51, %v7308_v39  ;;  %v8350_v61 = vmul.f32 %v8132_v51, %v7312_v16  ;;  %v8354_v30 = vmul.f32 %v8132_v51, %v7316_v29 }
 0x444   :  { %v8358_v36 = vmul.f32 %v8132_v51, %v7320_v2  ;;  %v8362_v17 = vmul.f32 %v8132_v51, %v7324_v33  ;;  %v8366_v39 = vmul.f32 %v8132_v51, %v7328_v27  ;;  %v8370_v16 = vmul.f32 %v8132_v51, %v7332_v28 }
 0x445   :  { %v8374_v29 = vmul.f32 %v8132_v51, %v7336_v24  ;;  %v8378_v2 = vmul.f32 %v8132_v51, %v7340_v43  ;;  %v8382_v33 = vmul.f32 %v8132_v51, %v7344_v1  ;;  %v8386_v27 = vmul.f32 %v8132_v51, %v7348_v13 }
 0x446   :  { %v8390_v28 = vmul.f32 %v8132_v51, %v7352_v58  ;;  %v8394_v24 = vmul.f32 %v8132_v51, %v7356_v42  ;;  %v8398_v43 = vmul.f32 %v8132_v51, %v7360_v41  ;;  %v8402_v1 = vmul.f32 %v8132_v51, %v7364_v45 }
 0x447   :  { %v8406_v13 = vmul.f32 %v8132_v51, %v7368_v38  ;;  %v8410_v58 = vmul.f32 %v8132_v51, %v7372_v44  ;;  %v8414_v42 = vmul.f32 %v8132_v51, %v7376_v23  ;;  %v8418_v41 = vmul.f32 %v8132_v51, %v7380_v21 }
 0x448   :  { %v8422_v45 = vmul.f32 %v8132_v51, %v7384_v20  ;;  %v8426_v38 = vmul.f32 %v8132_v51, %v7388_v55  ;;  %v8430_v44 = vmul.f32 %v8132_v51, %v7392_v63  ;;  %v8434_v23 = vmul.f32 %v8132_v51, %v7396_v57 }
 0x449   :  { %11670 = vst [vmem:[#allocation17_spill] sm:$0xff] %v8410_v58  ;;  %11671 = vst [vmem:[#allocation18_spill] sm:$0xff] %v8414_v42  ;;  %v11677_v42 = vld [vmem:[#allocation80_spill] sm:$0xff]  ;;  %v11776_v58 = vld [vmem:[#allocation87_spill] sm:$0xff] }
 0x44a   :  { %11672 = vst [vmem:[#allocation20_spill] sm:$0xff] %v8418_v41  ;;  %11673 = vst [vmem:[#allocation19_spill] sm:$0xff] %v8422_v45  ;;  %v8438_v21 = vmul.f32 %v8132_v51, %v11677_v42  ;;  %v11679_v41 = vld [vmem:[#allocation81_spill] sm:$0xff]  ;;  %v11681_v45 = vld [vmem:[#allocation82_spill] sm:$0xff] }
 0x44b   :  { %11674 = vst [vmem:[#allocation21_spill] sm:$0xff] %v8426_v38  ;;  %11675 = vst [vmem:[#allocation22_spill] sm:$0xff] %v8430_v44  ;;  %v8442_v20 = vmul.f32 %v8132_v51, %v11679_v41  ;;  %v8446_v55 = vmul.f32 %v8132_v51, %v11681_v45  ;;  %v11683_v38 = vld [vmem:[#allocation83_spill] sm:$0xff] }
 0x44c   :  { %11676 = vst [vmem:[#allocation24_spill] sm:$0xff] %v8434_v23  ;;  %11678 = vst [vmem:[#allocation23_spill] sm:$0xff] %v8438_v21  ;;  %v8450_v63 = vmul.f32 %v8132_v51, %v11683_v38  ;;  %v11685_v44 = vld [vmem:[#allocation35_spill] sm:$0xff]  ;;  %v11687_v23 = vld [vmem:[#allocation36_spill] sm:$0xff] }
 0x44d   :  { %11680 = vst [vmem:[#allocation25_spill] sm:$0xff] %v8442_v20  ;;  %11682 = vst [vmem:[#allocation26_spill] sm:$0xff] %v8446_v55  ;;  %v8454_v57 = vmul.f32 %v8132_v51, %v11685_v44  ;;  %v8458_v42 = vmul.f32 %v8132_v51, %v11687_v23  ;;  %v11689_v21 = vld [vmem:[#allocation38_spill] sm:$0xff]  ;;  %v11691_v20 = vld [vmem:[#allocation37_spill] sm:$0xff] }
 0x44e   :  { %11684 = vst [vmem:[#allocation28_spill] sm:$0xff] %v8450_v63  ;;  %v8462_v41 = vmul.f32 %v8132_v51, %v11689_v21  ;;  %v8466_v45 = vmul.f32 %v8132_v51, %v11691_v20  ;;  %v11693_v55 = vld [vmem:[#allocation39_spill] sm:$0xff]  ;;  %v11695_v63 = vld [vmem:[#allocation40_spill] sm:$0xff] }
 0x44f   :  { %11686 = vst [vmem:[#allocation27_spill] sm:$0xff] %v8454_v57  ;;  %11688 = vst [vmem:[#allocation29_spill] sm:$0xff] %v8458_v42  ;;  %v8470_v38 = vmul.f32 %v8132_v51, %v11693_v55  ;;  %v8474_v44 = vmul.f32 %v8132_v51, %v11695_v63  ;;  %v11697_v57 = vld [vmem:[#allocation42_spill] sm:$0xff]  ;;  %v11699_v42 = vld [vmem:[#allocation41_spill] sm:$0xff] }
 0x450   :  { %11690 = vst [vmem:[#allocation30_spill] sm:$0xff] %v8462_v41  ;;  %11692 = vst [vmem:[#allocation32_spill] sm:$0xff] %v8466_v45  ;;  %v8478_v23 = vmul.f32 %v8132_v51, %v11697_v57  ;;  %v8482_v21 = vmul.f32 %v8132_v51, %v11699_v42  ;;  %v11701_v41 = vld [vmem:[#allocation43_spill] sm:$0xff]  ;;  %v11703_v45 = vld [vmem:[#allocation44_spill] sm:$0xff] }
 0x451   :  { %11694 = vst [vmem:[#allocation80_spill] sm:$0xff] %v8470_v38  ;;  %11696 = vst [vmem:[#allocation81_spill] sm:$0xff] %v8474_v44  ;;  %v8486_v20 = vmul.f32 %v8132_v51, %v11701_v41  ;;  %v8490_v55 = vmul.f32 %v8132_v51, %v11703_v45  ;;  %v11705_v38 = vld [vmem:[#allocation46_spill] sm:$0xff]  ;;  %v11707_v44 = vld [vmem:[#allocation45_spill] sm:$0xff] }
 0x452   :  { %11698 = vst [vmem:[#allocation82_spill] sm:$0xff] %v8478_v23  ;;  %11700 = vst [vmem:[#allocation83_spill] sm:$0xff] %v8482_v21  ;;  %v8494_v63 = vmul.f32 %v8132_v51, %v11705_v38  ;;  %v8498_v57 = vmul.f32 %v8132_v51, %v11707_v44  ;;  %v11709_v23 = vld [vmem:[#allocation47_spill] sm:$0xff]  ;;  %v11711_v21 = vld [vmem:[#allocation48_spill] sm:$0xff] }
 0x453   :  { %11702 = vst [vmem:[#allocation35_spill] sm:$0xff] %v8486_v20  ;;  %11704 = vst [vmem:[#allocation36_spill] sm:$0xff] %v8490_v55  ;;  %v8502_v42 = vmul.f32 %v8132_v51, %v11709_v23  ;;  %v8506_v41 = vmul.f32 %v8132_v51, %v11711_v21  ;;  %v11713_v20 = vld [vmem:[#allocation50_spill] sm:$0xff]  ;;  %v11715_v55 = vld [vmem:[#allocation49_spill] sm:$0xff] }
 0x454   :  { %11706 = vst [vmem:[#allocation38_spill] sm:$0xff] %v8494_v63  ;;  %11708 = vst [vmem:[#allocation37_spill] sm:$0xff] %v8498_v57  ;;  %v8510_v45 = vmul.f32 %v8132_v51, %v11713_v20  ;;  %v8514_v38 = vmul.f32 %v8132_v51, %v11715_v55  ;;  %v11717_v63 = vld [vmem:[#allocation51_spill] sm:$0xff]  ;;  %v11719_v57 = vld [vmem:[#allocation52_spill] sm:$0xff] }
 0x455   :  { %11710 = vst [vmem:[#allocation39_spill] sm:$0xff] %v8502_v42  ;;  %11712 = vst [vmem:[#allocation40_spill] sm:$0xff] %v8506_v41  ;;  %v8518_v44 = vmul.f32 %v8132_v51, %v11717_v63  ;;  %v8522_v23 = vmul.f32 %v8132_v51, %v11719_v57  ;;  %v11721_v42 = vld [vmem:[#allocation54_spill] sm:$0xff]  ;;  %v11723_v41 = vld [vmem:[#allocation53_spill] sm:$0xff] }
 0x456   :  { %11714 = vst [vmem:[#allocation42_spill] sm:$0xff] %v8510_v45  ;;  %11716 = vst [vmem:[#allocation41_spill] sm:$0xff] %v8514_v38  ;;  %v8526_v21 = vmul.f32 %v8132_v51, %v11721_v42  ;;  %v8530_v20 = vmul.f32 %v8132_v51, %v11723_v41  ;;  %v11725_v45 = vld [vmem:[#allocation55_spill] sm:$0xff]  ;;  %v11727_v38 = vld [vmem:[#allocation56_spill] sm:$0xff] }
 0x457   :  { %11718 = vst [vmem:[#allocation43_spill] sm:$0xff] %v8518_v44  ;;  %11720 = vst [vmem:[#allocation44_spill] sm:$0xff] %v8522_v23  ;;  %v8534_v55 = vmul.f32 %v8132_v51, %v11725_v45  ;;  %v8538_v63 = vmul.f32 %v8132_v51, %v11727_v38  ;;  %v11729_v44 = vld [vmem:[#allocation58_spill] sm:$0xff]  ;;  %v11731_v23 = vld [vmem:[#allocation57_spill] sm:$0xff] }
 0x458   :  { %11722 = vst [vmem:[#allocation46_spill] sm:$0xff] %v8526_v21  ;;  %11724 = vst [vmem:[#allocation45_spill] sm:$0xff] %v8530_v20  ;;  %v8542_v57 = vmul.f32 %v8132_v51, %v11729_v44  ;;  %v8546_v42 = vmul.f32 %v8132_v51, %v11731_v23  ;;  %v11733_v21 = vld [vmem:[#allocation59_spill] sm:$0xff]  ;;  %v11735_v20 = vld [vmem:[#allocation60_spill] sm:$0xff] }
 0x459   :  { %11726 = vst [vmem:[#allocation47_spill] sm:$0xff] %v8534_v55  ;;  %11728 = vst [vmem:[#allocation48_spill] sm:$0xff] %v8538_v63  ;;  %v8550_v41 = vmul.f32 %v8132_v51, %v11733_v21  ;;  %v8554_v45 = vmul.f32 %v8132_v51, %v11735_v20  ;;  %v11737_v55 = vld [vmem:[#allocation62_spill] sm:$0xff]  ;;  %v11739_v63 = vld [vmem:[#allocation61_spill] sm:$0xff] }
 0x45a   :  { %11730 = vst [vmem:[#allocation50_spill] sm:$0xff] %v8542_v57  ;;  %11732 = vst [vmem:[#allocation49_spill] sm:$0xff] %v8546_v42  ;;  %v8558_v38 = vmul.f32 %v8132_v51, %v11737_v55  ;;  %v8562_v44 = vmul.f32 %v8132_v51, %v11739_v63  ;;  %v11741_v57 = vld [vmem:[#allocation63_spill] sm:$0xff]  ;;  %v11743_v42 = vld [vmem:[#allocation64_spill] sm:$0xff] }
 0x45b   :  { %11734 = vst [vmem:[#allocation51_spill] sm:$0xff] %v8550_v41  ;;  %11736 = vst [vmem:[#allocation52_spill] sm:$0xff] %v8554_v45  ;;  %v8566_v23 = vmul.f32 %v8132_v51, %v11741_v57  ;;  %v8570_v21 = vmul.f32 %v8132_v51, %v11743_v42  ;;  %v11745_v41 = vld [vmem:[#allocation66_spill] sm:$0xff]  ;;  %v11747_v45 = vld [vmem:[#allocation65_spill] sm:$0xff] }
 0x45c   :  { %11738 = vst [vmem:[#allocation54_spill] sm:$0xff] %v8558_v38  ;;  %11740 = vst [vmem:[#allocation53_spill] sm:$0xff] %v8562_v44  ;;  %v8574_v20 = vmul.f32 %v8132_v51, %v11745_v41  ;;  %v8578_v55 = vmul.f32 %v8132_v51, %v11747_v45  ;;  %v11749_v38 = vld [vmem:[#allocation67_spill] sm:$0xff]  ;;  %v11751_v44 = vld [vmem:[#allocation68_spill] sm:$0xff] }
 0x45d   :  { %11742 = vst [vmem:[#allocation55_spill] sm:$0xff] %v8566_v23  ;;  %11744 = vst [vmem:[#allocation56_spill] sm:$0xff] %v8570_v21  ;;  %v8582_v63 = vmul.f32 %v8132_v51, %v11749_v38  ;;  %v8586_v57 = vmul.f32 %v8132_v51, %v11751_v44  ;;  %v11753_v23 = vld [vmem:[#allocation70_spill] sm:$0xff]  ;;  %v11755_v21 = vld [vmem:[#allocation69_spill] sm:$0xff] }
 0x45e   :  { %11746 = vst [vmem:[#allocation58_spill] sm:$0xff] %v8574_v20  ;;  %11748 = vst [vmem:[#allocation57_spill] sm:$0xff] %v8578_v55  ;;  %v8590_v42 = vmul.f32 %v8132_v51, %v11753_v23  ;;  %v8594_v41 = vmul.f32 %v8132_v51, %v11755_v21  ;;  %v11757_v20 = vld [vmem:[#allocation71_spill] sm:$0xff]  ;;  %v11759_v55 = vld [vmem:[#allocation72_spill] sm:$0xff] }
 0x45f   :  { %11750 = vst [vmem:[#allocation59_spill] sm:$0xff] %v8582_v63  ;;  %11752 = vst [vmem:[#allocation60_spill] sm:$0xff] %v8586_v57  ;;  %v8598_v45 = vmul.f32 %v8132_v51, %v11757_v20  ;;  %v8602_v38 = vmul.f32 %v8132_v51, %v11759_v55  ;;  %v11761_v63 = vld [vmem:[#allocation74_spill] sm:$0xff]  ;;  %v11763_v57 = vld [vmem:[#allocation73_spill] sm:$0xff] }
 0x460   :  { %11754 = vst [vmem:[#allocation62_spill] sm:$0xff] %v8590_v42  ;;  %11756 = vst [vmem:[#allocation61_spill] sm:$0xff] %v8594_v41  ;;  %v8606_v44 = vmul.f32 %v8132_v51, %v11761_v63  ;;  %v8610_v23 = vmul.f32 %v8132_v51, %v11763_v57  ;;  %v11765_v42 = vld [vmem:[#allocation75_spill] sm:$0xff]  ;;  %v11767_v41 = vld [vmem:[#allocation76_spill] sm:$0xff] }
 0x461   :  { %11758 = vst [vmem:[#allocation63_spill] sm:$0xff] %v8598_v45  ;;  %11760 = vst [vmem:[#allocation64_spill] sm:$0xff] %v8602_v38  ;;  %v8614_v21 = vmul.f32 %v8132_v51, %v11765_v42  ;;  %v8618_v20 = vmul.f32 %v8132_v51, %v11767_v41  ;;  %v11769_v45 = vld [vmem:[#allocation84_spill] sm:$0xff]  ;;  %v8624_v38 = vpop.permute.xlu1 %4322  ;;  %v11771_v63 = vld [vmem:[#allocation77_spill] sm:$0xff] }
 0x462   :  { %11762 = vst [vmem:[#allocation66_spill] sm:$0xff] %v8606_v44  ;;  %11764 = vst [vmem:[#allocation65_spill] sm:$0xff] %v8610_v23  ;;  %v8622_v55 = vmul.f32 %v8132_v51, %v11769_v45  ;;  %v8628_v44 = vmul.f32 %v8132_v51, %v11771_v63  ;;  %v11772_v57 = vld [vmem:[#allocation78_spill] sm:$0xff]  ;;  %v11773_v42 = vld [vmem:[#allocation79_spill] sm:$0xff]  ;;  %v8648_v63 = vmul.f32 %v8132_v51, %v11776_v58 }
 0x463   :  { %11766 = vst [vmem:[#allocation67_spill] sm:$0xff] %v8614_v21  ;;  %11768 = vst [vmem:[#allocation68_spill] sm:$0xff] %v8618_v20  ;;  %v8632_v23 = vmul.f32 %v8132_v51, %v11772_v57  ;;  %v8636_v21 = vmul.f32 %v8132_v51, %v11773_v42  ;;  %v11774_v41 = vld [vmem:[#allocation85_spill] sm:$0xff]  ;;  %v11775_v45 = vld [vmem:[#allocation86_spill] sm:$0xff]  ;;  %v8652_v57 = vmul.f32 %v8624_v38, %v8138_v22 }
 0x464   :  { %11770 = vst [vmem:[#allocation70_spill] sm:$0xff] %v8622_v55  ;;  %v8640_v20 = vmul.f32 %v8132_v51, %v11774_v41  ;;  %v8644_v55 = vmul.f32 %v8132_v51, %v11775_v45  ;;  %v8656_v42 = vmul.f32 %v8624_v38, %v8142_v10  ;;  %v8660_v41 = vmul.f32 %v8624_v38, %v8146_v40  ;;  %v11782_v58 = vld [vmem:[#allocation33_spill] sm:$0xff] }
 0x465   :  { %v8664_v45 = vmul.f32 %v8624_v38, %v8150_v37  ;;  %v8668_v51 = vmul.f32 %v8624_v38, %v8154_v60  ;;  %v8672_v22 = vmul.f32 %v8624_v38, %v8158_v12  ;;  %v8676_v10 = vmul.f32 %v8624_v38, %v8162_v59 }
 0x466   :  { %11777 = vst [vmem:[#allocation69_spill] sm:$0xff] %v8660_v41  ;;  %v8680_v40 = vmul.f32 %v8624_v38, %v11782_v58  ;;  %v11784_v41 = vld [vmem:[#allocation34_spill] sm:$0xff] }
 0x467   :  { %11778 = vst [vmem:[#allocation71_spill] sm:$0xff] %v8664_v45  ;;  %11779 = vst [vmem:[#allocation72_spill] sm:$0xff] %v8668_v51  ;;  %v8684_v37 = vmul.f32 %v8624_v38, %v11784_v41  ;;  %v11786_v45 = vld [vmem:[#allocation2_spill] sm:$0xff]  ;;  %v11788_v51 = vld [vmem:[#allocation4_spill] sm:$0xff] }
 0x468   :  { %11780 = vst [vmem:[#allocation74_spill] sm:$0xff] %v8672_v22  ;;  %11781 = vst [vmem:[#allocation73_spill] sm:$0xff] %v8676_v10  ;;  %v8688_v60 = vmul.f32 %v8624_v38, %v11786_v45  ;;  %v8692_v12 = vmul.f32 %v8624_v38, %v11788_v51  ;;  %v11790_v22 = vld [vmem:[#allocation3_spill] sm:$0xff]  ;;  %v11792_v10 = vld [vmem:[#allocation5_spill] sm:$0xff] }
 0x469   :  { %11783 = vst [vmem:[#allocation75_spill] sm:$0xff] %v8680_v40  ;;  %11785 = vst [vmem:[#allocation76_spill] sm:$0xff] %v8684_v37  ;;  %v8696_v59 = vmul.f32 %v8624_v38, %v11790_v22  ;;  %v8700_v58 = vmul.f32 %v8624_v38, %v11792_v10  ;;  %v11794_v40 = vld [vmem:[#allocation6_spill] sm:$0xff]  ;;  %v11796_v37 = vld [vmem:[#allocation8_spill] sm:$0xff] }
 0x46a   :  { %11787 = vst [vmem:[#allocation84_spill] sm:$0xff] %v8688_v60  ;;  %11789 = vst [vmem:[#allocation77_spill] sm:$0xff] %v8692_v12  ;;  %v8704_v41 = vmul.f32 %v8624_v38, %v11794_v40  ;;  %v8708_v45 = vmul.f32 %v8624_v38, %v11796_v37  ;;  %v11798_v60 = vld [vmem:[#allocation7_spill] sm:$0xff]  ;;  %v11800_v12 = vld [vmem:[#allocation9_spill] sm:$0xff] }
 0x46b   :  { %11791 = vst [vmem:[#allocation78_spill] sm:$0xff] %v8696_v59  ;;  %11793 = vst [vmem:[#allocation79_spill] sm:$0xff] %v8700_v58  ;;  %v8712_v51 = vmul.f32 %v8624_v38, %v11798_v60  ;;  %v8716_v22 = vmul.f32 %v8624_v38, %v11800_v12  ;;  %v11802_v59 = vld [vmem:[#allocation10_spill] sm:$0xff]  ;;  %v11803_v58 = vld [vmem:[#allocation12_spill] sm:$0xff] }
 0x46c   :  { %11795 = vst [vmem:[#allocation85_spill] sm:$0xff] %v8704_v41  ;;  %11797 = vst [vmem:[#allocation86_spill] sm:$0xff] %v8708_v45  ;;  %v8720_v10 = vmul.f32 %v8624_v38, %v11802_v59  ;;  %v8724_v40 = vmul.f32 %v8624_v38, %v11803_v58  ;;  %v11805_v41 = vld [vmem:[#allocation11_spill] sm:$0xff]  ;;  %v11806_v45 = vld [vmem:[#allocation13_spill] sm:$0xff]  ;;  %v8744_v58 = vmul.f32 %v8624_v38, %v8230_v9 }
 0x46d   :  { %11799 = vst [vmem:[#allocation87_spill] sm:$0xff] %v8712_v51  ;;  %11801 = vst [vmem:[#allocation33_spill] sm:$0xff] %v8716_v22  ;;  %v8728_v37 = vmul.f32 %v8624_v38, %v11805_v41  ;;  %v8732_v60 = vmul.f32 %v8624_v38, %v11806_v45  ;;  %v11807_v51 = vld [vmem:[#allocation14_spill] sm:$0xff]  ;;  %v11808_v22 = vld [vmem:[#allocation16_spill] sm:$0xff]  ;;  %v8752_v45 = vmul.f32 %v8624_v38, %v8238_v3 }
 0x46e   :  { %11804 = vst [vmem:[#allocation34_spill] sm:$0xff] %v8724_v40  ;;  %v8736_v12 = vmul.f32 %v8624_v38, %v11807_v51  ;;  %v8740_v59 = vmul.f32 %v8624_v38, %v11808_v22  ;;  %v11809_v40 = vld [vmem:[#allocation15_spill] sm:$0xff]  ;;  %v8756_v51 = vmul.f32 %v8624_v38, %v8242_v8  ;;  %v8760_v22 = vmul.f32 %v8624_v38, %v8246_v50 }
 0x46f   :  { %v8748_v41 = vmul.f32 %v8624_v38, %v11809_v40  ;;  %v8764_v9 = vmul.f32 %v8624_v38, %v8250_v7  ;;  %v8768_v40 = vmul.f32 %v8624_v38, %v8254_v26  ;;  %v8772_v3 = vmul.f32 %v8624_v38, %v8258_v34 }
 0x470   :  { %v8776_v8 = vmul.f32 %v8624_v38, %v8262_v35  ;;  %v8780_v50 = vmul.f32 %v8624_v38, %v8266_v32  ;;  %v8784_v7 = vmul.f32 %v8624_v38, %v8270_v4  ;;  %v8788_v26 = vmul.f32 %v8624_v38, %v8274_v31 }
 0x471   :  { %v8792_v34 = vmul.f32 %v8624_v38, %v8278_v11  ;;  %v8796_v35 = vmul.f32 %v8624_v38, %v8282_v5  ;;  %v8800_v32 = vmul.f32 %v8624_v38, %v8286_v19  ;;  %v8804_v4 = vmul.f32 %v8624_v38, %v8290_v47 }
 0x472   :  { %v8808_v31 = vmul.f32 %v8624_v38, %v8294_v6  ;;  %v8812_v11 = vmul.f32 %v8624_v38, %v8298_v0  ;;  %v8816_v5 = vmul.f32 %v8624_v38, %v8302_v46  ;;  %v8820_v19 = vmul.f32 %v8624_v38, %v8306_v62 }
 0x473   :  { %v8824_v47 = vmul.f32 %v8624_v38, %v8310_v52  ;;  %v8828_v6 = vmul.f32 %v8624_v38, %v8314_v48  ;;  %v8832_v0 = vmul.f32 %v8624_v38, %v8318_v53  ;;  %v8836_v46 = vmul.f32 %v8624_v38, %v8322_v14 }
 0x474   :  { %v8840_v62 = vmul.f32 %v8624_v38, %v8326_v18  ;;  %v8844_v52 = vmul.f32 %v8624_v38, %v8330_v15  ;;  %v8848_v48 = vmul.f32 %v8624_v38, %v8334_v25  ;;  %v8852_v53 = vmul.f32 %v8624_v38, %v8338_v49 }
 0x475   :  { %v8856_v14 = vmul.f32 %v8624_v38, %v8342_v56  ;;  %v8860_v18 = vmul.f32 %v8624_v38, %v8346_v54  ;;  %v8864_v15 = vmul.f32 %v8624_v38, %v8350_v61  ;;  %v8868_v25 = vmul.f32 %v8624_v38, %v8354_v30 }
 0x476   :  { %v8872_v49 = vmul.f32 %v8624_v38, %v8358_v36  ;;  %v8876_v56 = vmul.f32 %v8624_v38, %v8362_v17  ;;  %v8880_v54 = vmul.f32 %v8624_v38, %v8366_v39  ;;  %v8884_v61 = vmul.f32 %v8624_v38, %v8370_v16 }
 0x477   :  { %v8888_v30 = vmul.f32 %v8624_v38, %v8374_v29  ;;  %v8892_v36 = vmul.f32 %v8624_v38, %v8378_v2  ;;  %v8896_v17 = vmul.f32 %v8624_v38, %v8382_v33  ;;  %v8900_v39 = vmul.f32 %v8624_v38, %v8386_v27 }
 0x478   :  { %v8904_v16 = vmul.f32 %v8624_v38, %v8390_v28  ;;  %v8908_v29 = vmul.f32 %v8624_v38, %v8394_v24  ;;  %v8912_v2 = vmul.f32 %v8624_v38, %v8398_v43  ;;  %v8916_v33 = vmul.f32 %v8624_v38, %v8402_v1 }
 0x479   :  { %11810 = vst [vmem:[#allocation2_spill] sm:$0xff] %v8900_v39  ;;  %v8920_v27 = vmul.f32 %v8624_v38, %v8406_v13  ;;  %v11816_v39 = vld [vmem:[#allocation17_spill] sm:$0xff] }
 0x47a   :  { %11811 = vst [vmem:[#allocation4_spill] sm:$0xff] %v8904_v16  ;;  %11812 = vst [vmem:[#allocation3_spill] sm:$0xff] %v8908_v29  ;;  %v8924_v28 = vmul.f32 %v8624_v38, %v11816_v39  ;;  %v11818_v16 = vld [vmem:[#allocation18_spill] sm:$0xff]  ;;  %v11820_v29 = vld [vmem:[#allocation20_spill] sm:$0xff] }
 0x47b   :  { %11813 = vst [vmem:[#allocation5_spill] sm:$0xff] %v8912_v2  ;;  %11814 = vst [vmem:[#allocation6_spill] sm:$0xff] %v8916_v33  ;;  %v8928_v24 = vmul.f32 %v8624_v38, %v11818_v16  ;;  %v8932_v43 = vmul.f32 %v8624_v38, %v11820_v29  ;;  %v11822_v2 = vld [vmem:[#allocation19_spill] sm:$0xff]  ;;  %v11824_v33 = vld [vmem:[#allocation21_spill] sm:$0xff] }
 0x47c   :  { %11815 = vst [vmem:[#allocation8_spill] sm:$0xff] %v8920_v27  ;;  %11817 = vst [vmem:[#allocation7_spill] sm:$0xff] %v8924_v28  ;;  %v8936_v1 = vmul.f32 %v8624_v38, %v11822_v2  ;;  %v8940_v13 = vmul.f32 %v8624_v38, %v11824_v33  ;;  %v11826_v27 = vld [vmem:[#allocation22_spill] sm:$0xff]  ;;  %v11828_v28 = vld [vmem:[#allocation24_spill] sm:$0xff] }
 0x47d   :  { %11819 = vst [vmem:[#allocation9_spill] sm:$0xff] %v8928_v24  ;;  %11821 = vst [vmem:[#allocation10_spill] sm:$0xff] %v8932_v43  ;;  %v8944_v39 = vmul.f32 %v8624_v38, %v11826_v27  ;;  %v8948_v16 = vmul.f32 %v8624_v38, %v11828_v28  ;;  %v11830_v24 = vld [vmem:[#allocation23_spill] sm:$0xff]  ;;  %v11832_v43 = vld [vmem:[#allocation25_spill] sm:$0xff] }
 0x47e   :  { %11823 = vst [vmem:[#allocation12_spill] sm:$0xff] %v8936_v1  ;;  %11825 = vst [vmem:[#allocation11_spill] sm:$0xff] %v8940_v13  ;;  %v8952_v29 = vmul.f32 %v8624_v38, %v11830_v24  ;;  %v8956_v2 = vmul.f32 %v8624_v38, %v11832_v43  ;;  %v11834_v1 = vld [vmem:[#allocation26_spill] sm:$0xff]  ;;  %v11836_v13 = vld [vmem:[#allocation28_spill] sm:$0xff] }
 0x47f   :  { %11827 = vst [vmem:[#allocation13_spill] sm:$0xff] %v8944_v39  ;;  %11829 = vst [vmem:[#allocation14_spill] sm:$0xff] %v8948_v16  ;;  %v8960_v33 = vmul.f32 %v8624_v38, %v11834_v1  ;;  %v8964_v27 = vmul.f32 %v8624_v38, %v11836_v13  ;;  %v11838_v39 = vld [vmem:[#allocation27_spill] sm:$0xff]  ;;  %v11840_v16 = vld [vmem:[#allocation29_spill] sm:$0xff] }
 0x480   :  { %11831 = vst [vmem:[#allocation16_spill] sm:$0xff] %v8952_v29  ;;  %11833 = vst [vmem:[#allocation15_spill] sm:$0xff] %v8956_v2  ;;  %v8968_v28 = vmul.f32 %v8624_v38, %v11838_v39  ;;  %v8972_v24 = vmul.f32 %v8624_v38, %v11840_v16  ;;  %v11842_v29 = vld [vmem:[#allocation30_spill] sm:$0xff]  ;;  %v11844_v2 = vld [vmem:[#allocation32_spill] sm:$0xff] }
 0x481   :  { %11835 = vst [vmem:[#allocation17_spill] sm:$0xff] %v8960_v33  ;;  %11837 = vst [vmem:[#allocation18_spill] sm:$0xff] %v8964_v27  ;;  %v8976_v43 = vmul.f32 %v8624_v38, %v11842_v29  ;;  %v8980_v1 = vmul.f32 %v8624_v38, %v11844_v2  ;;  %v11846_v33 = vld [vmem:[#allocation80_spill] sm:$0xff]  ;;  %v11848_v27 = vld [vmem:[#allocation81_spill] sm:$0xff] }
 0x482   :  { %11839 = vst [vmem:[#allocation20_spill] sm:$0xff] %v8968_v28  ;;  %11841 = vst [vmem:[#allocation19_spill] sm:$0xff] %v8972_v24  ;;  %v8984_v13 = vmul.f32 %v8624_v38, %v11846_v33  ;;  %v8988_v39 = vmul.f32 %v8624_v38, %v11848_v27  ;;  %v11850_v28 = vld [vmem:[#allocation82_spill] sm:$0xff]  ;;  %v11852_v24 = vld [vmem:[#allocation83_spill] sm:$0xff] }
 0x483   :  { %11843 = vst [vmem:[#allocation21_spill] sm:$0xff] %v8976_v43  ;;  %11845 = vst [vmem:[#allocation22_spill] sm:$0xff] %v8980_v1  ;;  %v8992_v16 = vmul.f32 %v8624_v38, %v11850_v28  ;;  %v8996_v29 = vmul.f32 %v8624_v38, %v11852_v24  ;;  %v11854_v43 = vld [vmem:[#allocation35_spill] sm:$0xff]  ;;  %v11856_v1 = vld [vmem:[#allocation36_spill] sm:$0xff] }
 0x484   :  { %11847 = vst [vmem:[#allocation24_spill] sm:$0xff] %v8984_v13  ;;  %11849 = vst [vmem:[#allocation23_spill] sm:$0xff] %v8988_v39  ;;  %v9000_v2 = vmul.f32 %v8624_v38, %v11854_v43  ;;  %v9004_v33 = vmul.f32 %v8624_v38, %v11856_v1  ;;  %v11858_v13 = vld [vmem:[#allocation38_spill] sm:$0xff]  ;;  %v11860_v39 = vld [vmem:[#allocation37_spill] sm:$0xff] }
 0x485   :  { %11851 = vst [vmem:[#allocation25_spill] sm:$0xff] %v8992_v16  ;;  %11853 = vst [vmem:[#allocation26_spill] sm:$0xff] %v8996_v29  ;;  %v9008_v27 = vmul.f32 %v8624_v38, %v11858_v13  ;;  %v9012_v28 = vmul.f32 %v8624_v38, %v11860_v39  ;;  %v11862_v16 = vld [vmem:[#allocation39_spill] sm:$0xff]  ;;  %v11864_v29 = vld [vmem:[#allocation40_spill] sm:$0xff] }
 0x486   :  { %11855 = vst [vmem:[#allocation28_spill] sm:$0xff] %v9000_v2  ;;  %11857 = vst [vmem:[#allocation27_spill] sm:$0xff] %v9004_v33  ;;  %v9016_v24 = vmul.f32 %v8624_v38, %v11862_v16  ;;  %v9020_v43 = vmul.f32 %v8624_v38, %v11864_v29  ;;  %v11866_v2 = vld [vmem:[#allocation42_spill] sm:$0xff]  ;;  %v11868_v33 = vld [vmem:[#allocation41_spill] sm:$0xff] }
 0x487   :  { %11859 = vst [vmem:[#allocation29_spill] sm:$0xff] %v9008_v27  ;;  %11861 = vst [vmem:[#allocation30_spill] sm:$0xff] %v9012_v28  ;;  %v9024_v1 = vmul.f32 %v8624_v38, %v11866_v2  ;;  %v9028_v13 = vmul.f32 %v8624_v38, %v11868_v33  ;;  %v11870_v27 = vld [vmem:[#allocation43_spill] sm:$0xff]  ;;  %v11872_v28 = vld [vmem:[#allocation44_spill] sm:$0xff] }
 0x488   :  { %11863 = vst [vmem:[#allocation32_spill] sm:$0xff] %v9016_v24  ;;  %11865 = vst [vmem:[#allocation80_spill] sm:$0xff] %v9020_v43  ;;  %v9032_v39 = vmul.f32 %v8624_v38, %v11870_v27  ;;  %v9036_v16 = vmul.f32 %v8624_v38, %v11872_v28  ;;  %v11874_v24 = vld [vmem:[#allocation46_spill] sm:$0xff]  ;;  %v11876_v43 = vld [vmem:[#allocation45_spill] sm:$0xff] }
 0x489   :  { %11867 = vst [vmem:[#allocation81_spill] sm:$0xff] %v9024_v1  ;;  %11869 = vst [vmem:[#allocation82_spill] sm:$0xff] %v9028_v13  ;;  %v9040_v29 = vmul.f32 %v8624_v38, %v11874_v24  ;;  %v9044_v2 = vmul.f32 %v8624_v38, %v11876_v43  ;;  %v11878_v1 = vld [vmem:[#allocation47_spill] sm:$0xff]  ;;  %v11880_v13 = vld [vmem:[#allocation48_spill] sm:$0xff] }
 0x48a   :  { %11871 = vst [vmem:[#allocation83_spill] sm:$0xff] %v9032_v39  ;;  %11873 = vst [vmem:[#allocation35_spill] sm:$0xff] %v9036_v16  ;;  %v9048_v33 = vmul.f32 %v8624_v38, %v11878_v1  ;;  %v9052_v27 = vmul.f32 %v8624_v38, %v11880_v13  ;;  %v11882_v39 = vld [vmem:[#allocation50_spill] sm:$0xff]  ;;  %v11884_v16 = vld [vmem:[#allocation49_spill] sm:$0xff] }
 0x48b   :  { %11875 = vst [vmem:[#allocation36_spill] sm:$0xff] %v9040_v29  ;;  %11877 = vst [vmem:[#allocation38_spill] sm:$0xff] %v9044_v2  ;;  %v9056_v28 = vmul.f32 %v8624_v38, %v11882_v39  ;;  %v9060_v24 = vmul.f32 %v8624_v38, %v11884_v16  ;;  %v11886_v29 = vld [vmem:[#allocation51_spill] sm:$0xff]  ;;  %v11888_v2 = vld [vmem:[#allocation52_spill] sm:$0xff] }
 0x48c   :  { %11879 = vst [vmem:[#allocation37_spill] sm:$0xff] %v9048_v33  ;;  %11881 = vst [vmem:[#allocation39_spill] sm:$0xff] %v9052_v27  ;;  %v9064_v43 = vmul.f32 %v8624_v38, %v11886_v29  ;;  %v9068_v1 = vmul.f32 %v8624_v38, %v11888_v2  ;;  %v11890_v33 = vld [vmem:[#allocation54_spill] sm:$0xff]  ;;  %v11892_v27 = vld [vmem:[#allocation53_spill] sm:$0xff] }
 0x48d   :  { %11883 = vst [vmem:[#allocation40_spill] sm:$0xff] %v9056_v28  ;;  %11885 = vst [vmem:[#allocation42_spill] sm:$0xff] %v9060_v24  ;;  %v9072_v13 = vmul.f32 %v8624_v38, %v11890_v33  ;;  %v9076_v39 = vmul.f32 %v8624_v38, %v11892_v27  ;;  %v11894_v28 = vld [vmem:[#allocation55_spill] sm:$0xff]  ;;  %v11896_v24 = vld [vmem:[#allocation56_spill] sm:$0xff] }
 0x48e   :  { %11887 = vst [vmem:[#allocation41_spill] sm:$0xff] %v9064_v43  ;;  %11889 = vst [vmem:[#allocation43_spill] sm:$0xff] %v9068_v1  ;;  %v9080_v16 = vmul.f32 %v8624_v38, %v11894_v28  ;;  %v9084_v29 = vmul.f32 %v8624_v38, %v11896_v24  ;;  %v11898_v43 = vld [vmem:[#allocation58_spill] sm:$0xff]  ;;  %v11900_v1 = vld [vmem:[#allocation57_spill] sm:$0xff] }
 0x48f   :  { %11891 = vst [vmem:[#allocation44_spill] sm:$0xff] %v9072_v13  ;;  %11893 = vst [vmem:[#allocation46_spill] sm:$0xff] %v9076_v39  ;;  %v9088_v2 = vmul.f32 %v8624_v38, %v11898_v43  ;;  %v9092_v33 = vmul.f32 %v8624_v38, %v11900_v1  ;;  %v11902_v13 = vld [vmem:[#allocation59_spill] sm:$0xff]  ;;  %v11904_v39 = vld [vmem:[#allocation60_spill] sm:$0xff] }
 0x490   :  { %11895 = vst [vmem:[#allocation45_spill] sm:$0xff] %v9080_v16  ;;  %11897 = vst [vmem:[#allocation47_spill] sm:$0xff] %v9084_v29  ;;  %v9096_v27 = vmul.f32 %v8624_v38, %v11902_v13  ;;  %v9100_v28 = vmul.f32 %v8624_v38, %v11904_v39  ;;  %v11906_v16 = vld [vmem:[#allocation62_spill] sm:$0xff]  ;;  %v11908_v29 = vld [vmem:[#allocation61_spill] sm:$0xff] }
 0x491   :  { %11899 = vst [vmem:[#allocation48_spill] sm:$0xff] %v9088_v2  ;;  %11901 = vst [vmem:[#allocation50_spill] sm:$0xff] %v9092_v33  ;;  %v9104_v24 = vmul.f32 %v8624_v38, %v11906_v16  ;;  %v9108_v43 = vmul.f32 %v8624_v38, %v11908_v29  ;;  %v11910_v2 = vld [vmem:[#allocation63_spill] sm:$0xff]  ;;  %v11912_v33 = vld [vmem:[#allocation64_spill] sm:$0xff] }
 0x492   :  { %11903 = vst [vmem:[#allocation49_spill] sm:$0xff] %v9096_v27  ;;  %11905 = vst [vmem:[#allocation51_spill] sm:$0xff] %v9100_v28  ;;  %v9112_v1 = vmul.f32 %v8624_v38, %v11910_v2  ;;  %v9116_v13 = vmul.f32 %v8624_v38, %v11912_v33  ;;  %v11914_v27 = vld [vmem:[#allocation66_spill] sm:$0xff]  ;;  %v11915_v28 = vld [vmem:[#allocation65_spill] sm:$0xff] }
 0x493   :  { %11907 = vst [vmem:[#allocation52_spill] sm:$0xff] %v9104_v24  ;;  %11909 = vst [vmem:[#allocation54_spill] sm:$0xff] %v9108_v43  ;;  %v9120_v39 = vmul.f32 %v8624_v38, %v11914_v27  ;;  %v9124_v16 = vmul.f32 %v8624_v38, %v11915_v28  ;;  %v11916_v24 = vld [vmem:[#allocation67_spill] sm:$0xff]  ;;  %v11917_v43 = vld [vmem:[#allocation68_spill] sm:$0xff]  ;;  %v9142_v27 = vmul.f32 %v8624_v38, %v8628_v44 }
 0x494   :  { %11911 = vst [vmem:[#allocation53_spill] sm:$0xff] %v9112_v1  ;;  %11913 = vst [vmem:[#allocation55_spill] sm:$0xff] %v9116_v13  ;;  %v9128_v29 = vmul.f32 %v8624_v38, %v11916_v24  ;;  %v9132_v2 = vmul.f32 %v8624_v38, %v11917_v43  ;;  %v11918_v1 = vld [vmem:[#allocation70_spill] sm:$0xff]  ;;  %v9138_v13 = vpop.permute.xlu1 %4456  ;;  %v9146_v28 = vmul.f32 %v8624_v38, %v8632_v23 }
 0x495   :  { %v9136_v33 = vmul.f32 %v8624_v38, %v11918_v1  ;;  %v9150_v24 = vmul.f32 %v8624_v38, %v8636_v21  ;;  %v9154_v43 = vmul.f32 %v8624_v38, %v8640_v20  ;;  %v9158_v1 = vmul.f32 %v8624_v38, %v8644_v55 }
 0x496   :  { %v9162_v44 = vmul.f32 %v8624_v38, %v8648_v63  ;;  %v9166_v23 = vadd.f32 %v9138_v13, %v8652_v57  ;;  %v9170_v21 = vadd.f32 %v9138_v13, %v8656_v42  ;;  %v11931_v63 = vld [vmem:[#allocation74_spill] sm:$0xff] }
 0x497   :  { %11919 = vst [vmem:[#allocation56_spill] sm:$0xff] %v9150_v24  ;;  %11920 = vst [vmem:[#allocation58_spill] sm:$0xff] %v9154_v43  ;;  %v11925_v24 = vld [vmem:[#allocation69_spill] sm:$0xff]  ;;  %v11927_v43 = vld [vmem:[#allocation71_spill] sm:$0xff]  ;;  %v9186_v57 = vadd.f32 %v9138_v13, %v11931_v63 }
 0x498   :  { %11921 = vst [vmem:[#allocation57_spill] sm:$0xff] %v9158_v1  ;;  %11922 = vst [vmem:[#allocation59_spill] sm:$0xff] %v9162_v44  ;;  %v9174_v20 = vadd.f32 %v9138_v13, %v11925_v24  ;;  %v9178_v55 = vadd.f32 %v9138_v13, %v11927_v43  ;;  %v11929_v1 = vld [vmem:[#allocation72_spill] sm:$0xff]  ;;  %v11933_v44 = vld [vmem:[#allocation73_spill] sm:$0xff] }
 0x499   :  { %11923 = vst [vmem:[#allocation60_spill] sm:$0xff] %v9166_v23  ;;  %11924 = vst [vmem:[#allocation62_spill] sm:$0xff] %v9170_v21  ;;  %v9182_v38 = vadd.f32 %v9138_v13, %v11929_v1  ;;  %v9190_v42 = vadd.f32 %v9138_v13, %v11933_v44  ;;  %v11935_v21 = vld [vmem:[#allocation75_spill] sm:$0xff] }
 0x49a   :  { %11926 = vst [vmem:[#allocation61_spill] sm:$0xff] %v9174_v20  ;;  %11928 = vst [vmem:[#allocation63_spill] sm:$0xff] %v9178_v55  ;;  %v9194_v24 = vadd.f32 %v9138_v13, %v11935_v21  ;;  %v11937_v20 = vld [vmem:[#allocation76_spill] sm:$0xff] }
 0x49b   :  { %11930 = vst [vmem:[#allocation64_spill] sm:$0xff] %v9182_v38  ;;  %11932 = vst [vmem:[#allocation66_spill] sm:$0xff] %v9186_v57  ;;  %v9198_v43 = vadd.f32 %v9138_v13, %v11937_v20  ;;  %v11939_v55 = vld [vmem:[#allocation84_spill] sm:$0xff]  ;;  %v11941_v38 = vld [vmem:[#allocation77_spill] sm:$0xff] }
 0x49c   :  { %11934 = vst [vmem:[#allocation65_spill] sm:$0xff] %v9190_v42  ;;  %11936 = vst [vmem:[#allocation67_spill] sm:$0xff] %v9194_v24  ;;  %v9202_v1 = vadd.f32 %v9138_v13, %v11939_v55  ;;  %v9206_v63 = vadd.f32 %v9138_v13, %v11941_v38  ;;  %v11943_v57 = vld [vmem:[#allocation78_spill] sm:$0xff]  ;;  %v11945_v42 = vld [vmem:[#allocation79_spill] sm:$0xff] }
 0x49d   :  { %11938 = vst [vmem:[#allocation68_spill] sm:$0xff] %v9198_v43  ;;  %v9210_v44 = vadd.f32 %v9138_v13, %v11943_v57  ;;  %v9214_v21 = vadd.f32 %v9138_v13, %v11945_v42  ;;  %v11947_v24 = vld [vmem:[#allocation85_spill] sm:$0xff]  ;;  %v11949_v43 = vld [vmem:[#allocation86_spill] sm:$0xff]  ;;  %v9234_v42 = vadd.f32 %v9138_v13, %v8720_v10  ;;  %v9254_v10 = vadd.f32 %v9138_v13, %v8740_v59 }
 0x49e   :  { %11940 = vst [vmem:[#allocation70_spill] sm:$0xff] %v9202_v1  ;;  %11942 = vst [vmem:[#allocation69_spill] sm:$0xff] %v9206_v63  ;;  %v9218_v20 = vadd.f32 %v9138_v13, %v11947_v24  ;;  %v9222_v55 = vadd.f32 %v9138_v13, %v11949_v43  ;;  %v11951_v1 = vld [vmem:[#allocation87_spill] sm:$0xff]  ;;  %v11953_v63 = vld [vmem:[#allocation33_spill] sm:$0xff]  ;;  %v9242_v43 = vadd.f32 %v9138_v13, %v8728_v37 }
 0x49f   :  { %11944 = vst [vmem:[#allocation71_spill] sm:$0xff] %v9210_v44  ;;  %11946 = vst [vmem:[#allocation72_spill] sm:$0xff] %v9214_v21  ;;  %v9226_v38 = vadd.f32 %v9138_v13, %v11951_v1  ;;  %v9230_v57 = vadd.f32 %v9138_v13, %v11953_v63  ;;  %v11956_v21 = vld [vmem:[#allocation34_spill] sm:$0xff]  ;;  %v9246_v1 = vadd.f32 %v9138_v13, %v8732_v60 }
 0x4a0   :  { %11948 = vst [vmem:[#allocation74_spill] sm:$0xff] %v9218_v20  ;;  %11950 = vst [vmem:[#allocation73_spill] sm:$0xff] %v9222_v55  ;;  %v9238_v24 = vadd.f32 %v9138_v13, %v11956_v21  ;;  %v9250_v63 = vadd.f32 %v9138_v13, %v8736_v12  ;;  %v9258_v21 = vadd.f32 %v9138_v13, %v8744_v58 }
 0x4a1   :  { %11952 = vst [vmem:[#allocation75_spill] sm:$0xff] %v9226_v38  ;;  %11954 = vst [vmem:[#allocation76_spill] sm:$0xff] %v9230_v57  ;;  %v9262_v37 = vadd.f32 %v9138_v13, %v8748_v41  ;;  %v9266_v60 = vadd.f32 %v9138_v13, %v8752_v45  ;;  %v9270_v12 = vadd.f32 %v9138_v13, %v8756_v51 }
 0x4a2   :  { %11955 = vst [vmem:[#allocation84_spill] sm:$0xff] %v9234_v42  ;;  %11957 = vst [vmem:[#allocation77_spill] sm:$0xff] %v9238_v24  ;;  %v9274_v59 = vadd.f32 %v9138_v13, %v8760_v22  ;;  %v9278_v58 = vadd.f32 %v9138_v13, %v8764_v9  ;;  %v9282_v41 = vadd.f32 %v9138_v13, %v8768_v40 }
 0x4a3   :  { %11958 = vst [vmem:[#allocation78_spill] sm:$0xff] %v9242_v43  ;;  %11959 = vst [vmem:[#allocation79_spill] sm:$0xff] %v9246_v1  ;;  %v9286_v45 = vadd.f32 %v9138_v13, %v8772_v3  ;;  %v9290_v51 = vadd.f32 %v9138_v13, %v8776_v8  ;;  %v9294_v22 = vadd.f32 %v9138_v13, %v8780_v50 }
 0x4a4   :  { %11960 = vst [vmem:[#allocation85_spill] sm:$0xff] %v9250_v63  ;;  %11961 = vst [vmem:[#allocation86_spill] sm:$0xff] %v9254_v10  ;;  %v9298_v9 = vadd.f32 %v9138_v13, %v8784_v7  ;;  %v9302_v40 = vadd.f32 %v9138_v13, %v8788_v26  ;;  %v9306_v3 = vadd.f32 %v9138_v13, %v8792_v34 }
 0x4a5   :  { %11962 = vst [vmem:[#allocation87_spill] sm:$0xff] %v9258_v21  ;;  %11963 = vst [vmem:[#allocation33_spill] sm:$0xff] %v9262_v37  ;;  %v9310_v8 = vadd.f32 %v9138_v13, %v8796_v35  ;;  %v9314_v50 = vadd.f32 %v9138_v13, %v8800_v32  ;;  %v9318_v7 = vadd.f32 %v9138_v13, %v8804_v4 }
 0x4a6   :  { %11964 = vst [vmem:[#allocation34_spill] sm:$0xff] %v9266_v60  ;;  %11965 = vst [vmem:[#allocation88_spill] sm:$0xff] %v9270_v12  ;;  %v9322_v26 = vadd.f32 %v9138_v13, %v8808_v31  ;;  %v9326_v34 = vadd.f32 %v9138_v13, %v8812_v11  ;;  %v9330_v35 = vadd.f32 %v9138_v13, %v8816_v5 }
 0x4a7   :  { %11966 = vst [vmem:[#allocation89_spill] sm:$0xff] %v9274_v59  ;;  %11967 = vst [vmem:[#allocation90_spill] sm:$0xff] %v9278_v58  ;;  %v9334_v32 = vadd.f32 %v9138_v13, %v8820_v19  ;;  %v9338_v4 = vadd.f32 %v9138_v13, %v8824_v47  ;;  %v9342_v31 = vadd.f32 %v9138_v13, %v8828_v6 }
 0x4a8   :  { %11968 = vst [vmem:[#allocation91_spill] sm:$0xff] %v9282_v41  ;;  %11969 = vst [vmem:[#allocation92_spill] sm:$0xff] %v9286_v45  ;;  %v9346_v11 = vadd.f32 %v9138_v13, %v8832_v0  ;;  %v9350_v5 = vadd.f32 %v9138_v13, %v8836_v46  ;;  %v9354_v19 = vadd.f32 %v9138_v13, %v8840_v62 }
 0x4a9   :  { %11970 = vst [vmem:[#allocation93_spill] sm:$0xff] %v9290_v51  ;;  %11971 = vst [vmem:[#allocation94_spill] sm:$0xff] %v9294_v22  ;;  %v9358_v47 = vadd.f32 %v9138_v13, %v8844_v52  ;;  %v9362_v6 = vadd.f32 %v9138_v13, %v8848_v48  ;;  %v9366_v0 = vadd.f32 %v9138_v13, %v8852_v53 }
 0x4aa   :  { %11972 = vst [vmem:[#allocation95_spill] sm:$0xff] %v9298_v9  ;;  %11973 = vst [vmem:[#allocation96_spill] sm:$0xff] %v9302_v40  ;;  %v9370_v46 = vadd.f32 %v9138_v13, %v8856_v14  ;;  %v9374_v62 = vadd.f32 %v9138_v13, %v8860_v18  ;;  %v9378_v52 = vadd.f32 %v9138_v13, %v8864_v15 }
 0x4ab   :  { %11974 = vst [vmem:[#allocation97_spill] sm:$0xff] %v9306_v3  ;;  %11975 = vst [vmem:[#allocation98_spill] sm:$0xff] %v9310_v8  ;;  %v9382_v48 = vadd.f32 %v9138_v13, %v8868_v25  ;;  %v9386_v53 = vadd.f32 %v9138_v13, %v8872_v49  ;;  %v9390_v14 = vadd.f32 %v9138_v13, %v8876_v56 }
 0x4ac   :  { %11976 = vst [vmem:[#allocation99_spill] sm:$0xff] %v9314_v50  ;;  %11977 = vst [vmem:[#allocation100_spill] sm:$0xff] %v9318_v7  ;;  %v9394_v18 = vadd.f32 %v9138_v13, %v8880_v54  ;;  %v9398_v15 = vadd.f32 %v9138_v13, %v8884_v61  ;;  %v9402_v25 = vadd.f32 %v9138_v13, %v8888_v30 }
 0x4ad   :  { %11978 = vst [vmem:[#allocation101_spill] sm:$0xff] %v9322_v26  ;;  %11979 = vst [vmem:[#allocation102_spill] sm:$0xff] %v9330_v35  ;;  %v9406_v49 = vadd.f32 %v9138_v13, %v8892_v36  ;;  %v9410_v56 = vadd.f32 %v9138_v13, %v8896_v17 }
 0x4ae   :  { %11980 = vst [vmem:[#allocation103_spill] sm:$0xff] %v9334_v32  ;;  %11981 = vst [vmem:[#allocation104_spill] sm:$0xff] %v9338_v4 }
 0x4af   :  { %11982 = vst [vmem:[#allocation105_spill] sm:$0xff] %v9342_v31  ;;  %11983 = vst [vmem:[#allocation106_spill] sm:$0xff] %v9346_v11 }
 0x4b0   :  { %11984 = vst [vmem:[#allocation107_spill] sm:$0xff] %v9350_v5  ;;  %11985 = vst [vmem:[#allocation108_spill] sm:$0xff] %v9354_v19  ;;  %v9731_v19 = vmul.f32 0.2, %v9230_v57 }
 0x4b1   :  { %11986 = vst [vmem:[#allocation109_spill] sm:$0xff] %v9358_v47  ;;  %11987 = vst [vmem:[#allocation110_spill] sm:$0xff] %v9362_v6  ;;  %v9720_v47 = vmul.f32 0.2, %v9218_v20 }
 0x4b2   :  { %11988 = vst [vmem:[#allocation111_spill] sm:$0xff] %v9366_v0  ;;  %11989 = vst [vmem:[#allocation112_spill] sm:$0xff] %v9370_v46  ;;  %v12147_v0 = vld [vmem:[#allocation72_spill] sm:$0xff]  ;;  %v9734_v46 = vmul.f32 0.2, %v9234_v42 }
 0x4b3   :  { %11990 = vst [vmem:[#allocation113_spill] sm:$0xff] %v9374_v62  ;;  %11991 = vst [vmem:[#allocation114_spill] sm:$0xff] %v9378_v52  ;;  %v9712_v62 = vmul.f32 0.2, %v9210_v44  ;;  %v9717_v6 = vmul.f32 0.2, %v12147_v0 }
 0x4b4   :  { %11992 = vst [vmem:[#allocation115_spill] sm:$0xff] %v9382_v48  ;;  %11993 = vst [vmem:[#allocation116_spill] sm:$0xff] %v9386_v53  ;;  %v12144_v48 = vld [vmem:[#allocation69_spill] sm:$0xff]  ;;  %v9753_v42 = vmul.f32 0.2, %v9254_v10 }
 0x4b5   :  { %11994 = vst [vmem:[#allocation117_spill] sm:$0xff] %v9390_v14  ;;  %11995 = vst [vmem:[#allocation118_spill] sm:$0xff] %v9394_v18  ;;  %v12000_v14 = vld [vmem:[#allocation2_spill] sm:$0xff]  ;;  %v12002_v18 = vld [vmem:[#allocation4_spill] sm:$0xff]  ;;  %v9709_v52 = vmul.f32 0.2, %v12144_v48 }
 0x4b6   :  { %11996 = vst [vmem:[#allocation119_spill] sm:$0xff] %v9398_v15  ;;  %11997 = vst [vmem:[#allocation120_spill] sm:$0xff] %v9402_v25  ;;  %v9414_v54 = vadd.f32 %v9138_v13, %v12000_v14  ;;  %v9418_v61 = vadd.f32 %v9138_v13, %v12002_v18  ;;  %v12004_v15 = vld [vmem:[#allocation3_spill] sm:$0xff]  ;;  %v12006_v25 = vld [vmem:[#allocation5_spill] sm:$0xff]  ;;  %v9838_v48 = vmul.f32 0.2, %v9346_v11 }
 0x4b7   :  { %11998 = vst [vmem:[#allocation121_spill] sm:$0xff] %v9406_v49  ;;  %11999 = vst [vmem:[#allocation122_spill] sm:$0xff] %v9410_v56  ;;  %v9422_v30 = vadd.f32 %v9138_v13, %v12004_v15  ;;  %v9426_v36 = vadd.f32 %v9138_v13, %v12006_v25  ;;  %v12008_v49 = vld [vmem:[#allocation6_spill] sm:$0xff]  ;;  %v12010_v56 = vld [vmem:[#allocation8_spill] sm:$0xff] }
 0x4b8   :  { %12001 = vst [vmem:[#allocation2_spill] sm:$0xff] %v9414_v54  ;;  %12003 = vst [vmem:[#allocation4_spill] sm:$0xff] %v9418_v61  ;;  %v9430_v17 = vadd.f32 %v9138_v13, %v12008_v49  ;;  %v9434_v14 = vadd.f32 %v9138_v13, %v12010_v56  ;;  %v12012_v54 = vld [vmem:[#allocation7_spill] sm:$0xff]  ;;  %v12014_v61 = vld [vmem:[#allocation9_spill] sm:$0xff] }
 0x4b9   :  { %12005 = vst [vmem:[#allocation3_spill] sm:$0xff] %v9422_v30  ;;  %12007 = vst [vmem:[#allocation5_spill] sm:$0xff] %v9426_v36  ;;  %v9438_v18 = vadd.f32 %v9138_v13, %v12012_v54  ;;  %v9442_v15 = vadd.f32 %v9138_v13, %v12014_v61  ;;  %v12016_v30 = vld [vmem:[#allocation10_spill] sm:$0xff]  ;;  %v12018_v36 = vld [vmem:[#allocation12_spill] sm:$0xff] }
 0x4ba   :  { %12009 = vst [vmem:[#allocation6_spill] sm:$0xff] %v9430_v17  ;;  %12011 = vst [vmem:[#allocation8_spill] sm:$0xff] %v9434_v14  ;;  %v9446_v25 = vadd.f32 %v9138_v13, %v12016_v30  ;;  %v9450_v49 = vadd.f32 %v9138_v13, %v12018_v36  ;;  %v12020_v17 = vld [vmem:[#allocation11_spill] sm:$0xff]  ;;  %v12022_v14 = vld [vmem:[#allocation13_spill] sm:$0xff] }
 0x4bb   :  { %12013 = vst [vmem:[#allocation7_spill] sm:$0xff] %v9438_v18  ;;  %12015 = vst [vmem:[#allocation9_spill] sm:$0xff] %v9442_v15  ;;  %v9454_v56 = vadd.f32 %v9138_v13, %v12020_v17  ;;  %v9458_v54 = vadd.f32 %v9138_v13, %v12022_v14  ;;  %v12024_v18 = vld [vmem:[#allocation14_spill] sm:$0xff]  ;;  %v12026_v15 = vld [vmem:[#allocation16_spill] sm:$0xff] }
 0x4bc   :  { %12017 = vst [vmem:[#allocation10_spill] sm:$0xff] %v9446_v25  ;;  %12019 = vst [vmem:[#allocation12_spill] sm:$0xff] %v9450_v49  ;;  %v9462_v61 = vadd.f32 %v9138_v13, %v12024_v18  ;;  %v9466_v30 = vadd.f32 %v9138_v13, %v12026_v15  ;;  %v12028_v25 = vld [vmem:[#allocation15_spill] sm:$0xff]  ;;  %v12030_v49 = vld [vmem:[#allocation17_spill] sm:$0xff] }
 0x4bd   :  { %12021 = vst [vmem:[#allocation11_spill] sm:$0xff] %v9454_v56  ;;  %12023 = vst [vmem:[#allocation13_spill] sm:$0xff] %v9458_v54  ;;  %v9470_v36 = vadd.f32 %v9138_v13, %v12028_v25  ;;  %v9474_v17 = vadd.f32 %v9138_v13, %v12030_v49  ;;  %v12032_v56 = vld [vmem:[#allocation18_spill] sm:$0xff]  ;;  %v12034_v54 = vld [vmem:[#allocation20_spill] sm:$0xff] }
 0x4be   :  { %12025 = vst [vmem:[#allocation14_spill] sm:$0xff] %v9462_v61  ;;  %12027 = vst [vmem:[#allocation16_spill] sm:$0xff] %v9466_v30  ;;  %v9478_v14 = vadd.f32 %v9138_v13, %v12032_v56  ;;  %v9482_v18 = vadd.f32 %v9138_v13, %v12034_v54  ;;  %v12036_v61 = vld [vmem:[#allocation19_spill] sm:$0xff]  ;;  %v12038_v30 = vld [vmem:[#allocation21_spill] sm:$0xff] }
 0x4bf   :  { %12029 = vst [vmem:[#allocation15_spill] sm:$0xff] %v9470_v36  ;;  %12031 = vst [vmem:[#allocation17_spill] sm:$0xff] %v9474_v17  ;;  %v9486_v15 = vadd.f32 %v9138_v13, %v12036_v61  ;;  %v9490_v25 = vadd.f32 %v9138_v13, %v12038_v30  ;;  %v12040_v36 = vld [vmem:[#allocation22_spill] sm:$0xff]  ;;  %v12042_v17 = vld [vmem:[#allocation24_spill] sm:$0xff] }
 0x4c0   :  { %12033 = vst [vmem:[#allocation18_spill] sm:$0xff] %v9478_v14  ;;  %12035 = vst [vmem:[#allocation20_spill] sm:$0xff] %v9482_v18  ;;  %v9494_v49 = vadd.f32 %v9138_v13, %v12040_v36  ;;  %v9498_v56 = vadd.f32 %v9138_v13, %v12042_v17  ;;  %v12044_v14 = vld [vmem:[#allocation23_spill] sm:$0xff]  ;;  %v12046_v18 = vld [vmem:[#allocation25_spill] sm:$0xff] }
 0x4c1   :  { %12037 = vst [vmem:[#allocation19_spill] sm:$0xff] %v9486_v15  ;;  %12039 = vst [vmem:[#allocation21_spill] sm:$0xff] %v9490_v25  ;;  %v9502_v54 = vadd.f32 %v9138_v13, %v12044_v14  ;;  %v9506_v61 = vadd.f32 %v9138_v13, %v12046_v18  ;;  %v12048_v15 = vld [vmem:[#allocation26_spill] sm:$0xff]  ;;  %v12050_v25 = vld [vmem:[#allocation28_spill] sm:$0xff] }
 0x4c2   :  { %12041 = vst [vmem:[#allocation22_spill] sm:$0xff] %v9494_v49  ;;  %12043 = vst [vmem:[#allocation24_spill] sm:$0xff] %v9498_v56  ;;  %v9510_v30 = vadd.f32 %v9138_v13, %v12048_v15  ;;  %v9514_v36 = vadd.f32 %v9138_v13, %v12050_v25  ;;  %v12052_v49 = vld [vmem:[#allocation27_spill] sm:$0xff]  ;;  %v12054_v56 = vld [vmem:[#allocation29_spill] sm:$0xff] }
 0x4c3   :  { %12045 = vst [vmem:[#allocation23_spill] sm:$0xff] %v9502_v54  ;;  %12047 = vst [vmem:[#allocation25_spill] sm:$0xff] %v9506_v61  ;;  %v9518_v17 = vadd.f32 %v9138_v13, %v12052_v49  ;;  %v9522_v14 = vadd.f32 %v9138_v13, %v12054_v56  ;;  %v12056_v54 = vld [vmem:[#allocation30_spill] sm:$0xff]  ;;  %v12058_v61 = vld [vmem:[#allocation32_spill] sm:$0xff] }
 0x4c4   :  { %12049 = vst [vmem:[#allocation26_spill] sm:$0xff] %v9510_v30  ;;  %12051 = vst [vmem:[#allocation28_spill] sm:$0xff] %v9514_v36  ;;  %v9526_v18 = vadd.f32 %v9138_v13, %v12056_v54  ;;  %v9530_v15 = vadd.f32 %v9138_v13, %v12058_v61  ;;  %v12060_v30 = vld [vmem:[#allocation80_spill] sm:$0xff]  ;;  %v12062_v36 = vld [vmem:[#allocation81_spill] sm:$0xff] }
 0x4c5   :  { %12053 = vst [vmem:[#allocation27_spill] sm:$0xff] %v9518_v17  ;;  %12055 = vst [vmem:[#allocation29_spill] sm:$0xff] %v9522_v14  ;;  %v9534_v25 = vadd.f32 %v9138_v13, %v12060_v30  ;;  %v9538_v49 = vadd.f32 %v9138_v13, %v12062_v36  ;;  %v12064_v17 = vld [vmem:[#allocation82_spill] sm:$0xff]  ;;  %v12066_v14 = vld [vmem:[#allocation83_spill] sm:$0xff] }
 0x4c6   :  { %12057 = vst [vmem:[#allocation30_spill] sm:$0xff] %v9526_v18  ;;  %12059 = vst [vmem:[#allocation32_spill] sm:$0xff] %v9530_v15  ;;  %v9542_v56 = vadd.f32 %v9138_v13, %v12064_v17  ;;  %v9546_v54 = vadd.f32 %v9138_v13, %v12066_v14  ;;  %v12068_v18 = vld [vmem:[#allocation35_spill] sm:$0xff]  ;;  %v12070_v15 = vld [vmem:[#allocation36_spill] sm:$0xff] }
 0x4c7   :  { %12061 = vst [vmem:[#allocation80_spill] sm:$0xff] %v9534_v25  ;;  %12063 = vst [vmem:[#allocation81_spill] sm:$0xff] %v9538_v49  ;;  %v9550_v61 = vadd.f32 %v9138_v13, %v12068_v18  ;;  %v9554_v30 = vadd.f32 %v9138_v13, %v12070_v15  ;;  %v12072_v25 = vld [vmem:[#allocation38_spill] sm:$0xff]  ;;  %v12074_v49 = vld [vmem:[#allocation37_spill] sm:$0xff] }
 0x4c8   :  { %12065 = vst [vmem:[#allocation82_spill] sm:$0xff] %v9542_v56  ;;  %12067 = vst [vmem:[#allocation83_spill] sm:$0xff] %v9546_v54  ;;  %v9558_v36 = vadd.f32 %v9138_v13, %v12072_v25  ;;  %v9562_v17 = vadd.f32 %v9138_v13, %v12074_v49  ;;  %v12076_v56 = vld [vmem:[#allocation39_spill] sm:$0xff]  ;;  %v12078_v54 = vld [vmem:[#allocation40_spill] sm:$0xff] }
 0x4c9   :  { %12069 = vst [vmem:[#allocation35_spill] sm:$0xff] %v9550_v61  ;;  %12071 = vst [vmem:[#allocation36_spill] sm:$0xff] %v9554_v30  ;;  %v9566_v14 = vadd.f32 %v9138_v13, %v12076_v56  ;;  %v9570_v18 = vadd.f32 %v9138_v13, %v12078_v54  ;;  %v12080_v61 = vld [vmem:[#allocation42_spill] sm:$0xff]  ;;  %v12082_v30 = vld [vmem:[#allocation41_spill] sm:$0xff] }
 0x4ca   :  { %12073 = vst [vmem:[#allocation38_spill] sm:$0xff] %v9558_v36  ;;  %12075 = vst [vmem:[#allocation37_spill] sm:$0xff] %v9562_v17  ;;  %v9574_v15 = vadd.f32 %v9138_v13, %v12080_v61  ;;  %v9578_v25 = vadd.f32 %v9138_v13, %v12082_v30  ;;  %v12084_v36 = vld [vmem:[#allocation43_spill] sm:$0xff]  ;;  %v12086_v17 = vld [vmem:[#allocation44_spill] sm:$0xff] }
 0x4cb   :  { %12077 = vst [vmem:[#allocation39_spill] sm:$0xff] %v9566_v14  ;;  %12079 = vst [vmem:[#allocation40_spill] sm:$0xff] %v9570_v18  ;;  %v9582_v49 = vadd.f32 %v9138_v13, %v12084_v36  ;;  %v9586_v56 = vadd.f32 %v9138_v13, %v12086_v17  ;;  %v12088_v14 = vld [vmem:[#allocation46_spill] sm:$0xff]  ;;  %v12090_v18 = vld [vmem:[#allocation45_spill] sm:$0xff] }
 0x4cc   :  { %12081 = vst [vmem:[#allocation42_spill] sm:$0xff] %v9574_v15  ;;  %12083 = vst [vmem:[#allocation41_spill] sm:$0xff] %v9578_v25  ;;  %v9590_v54 = vadd.f32 %v9138_v13, %v12088_v14  ;;  %v9594_v61 = vadd.f32 %v9138_v13, %v12090_v18  ;;  %v12092_v15 = vld [vmem:[#allocation47_spill] sm:$0xff]  ;;  %v12094_v25 = vld [vmem:[#allocation48_spill] sm:$0xff] }
 0x4cd   :  { %12085 = vst [vmem:[#allocation43_spill] sm:$0xff] %v9582_v49  ;;  %12087 = vst [vmem:[#allocation44_spill] sm:$0xff] %v9586_v56  ;;  %v9598_v30 = vadd.f32 %v9138_v13, %v12092_v15  ;;  %v9602_v36 = vadd.f32 %v9138_v13, %v12094_v25  ;;  %v12096_v49 = vld [vmem:[#allocation50_spill] sm:$0xff]  ;;  %v12098_v56 = vld [vmem:[#allocation49_spill] sm:$0xff] }
 0x4ce   :  { %12089 = vst [vmem:[#allocation46_spill] sm:$0xff] %v9590_v54  ;;  %12091 = vst [vmem:[#allocation45_spill] sm:$0xff] %v9594_v61  ;;  %v9606_v17 = vadd.f32 %v9138_v13, %v12096_v49  ;;  %v9610_v14 = vadd.f32 %v9138_v13, %v12098_v56  ;;  %v12100_v54 = vld [vmem:[#allocation51_spill] sm:$0xff]  ;;  %v12102_v61 = vld [vmem:[#allocation52_spill] sm:$0xff] }
 0x4cf   :  { %12093 = vst [vmem:[#allocation47_spill] sm:$0xff] %v9598_v30  ;;  %12095 = vst [vmem:[#allocation48_spill] sm:$0xff] %v9602_v36  ;;  %v9614_v18 = vadd.f32 %v9138_v13, %v12100_v54  ;;  %v9618_v15 = vadd.f32 %v9138_v13, %v12102_v61  ;;  %v12104_v30 = vld [vmem:[#allocation54_spill] sm:$0xff]  ;;  %v12106_v36 = vld [vmem:[#allocation53_spill] sm:$0xff]  ;;  %v9634_v54 = vadd.f32 %v9138_v13, %v9120_v39 }
 0x4d0   :  { %12097 = vst [vmem:[#allocation50_spill] sm:$0xff] %v9606_v17  ;;  %12099 = vst [vmem:[#allocation49_spill] sm:$0xff] %v9610_v14  ;;  %v9622_v25 = vadd.f32 %v9138_v13, %v12104_v30  ;;  %v9626_v49 = vadd.f32 %v9138_v13, %v12106_v36  ;;  %v12108_v17 = vld [vmem:[#allocation55_spill] sm:$0xff]  ;;  %v9638_v61 = vadd.f32 %v9138_v13, %v9124_v16  ;;  %v12140_v14 = vld [vmem:[#allocation68_spill] sm:$0xff] }
 0x4d1   :  { %12101 = vst [vmem:[#allocation51_spill] sm:$0xff] %v9614_v18  ;;  %12103 = vst [vmem:[#allocation52_spill] sm:$0xff] %v9618_v15  ;;  %v9630_v56 = vadd.f32 %v9138_v13, %v12108_v17  ;;  %v9642_v30 = vadd.f32 %v9138_v13, %v9128_v29  ;;  %v9646_v36 = vadd.f32 %v9138_v13, %v9132_v2  ;;  %v12138_v15 = vld [vmem:[#allocation67_spill] sm:$0xff]  ;;  %v9701_v53 = vmul.f32 0.2, %v12140_v14  ;;  %v12185_v44 = vld [vmem:[#allocation109_spill] sm:$0xff] }
 0x4d2   :  { %12105 = vst [vmem:[#allocation54_spill] sm:$0xff] %v9622_v25  ;;  %12107 = vst [vmem:[#allocation53_spill] sm:$0xff] %v9626_v49  ;;  %v9650_v17 = vadd.f32 %v9138_v13, %v9136_v33  ;;  %v9654_v39 = vadd.f32 %v9138_v13, %v9142_v27  ;;  %v9658_v16 = vadd.f32 %v9138_v13, %v9146_v28  ;;  %v12124_v27 = vld [vmem:[#allocation62_spill] sm:$0xff]  ;;  %v12126_v28 = vld [vmem:[#allocation61_spill] sm:$0xff]  ;;  %v9698_v18 = vmul.f32 0.2, %v12138_v15 }
 0x4d3   :  { %12109 = vst [vmem:[#allocation55_spill] sm:$0xff] %v9630_v56  ;;  %12110 = vst [vmem:[#allocation123_spill] sm:$0xff] %v9634_v54  ;;  %v12128_v54 = vld [vmem:[#allocation59_spill] sm:$0xff]  ;;  %v12136_v49 = vld [vmem:[#allocation65_spill] sm:$0xff]  ;;  %v9805_v15 = vmul.f32 0.2, %v9310_v8 }
 0x4d4   :  { %12111 = vst [vmem:[#allocation124_spill] sm:$0xff] %v9638_v61  ;;  %12112 = vst [vmem:[#allocation125_spill] sm:$0xff] %v9642_v30  ;;  %v12117_v61 = vld [vmem:[#allocation56_spill] sm:$0xff]  ;;  %v12119_v30 = vld [vmem:[#allocation58_spill] sm:$0xff]  ;;  %v9695_v25 = vmul.f32 0.2, %v12136_v49 }
 0x4d5   :  { %12113 = vst [vmem:[#allocation126_spill] sm:$0xff] %v9646_v36  ;;  %12114 = vst [vmem:[#allocation127_spill] sm:$0xff] %v9650_v17  ;;  %v9662_v29 = vadd.f32 %v9138_v13, %v12117_v61  ;;  %v9666_v2 = vadd.f32 %v9138_v13, %v12119_v30  ;;  %v12121_v36 = vld [vmem:[#allocation57_spill] sm:$0xff]  ;;  %v9673_v17 = vmul.f32 0.2, %v9166_v23  ;;  %v9683_v61 = vadd.f32 %v9138_v13, %v12128_v54  ;;  %v12142_v54 = vld [vmem:[#allocation70_spill] sm:$0xff] }
 0x4d6   :  { %12115 = vst [vmem:[#allocation128_spill] sm:$0xff] %v9654_v39  ;;  %12116 = vst [vmem:[#allocation129_spill] sm:$0xff] %v9658_v16  ;;  %v9670_v33 = vadd.f32 %v9138_v13, %v12121_v36  ;;  %v9676_v39 = vmul.f32 0.2, %v12124_v27  ;;  %v9679_v16 = vmul.f32 0.2, %v12126_v28 }
 0x4d7   :  { %12118 = vst [vmem:[#allocation56_spill] sm:$0xff] %v9662_v29  ;;  %12120 = vst [vmem:[#allocation58_spill] sm:$0xff] %v9666_v2  ;;  %v12130_v29 = vld [vmem:[#allocation63_spill] sm:$0xff]  ;;  %v12132_v2 = vld [vmem:[#allocation64_spill] sm:$0xff]  ;;  %v9723_v13 = vmul.f32 0.2, %v9222_v55 }
 0x4d8   :  { %12122 = vst [vmem:[#allocation57_spill] sm:$0xff] %v9670_v33  ;;  %12123 = vst [vmem:[#allocation130_spill] sm:$0xff] %v9673_v17  ;;  %v9686_v30 = vmul.f32 0.2, %v12130_v29  ;;  %v9689_v56 = vmul.f32 0.2, %v12132_v2 }
 0x4d9   :  { %12125 = vst [vmem:[#allocation131_spill] sm:$0xff] %v9676_v39  ;;  %12127 = vst [vmem:[#allocation132_spill] sm:$0xff] %v9679_v16  ;;  %v12134_v36 = vld [vmem:[#allocation66_spill] sm:$0xff]  ;;  %v9728_v23 = vmul.f32 0.2, %v9226_v38  ;;  %v12198_v20 = vld [vmem:[#allocation115_spill] sm:$0xff] }
 0x4da   :  { %12129 = vst [vmem:[#allocation59_spill] sm:$0xff] %v9683_v61  ;;  %12131 = vst [vmem:[#allocation133_spill] sm:$0xff] %v9686_v30  ;;  %v9692_v33 = vmul.f32 0.2, %v12134_v36  ;;  %v9706_v61 = vmul.f32 0.2, %v12142_v54 }
 0x4db   :  { %12133 = vst [vmem:[#allocation134_spill] sm:$0xff] %v9689_v56  ;;  %12137 = vst [vmem:[#allocation136_spill] sm:$0xff] %v9695_v25  ;;  %v9739_v27 = vmul.f32 0.2, %v9238_v24  ;;  %v9742_v55 = vmul.f32 0.2, %v9242_v43 }
 0x4dc   :  { %12135 = vst [vmem:[#allocation135_spill] sm:$0xff] %v9692_v33  ;;  %12139 = vst [vmem:[#allocation137_spill] sm:$0xff] %v9698_v18  ;;  %v9745_v17 = vmul.f32 0.2, %v9246_v1  ;;  %v9750_v28 = vmul.f32 0.2, %v9250_v63 }
 0x4dd   :  { %12141 = vst [vmem:[#allocation138_spill] sm:$0xff] %v9701_v53  ;;  %12143 = vst [vmem:[#allocation139_spill] sm:$0xff] %v9706_v61  ;;  %v9756_v39 = vmul.f32 0.2, %v9258_v21  ;;  %v9761_v29 = vmul.f32 0.2, %v9262_v37 }
 0x4de   :  { %12145 = vst [vmem:[#allocation140_spill] sm:$0xff] %v9709_v52  ;;  %12146 = vst [vmem:[#allocation141_spill] sm:$0xff] %v9712_v62  ;;  %v9764_v1 = vmul.f32 0.2, %v9266_v60  ;;  %v9767_v16 = vmul.f32 0.2, %v9270_v12 }
 0x4df   :  { %12148 = vst [vmem:[#allocation142_spill] sm:$0xff] %v9717_v6  ;;  %12149 = vst [vmem:[#allocation143_spill] sm:$0xff] %v9720_v47  ;;  %v9772_v2 = vmul.f32 0.2, %v9274_v59  ;;  %v9775_v21 = vmul.f32 0.2, %v9278_v58 }
 0x4e0   :  { %12150 = vst [vmem:[#allocation144_spill] sm:$0xff] %v9723_v13  ;;  %12151 = vst [vmem:[#allocation145_spill] sm:$0xff] %v9728_v23  ;;  %v9778_v30 = vmul.f32 0.2, %v9282_v41  ;;  %v9783_v36 = vmul.f32 0.2, %v9286_v45 }
 0x4e1   :  { %12152 = vst [vmem:[#allocation146_spill] sm:$0xff] %v9731_v19  ;;  %12153 = vst [vmem:[#allocation147_spill] sm:$0xff] %v9734_v46  ;;  %v9786_v12 = vmul.f32 0.2, %v9290_v51  ;;  %v9789_v56 = vmul.f32 0.2, %v9294_v22 }
 0x4e2   :  { %12154 = vst [vmem:[#allocation148_spill] sm:$0xff] %v9739_v27  ;;  %12155 = vst [vmem:[#allocation149_spill] sm:$0xff] %v9742_v55  ;;  %v9794_v49 = vmul.f32 0.2, %v9298_v9  ;;  %v9797_v41 = vmul.f32 0.2, %v9302_v40 }
 0x4e3   :  { %12156 = vst [vmem:[#allocation150_spill] sm:$0xff] %v9745_v17  ;;  %12157 = vst [vmem:[#allocation151_spill] sm:$0xff] %v9750_v28  ;;  %v9800_v33 = vmul.f32 0.2, %v9306_v3  ;;  %v9808_v22 = vmul.f32 0.2, %v9314_v50 }
 0x4e4   :  { %12158 = vst [vmem:[#allocation152_spill] sm:$0xff] %v9753_v42  ;;  %12159 = vst [vmem:[#allocation153_spill] sm:$0xff] %v9756_v39  ;;  %v9811_v25 = vmul.f32 0.2, %v9318_v7  ;;  %v9816_v14 = vmul.f32 0.2, %v9322_v26 }
 0x4e5   :  { %12160 = vst [vmem:[#allocation154_spill] sm:$0xff] %v9761_v29  ;;  %12161 = vst [vmem:[#allocation155_spill] sm:$0xff] %v9764_v1  ;;  %v9819_v3 = vmul.f32 0.2, %v9326_v34  ;;  %v9822_v18 = vmul.f32 0.2, %v9330_v35 }
 0x4e6   :  { %12162 = vst [vmem:[#allocation156_spill] sm:$0xff] %v9767_v16  ;;  %12163 = vst [vmem:[#allocation157_spill] sm:$0xff] %v9772_v2  ;;  %v9827_v54 = vmul.f32 0.2, %v9334_v32  ;;  %v9830_v7 = vmul.f32 0.2, %v9338_v4 }
 0x4e7   :  { %12164 = vst [vmem:[#allocation158_spill] sm:$0xff] %v9775_v21  ;;  %12165 = vst [vmem:[#allocation159_spill] sm:$0xff] %v9778_v30  ;;  %v9833_v53 = vmul.f32 0.2, %v9342_v31  ;;  %v9841_v35 = vmul.f32 0.2, %v9350_v5 }
 0x4e8   :  { %12166 = vst [vmem:[#allocation160_spill] sm:$0xff] %v9783_v36  ;;  %12167 = vst [vmem:[#allocation161_spill] sm:$0xff] %v9786_v12  ;;  %v9849_v4 = vmul.f32 0.2, %v12185_v44  ;;  %v12187_v31 = vld [vmem:[#allocation110_spill] sm:$0xff]  ;;  %v12192_v5 = vld [vmem:[#allocation112_spill] sm:$0xff] }
 0x4e9   :  { %12168 = vst [vmem:[#allocation162_spill] sm:$0xff] %v9789_v56  ;;  %12169 = vst [vmem:[#allocation163_spill] sm:$0xff] %v9794_v49  ;;  %v12196_v11 = vld [vmem:[#allocation114_spill] sm:$0xff]  ;;  %v12217_v57 = vld [vmem:[#allocation4_spill] sm:$0xff] }
 0x4ea   :  { %12170 = vst [vmem:[#allocation164_spill] sm:$0xff] %v9797_v41  ;;  %12171 = vst [vmem:[#allocation165_spill] sm:$0xff] %v9800_v33  ;;  %v9866_v62 = vmul.f32 0.2, %v12196_v11  ;;  %v12204_v6 = vld [vmem:[#allocation118_spill] sm:$0xff]  ;;  %v12206_v11 = vld [vmem:[#allocation119_spill] sm:$0xff] }
 0x4eb   :  { %12172 = vst [vmem:[#allocation166_spill] sm:$0xff] %v9805_v15  ;;  %12173 = vst [vmem:[#allocation167_spill] sm:$0xff] %v9808_v22  ;;  %v12223_v23 = vld [vmem:[#allocation6_spill] sm:$0xff]  ;;  %v12236_v43 = vld [vmem:[#allocation11_spill] sm:$0xff] }
 0x4ec   :  { %12174 = vst [vmem:[#allocation168_spill] sm:$0xff] %v9811_v25  ;;  %12175 = vst [vmem:[#allocation169_spill] sm:$0xff] %v9816_v14  ;;  %v12242_v27 = vld [vmem:[#allocation16_spill] sm:$0xff]  ;;  %v12255_v10 = vld [vmem:[#allocation21_spill] sm:$0xff] }
 0x4ed   :  { %12176 = vst [vmem:[#allocation170_spill] sm:$0xff] %v9819_v3  ;;  %12177 = vst [vmem:[#allocation171_spill] sm:$0xff] %v9822_v18  ;;  %v12183_v18 = vld [vmem:[#allocation108_spill] sm:$0xff]  ;;  %v12261_v28 = vld [vmem:[#allocation23_spill] sm:$0xff] }
 0x4ee   :  { %12178 = vst [vmem:[#allocation172_spill] sm:$0xff] %v9827_v54  ;;  %12179 = vst [vmem:[#allocation173_spill] sm:$0xff] %v9830_v7  ;;  %v9844_v61 = vmul.f32 0.2, %v12183_v18  ;;  %v12189_v7 = vld [vmem:[#allocation111_spill] sm:$0xff]  ;;  %v12194_v18 = vld [vmem:[#allocation113_spill] sm:$0xff] }
 0x4ef   :  { %12180 = vst [vmem:[#allocation174_spill] sm:$0xff] %v9833_v53  ;;  %12181 = vst [vmem:[#allocation175_spill] sm:$0xff] %v9838_v48  ;;  %v9852_v53 = vmul.f32 0.2, %v12187_v31  ;;  %v9855_v52 = vmul.f32 0.2, %v12189_v7 }
 0x4f0   :  { %12182 = vst [vmem:[#allocation176_spill] sm:$0xff] %v9841_v35  ;;  %12184 = vst [vmem:[#allocation177_spill] sm:$0xff] %v9844_v61  ;;  %v9860_v35 = vmul.f32 0.2, %v12192_v5  ;;  %v9863_v61 = vmul.f32 0.2, %v12194_v18 }
 0x4f1   :  { %12186 = vst [vmem:[#allocation178_spill] sm:$0xff] %v9849_v4  ;;  %12188 = vst [vmem:[#allocation179_spill] sm:$0xff] %v9852_v53  ;;  %v9871_v31 = vmul.f32 0.2, %v12198_v20  ;;  %v12200_v7 = vld [vmem:[#allocation116_spill] sm:$0xff]  ;;  %v12202_v53 = vld [vmem:[#allocation117_spill] sm:$0xff] }
 0x4f2   :  { %12190 = vst [vmem:[#allocation180_spill] sm:$0xff] %v9855_v52  ;;  %12193 = vst [vmem:[#allocation181_spill] sm:$0xff] %v9860_v35  ;;  %v9874_v52 = vmul.f32 0.2, %v12200_v7  ;;  %v9877_v0 = vmul.f32 0.2, %v12202_v53 }
 0x4f3   :  { %12195 = vst [vmem:[#allocation182_spill] sm:$0xff] %v9863_v61  ;;  %12197 = vst [vmem:[#allocation183_spill] sm:$0xff] %v9866_v62  ;;  %v9882_v18 = vmul.f32 0.2, %v12204_v6  ;;  %v9885_v62 = vmul.f32 0.2, %v12206_v11 }
 0x4f4   :  { %12199 = vst [vmem:[#allocation184_spill] sm:$0xff] %v9871_v31  ;;  %12201 = vst [vmem:[#allocation185_spill] sm:$0xff] %v9874_v52  ;;  %v12208_v61 = vld [vmem:[#allocation120_spill] sm:$0xff]  ;;  %v12211_v7 = vld [vmem:[#allocation121_spill] sm:$0xff]  ;;  %v9904_v11 = vmul.f32 0.2, %v12217_v57 }
 0x4f5   :  { %12203 = vst [vmem:[#allocation186_spill] sm:$0xff] %v9877_v0  ;;  %12205 = vst [vmem:[#allocation187_spill] sm:$0xff] %v9882_v18  ;;  %v9888_v47 = vmul.f32 0.2, %v12208_v61  ;;  %v9893_v52 = vmul.f32 0.2, %v12211_v7 }
 0x4f6   :  { %12207 = vst [vmem:[#allocation188_spill] sm:$0xff] %v9885_v62  ;;  %v12213_v53 = vld [vmem:[#allocation122_spill] sm:$0xff]  ;;  %12218 = vst [vmem:[#allocation193_spill] sm:$0xff] %v9904_v11  ;;  %v12219_v61 = vld [vmem:[#allocation3_spill] sm:$0xff] }
 0x4f7   :  { %12209 = vst [vmem:[#allocation189_spill] sm:$0xff] %v9888_v47  ;;  %12212 = vst [vmem:[#allocation190_spill] sm:$0xff] %v9893_v52  ;;  %v9896_v0 = vmul.f32 0.2, %v12213_v53  ;;  %v12215_v20 = vld [vmem:[#allocation2_spill] sm:$0xff]  ;;  %v12221_v62 = vld [vmem:[#allocation5_spill] sm:$0xff] }
 0x4f8   :  { %v9899_v13 = vmul.f32 0.2, %v12215_v20  ;;  %v9907_v47 = vmul.f32 0.2, %v12219_v61  ;;  %v9910_v38 = vmul.f32 0.2, %v12221_v62 }
 0x4f9   :  { %12214 = vst [vmem:[#allocation191_spill] sm:$0xff] %v9896_v0  ;;  %v9915_v53 = vmul.f32 0.2, %v12223_v23  ;;  %v12225_v20 = vld [vmem:[#allocation8_spill] sm:$0xff]  ;;  %v12227_v0 = vld [vmem:[#allocation7_spill] sm:$0xff]  ;;  %v12230_v61 = vld [vmem:[#allocation9_spill] sm:$0xff] }
 0x4fa   :  { %12216 = vst [vmem:[#allocation192_spill] sm:$0xff] %v9899_v13  ;;  %12220 = vst [vmem:[#allocation194_spill] sm:$0xff] %v9907_v47  ;;  %v9918_v13 = vmul.f32 0.2, %v12225_v20  ;;  %v9921_v19 = vmul.f32 0.2, %v12227_v0 }
 0x4fb   :  { %12222 = vst [vmem:[#allocation195_spill] sm:$0xff] %v9910_v38  ;;  %12224 = vst [vmem:[#allocation196_spill] sm:$0xff] %v9915_v53  ;;  %v9926_v47 = vmul.f32 0.2, %v12230_v61  ;;  %v12232_v62 = vld [vmem:[#allocation10_spill] sm:$0xff]  ;;  %v12234_v57 = vld [vmem:[#allocation12_spill] sm:$0xff] }
 0x4fc   :  { %12226 = vst [vmem:[#allocation197_spill] sm:$0xff] %v9918_v13  ;;  %12228 = vst [vmem:[#allocation198_spill] sm:$0xff] %v9921_v19  ;;  %v9929_v38 = vmul.f32 0.2, %v12232_v62  ;;  %v9932_v46 = vmul.f32 0.2, %v12234_v57 }
 0x4fd   :  { %12231 = vst [vmem:[#allocation199_spill] sm:$0xff] %v9926_v47  ;;  %v9937_v20 = vmul.f32 0.2, %v12236_v43  ;;  %v12238_v0 = vld [vmem:[#allocation13_spill] sm:$0xff]  ;;  %v12240_v13 = vld [vmem:[#allocation14_spill] sm:$0xff]  ;;  %v12244_v57 = vld [vmem:[#allocation15_spill] sm:$0xff] }
 0x4fe   :  { %12233 = vst [vmem:[#allocation200_spill] sm:$0xff] %v9929_v38  ;;  %12235 = vst [vmem:[#allocation201_spill] sm:$0xff] %v9932_v46  ;;  %v9940_v19 = vmul.f32 0.2, %v12238_v0  ;;  %v9943_v24 = vmul.f32 0.2, %v12240_v13 }
 0x4ff   :  { %12237 = vst [vmem:[#allocation202_spill] sm:$0xff] %v9937_v20  ;;  %v9948_v62 = vmul.f32 0.2, %v12242_v27  ;;  %v9951_v46 = vmul.f32 0.2, %v12244_v57  ;;  %v12246_v38 = vld [vmem:[#allocation17_spill] sm:$0xff] }
 0x500   :  { %12239 = vst [vmem:[#allocation203_spill] sm:$0xff] %v9940_v19  ;;  %12241 = vst [vmem:[#allocation204_spill] sm:$0xff] %v9943_v24  ;;  %v9954_v55 = vmul.f32 0.2, %v12246_v38  ;;  %v12249_v0 = vld [vmem:[#allocation18_spill] sm:$0xff]  ;;  %v12251_v13 = vld [vmem:[#allocation20_spill] sm:$0xff] }
 0x501   :  { %12243 = vst [vmem:[#allocation205_spill] sm:$0xff] %v9948_v62  ;;  %12245 = vst [vmem:[#allocation206_spill] sm:$0xff] %v9951_v46  ;;  %v9959_v19 = vmul.f32 0.2, %v12249_v0  ;;  %v9962_v24 = vmul.f32 0.2, %v12251_v13 }
 0x502   :  { %12247 = vst [vmem:[#allocation207_spill] sm:$0xff] %v9954_v55  ;;  %v12253_v43 = vld [vmem:[#allocation19_spill] sm:$0xff]  ;;  %v9970_v57 = vmul.f32 0.2, %v12255_v10  ;;  %v12257_v38 = vld [vmem:[#allocation22_spill] sm:$0xff]  ;;  %v12259_v46 = vld [vmem:[#allocation24_spill] sm:$0xff] }
 0x503   :  { %12250 = vst [vmem:[#allocation208_spill] sm:$0xff] %v9959_v19  ;;  %12252 = vst [vmem:[#allocation209_spill] sm:$0xff] %v9962_v24  ;;  %v9965_v17 = vmul.f32 0.2, %v12253_v43  ;;  %v9973_v55 = vmul.f32 0.2, %v12257_v38 }
 0x504   :  { %12256 = vst [vmem:[#allocation211_spill] sm:$0xff] %v9970_v57  ;;  %v9976_v63 = vmul.f32 0.2, %v12259_v46  ;;  %v9981_v13 = vmul.f32 0.2, %v12261_v28  ;;  %v12263_v43 = vld [vmem:[#allocation25_spill] sm:$0xff] }
 0x505   :  { %12254 = vst [vmem:[#allocation210_spill] sm:$0xff] %v9965_v17  ;;  %12258 = vst [vmem:[#allocation212_spill] sm:$0xff] %v9973_v55  ;;  %v9984_v17 = vmul.f32 0.2, %v12263_v43  ;;  %v12265_v24 = vld [vmem:[#allocation26_spill] sm:$0xff]  ;;  %v12268_v38 = vld [vmem:[#allocation28_spill] sm:$0xff] }
 0x506   :  { %12260 = vst [vmem:[#allocation213_spill] sm:$0xff] %v9976_v63  ;;  %12262 = vst [vmem:[#allocation214_spill] sm:$0xff] %v9981_v13  ;;  %v9987_v42 = vmul.f32 0.2, %v12265_v24  ;;  %v9992_v55 = vmul.f32 0.2, %v12268_v38 }
 0x507   :  { %12264 = vst [vmem:[#allocation215_spill] sm:$0xff] %v9984_v17  ;;  %v12270_v46 = vld [vmem:[#allocation27_spill] sm:$0xff]  ;;  %v12272_v10 = vld [vmem:[#allocation29_spill] sm:$0xff]  ;;  %v12274_v60 = vld [vmem:[#allocation30_spill] sm:$0xff] }
 0x508   :  { %12266 = vst [vmem:[#allocation216_spill] sm:$0xff] %v9987_v42  ;;  %12269 = vst [vmem:[#allocation217_spill] sm:$0xff] %v9992_v55  ;;  %v9995_v63 = vmul.f32 0.2, %v12270_v46  ;;  %v9998_v39 = vmul.f32 0.2, %v12272_v10 }
 0x509   :  { %v10003_v43 = vmul.f32 0.2, %v12274_v60  ;;  %v12276_v24 = vld [vmem:[#allocation32_spill] sm:$0xff]  ;;  %v12280_v29 = vld [vmem:[#allocation81_spill] sm:$0xff]  ;;  %v12282_v10 = vld [vmem:[#allocation82_spill] sm:$0xff] }
 0x50a   :  { %12271 = vst [vmem:[#allocation218_spill] sm:$0xff] %v9995_v63  ;;  %12273 = vst [vmem:[#allocation219_spill] sm:$0xff] %v9998_v39  ;;  %v10006_v42 = vmul.f32 0.2, %v12276_v24  ;;  %v12278_v17 = vld [vmem:[#allocation80_spill] sm:$0xff]  ;;  %v12284_v63 = vld [vmem:[#allocation83_spill] sm:$0xff] }
 0x50b   :  { %12275 = vst [vmem:[#allocation220_spill] sm:$0xff] %v10003_v43  ;;  %v10009_v37 = vmul.f32 0.2, %v12278_v17  ;;  %v10014_v46 = vmul.f32 0.2, %v12280_v29  ;;  %v12287_v24 = vld [vmem:[#allocation35_spill] sm:$0xff] }
 0x50c   :  { %12277 = vst [vmem:[#allocation221_spill] sm:$0xff] %v10006_v42  ;;  %v10017_v39 = vmul.f32 0.2, %v12282_v10  ;;  %v10020_v1 = vmul.f32 0.2, %v12284_v63  ;;  %v12289_v17 = vld [vmem:[#allocation36_spill] sm:$0xff] }
 0x50d   :  { %12279 = vst [vmem:[#allocation222_spill] sm:$0xff] %v10009_v37  ;;  %12281 = vst [vmem:[#allocation223_spill] sm:$0xff] %v10014_v46  ;;  %v10025_v42 = vmul.f32 0.2, %v12287_v24  ;;  %v10028_v37 = vmul.f32 0.2, %v12289_v17 }
 0x50e   :  { %12283 = vst [vmem:[#allocation224_spill] sm:$0xff] %v10017_v39  ;;  %12285 = vst [vmem:[#allocation225_spill] sm:$0xff] %v10020_v1  ;;  %v12291_v60 = vld [vmem:[#allocation38_spill] sm:$0xff]  ;;  %v12293_v58 = vld [vmem:[#allocation37_spill] sm:$0xff] }
 0x50f   :  { %12288 = vst [vmem:[#allocation226_spill] sm:$0xff] %v10025_v42  ;;  %12290 = vst [vmem:[#allocation227_spill] sm:$0xff] %v10028_v37  ;;  %v10031_v16 = vmul.f32 0.2, %v12291_v60  ;;  %v10036_v10 = vmul.f32 0.2, %v12293_v58 }
 0x510   :  { %v12295_v63 = vld [vmem:[#allocation39_spill] sm:$0xff]  ;;  %v12297_v39 = vld [vmem:[#allocation40_spill] sm:$0xff]  ;;  %v12299_v2 = vld [vmem:[#allocation42_spill] sm:$0xff] }
 0x511   :  { %12292 = vst [vmem:[#allocation228_spill] sm:$0xff] %v10031_v16  ;;  %12294 = vst [vmem:[#allocation229_spill] sm:$0xff] %v10036_v10  ;;  %v10039_v1 = vmul.f32 0.2, %v12295_v63  ;;  %v10042_v59 = vmul.f32 0.2, %v12297_v39 }
 0x512   :  { %v10047_v17 = vmul.f32 0.2, %v12299_v2  ;;  %v12301_v60 = vld [vmem:[#allocation41_spill] sm:$0xff]  ;;  %v12303_v37 = vld [vmem:[#allocation43_spill] sm:$0xff]  ;;  %v12306_v63 = vld [vmem:[#allocation44_spill] sm:$0xff] }
 0x513   :  { %12296 = vst [vmem:[#allocation230_spill] sm:$0xff] %v10039_v1  ;;  %12298 = vst [vmem:[#allocation231_spill] sm:$0xff] %v10042_v59  ;;  %v10050_v16 = vmul.f32 0.2, %v12301_v60  ;;  %v10053_v21 = vmul.f32 0.2, %v12303_v37 }
 0x514   :  { %12300 = vst [vmem:[#allocation232_spill] sm:$0xff] %v10047_v17  ;;  %v10058_v1 = vmul.f32 0.2, %v12306_v63  ;;  %v12308_v39 = vld [vmem:[#allocation46_spill] sm:$0xff]  ;;  %v12310_v58 = vld [vmem:[#allocation45_spill] sm:$0xff]  ;;  %v12312_v51 = vld [vmem:[#allocation47_spill] sm:$0xff] }
 0x515   :  { %12302 = vst [vmem:[#allocation233_spill] sm:$0xff] %v10050_v16  ;;  %12304 = vst [vmem:[#allocation234_spill] sm:$0xff] %v10053_v21  ;;  %v10061_v59 = vmul.f32 0.2, %v12308_v39  ;;  %v10064_v30 = vmul.f32 0.2, %v12310_v58 }
 0x516   :  { %12307 = vst [vmem:[#allocation235_spill] sm:$0xff] %v10058_v1  ;;  %v10069_v60 = vmul.f32 0.2, %v12312_v51  ;;  %v12314_v37 = vld [vmem:[#allocation48_spill] sm:$0xff]  ;;  %v12316_v16 = vld [vmem:[#allocation50_spill] sm:$0xff]  ;;  %v12318_v36 = vld [vmem:[#allocation49_spill] sm:$0xff] }
 0x517   :  { %12309 = vst [vmem:[#allocation236_spill] sm:$0xff] %v10061_v59  ;;  %12311 = vst [vmem:[#allocation237_spill] sm:$0xff] %v10064_v30  ;;  %v10072_v21 = vmul.f32 0.2, %v12314_v37  ;;  %v10075_v45 = vmul.f32 0.2, %v12316_v16 }
 0x518   :  { %12313 = vst [vmem:[#allocation238_spill] sm:$0xff] %v10069_v60  ;;  %v10080_v39 = vmul.f32 0.2, %v12318_v36  ;;  %v12320_v58 = vld [vmem:[#allocation51_spill] sm:$0xff]  ;;  %v12322_v59 = vld [vmem:[#allocation52_spill] sm:$0xff]  ;;  %v12325_v37 = vld [vmem:[#allocation54_spill] sm:$0xff] }
 0x519   :  { %12315 = vst [vmem:[#allocation239_spill] sm:$0xff] %v10072_v21  ;;  %12317 = vst [vmem:[#allocation240_spill] sm:$0xff] %v10075_v45  ;;  %v10083_v30 = vmul.f32 0.2, %v12320_v58  ;;  %v10086_v12 = vmul.f32 0.2, %v12322_v59 }
 0x51a   :  { %12319 = vst [vmem:[#allocation241_spill] sm:$0xff] %v10080_v39  ;;  %v10091_v21 = vmul.f32 0.2, %v12325_v37  ;;  %v12327_v16 = vld [vmem:[#allocation53_spill] sm:$0xff]  ;;  %v12329_v51 = vld [vmem:[#allocation55_spill] sm:$0xff]  ;;  %v12333_v59 = vld [vmem:[#allocation124_spill] sm:$0xff] }
 0x51b   :  { %12321 = vst [vmem:[#allocation242_spill] sm:$0xff] %v10083_v30  ;;  %12323 = vst [vmem:[#allocation243_spill] sm:$0xff] %v10086_v12  ;;  %v10094_v45 = vmul.f32 0.2, %v12327_v16  ;;  %v10097_v56 = vmul.f32 0.2, %v12329_v51 }
 0x51c   :  { %12326 = vst [vmem:[#allocation244_spill] sm:$0xff] %v10091_v21  ;;  %v12331_v40 = vld [vmem:[#allocation123_spill] sm:$0xff]  ;;  %v10105_v12 = vmul.f32 0.2, %v12333_v59  ;;  %v12335_v30 = vld [vmem:[#allocation125_spill] sm:$0xff]  ;;  %v12337_v49 = vld [vmem:[#allocation126_spill] sm:$0xff] }
 0x51d   :  { %12328 = vst [vmem:[#allocation245_spill] sm:$0xff] %v10094_v45  ;;  %12330 = vst [vmem:[#allocation246_spill] sm:$0xff] %v10097_v56  ;;  %v10102_v58 = vmul.f32 0.2, %v12331_v40  ;;  %v10108_v9 = vmul.f32 0.2, %v12335_v30 }
 0x51e   :  { %12334 = vst [vmem:[#allocation248_spill] sm:$0xff] %v10105_v12  ;;  %v10113_v16 = vmul.f32 0.2, %v12337_v49  ;;  %v12339_v51 = vld [vmem:[#allocation127_spill] sm:$0xff]  ;;  %v12341_v45 = vld [vmem:[#allocation128_spill] sm:$0xff]  ;;  %v12344_v59 = vld [vmem:[#allocation129_spill] sm:$0xff] }
 0x51f   :  { %12332 = vst [vmem:[#allocation247_spill] sm:$0xff] %v10102_v58  ;;  %12336 = vst [vmem:[#allocation249_spill] sm:$0xff] %v10108_v9  ;;  %v10116_v56 = vmul.f32 0.2, %v12339_v51  ;;  %v10119_v41 = vmul.f32 0.2, %v12341_v45 }
 0x520   :  { %12338 = vst [vmem:[#allocation250_spill] sm:$0xff] %v10113_v16  ;;  %v10124_v12 = vmul.f32 0.2, %v12344_v59  ;;  %v12346_v30 = vld [vmem:[#allocation56_spill] sm:$0xff]  ;;  %v12348_v40 = vld [vmem:[#allocation58_spill] sm:$0xff]  ;;  %v12350_v50 = vld [vmem:[#allocation57_spill] sm:$0xff] }
 0x521   :  { %12340 = vst [vmem:[#allocation251_spill] sm:$0xff] %v10116_v56  ;;  %12342 = vst [vmem:[#allocation252_spill] sm:$0xff] %v10119_v41  ;;  %v10127_v9 = vmul.f32 0.2, %v12346_v30  ;;  %v10130_v33 = vmul.f32 0.2, %v12348_v40 }
 0x522   :  { %12345 = vst [vmem:[#allocation253_spill] sm:$0xff] %v10124_v12  ;;  %v10135_v51 = vmul.f32 0.2, %v12350_v50  ;;  %v12352_v45 = vld [vmem:[#allocation59_spill] sm:$0xff]  ;;  %v12355_v15 = vld [vmem:[#allocation102_spill] sm:$0xff]  ;;  %v12359_v22 = vld [vmem:[#allocation105_spill] sm:$0xff] }
 0x523   :  { %12347 = vst [vmem:[#allocation254_spill] sm:$0xff] %v10127_v9  ;;  %12349 = vst [vmem:[#allocation255_spill] sm:$0xff] %v10130_v33  ;;  %v10138_v41 = vmul.f32 0.2, %v12352_v45  ;;  %v12357_v33 = vld [vmem:[#allocation104_spill] sm:$0xff]  ;;  %v12366_v30 = vld [vmem:[#allocation110_spill] sm:$0xff] }
 0x524   :  { %12351 = vst [vmem:[#allocation256_spill] sm:$0xff] %v10135_v51  ;;  %v12368_v9 = vld [vmem:[#allocation111_spill] sm:$0xff]  ;;  %v12370_v50 = vld [vmem:[#allocation113_spill] sm:$0xff]  ;;  %v12372_v51 = vld [vmem:[#allocation114_spill] sm:$0xff] }
 0x525   :  { %12353 = vst [vmem:[#allocation257_spill] sm:$0xff] %v10138_v41  ;;  %v12362_v41 = vld [vmem:[#allocation107_spill] sm:$0xff]  ;;  %v12375_v59 = vld [vmem:[#allocation116_spill] sm:$0xff]  ;;  %v12383_v56 = vld [vmem:[#allocation122_spill] sm:$0xff] }
 0x526   :  { %v12379_v14 = vld [vmem:[#allocation119_spill] sm:$0xff]  ;;  %v12381_v48 = vld [vmem:[#allocation120_spill] sm:$0xff]  ;;  %v12385_v4 = vld [vmem:[#allocation2_spill] sm:$0xff] }
 0x527   :  { %v12388_v40 = vld [vmem:[#allocation3_spill] sm:$0xff]  ;;  %v12392_v45 = vld [vmem:[#allocation8_spill] sm:$0xff]  ;;  %v12396_v44 = vld [vmem:[#allocation10_spill] sm:$0xff] }
 0x528   :  { %v12394_v31 = vld [vmem:[#allocation7_spill] sm:$0xff]  ;;  %v12398_v18 = vld [vmem:[#allocation12_spill] sm:$0xff]  ;;  %v12401_v12 = vld [vmem:[#allocation13_spill] sm:$0xff] }
 0x529   :  { %v12405_v8 = vld [vmem:[#allocation15_spill] sm:$0xff]  ;;  %v12407_v11 = vld [vmem:[#allocation17_spill] sm:$0xff]  ;;  %v12409_v6 = vld [vmem:[#allocation20_spill] sm:$0xff] }
 0x52a   :  { %v12411_v53 = vld [vmem:[#allocation19_spill] sm:$0xff]  ;;  %v12414_v26 = vld [vmem:[#allocation22_spill] sm:$0xff]  ;;  %v12418_v54 = vld [vmem:[#allocation25_spill] sm:$0xff] }
 0x52b   :  { %v12420_v20 = vld [vmem:[#allocation26_spill] sm:$0xff]  ;;  %v12422_v23 = vld [vmem:[#allocation27_spill] sm:$0xff]  ;;  %v12424_v62 = vld [vmem:[#allocation29_spill] sm:$0xff] }
 0x52c   :  { %v12427_v3 = vld [vmem:[#allocation32_spill] sm:$0xff]  ;;  %v12431_v35 = vld [vmem:[#allocation82_spill] sm:$0xff]  ;;  %v12433_v57 = vld [vmem:[#allocation83_spill] sm:$0xff] }
 0x52d   :  { %v12435_v27 = vld [vmem:[#allocation36_spill] sm:$0xff]  ;;  %v12437_v13 = vld [vmem:[#allocation38_spill] sm:$0xff]  ;;  %v12487_v61 = vld [vmem:[#allocation131_spill] sm:$0xff] }
 0x52e   :  { %v12483_v49 = vld [vmem:[#allocation60_spill] sm:$0xff]  ;;  %v12484_v21 = vld [vmem:[#allocation130_spill] sm:$0xff]  ;;  %v12489_v0 = vld [vmem:[#allocation61_spill] sm:$0xff] }
 0x52f   :  { %v12485_v63 = vmax.f32 %v12483_v49, %v12484_v21  ;;  %v12486_v19 = vld [vmem:[#allocation62_spill] sm:$0xff]  ;;  %v12490_v29 = vld [vmem:[#allocation132_spill] sm:$0xff]  ;;  %v12492_v58 = vld [vmem:[#allocation63_spill] sm:$0xff] }
 0x530   :  { %v12488_v37 = vmax.f32 %v12486_v19, %v12487_v61  ;;  %v12491_v55 = vmax.f32 %v12489_v0, %v12490_v29  ;;  %v12493_v17 = vld [vmem:[#allocation133_spill] sm:$0xff]  ;;  %v12495_v38 = vld [vmem:[#allocation64_spill] sm:$0xff]  ;;  %v12496_v39 = vld [vmem:[#allocation134_spill] sm:$0xff] }
 0x531   :  { %v12494_v2 = vmax.f32 %v12492_v58, %v12493_v17  ;;  %v12497_v36 = vmax.f32 %v12495_v38, %v12496_v39  ;;  %v12498_v5 = vld [vmem:[#allocation66_spill] sm:$0xff]  ;;  %v12499_v24 = vld [vmem:[#allocation135_spill] sm:$0xff]  ;;  %v12501_v7 = vld [vmem:[#allocation65_spill] sm:$0xff] }
 0x532   :  { %v5974_v60 = vpack.c.bf16 %v12488_v37, %v12485_v63  ;;  %v12500_v16 = vmax.f32 %v12498_v5, %v12499_v24  ;;  %v12502_v21 = vld [vmem:[#allocation136_spill] sm:$0xff]  ;;  %v12504_v10 = vld [vmem:[#allocation67_spill] sm:$0xff]  ;;  %v12505_v19 = vld [vmem:[#allocation137_spill] sm:$0xff] }
 0x533   :  { %v5975_v42 = vpack.c.bf16 %v12494_v2, %v12491_v55  ;;  %v12503_v49 = vmax.f32 %v12501_v7, %v12502_v21  ;;  %v12506_v63 = vmax.f32 %v12504_v10, %v12505_v19  ;;  %v12507_v61 = vld [vmem:[#allocation68_spill] sm:$0xff]  ;;  %v12508_v0 = vld [vmem:[#allocation138_spill] sm:$0xff]  ;;  %v12511_v58 = vld [vmem:[#allocation139_spill] sm:$0xff] }
 0x534   :  { %v5976_v1 = vpack.c.bf16 %v12500_v16, %v12497_v36  ;;  %v12509_v29 = vmax.f32 %v12507_v61, %v12508_v0  ;;  %v12510_v47 = vld [vmem:[#allocation70_spill] sm:$0xff]  ;;  %v12513_v2 = vld [vmem:[#allocation69_spill] sm:$0xff]  ;;  %v12514_v38 = vld [vmem:[#allocation140_spill] sm:$0xff] }
 0x535   :  { %v5977_v37 = vpack.c.bf16 %v12506_v63, %v12503_v49  ;;  %v12512_v55 = vmax.f32 %v12510_v47, %v12511_v58  ;;  %v12515_v39 = vmax.f32 %v12513_v2, %v12514_v38  ;;  %v12516_v32 = vld [vmem:[#allocation71_spill] sm:$0xff]  ;;  %v12517_v24 = vld [vmem:[#allocation141_spill] sm:$0xff]  ;;  %v12520_v10 = vld [vmem:[#allocation72_spill] sm:$0xff] }
 0x536   :  { %v12518_v5 = vmax.f32 %v12516_v32, %v12517_v24  ;;  %v12519_v36 = vld [vmem:[#allocation31_spill] sm:$0xff]  ;;  %v12521_v49 = vld [vmem:[#allocation142_spill] sm:$0xff]  ;;  %v12526_v47 = vld [vmem:[#allocation73_spill] sm:$0xff] }
 0x537   :  { %v5978_v17 = vpack.c.bf16 %v12512_v55, %v12509_v29  ;;  %v5107_v7 = vrot.slane %v5974_v60, %v12519_v36  ;;  %v5114_v21 = vrot.slane %v5975_v42, %v12519_v36  ;;  %v12522_v19 = vmax.f32 %v12520_v10, %v12521_v49  ;;  %v12523_v63 = vld [vmem:[#allocation74_spill] sm:$0xff]  ;;  %v12524_v61 = vld [vmem:[#allocation143_spill] sm:$0xff]  ;;  %v12527_v29 = vld [vmem:[#allocation144_spill] sm:$0xff] }
 0x538   :  { %v5979_v16 = vpack.c.bf16 %v12518_v5, %v12515_v39  ;;  %v12525_v0 = vmax.f32 %v12523_v63, %v12524_v61  ;;  %v12528_v58 = vmax.f32 %v12526_v47, %v12527_v29  ;;  %v12529_v55 = vld [vmem:[#allocation75_spill] sm:$0xff]  ;;  %v12530_v2 = vld [vmem:[#allocation145_spill] sm:$0xff]  ;;  %v5124_v32 = vrot.slane %v5976_v1, %v12519_v36  ;;  %v12532_v49 = vld [vmem:[#allocation76_spill] sm:$0xff] }
 0x539   :  { %v12531_v38 = vmax.f32 %v12529_v55, %v12530_v2  ;;  %v5131_v60 = vrot.slane %v5977_v37, %v12519_v36  ;;  %v5141_v42 = vrot.slane %v5978_v17, %v12519_v36  ;;  %v5115_v24 = vcombine.low %v5107_v7, %v5114_v21  ;;  %v12535_v61 = vld [vmem:[#allocation84_spill] sm:$0xff]  ;;  %v12538_v55 = vld [vmem:[#allocation77_spill] sm:$0xff]  ;;  %v12541_v17 = vld [vmem:[#allocation78_spill] sm:$0xff] }
 0x53a   :  { %v5980_v46 = vpack.c.bf16 %v12525_v0, %v12522_v19  ;;  %v5148_v39 = vrot.slane %v5979_v16, %v12519_v36  ;;  %v12533_v19 = vld [vmem:[#allocation146_spill] sm:$0xff]  ;;  %v12536_v0 = vld [vmem:[#allocation147_spill] sm:$0xff]  ;;  %v12539_v37 = vld [vmem:[#allocation148_spill] sm:$0xff] }
 0x53b   :  { %v5981_v28 = vpack.c.bf16 %v12531_v38, %v12528_v58  ;;  %v12534_v63 = vmax.f32 %v12532_v49, %v12533_v19  ;;  %v12537_v47 = vmax.f32 %v12535_v61, %v12536_v0  ;;  %v5132_v58 = vcombine.low %v5124_v32, %v5131_v60  ;;  %v12542_v38 = vld [vmem:[#allocation149_spill] sm:$0xff]  ;;  %v12544_v21 = vld [vmem:[#allocation79_spill] sm:$0xff]  ;;  %v12551_v32 = vld [vmem:[#allocation152_spill] sm:$0xff]  ;;  %5675 = vst [vmem:[%s10874_s4] sm:$0xff] %v5115_v24 }
 0x53c   :  { %v5158_v5 = vrot.slane %v5980_v46, %v12519_v36  ;;  %v5149_v1 = vcombine.low %v5141_v42, %v5148_v39  ;;  %v12540_v2 = vmax.f32 %v12538_v55, %v12539_v37  ;;  %v12543_v16 = vmax.f32 %v12541_v17, %v12542_v38  ;;  %v12545_v46 = vld [vmem:[#allocation150_spill] sm:$0xff]  ;;  %v12548_v52 = vld [vmem:[#allocation151_spill] sm:$0xff]  ;;  %v12554_v39 = vld [vmem:[#allocation153_spill] sm:$0xff] }
 0x53d   :  { %v5165_v10 = vrot.slane %v5981_v28, %v12519_v36  ;;  %v5982_v29 = vpack.c.bf16 %v12537_v47, %v12534_v63  ;;  %v12546_v43 = vmax.f32 %v12544_v21, %v12545_v46  ;;  %v12547_v28 = vld [vmem:[#allocation85_spill] sm:$0xff]  ;;  %v12550_v63 = vld [vmem:[#allocation86_spill] sm:$0xff]  ;;  %v12553_v42 = vld [vmem:[#allocation87_spill] sm:$0xff]  ;;  %5676 = vst [vmem:[%s10874_s4 + $0x8] sm:$0xff] %v5132_v58 }
 0x53e   :  { %v5983_v7 = vpack.c.bf16 %v12543_v16, %v12540_v2  ;;  %v12549_v25 = vmax.f32 %v12547_v28, %v12548_v52  ;;  %v12552_v60 = vmax.f32 %v12550_v63, %v12551_v32  ;;  %v12555_v0 = vmax.f32 %v12553_v42, %v12554_v39  ;;  %v12556_v55 = vld [vmem:[#allocation33_spill] sm:$0xff]  ;;  %v12557_v37 = vld [vmem:[#allocation154_spill] sm:$0xff]  ;;  %v12560_v38 = vld [vmem:[#allocation155_spill] sm:$0xff]  ;;  %5677 = vst [vmem:[%s10874_s4 + $0x10] sm:$0xff] %v5149_v1 }
 0x53f   :  { %v5166_v19 = vcombine.low %v5158_v5, %v5165_v10  ;;  %v5175_v61 = vrot.slane %v5982_v29, %v12519_v36  ;;  %v12558_v2 = vmax.f32 %v12556_v55, %v12557_v37  ;;  %v12559_v17 = vld [vmem:[#allocation34_spill] sm:$0xff]  ;;  %v12563_v5 = vld [vmem:[#allocation156_spill] sm:$0xff]  ;;  %v12565_v29 = vld [vmem:[#allocation89_spill] sm:$0xff] }
 0x540   :  { %v5984_v49 = vpack.c.bf16 %v12549_v25, %v12546_v43  ;;  %v5985_v47 = vpack.c.bf16 %v12555_v0, %v12552_v60  ;;  %v12561_v16 = vmax.f32 %v12559_v17, %v12560_v38  ;;  %v5182_v43 = vrot.slane %v5983_v7, %v12519_v36  ;;  %v12562_v25 = vld [vmem:[#allocation88_spill] sm:$0xff]  ;;  %v12566_v46 = vld [vmem:[#allocation157_spill] sm:$0xff]  ;;  %v12568_v32 = vld [vmem:[#allocation90_spill] sm:$0xff] }
 0x541   :  { %v12564_v10 = vmax.f32 %v12562_v25, %v12563_v5  ;;  %v12567_v28 = vmax.f32 %v12565_v29, %v12566_v46  ;;  %v12569_v60 = vld [vmem:[#allocation158_spill] sm:$0xff]  ;;  %v12571_v39 = vld [vmem:[#allocation91_spill] sm:$0xff]  ;;  %v12577_v38 = vld [vmem:[#allocation93_spill] sm:$0xff]  ;;  %5678 = vst [vmem:[%s10874_s4 + $0x18] sm:$0xff] %v5166_v19 }
 0x542   :  { %v5986_v21 = vpack.c.bf16 %v12561_v16, %v12558_v2  ;;  %v5192_v52 = vrot.slane %v5984_v49, %v12519_v36  ;;  %v12570_v42 = vmax.f32 %v12568_v32, %v12569_v60  ;;  %v12572_v0 = vld [vmem:[#allocation159_spill] sm:$0xff]  ;;  %v5199_v24 = vrot.slane %v5985_v47, %v12519_v36  ;;  %v12574_v49 = vld [vmem:[#allocation92_spill] sm:$0xff]  ;;  %v12578_v16 = vld [vmem:[#allocation161_spill] sm:$0xff] }
 0x543   :  { %v5987_v63 = vpack.c.bf16 %v12567_v28, %v12564_v10  ;;  %v12573_v55 = vmax.f32 %v12571_v39, %v12572_v0  ;;  %v12575_v2 = vld [vmem:[#allocation160_spill] sm:$0xff]  ;;  %v12579_v25 = vmax.f32 %v12577_v38, %v12578_v16  ;;  %v12580_v10 = vld [vmem:[#allocation94_spill] sm:$0xff]  ;;  %v12583_v28 = vld [vmem:[#allocation95_spill] sm:$0xff]  ;;  %v5183_v1 = vcombine.low %v5175_v61, %v5182_v43 }
 0x544   :  { %v5209_v7 = vrot.slane %v5986_v21, %v12519_v36  ;;  %v12576_v17 = vmax.f32 %v12574_v49, %v12575_v2  ;;  %v12581_v29 = vld [vmem:[#allocation162_spill] sm:$0xff]  ;;  %v12584_v58 = vld [vmem:[#allocation163_spill] sm:$0xff]  ;;  %v12587_v39 = vld [vmem:[#allocation164_spill] sm:$0xff]  ;;  %v5200_v38 = vcombine.low %v5192_v52, %v5199_v24 }
 0x545   :  { %v5988_v37 = vpack.c.bf16 %v12573_v55, %v12570_v42  ;;  %v12582_v46 = vmax.f32 %v12580_v10, %v12581_v29  ;;  %v12585_v32 = vmax.f32 %v12583_v28, %v12584_v58  ;;  %v5216_v47 = vrot.slane %v5987_v63, %v12519_v36  ;;  %v12586_v42 = vld [vmem:[#allocation96_spill] sm:$0xff]  ;;  %v12589_v55 = vld [vmem:[#allocation97_spill] sm:$0xff]  ;;  %v12592_v10 = vld [vmem:[#allocation98_spill] sm:$0xff]  ;;  %5679 = vst [vmem:[%s10874_s4 + $0x20] sm:$0xff] %v5183_v1 }
 0x546   :  { %v5989_v5 = vpack.c.bf16 %v12579_v25, %v12576_v17  ;;  %v12588_v0 = vmax.f32 %v12586_v42, %v12587_v39  ;;  %v12590_v49 = vld [vmem:[#allocation165_spill] sm:$0xff]  ;;  %v12593_v29 = vld [vmem:[#allocation166_spill] sm:$0xff]  ;;  %v12595_v61 = vld [vmem:[#allocation99_spill] sm:$0xff]  ;;  %5680 = vst [vmem:[%s10874_s4 + $0x28] sm:$0xff] %v5200_v38 }
 0x547   :  { %v5990_v60 = vpack.c.bf16 %v12585_v32, %v12582_v46  ;;  %v5226_v21 = vrot.slane %v5988_v37, %v12519_v36  ;;  %v12591_v2 = vmax.f32 %v12589_v55, %v12590_v49  ;;  %v12594_v19 = vmax.f32 %v12592_v10, %v12593_v29  ;;  %v12596_v43 = vld [vmem:[#allocation167_spill] sm:$0xff]  ;;  %v12598_v58 = vld [vmem:[#allocation100_spill] sm:$0xff]  ;;  %v12601_v39 = vld [vmem:[#allocation101_spill] sm:$0xff] }
 0x548   :  { %v5233_v16 = vrot.slane %v5989_v5, %v12519_v36  ;;  %v12597_v63 = vmax.f32 %v12595_v61, %v12596_v43  ;;  %v5217_v37 = vcombine.low %v5209_v7, %v5216_v47  ;;  %v12599_v32 = vld [vmem:[#allocation168_spill] sm:$0xff]  ;;  %v12604_v5 = vld [vmem:[#allocation170_spill] sm:$0xff]  ;;  %v12606_v55 = vld [vmem:[#allocation171_spill] sm:$0xff] }
 0x549   :  { %v5991_v17 = vpack.c.bf16 %v12591_v2, %v12588_v0  ;;  %v5243_v25 = vrot.slane %v5990_v60, %v12519_v36  ;;  %v12600_v42 = vmax.f32 %v12598_v58, %v12599_v32  ;;  %v12602_v0 = vld [vmem:[#allocation169_spill] sm:$0xff]  ;;  %v12605_v60 = vmax.f32 %v9326_v34, %v12604_v5  ;;  %v12609_v10 = vld [vmem:[#allocation172_spill] sm:$0xff]  ;;  %v12613_v34 = vld [vmem:[#allocation174_spill] sm:$0xff] }
 0x54a   :  { %v5992_v46 = vpack.c.bf16 %v12597_v63, %v12594_v19  ;;  %v12603_v52 = vmax.f32 %v12601_v39, %v12602_v0  ;;  %v12607_v49 = vmax.f32 %v12355_v15, %v12606_v55  ;;  %v5234_v7 = vcombine.low %v5226_v21, %v5233_v16  ;;  %v12611_v19 = vld [vmem:[#allocation173_spill] sm:$0xff]  ;;  %v12615_v58 = vld [vmem:[#allocation106_spill] sm:$0xff]  ;;  %v12616_v15 = vld [vmem:[#allocation175_spill] sm:$0xff]  ;;  %5681 = vst [vmem:[%s10874_s4 + $0x30] sm:$0xff] %v5217_v37 }
 0x54b   :  { %v5250_v28 = vrot.slane %v5991_v17, %v12519_v36  ;;  %v12608_v17 = vld [vmem:[#allocation103_spill] sm:$0xff]  ;;  %v12612_v61 = vmax.f32 %v12357_v33, %v12611_v19  ;;  %v12614_v63 = vmax.f32 %v12359_v22, %v12613_v34  ;;  %v12617_v32 = vmax.f32 %v12615_v58, %v12616_v15  ;;  %v12620_v39 = vld [vmem:[#allocation108_spill] sm:$0xff]  ;;  %v12621_v0 = vld [vmem:[#allocation177_spill] sm:$0xff] }
 0x54c   :  { %v5993_v24 = vpack.c.bf16 %v12603_v52, %v12600_v42  ;;  %v5994_v2 = vpack.c.bf16 %v12607_v49, %v12605_v60  ;;  %v5260_v47 = vrot.slane %v5992_v46, %v12519_v36  ;;  %v12610_v29 = vmax.f32 %v12608_v17, %v12609_v10  ;;  %v12618_v46 = vld [vmem:[#allocation176_spill] sm:$0xff]  ;;  %v12626_v60 = vld [vmem:[#allocation179_spill] sm:$0xff]  ;;  %v12631_v10 = vld [vmem:[#allocation181_spill] sm:$0xff]  ;;  %5682 = vst [vmem:[%s10874_s4 + $0x38] sm:$0xff] %v5234_v7 }
 0x54d   :  { %v5996_v42 = vpack.c.bf16 %v12617_v32, %v12614_v63  ;;  %v5251_v1 = vcombine.low %v5243_v25, %v5250_v28  ;;  %v12619_v33 = vmax.f32 %v12362_v41, %v12618_v46  ;;  %v12622_v52 = vmax.f32 %v12620_v39, %v12621_v0  ;;  %v12623_v25 = vld [vmem:[#allocation109_spill] sm:$0xff]  ;;  %v12624_v28 = vld [vmem:[#allocation178_spill] sm:$0xff]  ;;  %v12628_v41 = vld [vmem:[#allocation180_spill] sm:$0xff] }
 0x54e   :  { %v5995_v43 = vpack.c.bf16 %v12612_v61, %v12610_v29  ;;  %v5267_v21 = vrot.slane %v5993_v24, %v12519_v36  ;;  %v5277_v16 = vrot.slane %v5994_v2, %v12519_v36  ;;  %v12625_v24 = vmax.f32 %v12623_v25, %v12624_v28  ;;  %v12630_v17 = vld [vmem:[#allocation112_spill] sm:$0xff]  ;;  %v12637_v15 = vld [vmem:[#allocation115_spill] sm:$0xff]  ;;  %v12643_v39 = vld [vmem:[#allocation186_spill] sm:$0xff] }
 0x54f   :  { %v5997_v22 = vpack.c.bf16 %v12622_v52, %v12619_v33  ;;  %v5294_v38 = vrot.slane %v5996_v42, %v12519_v36  ;;  %v12627_v55 = vmax.f32 %v12366_v30, %v12626_v60  ;;  %v12629_v2 = vmax.f32 %v12368_v9, %v12628_v41  ;;  %v12635_v30 = vld [vmem:[#allocation183_spill] sm:$0xff]  ;;  %v12638_v9 = vld [vmem:[#allocation184_spill] sm:$0xff]  ;;  %v12640_v42 = vld [vmem:[#allocation185_spill] sm:$0xff]  ;;  %5683 = vst [vmem:[%s10874_s4 + $0x40] sm:$0xff] %v5251_v1 }
 0x550   :  { %v5284_v5 = vrot.slane %v5995_v43, %v12519_v36  ;;  %v12632_v29 = vmax.f32 %v12630_v17, %v12631_v10  ;;  %v5268_v37 = vcombine.low %v5260_v47, %v5267_v21  ;;  %v12633_v43 = vld [vmem:[#allocation182_spill] sm:$0xff]  ;;  %v12636_v63 = vmax.f32 %v12372_v51, %v12635_v30  ;;  %v12642_v21 = vld [vmem:[#allocation117_spill] sm:$0xff]  ;;  %v12646_v52 = vld [vmem:[#allocation187_spill] sm:$0xff] }
 0x551   :  { %v5998_v49 = vpack.c.bf16 %v12627_v55, %v12625_v24  ;;  %v5301_v61 = vrot.slane %v5997_v22, %v12519_v36  ;;  %v12634_v34 = vmax.f32 %v12370_v50, %v12633_v43  ;;  %v12639_v32 = vmax.f32 %v12637_v15, %v12638_v9  ;;  %v12645_v0 = vld [vmem:[#allocation118_spill] sm:$0xff]  ;;  %v12648_v60 = vld [vmem:[#allocation188_spill] sm:$0xff]  ;;  %v12655_v10 = vld [vmem:[#allocation191_spill] sm:$0xff] }
 0x552   :  { %v5999_v19 = vpack.c.bf16 %v12632_v29, %v12629_v2  ;;  %v12641_v46 = vmax.f32 %v12375_v59, %v12640_v42  ;;  %v5285_v7 = vcombine.low %v5277_v16, %v5284_v5  ;;  %v12644_v51 = vmax.f32 %v12642_v21, %v12643_v39  ;;  %v12650_v16 = vld [vmem:[#allocation189_spill] sm:$0xff]  ;;  %5684 = vst [vmem:[%s10874_s4 + $0x48] sm:$0xff] %v5268_v37  ;;  %v12659_v43 = vld [vmem:[#allocation4_spill] sm:$0xff] }
 0x553   :  { %v6000_v58 = vpack.c.bf16 %v12636_v63, %v12634_v34  ;;  %v5311_v47 = vrot.slane %v5998_v49, %v12519_v36  ;;  %v12647_v22 = vmax.f32 %v12645_v0, %v12646_v52  ;;  %v5302_v28 = vcombine.low %v5294_v38, %v5301_v61  ;;  %v12652_v2 = vld [vmem:[#allocation121_spill] sm:$0xff]  ;;  %v12653_v38 = vld [vmem:[#allocation190_spill] sm:$0xff]  ;;  %v12675_v52 = vld [vmem:[#allocation199_spill] sm:$0xff] }
 0x554   :  { %v6001_v33 = vpack.c.bf16 %v12641_v46, %v12639_v32  ;;  %v5318_v50 = vrot.slane %v5999_v19, %v12519_v36  ;;  %v12649_v1 = vmax.f32 %v12379_v14, %v12648_v60  ;;  %v12651_v5 = vmax.f32 %v12381_v48, %v12650_v16  ;;  %v12657_v14 = vld [vmem:[#allocation192_spill] sm:$0xff]  ;;  %v12660_v48 = vld [vmem:[#allocation193_spill] sm:$0xff]  ;;  %5685 = vst [vmem:[%s10874_s4 + $0x50] sm:$0xff] %v5285_v7  ;;  %v12667_v46 = vld [vmem:[#allocation6_spill] sm:$0xff] }
 0x555   :  { %v6002_v25 = vpack.c.bf16 %v12647_v22, %v12644_v51  ;;  %v5328_v59 = vrot.slane %v6000_v58, %v12519_v36  ;;  %v12654_v17 = vmax.f32 %v12652_v2, %v12653_v38  ;;  %v12656_v29 = vmax.f32 %v12383_v56, %v12655_v10  ;;  %v12662_v58 = vld [vmem:[#allocation194_spill] sm:$0xff]  ;;  %v12664_v9 = vld [vmem:[#allocation5_spill] sm:$0xff]  ;;  %v12665_v56 = vld [vmem:[#allocation195_spill] sm:$0xff]  ;;  %5686 = vst [vmem:[%s10874_s4 + $0x58] sm:$0xff] %v5302_v28 }
 0x556   :  { %v5335_v24 = vrot.slane %v6001_v33, %v12519_v36  ;;  %v6003_v55 = vpack.c.bf16 %v12651_v5, %v12649_v1  ;;  %v5319_v49 = vcombine.low %v5311_v47, %v5318_v50  ;;  %v12658_v61 = vmax.f32 %v12385_v4, %v12657_v14  ;;  %v12668_v4 = vld [vmem:[#allocation196_spill] sm:$0xff]  ;;  %v12670_v47 = vld [vmem:[#allocation197_spill] sm:$0xff]  ;;  %v12681_v5 = vld [vmem:[#allocation11_spill] sm:$0xff] }
 0x557   :  { %v5345_v41 = vrot.slane %v6002_v25, %v12519_v36  ;;  %v6004_v19 = vpack.c.bf16 %v12656_v29, %v12654_v17  ;;  %v12661_v34 = vmax.f32 %v12659_v43, %v12660_v48  ;;  %v12663_v15 = vmax.f32 %v12388_v40, %v12662_v58  ;;  %v12672_v40 = vld [vmem:[#allocation198_spill] sm:$0xff]  ;;  %v12674_v0 = vld [vmem:[#allocation9_spill] sm:$0xff]  ;;  %v12684_v38 = vld [vmem:[#allocation203_spill] sm:$0xff] }
 0x558   :  { %v5336_v37 = vcombine.low %v5328_v59, %v5335_v24  ;;  %v5352_v63 = vrot.slane %v6003_v55, %v12519_v36  ;;  %v12666_v32 = vmax.f32 %v12664_v9, %v12665_v56  ;;  %v12669_v33 = vmax.f32 %v12667_v46, %v12668_v4  ;;  %v12677_v59 = vld [vmem:[#allocation200_spill] sm:$0xff]  ;;  %5687 = vst [vmem:[%s10874_s4 + $0x60] sm:$0xff] %v5319_v49  ;;  %v12682_v55 = vld [vmem:[#allocation202_spill] sm:$0xff] }
 0x559   :  { %v6005_v30 = vpack.c.bf16 %v12661_v34, %v12658_v61  ;;  %v12671_v50 = vmax.f32 %v12392_v45, %v12670_v47  ;;  %v5362_v7 = vrot.slane %v6004_v19, %v12519_v36  ;;  %v12673_v51 = vmax.f32 %v12394_v31, %v12672_v40  ;;  %v12679_v45 = vld [vmem:[#allocation201_spill] sm:$0xff]  ;;  %v12687_v29 = vld [vmem:[#allocation204_spill] sm:$0xff]  ;;  %v12696_v9 = vld [vmem:[#allocation18_spill] sm:$0xff] }
 0x55a   :  { %v6006_v42 = vpack.c.bf16 %v12666_v32, %v12663_v15  ;;  %v12676_v22 = vmax.f32 %v12674_v0, %v12675_v52  ;;  %v12678_v24 = vmax.f32 %v12396_v44, %v12677_v59  ;;  %v12680_v60 = vmax.f32 %v12398_v18, %v12679_v45  ;;  %5688 = vst [vmem:[%s10874_s4 + $0x68] sm:$0xff] %v5336_v37  ;;  %v12689_v14 = vld [vmem:[#allocation16_spill] sm:$0xff]  ;;  %v12690_v61 = vld [vmem:[#allocation205_spill] sm:$0xff]  ;;  %v12694_v37 = vld [vmem:[#allocation207_spill] sm:$0xff] }
 0x55b   :  { %v6007_v21 = vpack.c.bf16 %v12671_v50, %v12669_v33  ;;  %v5369_v39 = vrot.slane %v6005_v30, %v12519_v36  ;;  %v5353_v28 = vcombine.low %v5345_v41, %v5352_v63  ;;  %v12683_v2 = vmax.f32 %v12681_v5, %v12682_v55  ;;  %v12686_v41 = vld [vmem:[#allocation14_spill] sm:$0xff]  ;;  %v12697_v56 = vld [vmem:[#allocation208_spill] sm:$0xff]  ;;  %v12703_v50 = vld [vmem:[#allocation21_spill] sm:$0xff] }
 0x55c   :  { %v6008_v25 = vpack.c.bf16 %v12676_v22, %v12673_v51  ;;  %v6009_v1 = vpack.c.bf16 %v12680_v60, %v12678_v24  ;;  %v5379_v16 = vrot.slane %v6006_v42, %v12519_v36  ;;  %v12685_v17 = vmax.f32 %v12401_v12, %v12684_v38  ;;  %v12692_v30 = vld [vmem:[#allocation206_spill] sm:$0xff]  ;;  %v12699_v42 = vld [vmem:[#allocation209_spill] sm:$0xff]  ;;  %v12706_v40 = vld [vmem:[#allocation212_spill] sm:$0xff] }
 0x55d   :  { %v5386_v31 = vrot.slane %v6007_v21, %v12519_v36  ;;  %v5370_v18 = vcombine.low %v5362_v7, %v5369_v39  ;;  %v12688_v19 = vmax.f32 %v12686_v41, %v12687_v29  ;;  %v12691_v43 = vmax.f32 %v12689_v14, %v12690_v61  ;;  %5689 = vst [vmem:[%s10874_s4 + $0x70] sm:$0xff] %v5353_v28  ;;  %v12701_v47 = vld [vmem:[#allocation210_spill] sm:$0xff]  ;;  %v12704_v21 = vld [vmem:[#allocation211_spill] sm:$0xff]  ;;  %v12708_v51 = vld [vmem:[#allocation24_spill] sm:$0xff] }
 0x55e   :  { %v6010_v44 = vpack.c.bf16 %v12685_v17, %v12683_v2  ;;  %v5396_v10 = vrot.slane %v6008_v25, %v12519_v36  ;;  %v5403_v49 = vrot.slane %v6009_v1, %v12519_v36  ;;  %v12693_v63 = vmax.f32 %v12405_v8, %v12692_v30  ;;  %v12709_v0 = vld [vmem:[#allocation213_spill] sm:$0xff]  ;;  %v12712_v24 = vld [vmem:[#allocation214_spill] sm:$0xff]  ;;  %v12714_v60 = vld [vmem:[#allocation215_spill] sm:$0xff] }
 0x55f   :  { %v6011_v48 = vpack.c.bf16 %v12691_v43, %v12688_v19  ;;  %v5387_v34 = vcombine.low %v5379_v16, %v5386_v31  ;;  %v12695_v58 = vmax.f32 %v12407_v11, %v12694_v37  ;;  %v12698_v32 = vmax.f32 %v12696_v9, %v12697_v56  ;;  %5690 = vst [vmem:[%s10874_s4 + $0x78] sm:$0xff] %v5370_v18  ;;  %v12718_v31 = vld [vmem:[#allocation28_spill] sm:$0xff]  ;;  %v12719_v5 = vld [vmem:[#allocation217_spill] sm:$0xff]  ;;  %v12721_v18 = vld [vmem:[#allocation218_spill] sm:$0xff] }
 0x560   :  { %v5413_v12 = vrot.slane %v6010_v44, %v12519_v36  ;;  %v12700_v46 = vmax.f32 %v12409_v6, %v12699_v42  ;;  %v5404_v33 = vcombine.low %v5396_v10, %v5403_v49  ;;  %v12702_v11 = vmax.f32 %v12411_v53, %v12701_v47  ;;  %v12711_v53 = vld [vmem:[#allocation23_spill] sm:$0xff]  ;;  %v12725_v14 = vld [vmem:[#allocation30_spill] sm:$0xff]  ;;  %v12726_v61 = vld [vmem:[#allocation220_spill] sm:$0xff] }
 0x561   :  { %v6012_v15 = vpack.c.bf16 %v12695_v58, %v12693_v63  ;;  %v5420_v8 = vrot.slane %v6011_v48, %v12519_v36  ;;  %v12705_v7 = vmax.f32 %v12703_v50, %v12704_v21  ;;  %v12707_v6 = vmax.f32 %v12414_v26, %v12706_v40  ;;  %v12716_v26 = vld [vmem:[#allocation216_spill] sm:$0xff]  ;;  %5691 = vst [vmem:[%s10874_s4 + $0x80] sm:$0xff] %v5387_v34  ;;  %v12723_v10 = vld [vmem:[#allocation219_spill] sm:$0xff]  ;;  %v12728_v48 = vld [vmem:[#allocation221_spill] sm:$0xff] }
 0x562   :  { %v6013_v4 = vpack.c.bf16 %v12700_v46, %v12698_v32  ;;  %v12710_v52 = vmax.f32 %v12708_v51, %v12709_v0  ;;  %v12713_v45 = vmax.f32 %v12711_v53, %v12712_v24  ;;  %v12715_v1 = vmax.f32 %v12418_v54, %v12714_v60  ;;  %5692 = vst [vmem:[%s10874_s4 + $0x88] sm:$0xff] %v5404_v33  ;;  %v12730_v30 = vld [vmem:[#allocation80_spill] sm:$0xff]  ;;  %v12731_v63 = vld [vmem:[#allocation222_spill] sm:$0xff]  ;;  %v12733_v58 = vld [vmem:[#allocation81_spill] sm:$0xff] }
 0x563   :  { %v6014_v39 = vpack.c.bf16 %v12705_v7, %v12702_v11  ;;  %v5430_v25 = vrot.slane %v6012_v15, %v12519_v36  ;;  %v12717_v16 = vmax.f32 %v12420_v20, %v12716_v26  ;;  %v12720_v55 = vmax.f32 %v12718_v31, %v12719_v5  ;;  %v12734_v15 = vld [vmem:[#allocation223_spill] sm:$0xff]  ;;  %v12736_v32 = vld [vmem:[#allocation224_spill] sm:$0xff]  ;;  %v12738_v46 = vld [vmem:[#allocation225_spill] sm:$0xff] }
 0x564   :  { %v6015_v22 = vpack.c.bf16 %v12710_v52, %v12707_v6  ;;  %v5437_v59 = vrot.slane %v6013_v4, %v12519_v36  ;;  %v6016_v28 = vpack.c.bf16 %v12715_v1, %v12713_v45  ;;  %v5421_v38 = vcombine.low %v5413_v12, %v5420_v8  ;;  %v12740_v47 = vld [vmem:[#allocation35_spill] sm:$0xff]  ;;  %v12741_v11 = vld [vmem:[#allocation226_spill] sm:$0xff]  ;;  %v12747_v6 = vld [vmem:[#allocation37_spill] sm:$0xff] }
 0x565   :  { %v6017_v2 = vpack.c.bf16 %v12720_v55, %v12717_v16  ;;  %v5447_v17 = vrot.slane %v6014_v39, %v12519_v36  ;;  %v12722_v54 = vmax.f32 %v12422_v23, %v12721_v18  ;;  %v12724_v49 = vmax.f32 %v12424_v62, %v12723_v10  ;;  %v12743_v21 = vld [vmem:[#allocation227_spill] sm:$0xff]  ;;  %v12753_v53 = vld [vmem:[#allocation40_spill] sm:$0xff]  ;;  %v12756_v60 = vld [vmem:[#allocation42_spill] sm:$0xff] }
 0x566   :  { %v5454_v44 = vrot.slane %v6015_v22, %v12519_v36  ;;  %v5438_v41 = vcombine.low %v5430_v25, %v5437_v59  ;;  %v5464_v29 = vrot.slane %v6016_v28, %v12519_v36  ;;  %v12727_v43 = vmax.f32 %v12725_v14, %v12726_v61  ;;  %5693 = vst [vmem:[%s10874_s4 + $0x90] sm:$0xff] %v5421_v38  ;;  %v12750_v25 = vld [vmem:[#allocation39_spill] sm:$0xff]  ;;  %v12751_v59 = vld [vmem:[#allocation230_spill] sm:$0xff]  ;;  %v12757_v1 = vld [vmem:[#allocation232_spill] sm:$0xff] }
 0x567   :  { %v6018_v20 = vpack.c.bf16 %v12724_v49, %v12722_v54  ;;  %v5471_v19 = vrot.slane %v6017_v2, %v12519_v36  ;;  %v12729_v23 = vmax.f32 %v12427_v3, %v12728_v48  ;;  %v12732_v37 = vmax.f32 %v12730_v30, %v12731_v63  ;;  %v12754_v24 = vld [vmem:[#allocation231_spill] sm:$0xff]  ;;  %v12759_v26 = vld [vmem:[#allocation41_spill] sm:$0xff]  ;;  %v12765_v54 = vld [vmem:[#allocation44_spill] sm:$0xff] }
 0x568   :  { %v5455_v12 = vcombine.low %v5447_v17, %v5454_v44  ;;  %v12735_v9 = vmax.f32 %v12733_v58, %v12734_v15  ;;  %v12737_v42 = vmax.f32 %v12431_v35, %v12736_v32  ;;  %v12739_v4 = vmax.f32 %v12433_v57, %v12738_v46  ;;  %v12745_v35 = vld [vmem:[#allocation228_spill] sm:$0xff]  ;;  %v12748_v57 = vld [vmem:[#allocation229_spill] sm:$0xff]  ;;  %5694 = vst [vmem:[%s10874_s4 + $0x98] sm:$0xff] %v5438_v41  ;;  %v12762_v17 = vld [vmem:[#allocation43_spill] sm:$0xff] }
 0x569   :  { %v6019_v34 = vpack.c.bf16 %v12729_v23, %v12727_v43  ;;  %v5481_v62 = vrot.slane %v6018_v20, %v12519_v36  ;;  %v5472_v3 = vcombine.low %v5464_v29, %v5471_v19  ;;  %v12742_v50 = vmax.f32 %v12740_v47, %v12741_v11  ;;  %v12760_v16 = vld [vmem:[#allocation233_spill] sm:$0xff]  ;;  %v12763_v44 = vld [vmem:[#allocation234_spill] sm:$0xff]  ;;  %v12766_v10 = vld [vmem:[#allocation235_spill] sm:$0xff] }
 0x56a   :  { %v6020_v56 = vpack.c.bf16 %v12735_v9, %v12732_v37  ;;  %v6021_v33 = vpack.c.bf16 %v12739_v4, %v12737_v42  ;;  %v12744_v7 = vmax.f32 %v12435_v27, %v12743_v21  ;;  %v12746_v40 = vmax.f32 %v12437_v13, %v12745_v35  ;;  %5695 = vst [vmem:[%s10874_s4 + $0xa0] sm:$0xff] %v5455_v12  ;;  %v12768_v14 = vld [vmem:[#allocation46_spill] sm:$0xff]  ;;  %v12769_v61 = vld [vmem:[#allocation236_spill] sm:$0xff]  ;;  %v12771_v48 = vld [vmem:[#allocation45_spill] sm:$0xff] }
 0x56b   :  { %v5488_v8 = vrot.slane %v6019_v34, %v12519_v36  ;;  %v12749_v51 = vmax.f32 %v12747_v6, %v12748_v57  ;;  %v12752_v27 = vmax.f32 %v12750_v25, %v12751_v59  ;;  %v12755_v45 = vmax.f32 %v12753_v53, %v12754_v24  ;;  %5696 = vst [vmem:[%s10874_s4 + $0xa8] sm:$0xff] %v5472_v3  ;;  %v12772_v23 = vld [vmem:[#allocation237_spill] sm:$0xff]  ;;  %v12774_v63 = vld [vmem:[#allocation47_spill] sm:$0xff]  ;;  %v12775_v37 = vld [vmem:[#allocation238_spill] sm:$0xff] }
 0x56c   :  { %v6022_v39 = vpack.c.bf16 %v12744_v7, %v12742_v50  ;;  %v5498_v52 = vrot.slane %v6020_v56, %v12519_v36  ;;  %v5505_v22 = vrot.slane %v6021_v33, %v12519_v36  ;;  %v12758_v28 = vmax.f32 %v12756_v60, %v12757_v1  ;;  %v12777_v15 = vld [vmem:[#allocation48_spill] sm:$0xff]  ;;  %v12778_v9 = vld [vmem:[#allocation239_spill] sm:$0xff]  ;;  %v12780_v42 = vld [vmem:[#allocation50_spill] sm:$0xff] }
 0x56d   :  { %v6023_v0 = vpack.c.bf16 %v12749_v51, %v12746_v40  ;;  %v6024_v13 = vpack.c.bf16 %v12755_v45, %v12752_v27  ;;  %v12761_v31 = vmax.f32 %v12759_v26, %v12760_v16  ;;  %v5489_v55 = vcombine.low %v5481_v62, %v5488_v8  ;;  %v12781_v46 = vld [vmem:[#allocation240_spill] sm:$0xff]  ;;  %v12783_v33 = vld [vmem:[#allocation49_spill] sm:$0xff]  ;;  %v12786_v21 = vld [vmem:[#allocation51_spill] sm:$0xff] }
 0x56e   :  { %v5515_v2 = vrot.slane %v6022_v39, %v12519_v36  ;;  %v12764_v18 = vmax.f32 %v12762_v17, %v12763_v44  ;;  %v12767_v49 = vmax.f32 %v12765_v54, %v12766_v10  ;;  %v5506_v41 = vcombine.low %v5498_v52, %v5505_v22  ;;  %v12784_v3 = vld [vmem:[#allocation241_spill] sm:$0xff]  ;;  %v12787_v7 = vld [vmem:[#allocation242_spill] sm:$0xff]  ;;  %v12789_v35 = vld [vmem:[#allocation52_spill] sm:$0xff] }
 0x56f   :  { %v6025_v5 = vpack.c.bf16 %v12761_v31, %v12758_v28  ;;  %v5522_v38 = vrot.slane %v6023_v0, %v12519_v36  ;;  %v5532_v29 = vrot.slane %v6024_v13, %v12519_v36  ;;  %v12770_v43 = vmax.f32 %v12768_v14, %v12769_v61  ;;  %5697 = vst [vmem:[%s10874_s4 + $0xb0] sm:$0xff] %v5489_v55  ;;  %v12790_v40 = vld [vmem:[#allocation243_spill] sm:$0xff]  ;;  %v12792_v51 = vld [vmem:[#allocation54_spill] sm:$0xff]  ;;  %v12793_v0 = vld [vmem:[#allocation244_spill] sm:$0xff] }
 0x570   :  { %v6026_v20 = vpack.c.bf16 %v12767_v49, %v12764_v18  ;;  %v12773_v34 = vmax.f32 %v12771_v48, %v12772_v23  ;;  %v12776_v58 = vmax.f32 %v12774_v63, %v12775_v37  ;;  %v12779_v56 = vmax.f32 %v12777_v15, %v12778_v9  ;;  %v12795_v22 = vld [vmem:[#allocation53_spill] sm:$0xff]  ;;  %5698 = vst [vmem:[%s10874_s4 + $0xb8] sm:$0xff] %v5506_v41  ;;  %v12800_v13 = vld [vmem:[#allocation55_spill] sm:$0xff]  ;;  %v12801_v60 = vld [vmem:[#allocation246_spill] sm:$0xff] }
 0x571   :  { %v5539_v19 = vrot.slane %v6025_v5, %v12519_v36  ;;  %v5523_v62 = vcombine.low %v5515_v2, %v5522_v38  ;;  %v12782_v4 = vmax.f32 %v12780_v42, %v12781_v46  ;;  %v12785_v8 = vmax.f32 %v12783_v33, %v12784_v3  ;;  %v12796_v25 = vld [vmem:[#allocation245_spill] sm:$0xff]  ;;  %v12803_v28 = vld [vmem:[#allocation123_spill] sm:$0xff]  ;;  %v12806_v5 = vld [vmem:[#allocation124_spill] sm:$0xff] }
 0x572   :  { %v6027_v12 = vpack.c.bf16 %v12773_v34, %v12770_v43  ;;  %v5549_v30 = vrot.slane %v6026_v20, %v12519_v36  ;;  %v6028_v32 = vpack.c.bf16 %v12779_v56, %v12776_v58  ;;  %v12788_v39 = vmax.f32 %v12786_v21, %v12787_v7  ;;  %v12804_v26 = vld [vmem:[#allocation247_spill] sm:$0xff]  ;;  %v12807_v55 = vld [vmem:[#allocation248_spill] sm:$0xff]  ;;  %v12809_v38 = vld [vmem:[#allocation125_spill] sm:$0xff] }
 0x573   :  { %v6029_v47 = vpack.c.bf16 %v12785_v8, %v12782_v4  ;;  %v5540_v11 = vcombine.low %v5532_v29, %v5539_v19  ;;  %v12791_v6 = vmax.f32 %v12789_v35, %v12790_v40  ;;  %v12794_v52 = vmax.f32 %v12792_v51, %v12793_v0  ;;  %v12810_v17 = vld [vmem:[#allocation249_spill] sm:$0xff]  ;;  %5699 = vst [vmem:[%s10874_s4 + $0xc0] sm:$0xff] %v5523_v62  ;;  %v12812_v20 = vld [vmem:[#allocation126_spill] sm:$0xff]  ;;  %v12815_v19 = vld [vmem:[#allocation127_spill] sm:$0xff] }
 0x574   :  { %v5556_v50 = vrot.slane %v6027_v12, %v12519_v36  ;;  %v12797_v59 = vmax.f32 %v12795_v22, %v12796_v25  ;;  %v5566_v24 = vrot.slane %v6028_v32, %v12519_v36  ;;  %v12802_v1 = vmax.f32 %v12800_v13, %v12801_v60  ;;  %v12813_v41 = vld [vmem:[#allocation250_spill] sm:$0xff]  ;;  %v12816_v14 = vld [vmem:[#allocation251_spill] sm:$0xff]  ;;  %v12818_v12 = vld [vmem:[#allocation128_spill] sm:$0xff] }
 0x575   :  { %v6030_v57 = vpack.c.bf16 %v12791_v6, %v12788_v39  ;;  %v5573_v45 = vrot.slane %v6029_v47, %v12519_v36  ;;  %v12805_v16 = vmax.f32 %v12803_v28, %v12804_v26  ;;  %v12808_v2 = vmax.f32 %v12806_v5, %v12807_v55  ;;  %5700 = vst [vmem:[%s10874_s4 + $0xc8] sm:$0xff] %v5540_v11  ;;  %v12819_v62 = vld [vmem:[#allocation252_spill] sm:$0xff]  ;;  %v12821_v63 = vld [vmem:[#allocation129_spill] sm:$0xff]  ;;  %v12825_v42 = vld [vmem:[#allocation254_spill] sm:$0xff] }
 0x576   :  { %v6031_v27 = vpack.c.bf16 %v12797_v59, %v12794_v52  ;;  %v12811_v44 = vmax.f32 %v12809_v38, %v12810_v17  ;;  %v5557_v54 = vcombine.low %v5549_v30, %v5556_v50  ;;  %v12814_v29 = vmax.f32 %v12812_v20, %v12813_v41  ;;  %v12822_v37 = vld [vmem:[#allocation253_spill] sm:$0xff]  ;;  %v12824_v32 = vld [vmem:[#allocation56_spill] sm:$0xff]  ;;  %v12827_v4 = vld [vmem:[#allocation58_spill] sm:$0xff] }
 0x577   :  { %v6032_v31 = vpack.c.bf16 %v12805_v16, %v12802_v1  ;;  %v5583_v10 = vrot.slane %v6030_v57, %v12519_v36  ;;  %v12817_v61 = vmax.f32 %v12815_v19, %v12816_v14  ;;  %v5574_v48 = vcombine.low %v5566_v24, %v5573_v45  ;;  %v12828_v33 = vld [vmem:[#allocation255_spill] sm:$0xff]  ;;  %v12830_v47 = vld [vmem:[#allocation57_spill] sm:$0xff]  ;;  %v12831_v11 = vld [vmem:[#allocation256_spill] sm:$0xff] }
 0x578   :  { %v6033_v18 = vpack.c.bf16 %v12811_v44, %v12808_v2  ;;  %v5590_v49 = vrot.slane %v6031_v27, %v12519_v36  ;;  %v12820_v30 = vmax.f32 %v12818_v12, %v12819_v62  ;;  %v12823_v58 = vmax.f32 %v12821_v63, %v12822_v37  ;;  %v12833_v21 = vld [vmem:[#allocation59_spill] sm:$0xff]  ;;  %v12834_v7 = vld [vmem:[#allocation257_spill] sm:$0xff]  ;;  %5701 = vst [vmem:[%s10874_s4 + $0xd0] sm:$0xff] %v5557_v54 }
 0x579   :  { %v6034_v43 = vpack.c.bf16 %v12817_v61, %v12814_v29  ;;  %v5600_v23 = vrot.slane %v6032_v31, %v12519_v36  ;;  %v12826_v46 = vmax.f32 %v12824_v32, %v12825_v42  ;;  %v12829_v3 = vmax.f32 %v12827_v4, %v12828_v33  ;;  %5702 = vst [vmem:[%s10874_s4 + $0xd8] sm:$0xff] %v5574_v48 }
 0x57a   :  { %v5607_v34 = vrot.slane %v6033_v18, %v12519_v36  ;;  %v6035_v15 = vpack.c.bf16 %v12823_v58, %v12820_v30  ;;  %v5591_v9 = vcombine.low %v5583_v10, %v5590_v49  ;;  %v12832_v50 = vmax.f32 %v12830_v47, %v12831_v11 }
 0x57b   :  { %v5617_v56 = vrot.slane %v6034_v43, %v12519_v36  ;;  %v6036_v8 = vpack.c.bf16 %v12829_v3, %v12826_v46  ;;  %v12835_v39 = vmax.f32 %v12833_v21, %v12834_v7 }
 0x57c   :  { %v5608_v40 = vcombine.low %v5600_v23, %v5607_v34  ;;  %v5624_v6 = vrot.slane %v6035_v15, %v12519_v36  ;;  %5703 = vst [vmem:[%s10874_s4 + $0xe0] sm:$0xff] %v5591_v9 }
 0x57d   :  { %v6037_v35 = vpack.c.bf16 %v12835_v39, %v12832_v50  ;;  %v5634_v57 = vrot.slane %v6036_v8, %v12519_v36 }
 0x57e   :  { %v5625_v0 = vcombine.low %v5617_v56, %v5624_v6  ;;  %5704 = vst [vmem:[%s10874_s4 + $0xe8] sm:$0xff] %v5608_v40 }
 0x57f   :  { %v5641_v51 = vrot.slane %v6037_v35, %v12519_v36 }
 0x580   :  { %5705 = vst [vmem:[%s10874_s4 + $0xf0] sm:$0xff] %v5625_v0 }
 0x581   :  { %v5642_v52 = vcombine.low %v5634_v57, %v5641_v51 }
 0x583   :  { %5713 = vst.msk [vmem:[%s10874_s4 + $0xf8] sm:$0xff] %vm5712_vm9, %v5642_v52 }

// kernel: discriminator_forward.10
= control target key start
LH: loop header
LB: loop body
LE: loop exit
PB: predicated region body
PF: predicated region fallthrough
CT: control target
= control target key end

     0   :  { %v1640_v3 = vmov 0   ;;  %vm403_vm0 = vcmask 261120   ;;  %vm1093_vm1 = vcmask 1014784   ;;  %vm1515_vm2 = vcmask 1043456   ;;  %s2409_s0 = inlined_call_operand.vmem [shape: bf16[32,4092], index: 0, kind: input, shape index: {}]   ;;  %s2410_s1 = inlined_call_operand.vmem [shape: bf16[8,32], index: 1, kind: input, shape index: {}]   ;;  %s2411_s2 = inlined_call_operand.vmem [shape: f32[8,1], index: 2, kind: input, shape index: {}]   ;;  %s2412_s3 = inlined_call_operand.vmem [shape: f32[8,1], index: 3, kind: input, shape index: {}]   ;;  %s2413_s4 = inlined_call_operand.vmem [shape: bf16[8,4092], index: 4, kind: output, shape index: {}]  }
   0x1   :  { %v19_v0 = vld [vmem:[%s2409_s0] sm:$0xff]  ;;  %v20_v2 = vld [vmem:[%s2409_s0 + $0x8] sm:$0xff]  ;;  %439 = vmatprep.mubr.bf16.mxu0 %v1640_v3  ;;  %480 = vmatprep.mubr.bf16.mxu1 %v1640_v3  ;;  %v21_v15 = vld [vmem:[%s2409_s0 + $0x10] sm:$0xff]  ;;  %vm1516_vm3 = vcmask 1014788  }
   0x2   :  { %v35_v1 = vld [vmem:[%s2409_s0 + $0x80] sm:$0xff]  ;;  %v36_v6 = vld [vmem:[%s2409_s0 + $0x88] sm:$0xff]  ;;  %1636 = vset.pattern.permute.xlu1 %v1640_v3  ;;  %1637 = vset.pattern.permute.xlu0 %v1640_v3  ;;  %v37_v16 = vld [vmem:[%s2409_s0 + $0x90] sm:$0xff] }
   0x3   :  { %v1524_v4 = vcombine.high %v19_v0, %v35_v1  ;;  %v1523_v5 = vcombine.low %v19_v0, %v35_v1  ;;  %v51_v7 = vld [vmem:[%s2409_s0 + $0x100] sm:$0xff]  ;;  %v1526_v9 = vcombine.high %v20_v2, %v36_v6  ;;  %v1525_v10 = vcombine.low %v20_v2, %v36_v6  ;;  %v52_v12 = vld [vmem:[%s2409_s0 + $0x108] sm:$0xff]  ;;  %v22_v17 = vld [vmem:[%s2409_s0 + $0x18] sm:$0xff] }
   0x4   :  { %v67_v8 = vld [vmem:[%s2409_s0 + $0x180] sm:$0xff]  ;;  %v68_v13 = vld [vmem:[%s2409_s0 + $0x188] sm:$0xff]  ;;  %v38_v19 = vld [vmem:[%s2409_s0 + $0x98] sm:$0xff]  ;;  %v1528_v21 = vcombine.high %v21_v15, %v37_v16  ;;  %v1527_v28 = vcombine.low %v21_v15, %v37_v16 }
   0x5   :  { %v1556_v11 = vcombine.high %v51_v7, %v67_v8  ;;  %407 = vmatprep.subr.bf16.mxu0 %v1524_v4  ;;  %v1558_v14 = vcombine.high %v52_v12, %v68_v13  ;;  %448 = vmatprep.subr.bf16.mxu1 %v1526_v9  ;;  %v1555_v18 = vcombine.low %v51_v7, %v67_v8  ;;  %v53_v23 = vld [vmem:[%s2409_s0 + $0x110] sm:$0xff]  ;;  %v54_v25 = vld [vmem:[%s2409_s0 + $0x118] sm:$0xff]  ;;  %v1721_v27 = vld [vmem:[%s2410_s1] sm:$0xf] }
   0x6   :  { %408 = vmatpush1.bf16.msra.mxu0 %v1523_v5  ;;  %449 = vmatpush1.bf16.msra.mxu1 %v1525_v10  ;;  %v1557_v20 = vcombine.low %v52_v12, %v68_v13  ;;  %v1530_v22 = vcombine.high %v22_v17, %v38_v19  ;;  %v69_v24 = vld [vmem:[%s2409_s0 + $0x190] sm:$0xff]  ;;  %v70_v26 = vld [vmem:[%s2409_s0 + $0x198] sm:$0xff]  ;;  %v1529_v29 = vcombine.low %v22_v17, %v38_v19  ;;  %v23_v32 = vld [vmem:[%s2409_s0 + $0x20] sm:$0xff] }
   0x7   :  { %409 = vmatprep.subr.bf16.mxu0 %v1556_v11  ;;  %450 = vmatprep.subr.bf16.mxu1 %v1558_v14  ;;  %v1560_v30 = vcombine.high %v53_v23, %v69_v24  ;;  %v1562_v31 = vcombine.high %v54_v25, %v70_v26  ;;  %v39_v33 = vld [vmem:[%s2409_s0 + $0xa0] sm:$0xff]  ;;  %v24_v34 = vld [vmem:[%s2409_s0 + $0x28] sm:$0xff]  ;;  %v1559_v36 = vcombine.low %v53_v23, %v69_v24  ;;  %v25_v48 = vld [vmem:[%s2409_s0 + $0x30] sm:$0xff] }
   0x8   :  { %v40_v35 = vld [vmem:[%s2409_s0 + $0xa8] sm:$0xff]  ;;  %v1561_v37 = vcombine.low %v54_v25, %v70_v26  ;;  %v1532_v38 = vcombine.high %v23_v32, %v39_v33  ;;  %v55_v40 = vld [vmem:[%s2409_s0 + $0x120] sm:$0xff]  ;;  %v1531_v44 = vcombine.low %v23_v32, %v39_v33  ;;  %v41_v49 = vld [vmem:[%s2409_s0 + $0xb0] sm:$0xff] }
   0x9   :  { %v1534_v39 = vcombine.high %v24_v34, %v40_v35  ;;  %v71_v41 = vld [vmem:[%s2409_s0 + $0x1a0] sm:$0xff]  ;;  %v56_v42 = vld [vmem:[%s2409_s0 + $0x128] sm:$0xff]  ;;  %v1533_v45 = vcombine.low %v24_v34, %v40_v35  ;;  %v26_v50 = vld [vmem:[%s2409_s0 + $0x38] sm:$0xff]  ;;  %v1536_v54 = vcombine.high %v25_v48, %v41_v49  ;;  %v1535_v60 = vcombine.low %v25_v48, %v41_v49 }
   0xa   :  { %410 = vmatpush1.bf16.msra.mxu0 %v1555_v18  ;;  %451 = vmatpush1.bf16.msra.mxu1 %v1557_v20  ;;  %v72_v43 = vld [vmem:[%s2409_s0 + $0x1a8] sm:$0xff]  ;;  %v1564_v46 = vcombine.high %v55_v40, %v71_v41  ;;  %v42_v51 = vld [vmem:[%s2409_s0 + $0xb8] sm:$0xff]  ;;  %v1563_v52 = vcombine.low %v55_v40, %v71_v41  ;;  %v57_v56 = vld [vmem:[%s2409_s0 + $0x130] sm:$0xff] }
   0xb   :  { %489 = vmatprep.subr.bf16.mxu0 %v1528_v21  ;;  %530 = vmatprep.subr.bf16.mxu1 %v1530_v22  ;;  %v1566_v47 = vcombine.high %v56_v42, %v72_v43  ;;  %v1565_v53 = vcombine.low %v56_v42, %v72_v43  ;;  %v1538_v55 = vcombine.high %v26_v50, %v42_v51  ;;  %v73_v57 = vld [vmem:[%s2409_s0 + $0x1b0] sm:$0xff]  ;;  %v58_v58 = vld [vmem:[%s2409_s0 + $0x138] sm:$0xff]  ;;  %v27_v0 = vld [vmem:[%s2409_s0 + $0x40] sm:$0xff] }
   0xc   :  { %v74_v59 = vld [vmem:[%s2409_s0 + $0x1b8] sm:$0xff]  ;;  %v1537_v61 = vcombine.low %v26_v50, %v42_v51  ;;  %v1568_v62 = vcombine.high %v57_v56, %v73_v57  ;;  %v43_v1 = vld [vmem:[%s2409_s0 + $0xc0] sm:$0xff]  ;;  %v28_v2 = vld [vmem:[%s2409_s0 + $0x48] sm:$0xff]  ;;  %v1567_v5 = vcombine.low %v57_v56, %v73_v57 }
   0xd   :  { %1587 = vmatmul.mubr.msk.bf16.vlgmr.msra.gmra.mrb[0].mxu0 %vm403_vm0, %v1721_v27  ;;  %1588 = vmatmul.mubr.msk.bf16.vlgmr.msra.gmra.mrb[0].mxu1 %vm403_vm0, %v1721_v27  ;;  %v1570_v63 = vcombine.high %v58_v58, %v74_v59  ;;  %v44_v4 = vld [vmem:[%s2409_s0 + $0xc8] sm:$0xff]  ;;  %v1569_v6 = vcombine.low %v58_v58, %v74_v59  ;;  %v1540_v7 = vcombine.high %v27_v0, %v43_v1  ;;  %v59_v9 = vld [vmem:[%s2409_s0 + $0x140] sm:$0xff]  ;;  %v29_v17 = vld [vmem:[%s2409_s0 + $0x50] sm:$0xff] }
   0xe   :  { %490 = vmatpush1.bf16.msra.mxu0 %v1527_v28  ;;  %531 = vmatpush1.bf16.msra.mxu1 %v1529_v29  ;;  %v1542_v8 = vcombine.high %v28_v2, %v44_v4  ;;  %v75_v10 = vld [vmem:[%s2409_s0 + $0x1c0] sm:$0xff]  ;;  %v60_v11 = vld [vmem:[%s2409_s0 + $0x148] sm:$0xff]  ;;  %v1539_v13 = vcombine.low %v27_v0, %v43_v1  ;;  %v1541_v14 = vcombine.low %v28_v2, %v44_v4  ;;  %v45_v18 = vld [vmem:[%s2409_s0 + $0xd0] sm:$0xff] }
   0xf   :  { %491 = vmatprep.subr.bf16.mxu0 %v1560_v30  ;;  %532 = vmatprep.subr.bf16.mxu1 %v1562_v31  ;;  %v76_v12 = vld [vmem:[%s2409_s0 + $0x1c8] sm:$0xff]  ;;  %v1572_v15 = vcombine.high %v59_v9, %v75_v10  ;;  %v30_v19 = vld [vmem:[%s2409_s0 + $0x58] sm:$0xff]  ;;  %v1571_v21 = vcombine.low %v59_v9, %v75_v10  ;;  %v1544_v23 = vcombine.high %v29_v17, %v45_v18  ;;  %v61_v25 = vld [vmem:[%s2409_s0 + $0x150] sm:$0xff] }
  0x10   :  { %521 = vmatprep.mubr.bf16.mxu0 %v1640_v3  ;;  %562 = vmatprep.mubr.bf16.mxu1 %v1640_v3  ;;  %v1574_v16 = vcombine.high %v60_v11, %v76_v12  ;;  %v46_v20 = vld [vmem:[%s2409_s0 + $0xd8] sm:$0xff]  ;;  %v1573_v22 = vcombine.low %v60_v11, %v76_v12  ;;  %v77_v26 = vld [vmem:[%s2409_s0 + $0x1d0] sm:$0xff]  ;;  %v1543_v30 = vcombine.low %v29_v17, %v45_v18  ;;  %v31_v34 = vld [vmem:[%s2409_s0 + $0x60] sm:$0xff] }
  0x11   :  { %v1546_v24 = vcombine.high %v30_v19, %v46_v20  ;;  %v62_v28 = vld [vmem:[%s2409_s0 + $0x158] sm:$0xff]  ;;  %v1545_v31 = vcombine.low %v30_v19, %v46_v20  ;;  %v1576_v32 = vcombine.high %v61_v25, %v77_v26  ;;  %v47_v35 = vld [vmem:[%s2409_s0 + $0xe0] sm:$0xff]  ;;  %v33_v50 = vld [vmem:[%s2409_s0 + $0x70] sm:$0xff] }
  0x12   :  { %492 = vmatpush1.bf16.msra.mxu0 %v1559_v36  ;;  %533 = vmatpush1.bf16.msra.mxu1 %v1561_v37  ;;  %v78_v29 = vld [vmem:[%s2409_s0 + $0x1d8] sm:$0xff]  ;;  %v32_v36 = vld [vmem:[%s2409_s0 + $0x68] sm:$0xff]  ;;  %v1548_v40 = vcombine.high %v31_v34, %v47_v35  ;;  %v63_v42 = vld [vmem:[%s2409_s0 + $0x160] sm:$0xff] }
  0x13   :  { %571 = vmatprep.subr.bf16.mxu0 %v1532_v38  ;;  %612 = vmatprep.subr.bf16.mxu1 %v1534_v39  ;;  %v1578_v33 = vcombine.high %v62_v28, %v78_v29  ;;  %v48_v37 = vld [vmem:[%s2409_s0 + $0xe8] sm:$0xff]  ;;  %v1575_v38 = vcombine.low %v61_v25, %v77_v26  ;;  %v1577_v39 = vcombine.low %v62_v28, %v78_v29  ;;  %v79_v43 = vld [vmem:[%s2409_s0 + $0x1e0] sm:$0xff]  ;;  %v49_v51 = vld [vmem:[%s2409_s0 + $0xf0] sm:$0xff] }
  0x14   :  { %v1550_v41 = vcombine.high %v32_v36, %v48_v37  ;;  %v1580_v48 = vcombine.high %v63_v42, %v79_v43  ;;  %v1552_v56 = vcombine.high %v33_v50, %v49_v51  ;;  %v65_v58 = vld [vmem:[%s2409_s0 + $0x170] sm:$0xff]  ;;  %vm2361_vm4 = vmor %vm1516_vm3, %vm1515_vm2 }
  0x15   :  { %1589 = vmatmul.mubr.msk.bf16.vlgmr.msra.gmra.mrb[4].mxu0 %vm403_vm0, %v1721_v27  ;;  %1590 = vmatmul.mubr.msk.bf16.vlgmr.msra.gmra.mrb[4].mxu1 %vm403_vm0, %v1721_v27  ;;  %v81_v59 = vld [vmem:[%s2409_s0 + $0x1f0] sm:$0xff] }
  0x16   :  { %572 = vmatpush1.bf16.msra.mxu0 %v1531_v44  ;;  %613 = vmatpush1.bf16.msra.mxu1 %v1533_v45  ;;  %v64_v44 = vld [vmem:[%s2409_s0 + $0x168] sm:$0xff]  ;;  %v1584_v0 = vcombine.high %v65_v58, %v81_v59  ;;  %v1583_v2 = vcombine.low %v65_v58, %v81_v59 }
  0x17   :  { %573 = vmatprep.subr.bf16.mxu0 %v1564_v46  ;;  %614 = vmatprep.subr.bf16.mxu1 %v1566_v47  ;;  %v80_v45 = vld [vmem:[%s2409_s0 + $0x1e8] sm:$0xff]  ;;  %v1547_v46 = vcombine.low %v31_v34, %v47_v35  ;;  %v1549_v47 = vcombine.low %v32_v36, %v48_v37 }
  0x18   :  { %603 = vmatprep.mubr.bf16.mxu0 %v1640_v3  ;;  %644 = vmatprep.mubr.bf16.mxu1 %v1640_v3  ;;  %v1582_v49 = vcombine.high %v64_v44, %v80_v45 }
  0x1a   :  { %574 = vmatpush1.bf16.msra.mxu0 %v1563_v52  ;;  %615 = vmatpush1.bf16.msra.mxu1 %v1565_v53  ;;  %v34_v52 = vld [vmem:[%s2409_s0 + $0x78] sm:$0xff] }
  0x1b   :  { %653 = vmatprep.subr.bf16.mxu0 %v1536_v54  ;;  %694 = vmatprep.subr.bf16.mxu1 %v1538_v55  ;;  %v50_v53 = vld [vmem:[%s2409_s0 + $0xf8] sm:$0xff]  ;;  %v1579_v54 = vcombine.low %v63_v42, %v79_v43  ;;  %v1581_v55 = vcombine.low %v64_v44, %v80_v45 }
  0x1c   :  { %v1554_v57 = vcombine.high %v34_v52, %v50_v53 }
  0x1d   :  { %1591 = vmatmul.mubr.msk.bf16.vlgmr.msra.gmra.mrb[8].mxu0 %vm403_vm0, %v1721_v27  ;;  %1592 = vmatmul.mubr.msk.bf16.vlgmr.msra.gmra.mrb[8].mxu1 %vm403_vm0, %v1721_v27 }
  0x1e   :  { %654 = vmatpush1.bf16.msra.mxu0 %v1535_v60  ;;  %695 = vmatpush1.bf16.msra.mxu1 %v1537_v61  ;;  %v66_v60 = vld [vmem:[%s2409_s0 + $0x178] sm:$0xff] }
  0x1f   :  { %655 = vmatprep.subr.bf16.mxu0 %v1568_v62  ;;  %696 = vmatprep.subr.bf16.mxu1 %v1570_v63  ;;  %v82_v61 = vld [vmem:[%s2409_s0 + $0x1f8] sm:$0xff]  ;;  %v1551_v62 = vcombine.low %v33_v50, %v49_v51  ;;  %v1553_v63 = vcombine.low %v34_v52, %v50_v53 }
  0x20   :  { %685 = vmatprep.mubr.bf16.mxu0 %v1640_v3  ;;  %726 = vmatprep.mubr.bf16.mxu1 %v1640_v3  ;;  %v1586_v1 = vcombine.high %v66_v60, %v82_v61  ;;  %v1585_v4 = vcombine.low %v66_v60, %v82_v61 }
  0x22   :  { %656 = vmatpush1.bf16.msra.mxu0 %v1567_v5  ;;  %697 = vmatpush1.bf16.msra.mxu1 %v1569_v6 }
  0x23   :  { %735 = vmatprep.subr.bf16.mxu0 %v1540_v7  ;;  %776 = vmatprep.subr.bf16.mxu1 %v1542_v8 }
  0x25   :  { %1593 = vmatmul.mubr.msk.bf16.vlgmr.msra.gmra.mrb[12].mxu0 %vm403_vm0, %v1721_v27  ;;  %1594 = vmatmul.mubr.msk.bf16.vlgmr.msra.gmra.mrb[12].mxu1 %vm403_vm0, %v1721_v27 }
  0x26   :  { %736 = vmatpush1.bf16.msra.mxu0 %v1539_v13  ;;  %777 = vmatpush1.bf16.msra.mxu1 %v1541_v14 }
  0x27   :  { %737 = vmatprep.subr.bf16.mxu0 %v1572_v15  ;;  %778 = vmatprep.subr.bf16.mxu1 %v1574_v16 }
  0x28   :  { %767 = vmatprep.mubr.bf16.mxu0 %v1640_v3  ;;  %808 = vmatprep.mubr.bf16.mxu1 %v1640_v3 }
  0x2a   :  { %738 = vmatpush1.bf16.msra.mxu0 %v1571_v21  ;;  %779 = vmatpush1.bf16.msra.mxu1 %v1573_v22 }
  0x2b   :  { %817 = vmatprep.subr.bf16.mxu0 %v1544_v23  ;;  %858 = vmatprep.subr.bf16.mxu1 %v1546_v24 }
  0x2d   :  { %1595 = vmatmul.mubr.msk.bf16.vlgmr.msra.gmra.mrb[16].mxu0 %vm403_vm0, %v1721_v27  ;;  %1596 = vmatmul.mubr.msk.bf16.vlgmr.msra.gmra.mrb[16].mxu1 %vm403_vm0, %v1721_v27 }
  0x2e   :  { %818 = vmatpush1.bf16.msra.mxu0 %v1543_v30  ;;  %859 = vmatpush1.bf16.msra.mxu1 %v1545_v31 }
  0x2f   :  { %819 = vmatprep.subr.bf16.mxu0 %v1576_v32  ;;  %860 = vmatprep.subr.bf16.mxu1 %v1578_v33 }
  0x30   :  { %849 = vmatprep.mubr.bf16.mxu0 %v1640_v3  ;;  %890 = vmatprep.mubr.bf16.mxu1 %v1640_v3 }
  0x32   :  { %820 = vmatpush1.bf16.msra.mxu0 %v1575_v38  ;;  %861 = vmatpush1.bf16.msra.mxu1 %v1577_v39 }
  0x33   :  { %899 = vmatprep.subr.bf16.mxu0 %v1548_v40  ;;  %940 = vmatprep.subr.bf16.mxu1 %v1550_v41 }
  0x35   :  { %1597 = vmatmul.mubr.msk.bf16.vlgmr.msra.gmra.mrb[20].mxu0 %vm403_vm0, %v1721_v27  ;;  %1598 = vmatmul.mubr.msk.bf16.vlgmr.msra.gmra.mrb[20].mxu1 %vm403_vm0, %v1721_v27 }
  0x36   :  { %900 = vmatpush1.bf16.msra.mxu0 %v1547_v46  ;;  %941 = vmatpush1.bf16.msra.mxu1 %v1549_v47 }
  0x37   :  { %901 = vmatprep.subr.bf16.mxu0 %v1580_v48  ;;  %942 = vmatprep.subr.bf16.mxu1 %v1582_v49 }
  0x38   :  { %931 = vmatprep.mubr.bf16.mxu0 %v1640_v3  ;;  %972 = vmatprep.mubr.bf16.mxu1 %v1640_v3 }
  0x3a   :  { %902 = vmatpush1.bf16.msra.mxu0 %v1579_v54  ;;  %943 = vmatpush1.bf16.msra.mxu1 %v1581_v55 }
  0x3b   :  { %981 = vmatprep.subr.bf16.mxu0 %v1552_v56  ;;  %1022 = vmatprep.subr.bf16.mxu1 %v1554_v57 }
  0x3d   :  { %1599 = vmatmul.mubr.msk.bf16.vlgmr.msra.gmra.mrb[24].mxu0 %vm403_vm0, %v1721_v27  ;;  %1600 = vmatmul.mubr.msk.bf16.vlgmr.msra.gmra.mrb[24].mxu1 %vm403_vm0, %v1721_v27 }
  0x3e   :  { %982 = vmatpush1.bf16.msra.mxu0 %v1551_v62  ;;  %1023 = vmatpush1.bf16.msra.mxu1 %v1553_v63 }
  0x3f   :  { %983 = vmatprep.subr.bf16.mxu0 %v1584_v0  ;;  %1024 = vmatprep.subr.bf16.mxu1 %v1586_v1 }
  0x40   :  { %1013 = vmatprep.mubr.bf16.mxu0 %v1640_v3  ;;  %1054 = vmatprep.mubr.bf16.mxu1 %v1640_v3 }
  0x42   :  { %984 = vmatpush1.bf16.msra.mxu0 %v1583_v2  ;;  %1025 = vmatpush1.bf16.msra.mxu1 %v1585_v4 }
  0x45   :  { %1601 = vmatmul.mubr.msk.bf16.vlgmr.msra.gmra.mrb[28].mxu0 %vm403_vm0, %v1721_v27  ;;  %1602 = vmatmul.mubr.msk.bf16.vlgmr.msra.gmra.mrb[28].mxu1 %vm403_vm0, %v1721_v27 }
  0xe0   :  { %v1913_v5 = vpop.f32.mrb[0].mxu0  ;;  %v1917_v7 = vpop.f32.mrb[0].mxu1 }
  0xe1   :  { %v1915_v6 = vpop.f32.mrb[1].mxu0  ;;  %v1921_v10 = vpop.f32.mrb[1].mxu1 }
  0xe2   :  { %v1063_v8 = vadd.f32 %v1915_v6, %v1913_v5  ;;  %v445_v9 = vpop.f32.mrb[2].mxu0  ;;  %v486_v11 = vpop.f32.mrb[2].mxu1 }
  0xe3   :  { %v446_v3 = vpop.f32.mrb[3].mxu0  ;;  %v487_v13 = vpop.f32.mrb[3].mxu1 }
  0xe4   :  { %v1064_v12 = vadd.f32 %v1063_v8, %v1917_v7 }
  0xe6   :  { %v1065_v14 = vadd.f32 %v1064_v12, %v1921_v10 }
  0xe8   :  { %v1925_v27 = vpop.f32.mrb[4].mxu0  ;;  %v1930_v17 = vpop.f32.mrb[4].mxu1 }
  0xe9   :  { %v1066_v15 = vadd.f32 %v1065_v14, %v1925_v27  ;;  %v1928_v16 = vpop.f32.mrb[5].mxu0  ;;  %v1932_v19 = vpop.f32.mrb[5].mxu1 }
  0xea   :  { %v527_v18 = vpop.f32.mrb[6].mxu0  ;;  %v568_v22 = vpop.f32.mrb[6].mxu1 }
  0xeb   :  { %v1067_v20 = vadd.f32 %v1066_v15, %v1928_v16  ;;  %v528_v21 = vpop.f32.mrb[7].mxu0  ;;  %v569_v23 = vpop.f32.mrb[7].mxu1 }
  0xed   :  { %v1068_v24 = vadd.f32 %v1067_v20, %v1930_v17 }
  0xef   :  { %v1069_v25 = vadd.f32 %v1068_v24, %v1932_v19 }
  0xf0   :  { %v1937_v26 = vpop.f32.mrb[8].mxu0  ;;  %v1942_v30 = vpop.f32.mrb[8].mxu1 }
  0xf1   :  { %v1070_v28 = vadd.f32 %v1069_v25, %v1937_v26  ;;  %v1940_v29 = vpop.f32.mrb[9].mxu0  ;;  %v1944_v32 = vpop.f32.mrb[9].mxu1 }
  0xf2   :  { %v609_v31 = vpop.f32.mrb[10].mxu0  ;;  %v650_v35 = vpop.f32.mrb[10].mxu1 }
  0xf3   :  { %v1071_v33 = vadd.f32 %v1070_v28, %v1940_v29  ;;  %v610_v34 = vpop.f32.mrb[11].mxu0  ;;  %v651_v36 = vpop.f32.mrb[11].mxu1 }
  0xf5   :  { %v1072_v37 = vadd.f32 %v1071_v33, %v1942_v30 }
  0xf7   :  { %v1073_v38 = vadd.f32 %v1072_v37, %v1944_v32 }
  0xf8   :  { %v1949_v39 = vpop.f32.mrb[12].mxu0  ;;  %v1954_v42 = vpop.f32.mrb[12].mxu1 }
  0xf9   :  { %v1074_v40 = vadd.f32 %v1073_v38, %v1949_v39  ;;  %v1952_v41 = vpop.f32.mrb[13].mxu0  ;;  %v1956_v44 = vpop.f32.mrb[13].mxu1 }
  0xfa   :  { %v691_v43 = vpop.f32.mrb[14].mxu0  ;;  %v732_v47 = vpop.f32.mrb[14].mxu1 }
  0xfb   :  { %v1075_v45 = vadd.f32 %v1074_v40, %v1952_v41  ;;  %v692_v46 = vpop.f32.mrb[15].mxu0  ;;  %v733_v48 = vpop.f32.mrb[15].mxu1 }
  0xfd   :  { %v1076_v49 = vadd.f32 %v1075_v45, %v1954_v42 }
  0xff   :  { %v1077_v50 = vadd.f32 %v1076_v49, %v1956_v44 }
 0x100   :  { %v1961_v51 = vpop.f32.mrb[16].mxu0  ;;  %v1966_v54 = vpop.f32.mrb[16].mxu1 }
 0x101   :  { %v1078_v52 = vadd.f32 %v1077_v50, %v1961_v51  ;;  %v1964_v53 = vpop.f32.mrb[17].mxu0  ;;  %v1968_v56 = vpop.f32.mrb[17].mxu1 }
 0x102   :  { %v773_v55 = vpop.f32.mrb[18].mxu0  ;;  %v814_v59 = vpop.f32.mrb[18].mxu1 }
 0x103   :  { %v1079_v57 = vadd.f32 %v1078_v52, %v1964_v53  ;;  %v774_v58 = vpop.f32.mrb[19].mxu0  ;;  %v815_v60 = vpop.f32.mrb[19].mxu1  ;;  %v1232_v55 = vld [vmem:[%s2411_s2] sm:$0xff] }
 0x104   :  { %1235 = vperm.xlu1 %1636, %v1232_v55  }
 0x105   :  { %v1080_v61 = vadd.f32 %v1079_v57, %v1966_v54  ;;  %v1270_v57 = vld [vmem:[%s2412_s3] sm:$0xff] }
 0x107   :  { %v1081_v62 = vadd.f32 %v1080_v61, %v1968_v56 }
 0x108   :  { %v1973_v63 = vpop.f32.mrb[20].mxu0  ;;  %v1978_v2 = vpop.f32.mrb[20].mxu1  ;;  %1273 = vperm.xlu1 %1636, %v1270_v57  }
 0x109   :  { %v1082_v0 = vadd.f32 %v1081_v62, %v1973_v63  ;;  %v1976_v1 = vpop.f32.mrb[21].mxu0  ;;  %v1980_v8 = vpop.f32.mrb[21].mxu1 }
 0x10a   :  { %v855_v4 = vpop.f32.mrb[22].mxu0  ;;  %v896_v11 = vpop.f32.mrb[22].mxu1 }
 0x10b   :  { %v1083_v9 = vadd.f32 %v1082_v0, %v1976_v1  ;;  %v856_v3 = vpop.f32.mrb[23].mxu0  ;;  %v897_v12 = vpop.f32.mrb[23].mxu1 }
 0x10d   :  { %v1084_v13 = vadd.f32 %v1083_v9, %v1978_v2 }
 0x10f   :  { %v1085_v14 = vadd.f32 %v1084_v13, %v1980_v8 }
 0x110   :  { %v1985_v15 = vpop.f32.mrb[24].mxu0  ;;  %v1990_v21 = vpop.f32.mrb[24].mxu1 }
 0x111   :  { %v1086_v18 = vadd.f32 %v1085_v14, %v1985_v15  ;;  %v1988_v20 = vpop.f32.mrb[25].mxu0  ;;  %v1992_v23 = vpop.f32.mrb[25].mxu1 }
 0x112   :  { %v937_v22 = vpop.f32.mrb[26].mxu0  ;;  %v978_v28 = vpop.f32.mrb[26].mxu1 }
 0x113   :  { %v1087_v24 = vadd.f32 %v1086_v18, %v1988_v20  ;;  %v938_v25 = vpop.f32.mrb[27].mxu0  ;;  %v979_v31 = vpop.f32.mrb[27].mxu1 }
 0x115   :  { %v1088_v33 = vadd.f32 %v1087_v24, %v1990_v21 }
 0x117   :  { %v1089_v34 = vadd.f32 %v1088_v33, %v1992_v23 }
 0x118   :  { %v1997_v35 = vpop.f32.mrb[28].mxu0  ;;  %v2002_v38 = vpop.f32.mrb[28].mxu1 }
 0x119   :  { %v1090_v36 = vadd.f32 %v1089_v34, %v1997_v35  ;;  %v2000_v37 = vpop.f32.mrb[29].mxu0  ;;  %v2004_v43 = vpop.f32.mrb[29].mxu1 }
 0x11a   :  { %v1019_v40 = vpop.f32.mrb[30].mxu0  ;;  %v1060_v47 = vpop.f32.mrb[30].mxu1  ;;  %v1094_v49 = vsel %vm1093_vm1, %v2004_v43, 0.0 }
 0x11b   :  { %v1091_v45 = vadd.f32 %v1090_v36, %v2000_v37  ;;  %v1020_v46 = vpop.f32.mrb[31].mxu0  ;;  %v1061_v48 = vpop.f32.mrb[31].mxu1 }
 0x11d   :  { %v1092_v50 = vadd.f32 %v1091_v45, %v2002_v38 }
 0x11f   :  { %v1095_v52 = vadd.f32 %v1094_v49, %v1092_v50 }
 0x121   :  { %1096 = vadd.xlane.f32.xlu0 %v1095_v52 }
 0x1ae   :  { %v1097_v58 = vpop.xlane.xlu0 %1096 }
 0x1af   :  { %v2016_v59 = vmul.f32 0.00024437928, %v1097_v58 }
 0x1b1   :  { %v2020_v60 = vsub.f32 %v1913_v5, %v2016_v59  ;;  %v2024_v61 = vsub.f32 %v1915_v6, %v2016_v59  ;;  %v2028_v62 = vsub.f32 %v1917_v7, %v2016_v59  ;;  %v2036_v9 = vsub.f32 %v1921_v10, %v2016_v59 }
 0x1b2   :  { %v2040_v5 = vsub.f32 %v1925_v27, %v2016_v59  ;;  %v2046_v7 = vsub.f32 %v1928_v16, %v2016_v59  ;;  %v2052_v10 = vsub.f32 %v1930_v17, %v2016_v59  ;;  %v2058_v14 = vsub.f32 %v1932_v19, %v2016_v59 }
 0x1b3   :  { %v1131_v0 = vmul.f32 %v2020_v60, %v2020_v60  ;;  %v1132_v4 = vmul.f32 %v2024_v61, %v2024_v61  ;;  %v1133_v6 = vmul.f32 %v2028_v62, %v2028_v62  ;;  %v1134_v11 = vmul.f32 %v2036_v9, %v2036_v9 }
 0x1b4   :  { %v1135_v27 = vmul.f32 %v2040_v5, %v2040_v5  ;;  %v1136_v16 = vmul.f32 %v2046_v7, %v2046_v7  ;;  %v2064_v22 = vsub.f32 %v1937_v26, %v2016_v59  ;;  %v1137_v17 = vmul.f32 %v2052_v10, %v2052_v10 }
 0x1b5   :  { %v1163_v3 = vadd.f32 %v1132_v4, %v1131_v0  ;;  %v2070_v25 = vsub.f32 %v1940_v29, %v2016_v59  ;;  %v1138_v19 = vmul.f32 %v2058_v14, %v2058_v14  ;;  %v2076_v31 = vsub.f32 %v1942_v30, %v2016_v59 }
 0x1b6   :  { %v1139_v26 = vmul.f32 %v2064_v22, %v2064_v22  ;;  %v2082_v34 = vsub.f32 %v1944_v32, %v2016_v59  ;;  %v2088_v40 = vsub.f32 %v1949_v39, %v2016_v59  ;;  %v2094_v46 = vsub.f32 %v1952_v41, %v2016_v59 }
 0x1b7   :  { %v1164_v12 = vadd.f32 %v1163_v3, %v1133_v6  ;;  %v1140_v29 = vmul.f32 %v2070_v25, %v2070_v25  ;;  %v1141_v30 = vmul.f32 %v2076_v31, %v2076_v31  ;;  %v2100_v48 = vsub.f32 %v1954_v42, %v2016_v59 }
 0x1b8   :  { %v1142_v32 = vmul.f32 %v2082_v34, %v2082_v34  ;;  %v1143_v39 = vmul.f32 %v2088_v40, %v2088_v40  ;;  %v2106_v50 = vsub.f32 %v1956_v44, %v2016_v59  ;;  %v1144_v41 = vmul.f32 %v2094_v46, %v2094_v46 }
 0x1b9   :  { %v1165_v13 = vadd.f32 %v1164_v12, %v1134_v11  ;;  %v2112_v55 = vsub.f32 %v1961_v51, %v2016_v59  ;;  %v1145_v42 = vmul.f32 %v2100_v48, %v2100_v48  ;;  %v2118_v58 = vsub.f32 %v1964_v53, %v2016_v59 }
 0x1ba   :  { %v1146_v44 = vmul.f32 %v2106_v50, %v2106_v50  ;;  %v2124_v4 = vsub.f32 %v1966_v54, %v2016_v59  ;;  %v2130_v3 = vsub.f32 %v1968_v56, %v2016_v59  ;;  %v2136_v12 = vsub.f32 %v1973_v63, %v2016_v59 }
 0x1bb   :  { %v1166_v18 = vadd.f32 %v1165_v13, %v1135_v27  ;;  %v1147_v51 = vmul.f32 %v2112_v55, %v2112_v55  ;;  %v1148_v53 = vmul.f32 %v2118_v58, %v2118_v58  ;;  %v2142_v13 = vsub.f32 %v1976_v1, %v2016_v59 }
 0x1bc   :  { %v1149_v54 = vmul.f32 %v2124_v4, %v2124_v4  ;;  %v1150_v56 = vmul.f32 %v2130_v3, %v2130_v3  ;;  %v1151_v63 = vmul.f32 %v2136_v12, %v2136_v12 }
 0x1bd   :  { %v1167_v24 = vadd.f32 %v1166_v18, %v1136_v16  ;;  %v2148_v18 = vsub.f32 %v1978_v2, %v2016_v59  ;;  %v1124_v2 = vsub.f32 %v1988_v20, %v2016_v59  ;;  %v1128_v20 = vsub.f32 %v2000_v37, %v2016_v59 }
 0x1bf   :  { %v1168_v28 = vadd.f32 %v1167_v24, %v1137_v17  ;;  %v1122_v24 = vsub.f32 %v1980_v8, %v2016_v59 }
 0x1c1   :  { %v1169_v33 = vadd.f32 %v1168_v28, %v1138_v19  ;;  %v1152_v19 = vmul.f32 %v2142_v13, %v2142_v13  ;;  %v1123_v28 = vsub.f32 %v1985_v15, %v2016_v59  ;;  %v1127_v15 = vsub.f32 %v1997_v35, %v2016_v59 }
 0x1c3   :  { %v1170_v36 = vadd.f32 %v1169_v33, %v1139_v26  ;;  %v1153_v26 = vmul.f32 %v2148_v18, %v2148_v18  ;;  %v1155_v8 = vmul.f32 %v1123_v28, %v1123_v28 }
 0x1c5   :  { %v1171_v45 = vadd.f32 %v1170_v36, %v1140_v29  ;;  %v1154_v29 = vmul.f32 %v1122_v24, %v1122_v24 }
 0x1c7   :  { %v1172_v47 = vadd.f32 %v1171_v45, %v1141_v30  ;;  %v1125_v30 = vsub.f32 %v1990_v21, %v2016_v59  ;;  %v1130_v21 = vsub.f32 %v2004_v43, %v2016_v59 }
 0x1c9   :  { %v1173_v49 = vadd.f32 %v1172_v47, %v1142_v32  ;;  %v1126_v32 = vsub.f32 %v1992_v23, %v2016_v59  ;;  %v1156_v47 = vmul.f32 %v1124_v2, %v1124_v2 }
 0x1cb   :  { %v1174_v52 = vadd.f32 %v1173_v49, %v1143_v39  ;;  %v1157_v49 = vmul.f32 %v1125_v30, %v1125_v30 }
 0x1cd   :  { %v1175_v57 = vadd.f32 %v1174_v52, %v1144_v41  ;;  %v1158_v52 = vmul.f32 %v1126_v32, %v1126_v32 }
 0x1cf   :  { %v1176_v0 = vadd.f32 %v1175_v57, %v1145_v42  ;;  %v1129_v57 = vsub.f32 %v2002_v38, %v2016_v59 }
 0x1d1   :  { %v1177_v6 = vadd.f32 %v1176_v0, %v1146_v44  ;;  %v1159_v44 = vmul.f32 %v1127_v15, %v1127_v15  ;;  %v1160_v0 = vmul.f32 %v1128_v20, %v1128_v20 }
 0x1d3   :  { %v1178_v11 = vadd.f32 %v1177_v6, %v1147_v51  ;;  %v1162_v6 = vmul.f32 %v1130_v21, %v1130_v21 }
 0x1d5   :  { %v1179_v27 = vadd.f32 %v1178_v11, %v1148_v53  ;;  %v1161_v53 = vmul.f32 %v1129_v57, %v1129_v57 }
 0x1d7   :  { %v1180_v16 = vadd.f32 %v1179_v27, %v1149_v54  ;;  %v1193_v54 = vsel %vm1093_vm1, %v1162_v6, 0.0 }
 0x1d9   :  { %v1181_v17 = vadd.f32 %v1180_v16, %v1150_v56 }
 0x1db   :  { %v1182_v1 = vadd.f32 %v1181_v17, %v1151_v63 }
 0x1dd   :  { %v1183_v33 = vadd.f32 %v1182_v1, %v1152_v19 }
 0x1df   :  { %v1184_v36 = vadd.f32 %v1183_v33, %v1153_v26 }
 0x1e1   :  { %v1185_v45 = vadd.f32 %v1184_v36, %v1154_v29 }
 0x1e3   :  { %v1186_v39 = vadd.f32 %v1185_v45, %v1155_v8 }
 0x1e5   :  { %v1187_v41 = vadd.f32 %v1186_v39, %v1156_v47 }
 0x1e7   :  { %v1188_v42 = vadd.f32 %v1187_v41, %v1157_v49 }
 0x1e9   :  { %v1189_v23 = vadd.f32 %v1188_v42, %v1158_v52 }
 0x1eb   :  { %v1190_v51 = vadd.f32 %v1189_v23, %v1159_v44 }
 0x1ed   :  { %v1191_v35 = vadd.f32 %v1190_v51, %v1160_v0 }
 0x1ef   :  { %v1192_v11 = vadd.f32 %v1191_v35, %v1161_v53 }
 0x1f1   :  { %v1194_v27 = vadd.f32 %v1193_v54, %v1192_v11 }
 0x1f3   :  { %1195 = vadd.xlane.f32.xlu0 %v1194_v27 }
 0x280   :  { %v1196_v37 = vpop.xlane.xlu0 %1195 }
 0x281   :  { %v1197_v56 = vmul.f32 0.00024437928, %v1196_v37 }
 0x283   :  { %v1198_v16 = vadd.f32 1e-05, %v1197_v56 }
 0x285   :  { %1638 = vrsqrt.f32 %v1198_v16 }
 0x28f   :  { %v1639_v43 = vpop.eup %1638 }
 0x290   :  { %v1200_v63 = vmul.f32 %v1639_v43, %v2020_v60  ;;  %v1201_v38 = vmul.f32 %v1639_v43, %v2024_v61  ;;  %v1202_v59 = vmul.f32 %v1639_v43, %v2028_v62  ;;  %v1203_v17 = vmul.f32 %v1639_v43, %v2036_v9 }
 0x291   :  { %v1204_v19 = vmul.f32 %v1639_v43, %v2040_v5  ;;  %v1205_v1 = vmul.f32 %v1639_v43, %v2046_v7  ;;  %v1206_v26 = vmul.f32 %v1639_v43, %v2052_v10  ;;  %v1207_v33 = vmul.f32 %v1639_v43, %v2058_v14 }
 0x292   :  { %v1208_v29 = vmul.f32 %v1639_v43, %v2064_v22  ;;  %v1209_v36 = vmul.f32 %v1639_v43, %v2070_v25  ;;  %v1210_v60 = vmul.f32 %v1639_v43, %v2076_v31  ;;  %v1211_v61 = vmul.f32 %v1639_v43, %v2082_v34 }
 0x293   :  { %v1212_v62 = vmul.f32 %v1639_v43, %v2088_v40  ;;  %v1213_v9 = vmul.f32 %v1639_v43, %v2094_v46  ;;  %v1214_v5 = vmul.f32 %v1639_v43, %v2100_v48  ;;  %v1215_v7 = vmul.f32 %v1639_v43, %v2106_v50  ;;  %v1236_v48 = vpop.permute.xlu1 %1235 }
 0x294   :  { %v1216_v10 = vmul.f32 %v1639_v43, %v2112_v55  ;;  %v1217_v14 = vmul.f32 %v1639_v43, %v2118_v58  ;;  %v1218_v22 = vmul.f32 %v1639_v43, %v2124_v4  ;;  %v1219_v25 = vmul.f32 %v1639_v43, %v2130_v3 }
 0x295   :  { %v1220_v31 = vmul.f32 %v1639_v43, %v2136_v12  ;;  %v1221_v34 = vmul.f32 %v1639_v43, %v2142_v13  ;;  %v1222_v40 = vmul.f32 %v1639_v43, %v2148_v18  ;;  %v1223_v8 = vmul.f32 %v1639_v43, %v1122_v24 }
 0x296   :  { %v1224_v46 = vmul.f32 %v1639_v43, %v1123_v28  ;;  %v1225_v45 = vmul.f32 %v1639_v43, %v1124_v2  ;;  %v1226_v47 = vmul.f32 %v1639_v43, %v1125_v30  ;;  %v1227_v50 = vmul.f32 %v1639_v43, %v1126_v32 }
 0x297   :  { %v1228_v39 = vmul.f32 %v1639_v43, %v1127_v15  ;;  %v1229_v55 = vmul.f32 %v1639_v43, %v1128_v20  ;;  %v1230_v49 = vmul.f32 %v1639_v43, %v1129_v57  ;;  %v1231_v58 = vmul.f32 %v1639_v43, %v1130_v21  ;;  %v1274_v27 = vpop.permute.xlu1 %1273 }
 0x298   :  { %v1238_v41 = vmul.f32 %v1236_v48, %v1200_v63  ;;  %v1239_v4 = vmul.f32 %v1236_v48, %v1201_v38  ;;  %v1240_v52 = vmul.f32 %v1236_v48, %v1202_v59  ;;  %v1241_v3 = vmul.f32 %v1236_v48, %v1203_v17 }
 0x299   :  { %v1242_v42 = vmul.f32 %v1236_v48, %v1204_v19  ;;  %v1243_v12 = vmul.f32 %v1236_v48, %v1205_v1  ;;  %v1244_v44 = vmul.f32 %v1236_v48, %v1206_v26  ;;  %v1245_v13 = vmul.f32 %v1236_v48, %v1207_v33 }
 0x29a   :  { %v1246_v23 = vmul.f32 %v1236_v48, %v1208_v29  ;;  %v1247_v18 = vmul.f32 %v1236_v48, %v1209_v36  ;;  %v1248_v24 = vmul.f32 %v1236_v48, %v1210_v60  ;;  %v1249_v28 = vmul.f32 %v1236_v48, %v1211_v61 }
 0x29b   :  { %v1250_v2 = vmul.f32 %v1236_v48, %v1212_v62  ;;  %v1251_v0 = vmul.f32 %v1236_v48, %v1213_v9  ;;  %v1252_v30 = vmul.f32 %v1236_v48, %v1214_v5  ;;  %v1253_v32 = vmul.f32 %v1236_v48, %v1215_v7 }
 0x29c   :  { %v1254_v15 = vmul.f32 %v1236_v48, %v1216_v10  ;;  %v1255_v20 = vmul.f32 %v1236_v48, %v1217_v14  ;;  %v1256_v57 = vmul.f32 %v1236_v48, %v1218_v22  ;;  %v1257_v21 = vmul.f32 %v1236_v48, %v1219_v25 }
 0x29d   :  { %v1258_v51 = vmul.f32 %v1236_v48, %v1220_v31  ;;  %v1259_v6 = vmul.f32 %v1236_v48, %v1221_v34  ;;  %v1260_v53 = vmul.f32 %v1236_v48, %v1222_v40  ;;  %v1261_v35 = vmul.f32 %v1236_v48, %v1223_v8 }
 0x29e   :  { %v1262_v11 = vmul.f32 %v1236_v48, %v1224_v46  ;;  %v1263_v54 = vmul.f32 %v1236_v48, %v1225_v45  ;;  %v1264_v37 = vmul.f32 %v1236_v48, %v1226_v47  ;;  %v1265_v56 = vmul.f32 %v1236_v48, %v1227_v50 }
 0x29f   :  { %v1266_v16 = vmul.f32 %v1236_v48, %v1228_v39  ;;  %v1267_v43 = vmul.f32 %v1236_v48, %v1229_v55  ;;  %v1268_v63 = vmul.f32 %v1236_v48, %v1230_v49  ;;  %v1269_v38 = vmul.f32 %v1236_v48, %v1231_v58 }
 0x2a0   :  { %v2198_v59 = vadd.f32 %v1274_v27, %v1238_v41  ;;  %v2200_v17 = vadd.f32 %v1274_v27, %v1239_v4  ;;  %v2202_v19 = vadd.f32 %v1274_v27, %v1240_v52  ;;  %v2204_v1 = vadd.f32 %v1274_v27, %v1241_v3 }
 0x2a1   :  { %v2206_v26 = vadd.f32 %v1274_v27, %v1242_v42  ;;  %v2208_v33 = vadd.f32 %v1274_v27, %v1243_v12  ;;  %v2210_v29 = vadd.f32 %v1274_v27, %v1244_v44  ;;  %v2212_v36 = vadd.f32 %v1274_v27, %v1245_v13 }
 0x2a2   :  { %v2214_v60 = vadd.f32 %v1274_v27, %v1246_v23  ;;  %v2216_v61 = vadd.f32 %v1274_v27, %v1247_v18  ;;  %v2218_v62 = vadd.f32 %v1274_v27, %v1248_v24  ;;  %v2220_v9 = vadd.f32 %v1274_v27, %v1249_v28 }
 0x2a3   :  { %v2222_v5 = vadd.f32 %v1274_v27, %v1250_v2  ;;  %v2224_v7 = vadd.f32 %v1274_v27, %v1251_v0  ;;  %v2226_v10 = vadd.f32 %v1274_v27, %v1252_v30  ;;  %v2228_v14 = vadd.f32 %v1274_v27, %v1253_v32 }
 0x2a4   :  { %v2230_v22 = vadd.f32 %v1274_v27, %v1254_v15  ;;  %v2232_v25 = vadd.f32 %v1274_v27, %v1255_v20  ;;  %v2234_v31 = vadd.f32 %v1274_v27, %v1256_v57  ;;  %v2236_v34 = vadd.f32 %v1274_v27, %v1257_v21 }
 0x2a5   :  { %v2238_v40 = vadd.f32 %v1274_v27, %v1258_v51  ;;  %v2240_v8 = vadd.f32 %v1274_v27, %v1259_v6  ;;  %v2242_v46 = vadd.f32 %v1274_v27, %v1260_v53  ;;  %v2244_v45 = vadd.f32 %v1274_v27, %v1261_v35 }
 0x2a6   :  { %v2246_v48 = vadd.f32 %v1274_v27, %v1262_v11  ;;  %v2248_v47 = vadd.f32 %v1274_v27, %v1263_v54  ;;  %v2250_v50 = vadd.f32 %v1274_v27, %v1264_v37  ;;  %v2252_v39 = vadd.f32 %v1274_v27, %v1265_v56 }
 0x2a7   :  { %v2254_v55 = vadd.f32 %v1274_v27, %v1266_v16  ;;  %v2256_v49 = vadd.f32 %v1274_v27, %v1267_v43  ;;  %v2258_v58 = vadd.f32 %v1274_v27, %v1268_v63  ;;  %v2261_v41 = vmul.f32 0.2, %v2198_v59 }
 0x2a8   :  { %v2264_v4 = vmul.f32 0.2, %v2200_v17  ;;  %v2267_v52 = vmul.f32 0.2, %v2202_v19  ;;  %v2269_v3 = vadd.f32 %v1274_v27, %v1269_v38  ;;  %v2272_v42 = vmul.f32 0.2, %v2204_v1 }
 0x2a9   :  { %2416 = vst [vmem:[#allocation2_spill] sm:$0xff] %v2256_v49  ;;  %v2275_v12 = vmul.f32 0.2, %v2206_v26  ;;  %v2278_v44 = vmul.f32 0.2, %v2208_v33  ;;  %v1340_v24 = vmax.f32 %v2198_v59, %v2261_v41 }
 0x2aa   :  { %2417 = vst [vmem:[#allocation3_spill] sm:$0xff] %v2269_v3  ;;  %v2281_v13 = vmul.f32 0.2, %v2210_v29  ;;  %v2284_v23 = vmul.f32 0.2, %v2212_v36  ;;  %v1341_v30 = vmax.f32 %v2200_v17, %v2264_v4  ;;  %v1342_v57 = vmax.f32 %v2202_v19, %v2267_v52 }
 0x2ab   :  { %v2287_v18 = vmul.f32 0.2, %v2214_v60  ;;  %v1317_v28 = vmul.f32 0.2, %v2216_v61  ;;  %v1318_v2 = vmul.f32 0.2, %v2218_v62  ;;  %v1343_v53 = vmax.f32 %v2204_v1, %v2272_v42 }
 0x2ac   :  { %v1319_v0 = vmul.f32 0.2, %v2220_v9  ;;  %v1320_v32 = vmul.f32 0.2, %v2222_v5  ;;  %v1321_v15 = vmul.f32 0.2, %v2224_v7  ;;  %v1344_v27 = vmax.f32 %v2206_v26, %v2275_v12 }
 0x2ad   :  { %v1322_v20 = vmul.f32 0.2, %v2226_v10  ;;  %v1323_v21 = vmul.f32 0.2, %v2228_v14  ;;  %v1324_v51 = vmul.f32 0.2, %v2230_v22  ;;  %v1345_v43 = vmax.f32 %v2208_v33, %v2278_v44 }
 0x2ae   :  { %v1325_v6 = vmul.f32 0.2, %v2232_v25  ;;  %v1326_v35 = vmul.f32 0.2, %v2234_v31  ;;  %v1327_v11 = vmul.f32 0.2, %v2236_v34  ;;  %v1346_v17 = vmax.f32 %v2210_v29, %v2281_v13 }
 0x2af   :  { %v1328_v54 = vmul.f32 0.2, %v2238_v40  ;;  %v1329_v37 = vmul.f32 0.2, %v2240_v8  ;;  %v1330_v56 = vmul.f32 0.2, %v2242_v46  ;;  %v1347_v33 = vmax.f32 %v2212_v36, %v2284_v23 }
 0x2b0   :  { %v1331_v16 = vmul.f32 0.2, %v2244_v45  ;;  %v1332_v63 = vmul.f32 0.2, %v2246_v48  ;;  %v1333_v38 = vmul.f32 0.2, %v2248_v47  ;;  %v1348_v52 = vmax.f32 %v2214_v60, %v2287_v18 }
 0x2b1   :  { %v1334_v59 = vmul.f32 0.2, %v2250_v50  ;;  %v1335_v19 = vmul.f32 0.2, %v2252_v39  ;;  %v1336_v1 = vmul.f32 0.2, %v2254_v55  ;;  %v1349_v42 = vmax.f32 %v2216_v61, %v1317_v28 }
 0x2b2   :  { %v1337_v26 = vmul.f32 0.2, %v2256_v49  ;;  %v1338_v41 = vmul.f32 0.2, %v2258_v58  ;;  %v1339_v4 = vmul.f32 0.2, %v2269_v3  ;;  %v1350_v29 = vmax.f32 %v2218_v62, %v1318_v2 }
 0x2b3   :  { %v1351_v12 = vmax.f32 %v2220_v9, %v1319_v0  ;;  %v1352_v44 = vmax.f32 %v2222_v5, %v1320_v32  ;;  %v1353_v13 = vmax.f32 %v2224_v7, %v1321_v15  ;;  %v1354_v49 = vmax.f32 %v2226_v10, %v1322_v20  ;;  %v2418_v18 = vld [vmem:[#allocation2_spill] sm:$0xff]  ;;  %v2419_v28 = vld [vmem:[#allocation3_spill] sm:$0xff] }
 0x2b4   :  { %v1355_v36 = vmax.f32 %v2228_v14, %v1323_v21  ;;  %v1356_v23 = vmax.f32 %v2230_v22, %v1324_v51  ;;  %v1357_v3 = vmax.f32 %v2232_v25, %v1325_v6  ;;  %v1358_v60 = vmax.f32 %v2234_v31, %v1326_v35 }
 0x2b5   :  { %v1359_v61 = vmax.f32 %v2236_v34, %v1327_v11  ;;  %v1360_v62 = vmax.f32 %v2238_v40, %v1328_v54  ;;  %v1361_v9 = vmax.f32 %v2240_v8, %v1329_v37  ;;  %v1362_v5 = vmax.f32 %v2242_v46, %v1330_v56 }
 0x2b6   :  { %v1363_v7 = vmax.f32 %v2244_v45, %v1331_v16  ;;  %v1364_v10 = vmax.f32 %v2246_v48, %v1332_v63  ;;  %v1365_v14 = vmax.f32 %v2248_v47, %v1333_v38  ;;  %v1366_v22 = vmax.f32 %v2250_v50, %v1334_v59 }
 0x2b7   :  { %v1367_v25 = vmax.f32 %v2252_v39, %v1335_v19  ;;  %v1368_v31 = vmax.f32 %v2254_v55, %v1336_v1  ;;  %v1369_v34 = vmax.f32 %v2418_v18, %v1337_v26  ;;  %v1370_v40 = vmax.f32 %v2258_v58, %v1338_v41 }
 0x2b8   :  { %v1371_v8 = vmax.f32 %v2419_v28, %v1339_v4  ;;  %v1619_v2 = vpack.c.bf16 %v1341_v30, %v1340_v24  ;;  %v1620_v46 = vpack.c.bf16 %v1343_v53, %v1342_v57  ;;  %v1621_v0 = vpack.c.bf16 %v1345_v43, %v1344_v27 }
 0x2b9   :  { %v1622_v45 = vpack.c.bf16 %v1347_v33, %v1346_v17  ;;  %v1623_v32 = vpack.c.bf16 %v1349_v42, %v1348_v52  ;;  %v1624_v48 = vpack.c.bf16 %v1351_v12, %v1350_v29  ;;  %v1625_v15 = vpack.c.bf16 %v1353_v13, %v1352_v44 }
 0x2ba   :  { %v1626_v47 = vpack.c.bf16 %v1355_v36, %v1354_v49  ;;  %v1627_v20 = vpack.c.bf16 %v1357_v3, %v1356_v23  ;;  %v1628_v50 = vpack.c.bf16 %v1359_v61, %v1358_v60  ;;  %1500 = vst [vmem:[%s2413_s4] sm:$0xff] %v1619_v2  ;;  %1501 = vst [vmem:[%s2413_s4 + $0x8] sm:$0xff] %v1620_v46 }
 0x2bb   :  { %v1629_v55 = vpack.c.bf16 %v1361_v9, %v1360_v62  ;;  %v1630_v58 = vpack.c.bf16 %v1363_v7, %v1362_v5  ;;  %v1631_v24 = vpack.c.bf16 %v1365_v14, %v1364_v10  ;;  %v1632_v49 = vpack.c.bf16 %v1367_v25, %v1366_v22  ;;  %1502 = vst [vmem:[%s2413_s4 + $0x10] sm:$0xff] %v1621_v0 }
 0x2bc   :  { %1503 = vst [vmem:[%s2413_s4 + $0x18] sm:$0xff] %v1622_v45  ;;  %1504 = vst [vmem:[%s2413_s4 + $0x20] sm:$0xff] %v1623_v32  ;;  %v1633_v3 = vpack.c.bf16 %v1369_v34, %v1368_v31  ;;  %v1634_v30 = vpack.c.bf16 %v1371_v8, %v1370_v40 }
 0x2bd   :  { %1505 = vst [vmem:[%s2413_s4 + $0x28] sm:$0xff] %v1624_v48  ;;  %1506 = vst [vmem:[%s2413_s4 + $0x30] sm:$0xff] %v1625_v15 }
 0x2be   :  { %1507 = vst [vmem:[%s2413_s4 + $0x38] sm:$0xff] %v1626_v47  ;;  %1508 = vst [vmem:[%s2413_s4 + $0x40] sm:$0xff] %v1627_v20 }
 0x2bf   :  { %1509 = vst [vmem:[%s2413_s4 + $0x48] sm:$0xff] %v1628_v50  ;;  %1510 = vst [vmem:[%s2413_s4 + $0x50] sm:$0xff] %v1629_v55 }
 0x2c0   :  { %1511 = vst [vmem:[%s2413_s4 + $0x58] sm:$0xff] %v1630_v58  ;;  %1512 = vst [vmem:[%s2413_s4 + $0x60] sm:$0xff] %v1631_v24 }
 0x2c1   :  { %1513 = vst [vmem:[%s2413_s4 + $0x68] sm:$0xff] %v1632_v49  ;;  %1514 = vst [vmem:[%s2413_s4 + $0x70] sm:$0xff] %v1633_v3 }
 0x2c2   :  { %1518 = vst.msk [vmem:[%s2413_s4 + $0x78] sm:$0xff] %vm2361_vm4, %v1634_v30 }

// kernel: discriminator_forward.11
= control target key start
LH: loop header
LB: loop body
LE: loop exit
PB: predicated region body
PF: predicated region fallthrough
CT: control target
= control target key end

     0   :  { %v949_v1 = vmov 0   ;;  %vm199_vm0 = vcmask 1043456   ;;  %vm195_vm1 = vcmask 326656   ;;  %v950_v37 = vmov 0.0   ;;  %s1344_s0 = inlined_call_operand.vmem [shape: bf16[40,1362], index: 0, kind: input, shape index: {}]   ;;  %s1345_s1 = inlined_call_operand.vmem [shape: bf16[16,40], index: 1, kind: input, shape index: {}]   ;;  %s1346_s2 = inlined_call_operand.vmem [shape: f32[16,1], index: 2, kind: input, shape index: {}]   ;;  %s1347_s3 = inlined_call_operand.vmem [shape: f32[16,1], index: 3, kind: input, shape index: {}]   ;;  %s1348_s4 = inlined_call_operand.vmem [shape: bf16[16,1362], index: 4, kind: output, shape index: {}]  }
   0x1   :  { %v901_v0 = vld [vmem:[%s1344_s0 + $0x4] ss:$44 sps:$4 sm:$0xff]   ;;  %265 = vmatprep.mubr.bf16.mxu0 %v949_v1  ;;  %308 = vmatprep.mubr.bf16.mxu1 %v949_v1  ;;  %v903_v2 = vld [vmem:[%s1344_s0 + $0xc] ss:$44 sps:$4 sm:$0xff]   ;;  %v906_v4 = vld [vmem:[%s1344_s0 + $0x8] ss:$44 sps:$4 sm:$0xff]  }
   0x2   :  { %900 = vset.pattern.permute.xlu1 %v949_v1  ;;  %899 = vset.pattern.permute.xlu0 %v949_v1  ;;  %v905_v3 = vld [vmem:[%s1344_s0] ss:$44 sps:$4 sm:$0xff]   ;;  %v907_v5 = vld [vmem:[%s1344_s0 + $0x5c] ss:$44 sps:$4 sm:$0xff]   ;;  %v909_v6 = vld [vmem:[%s1344_s0 + $0x64] ss:$44 sps:$4 sm:$0xff]  }
   0x3   :  { %233 = vmatprep.subr.bf16.mxu0 %v901_v0  ;;  %276 = vmatprep.subr.bf16.mxu1 %v903_v2  ;;  %v911_v7 = vld [vmem:[%s1344_s0 + $0x58] ss:$44 sps:$4 sm:$0xff]   ;;  %v912_v8 = vld [vmem:[%s1344_s0 + $0x60] ss:$44 sps:$4 sm:$0xff]   ;;  %v44_v9 = vld [vmem:[%s1344_s0 + $0xb0] sm:$0xff]  ;;  %vm951_vm2 = vmmov 0  }
   0x4   :  { %234 = vmatpush1.bf16.msra.mxu0 %v905_v3  ;;  %277 = vmatpush1.bf16.msra.mxu1 %v906_v4  ;;  %v45_v10 = vld [vmem:[%s1344_s0 + $0xb8] sm:$0xff]  ;;  %v837_v11 = vcombine.high %v44_v9, %v44_v9  ;;  %v836_v13 = vcombine.low %v44_v9, %v44_v9  ;;  %v920_v17 = vld [vmem:[%s1344_s0 + $0x14] ss:$44 sps:$4 sm:$0xff]   ;;  %v47_v25 = vld [vmem:[%s1344_s0 + $0xc8] sm:$0xff]  ;;  %vm498_vm3 = vcmask 670720   ;;  %vm801_vm4 = vcmask 666624  }
   0x5   :  { %235 = vmatprep.subr.bf16.mxu0 %v907_v5  ;;  %278 = vmatprep.subr.bf16.mxu1 %v909_v6  ;;  %v839_v12 = vcombine.high %v45_v10, %v45_v10  ;;  %v838_v14 = vcombine.low %v45_v10, %v45_v10  ;;  %v923_v18 = vld [vmem:[%s1344_s0 + $0x1c] ss:$44 sps:$4 sm:$0xff]   ;;  %v1024_v19 = vld [vmem:[%s1345_s1] sm:$0xff]   ;;  %v926_v22 = vld [vmem:[%s1344_s0 + $0x6c] ss:$44 sps:$4 sm:$0xff]   ;;  %v843_v29 = vcombine.high %v47_v25, %v47_v25 }
   0x6   :  { %v201_v15 = vsel %vm199_vm0, %v836_v13, 0  ;;  %v918_v20 = vld [vmem:[%s1344_s0 + $0x10] ss:$44 sps:$4 sm:$0xff]   ;;  %v921_v21 = vld [vmem:[%s1344_s0 + $0x18] ss:$44 sps:$4 sm:$0xff]   ;;  %v842_v31 = vcombine.low %v47_v25, %v47_v25  ;;  %v617_v47 = vld [vmem:[%s1346_s2 + $0x8] sm:$0xff] }
   0x7   :  { %v207_v16 = vsel %vm199_vm0, %v838_v14, 0  ;;  %v929_v23 = vld [vmem:[%s1344_s0 + $0x74] ss:$44 sps:$4 sm:$0xff]   ;;  %v927_v27 = vld [vmem:[%s1344_s0 + $0x70] ss:$44 sps:$4 sm:$0xff]   ;;  %625 = vperm.xlu1 %900, %v617_v47  }
   0x8   :  { %236 = vmatpush1.bf16.msra.mxu0 %v911_v7  ;;  %279 = vmatpush1.bf16.msra.mxu1 %v912_v8  ;;  %v46_v24 = vld [vmem:[%s1344_s0 + $0xc0] sm:$0xff]  ;;  %v924_v26 = vld [vmem:[%s1344_s0 + $0x68] ss:$44 sps:$4 sm:$0xff]   ;;  %v219_v33 = vsel %vm199_vm0, %v842_v31, 0  ;;  %v944_v44 = vld [vmem:[%s1344_s0 + $0xd8] ss:$0 sps:$4 sm:$0xff]  }
   0x9   :  { %847 = vmatprep.subr.msk.bf16.mxu0 %vm199_vm0, %v837_v11  ;;  %849 = vmatprep.subr.msk.bf16.mxu1 %vm199_vm0, %v839_v12  ;;  %v841_v28 = vcombine.high %v46_v24, %v46_v24  ;;  %v840_v30 = vcombine.low %v46_v24, %v46_v24  ;;  %v936_v34 = vld [vmem:[%s1344_s0 + $0x24] ss:$44 sps:$4 sm:$0xff]   ;;  %v934_v35 = vld [vmem:[%s1344_s0 + $0x20] ss:$44 sps:$4 sm:$0xff]   ;;  %v937_v36 = vld [vmem:[%s1344_s0 + $0x28] ss:$44 sps:$4 sm:$0xff]  }
   0xa   :  { %v940_v38 = vld [vmem:[%s1344_s0 + $0x7c] ss:$44 sps:$4 sm:$0xff]   ;;  %v48_v39 = vld [vmem:[%s1344_s0 + $0xd0] sm:$0xff]  ;;  %v938_v40 = vld [vmem:[%s1344_s0 + $0x78] ss:$44 sps:$4 sm:$0xff]   ;;  %v231_v46 = vsel %vm199_vm0, %v944_v44, 0 }
   0xb   :  { %v213_v32 = vsel %vm199_vm0, %v840_v30, 0  ;;  %v941_v41 = vld [vmem:[%s1344_s0 + $0x80] ss:$44 sps:$4 sm:$0xff]   ;;  %v845_v42 = vcombine.high %v48_v39, %v48_v39  ;;  %v844_v43 = vcombine.low %v48_v39, %v48_v39 }
   0xc   :  { %238 = vmatpush1.bf16.msra.mxu0 %v201_v15  ;;  %281 = vmatpush1.bf16.msra.mxu1 %v207_v16  ;;  %v650_v48 = vld [vmem:[%s1347_s3] sm:$0xff] }
   0xd   :  { %319 = vmatprep.subr.bf16.mxu0 %v920_v17  ;;  %362 = vmatprep.subr.bf16.mxu1 %v923_v18  ;;  %v225_v45 = vsel %vm199_vm0, %v844_v43, 0  ;;  %v616_v31 = vld [vmem:[%s1346_s2] sm:$0xff] }
   0xe   :  { %654 = vperm.xlu1 %900, %v650_v48  }
   0xf   :  { %848 = vmatmul.mubr.msk.bf16.vlgmr.msra.gmra.mrb[0].mxu0 %vm195_vm1, %v1024_v19  ;;  %850 = vmatmul.mubr.msk.bf16.vlgmr.msra.gmra.mrb[0].mxu1 %vm195_vm1, %v1024_v19 }
  0x10   :  { %320 = vmatpush1.bf16.msra.mxu0 %v918_v20  ;;  %363 = vmatpush1.bf16.msra.mxu1 %v921_v21 }
  0x11   :  { %321 = vmatprep.subr.bf16.mxu0 %v926_v22  ;;  %364 = vmatprep.subr.bf16.mxu1 %v929_v23 }
  0x12   :  { %351 = vmatprep.mubr.bf16.mxu0 %v949_v1  ;;  %394 = vmatprep.mubr.bf16.mxu1 %v949_v1 }
  0x14   :  { %322 = vmatpush1.bf16.msra.mxu0 %v924_v26  ;;  %365 = vmatpush1.bf16.msra.mxu1 %v927_v27 }
  0x15   :  { %851 = vmatprep.subr.msk.bf16.mxu0 %vm199_vm0, %v841_v28  ;;  %853 = vmatprep.subr.msk.bf16.mxu1 %vm199_vm0, %v843_v29 }
  0x18   :  { %324 = vmatpush1.bf16.msra.mxu0 %v213_v32  ;;  %367 = vmatpush1.bf16.msra.mxu1 %v219_v33 }
  0x19   :  { %405 = vmatprep.subr.bf16.mxu0 %v936_v34  ;;  %886 = vmatprep.subr.bf16.mxu1 %v950_v37 }
  0x1b   :  { %852 = vmatmul.mubr.msk.bf16.vlgmr.msra.gmra.mrb[4].mxu0 %vm195_vm1, %v1024_v19  ;;  %854 = vmatmul.mubr.msk.bf16.vlgmr.msra.gmra.mrb[4].mxu1 %vm195_vm1, %v1024_v19 }
  0x1c   :  { %406 = vmatpush1.bf16.msra.mxu0 %v934_v35  ;;  %887 = vmatpush3.bf16.msra.mxu1 %v937_v36 }
  0x1d   :  { %407 = vmatprep.subr.bf16.mxu0 %v940_v38  ;;  %888 = vmatprep.subr.bf16.mxu1 %v950_v37 }
  0x1e   :  { %437 = vmatprep.mubr.bf16.mxu0 %v949_v1  ;;  %892 = vmatprep.mubr.msk.bf16.mxu1 %vm951_vm2, %v950_v37 }
  0x20   :  { %408 = vmatpush1.bf16.msra.mxu0 %v938_v40  ;;  %889 = vmatpush3.bf16.msra.mxu1 %v941_v41 }
  0x21   :  { %855 = vmatprep.subr.msk.bf16.mxu0 %vm199_vm0, %v845_v42  ;;  %890 = vmatprep.subr.bf16.mxu1 %v950_v37 }
  0x24   :  { %410 = vmatpush1.bf16.msra.mxu0 %v225_v45  ;;  %891 = vmatpush3.bf16.msra.mxu1 %v231_v46 }
  0x27   :  { %856 = vmatmul.mubr.msk.bf16.vlgmr.msra.gmra.mrb[8].mxu0 %vm195_vm1, %v1024_v19  ;;  %893 = vmatmul.mubr.msk.bf16.vlgmr.msra.gmra.mrb[8].mxu1 %vm195_vm1, %v1024_v19 }
  0xe2   :  { %v267_v49 = vpop.f32.mrb[0].mxu0  ;;  %v310_v50 = vpop.f32.mrb[0].mxu1 }
  0xe3   :  { %v269_v51 = vpop.f32.mrb[1].mxu0  ;;  %v312_v52 = vpop.f32.mrb[1].mxu1 }
  0xe4   :  { %v489_v53 = vadd.f32 %v269_v51, %v267_v49  ;;  %v271_v54 = vpop.f32.mrb[2].mxu0  ;;  %v1102_v55 = vpop.f32.mrb[2].mxu1 }
  0xe5   :  { %v273_v56 = vpop.f32.mrb[3].mxu0  ;;  %v1104_v57 = vpop.f32.mrb[3].mxu1 }
  0xe6   :  { %v490_v58 = vadd.f32 %v489_v53, %v310_v50  ;;  %v503_v59 = vadd.f32 %v273_v56, %v271_v54 }
  0xe8   :  { %v491_v60 = vadd.f32 %v490_v58, %v312_v52  ;;  %v504_v61 = vadd.f32 %v503_v59, %v1102_v55 }
  0xea   :  { %v505_v62 = vadd.f32 %v504_v61, %v1104_v57 }
  0xee   :  { %v353_v63 = vpop.f32.mrb[4].mxu0  ;;  %v396_v0 = vpop.f32.mrb[4].mxu1 }
  0xef   :  { %v492_v1 = vadd.f32 %v491_v60, %v353_v63  ;;  %v355_v2 = vpop.f32.mrb[5].mxu0  ;;  %v398_v3 = vpop.f32.mrb[5].mxu1 }
  0xf0   :  { %v357_v4 = vpop.f32.mrb[6].mxu0  ;;  %v1108_v5 = vpop.f32.mrb[6].mxu1 }
  0xf1   :  { %v493_v6 = vadd.f32 %v492_v1, %v355_v2  ;;  %v506_v7 = vadd.f32 %v505_v62, %v357_v4  ;;  %v1110_v8 = vpop.f32.mrb[7].mxu0  ;;  %v1112_v9 = vpop.f32.mrb[7].mxu1 }
  0xf3   :  { %v494_v10 = vadd.f32 %v493_v6, %v396_v0  ;;  %v507_v11 = vadd.f32 %v506_v7, %v1110_v8 }
  0xf5   :  { %v495_v12 = vadd.f32 %v494_v10, %v398_v3  ;;  %v508_v13 = vadd.f32 %v507_v11, %v1108_v5 }
  0xf7   :  { %v509_v14 = vadd.f32 %v508_v13, %v1112_v9 }
  0xfa   :  { %v439_v15 = vpop.f32.mrb[8].mxu0  ;;  %v482_v16 = vpop.f32.mrb[8].mxu1 }
  0xfb   :  { %v496_v17 = vadd.f32 %v495_v12, %v439_v15  ;;  %v441_v18 = vpop.f32.mrb[9].mxu0  ;;  %v894_v19 = vpop.f32.mrb[9].mxu1  ;;  %v499_v22 = vsel %vm498_vm3, %v482_v16, 0.0 }
  0xfc   :  { %v1117_v20 = vpop.f32.mrb[10].mxu0  ;;  %v1119_v21 = vpop.f32.mrb[10].mxu1 }
  0xfd   :  { %v497_v23 = vadd.f32 %v496_v17, %v441_v18  ;;  %v510_v24 = vadd.f32 %v509_v14, %v1117_v20  ;;  %v1123_v25 = vpop.f32.mrb[11].mxu0  ;;  %v895_v26 = vpop.f32.mrb[11].mxu1  ;;  %v512_v29 = vsel %vm498_vm3, %v1119_v21, 0.0 }
  0xff   :  { %v511_v27 = vadd.f32 %v510_v24, %v1123_v25  ;;  %v500_v28 = vadd.f32 %v499_v22, %v497_v23 }
 0x101   :  { %501 = vadd.xlane.f32.xlu0 %v500_v28  ;;  %v513_v30 = vadd.f32 %v512_v29, %v511_v27 }
 0x105   :  { %514 = vadd.xlane.f32.xlu0 %v513_v30 }
 0x11b   :  { %620 = vperm.xlu0 %899, %v616_v31  }
 0x18e   :  { %v502_v32 = vpop.xlane.xlu0 %501 }
 0x18f   :  { %v516_v33 = vmul.f32 0.0007342144, %v502_v32 }
 0x191   :  { %v1131_v34 = vsub.f32 %v267_v49, %v516_v33  ;;  %v1133_v35 = vsub.f32 %v269_v51, %v516_v33  ;;  %v1135_v37 = vsub.f32 %v310_v50, %v516_v33  ;;  %v1137_v39 = vsub.f32 %v312_v52, %v516_v33 }
 0x192   :  { %v515_v36 = vpop.xlane.xlu0 %514  ;;  %v1143_v42 = vsub.f32 %v353_v63, %v516_v33  ;;  %v1151_v47 = vsub.f32 %v355_v2, %v516_v33  ;;  %v1155_v50 = vsub.f32 %v396_v0, %v516_v33  ;;  %v1169_v59 = vsub.f32 %v398_v3, %v516_v33 }
 0x193   :  { %v517_v38 = vmul.f32 0.0007342144, %v515_v36  ;;  %v540_v40 = vmul.f32 %v1131_v34, %v1131_v34  ;;  %v541_v41 = vmul.f32 %v1133_v35, %v1133_v35  ;;  %v542_v43 = vmul.f32 %v1135_v37, %v1135_v37 }
 0x194   :  { %v543_v48 = vmul.f32 %v1137_v39, %v1137_v39  ;;  %v544_v52 = vmul.f32 %v1143_v42, %v1143_v42  ;;  %v545_v60 = vmul.f32 %v1151_v47, %v1151_v47  ;;  %v1177_v0 = vsub.f32 %v439_v15, %v516_v33 }
 0x195   :  { %v562_v44 = vadd.f32 %v541_v41, %v540_v40  ;;  %v1147_v45 = vsub.f32 %v271_v54, %v517_v38  ;;  %v1149_v46 = vsub.f32 %v273_v56, %v517_v38  ;;  %v1158_v51 = vsub.f32 %v1102_v55, %v517_v38 }
 0x196   :  { %v1167_v58 = vsub.f32 %v1104_v57, %v517_v38  ;;  %v1173_v61 = vsub.f32 %v357_v4, %v517_v38  ;;  %v546_v1 = vmul.f32 %v1155_v50, %v1155_v50  ;;  %v528_v57 = vsub.f32 %v482_v16, %v516_v33 }
 0x197   :  { %v563_v49 = vadd.f32 %v562_v44, %v542_v43  ;;  %v551_v54 = vmul.f32 %v1147_v45, %v1147_v45  ;;  %v552_v56 = vmul.f32 %v1149_v46, %v1149_v46  ;;  %v553_v62 = vmul.f32 %v1158_v51, %v1158_v51  ;;  %v651_v43 = vld [vmem:[%s1347_s3 + $0x8] sm:$0xff]  ;;  %v1224_v44 = vpop.permute.xlu1 %625 }
 0x198   :  { %v1182_v3 = vsub.f32 %v1110_v8, %v517_v38  ;;  %v554_v6 = vmul.f32 %v1167_v58, %v1167_v58  ;;  %v527_v4 = vsub.f32 %v441_v18, %v516_v33  ;;  %v547_v10 = vmul.f32 %v1169_v59, %v1169_v59 }
 0x199   :  { %v564_v53 = vadd.f32 %v563_v49, %v543_v48  ;;  %v575_v63 = vadd.f32 %v552_v56, %v551_v54  ;;  %v1189_v12 = vsub.f32 %v1108_v5, %v517_v38  ;;  %v555_v13 = vmul.f32 %v1173_v61, %v1173_v61 }
 0x19a   :  { %v548_v8 = vmul.f32 %v1177_v0, %v1177_v0  ;;  %v550_v16 = vmul.f32 %v528_v57, %v528_v57  ;;  %v1196_v17 = vsub.f32 %v1112_v9, %v517_v38  ;;  %v556_v18 = vmul.f32 %v1182_v3, %v1182_v3 }
 0x19b   :  { %v565_v55 = vadd.f32 %v564_v53, %v544_v52  ;;  %v576_v7 = vadd.f32 %v575_v63, %v553_v62  ;;  %v549_v22 = vmul.f32 %v527_v4, %v527_v4  ;;  %v1201_v5 = vsub.f32 %v1117_v20, %v517_v38  ;;  %v1226_v48 = vpop.permute.xlu1 %654  ;;  %v621_v62 = vpop.permute.xlu0 %620 }
 0x19c   :  { %v557_v24 = vmul.f32 %v1189_v12, %v1189_v12  ;;  %v1206_v28 = vsub.f32 %v1119_v21, %v517_v38  ;;  %v571_v9 = vsel %vm498_vm3, %v550_v16, 0.0  ;;  %v1210_v29 = vsub.f32 %v1123_v25, %v517_v38 }
 0x19d   :  { %v566_v2 = vadd.f32 %v565_v55, %v545_v60  ;;  %v577_v14 = vadd.f32 %v576_v7, %v554_v6  ;;  %v558_v30 = vmul.f32 %v1196_v17, %v1196_v17  ;;  %v559_v20 = vmul.f32 %v1201_v5, %v1201_v5 }
 0x19e   :  { %v561_v36 = vmul.f32 %v1206_v28, %v1206_v28  ;;  %v560_v21 = vmul.f32 %v1210_v29, %v1210_v29 }
 0x19f   :  { %v567_v11 = vadd.f32 %v566_v2, %v546_v1  ;;  %v578_v19 = vadd.f32 %v577_v14, %v555_v13 }
 0x1a0   :  { %v584_v25 = vsel %vm498_vm3, %v561_v36, 0.0 }
 0x1a1   :  { %v568_v15 = vadd.f32 %v567_v11, %v547_v10  ;;  %v579_v26 = vadd.f32 %v578_v19, %v556_v18 }
 0x1a3   :  { %v569_v23 = vadd.f32 %v568_v15, %v548_v8  ;;  %v580_v31 = vadd.f32 %v579_v26, %v557_v24 }
 0x1a5   :  { %v570_v27 = vadd.f32 %v569_v23, %v549_v22  ;;  %v581_v33 = vadd.f32 %v580_v31, %v558_v30 }
 0x1a7   :  { %v572_v32 = vadd.f32 %v571_v9, %v570_v27  ;;  %v582_v40 = vadd.f32 %v581_v33, %v559_v20 }
 0x1a9   :  { %573 = vadd.xlane.f32.xlu1 %v572_v32  ;;  %v583_v41 = vadd.f32 %v582_v40, %v560_v21 }
 0x1ab   :  { %v585_v38 = vadd.f32 %v584_v25, %v583_v41 }
 0x1ad   :  { %586 = vadd.xlane.f32.xlu1 %v585_v38 }
 0x1be   :  { %659 = vperm.xlu1 %900, %v651_v43  }
 0x236   :  { %v574_v49 = vpop.xlane.xlu1 %573 }
 0x237   :  { %v588_v52 = vmul.f32 0.0007342144, %v574_v49 }
 0x239   :  { %v590_v53 = vadd.f32 1e-05, %v588_v52 }
 0x23a   :  { %v587_v54 = vpop.xlane.xlu1 %586 }
 0x23b   :  { %945 = vrsqrt.f32 %v590_v53  ;;  %v589_v56 = vmul.f32 0.0007342144, %v587_v54 }
 0x23d   :  { %v591_v60 = vadd.f32 1e-05, %v589_v56 }
 0x23e   :  { %v660_v41 = vpop.permute.xlu1 %659 }
 0x23f   :  { %947 = vrsqrt.f32 %v591_v60 }
 0x245   :  { %v946_v55 = vpop.eup %945 }
 0x246   :  { %v594_v63 = vmul.f32 %v946_v55, %v1131_v34  ;;  %v595_v1 = vmul.f32 %v946_v55, %v1133_v35  ;;  %v596_v2 = vmul.f32 %v946_v55, %v1135_v37  ;;  %v597_v6 = vmul.f32 %v946_v55, %v1137_v39 }
 0x247   :  { %v598_v7 = vmul.f32 %v946_v55, %v1143_v42  ;;  %v599_v10 = vmul.f32 %v946_v55, %v1151_v47  ;;  %v600_v11 = vmul.f32 %v946_v55, %v1155_v50  ;;  %v601_v13 = vmul.f32 %v946_v55, %v1169_v59 }
 0x248   :  { %v602_v14 = vmul.f32 %v946_v55, %v1177_v0  ;;  %v603_v8 = vmul.f32 %v946_v55, %v527_v4  ;;  %v604_v15 = vmul.f32 %v946_v55, %v528_v57  ;;  %v628_v16 = vmul.f32 %v621_v62, %v594_v63 }
 0x249   :  { %v629_v34 = vmul.f32 %v621_v62, %v595_v1  ;;  %v630_v18 = vmul.f32 %v621_v62, %v596_v2  ;;  %v631_v35 = vmul.f32 %v621_v62, %v597_v6  ;;  %v632_v19 = vmul.f32 %v621_v62, %v598_v7  ;;  %v948_v57 = vpop.eup %947 }
 0x24a   :  { %v633_v37 = vmul.f32 %v621_v62, %v599_v10  ;;  %v634_v22 = vmul.f32 %v621_v62, %v600_v11  ;;  %v1237_v39 = vmul.f32 %v621_v62, %v601_v13  ;;  %v1239_v42 = vmul.f32 %v621_v62, %v602_v14 }
 0x24b   :  { %v1241_v47 = vmul.f32 %v621_v62, %v603_v8  ;;  %v1243_v50 = vmul.f32 %v621_v62, %v604_v15  ;;  %v1246_v59 = vadd.f32 %v1226_v48, %v628_v16  ;;  %v1249_v0 = vadd.f32 %v1226_v48, %v629_v34 }
 0x24c   :  { %v1252_v4 = vadd.f32 %v1226_v48, %v630_v18  ;;  %v1255_v23 = vadd.f32 %v1226_v48, %v631_v35  ;;  %v1258_v24 = vadd.f32 %v1226_v48, %v632_v19  ;;  %v1261_v26 = vadd.f32 %v1226_v48, %v633_v37 }
 0x24d   :  { %v605_v27 = vmul.f32 %v948_v57, %v1147_v45  ;;  %v606_v9 = vmul.f32 %v948_v57, %v1149_v46  ;;  %v607_v30 = vmul.f32 %v948_v57, %v1158_v51  ;;  %v608_v31 = vmul.f32 %v948_v57, %v1167_v58 }
 0x24e   :  { %v609_v32 = vmul.f32 %v948_v57, %v1173_v61  ;;  %v610_v20 = vmul.f32 %v948_v57, %v1182_v3  ;;  %v611_v33 = vmul.f32 %v948_v57, %v1189_v12  ;;  %v612_v36 = vmul.f32 %v948_v57, %v1196_v17 }
 0x24f   :  { %v613_v21 = vmul.f32 %v948_v57, %v1201_v5  ;;  %v614_v40 = vmul.f32 %v948_v57, %v1210_v29  ;;  %v615_v45 = vmul.f32 %v948_v57, %v1206_v28  ;;  %v639_v46 = vmul.f32 %v1224_v44, %v605_v27 }
 0x250   :  { %v640_v51 = vmul.f32 %v1224_v44, %v606_v9  ;;  %v641_v58 = vmul.f32 %v1224_v44, %v607_v30  ;;  %v642_v61 = vmul.f32 %v1224_v44, %v608_v31  ;;  %v643_v3 = vmul.f32 %v1224_v44, %v609_v32 }
 0x251   :  { %v644_v12 = vmul.f32 %v1224_v44, %v610_v20  ;;  %v645_v17 = vmul.f32 %v1224_v44, %v611_v33  ;;  %v646_v5 = vmul.f32 %v1224_v44, %v612_v36  ;;  %v647_v29 = vmul.f32 %v1224_v44, %v613_v21 }
 0x252   :  { %v648_v28 = vmul.f32 %v1224_v44, %v614_v40  ;;  %v649_v25 = vmul.f32 %v1224_v44, %v615_v45  ;;  %v673_v38 = vadd.f32 %v660_v41, %v639_v46  ;;  %v674_v43 = vadd.f32 %v660_v41, %v640_v51 }
 0x253   :  { %v675_v49 = vadd.f32 %v660_v41, %v641_v58  ;;  %v676_v52 = vadd.f32 %v660_v41, %v642_v61  ;;  %v677_v53 = vadd.f32 %v660_v41, %v643_v3  ;;  %v678_v54 = vadd.f32 %v660_v41, %v644_v12 }
 0x254   :  { %v679_v56 = vadd.f32 %v660_v41, %v645_v17  ;;  %v680_v60 = vadd.f32 %v660_v41, %v646_v5  ;;  %v681_v55 = vadd.f32 %v660_v41, %v647_v29  ;;  %v682_v62 = vadd.f32 %v660_v41, %v648_v28 }
 0x255   :  { %v683_v63 = vadd.f32 %v660_v41, %v649_v25  ;;  %v695_v1 = vmul.f32 0.2, %v673_v38  ;;  %v696_v2 = vmul.f32 0.2, %v674_v43  ;;  %v697_v6 = vmul.f32 0.2, %v675_v49 }
 0x256   :  { %v698_v7 = vmul.f32 0.2, %v676_v52  ;;  %v699_v10 = vmul.f32 0.2, %v677_v53  ;;  %v700_v11 = vmul.f32 0.2, %v678_v54  ;;  %v668_v44 = vadd.f32 %v1226_v48, %v634_v22 }
 0x257   :  { %v701_v13 = vmul.f32 0.2, %v679_v56  ;;  %v702_v14 = vmul.f32 0.2, %v680_v60  ;;  %v703_v8 = vmul.f32 0.2, %v681_v55  ;;  %v717_v15 = vmax.f32 %v673_v38, %v695_v1 }
 0x258   :  { %v704_v16 = vmul.f32 0.2, %v682_v62  ;;  %v705_v34 = vmul.f32 0.2, %v683_v63  ;;  %v718_v18 = vmax.f32 %v674_v43, %v696_v2  ;;  %v719_v35 = vmax.f32 %v675_v49, %v697_v6 }
 0x259   :  { %v720_v19 = vmax.f32 %v676_v52, %v698_v7  ;;  %v721_v37 = vmax.f32 %v677_v53, %v699_v10  ;;  %v722_v57 = vmax.f32 %v678_v54, %v700_v11  ;;  %v723_v27 = vmax.f32 %v679_v56, %v701_v13 }
 0x25a   :  { %v724_v9 = vmax.f32 %v680_v60, %v702_v14  ;;  %v725_v30 = vmax.f32 %v681_v55, %v703_v8  ;;  %v726_v31 = vmax.f32 %v682_v62, %v704_v16  ;;  %v727_v32 = vmax.f32 %v683_v63, %v705_v34 }
 0x25b   :  { %v876_v20 = vpack.c.bf16 %v718_v18, %v717_v15  ;;  %v877_v33 = vpack.c.bf16 %v720_v19, %v719_v35  ;;  %v878_v36 = vpack.c.bf16 %v722_v57, %v721_v37  ;;  %v669_v22 = vadd.f32 %v1226_v48, %v1237_v39 }
 0x25c   :  { %v879_v21 = vpack.c.bf16 %v724_v9, %v723_v27  ;;  %v880_v40 = vpack.c.bf16 %v726_v31, %v725_v30  ;;  %v881_v45 = vpack.c.bf16 %v727_v32, %v727_v32  ;;  %v670_v46 = vadd.f32 %v1226_v48, %v1239_v42 }
 0x25d   :  { %803 = vst [vmem:[%s1348_s4 + $0x2c] sm:$0xff] %v876_v20  ;;  %804 = vst [vmem:[%s1348_s4 + $0x34] sm:$0xff] %v877_v33  ;;  %v671_v39 = vadd.f32 %v1226_v48, %v1241_v47  ;;  %v672_v51 = vadd.f32 %v1226_v48, %v1243_v50  ;;  %v684_v42 = vmul.f32 0.2, %v1246_v59  ;;  %v685_v58 = vmul.f32 0.2, %v1249_v0 }
 0x25e   :  { %805 = vst [vmem:[%s1348_s4 + $0x3c] sm:$0xff] %v878_v36  ;;  %806 = vst [vmem:[%s1348_s4 + $0x44] sm:$0xff] %v879_v21  ;;  %v686_v47 = vmul.f32 0.2, %v1252_v4  ;;  %v687_v48 = vmul.f32 0.2, %v1255_v23 }
 0x25f   :  { %807 = vst [vmem:[%s1348_s4 + $0x4c] sm:$0xff] %v880_v40  ;;  %808 = vst.msk [vmem:[%s1348_s4 + $0x54] sm:$0xf] %vm801_vm4, %v881_v45  ;;  %v688_v50 = vmul.f32 0.2, %v1258_v24  ;;  %v706_v17 = vmax.f32 %v1246_v59, %v684_v42  ;;  %v707_v28 = vmax.f32 %v1249_v0, %v685_v58 }
 0x260   :  { %v689_v61 = vmul.f32 0.2, %v1261_v26  ;;  %v690_v3 = vmul.f32 0.2, %v668_v44  ;;  %v691_v12 = vmul.f32 0.2, %v669_v22  ;;  %v708_v25 = vmax.f32 %v1252_v4, %v686_v47 }
 0x261   :  { %v692_v5 = vmul.f32 0.2, %v670_v46  ;;  %v693_v29 = vmul.f32 0.2, %v671_v39  ;;  %v694_v41 = vmul.f32 0.2, %v672_v51  ;;  %v709_v38 = vmax.f32 %v1255_v23, %v687_v48 }
 0x262   :  { %v710_v43 = vmax.f32 %v1258_v24, %v688_v50  ;;  %v711_v49 = vmax.f32 %v1261_v26, %v689_v61  ;;  %v712_v52 = vmax.f32 %v668_v44, %v690_v3  ;;  %v713_v53 = vmax.f32 %v669_v22, %v691_v12 }
 0x263   :  { %v714_v54 = vmax.f32 %v670_v46, %v692_v5  ;;  %v715_v56 = vmax.f32 %v671_v39, %v693_v29  ;;  %v716_v60 = vmax.f32 %v672_v51, %v694_v41  ;;  %v870_v55 = vpack.c.bf16 %v707_v28, %v706_v17 }
 0x264   :  { %v871_v59 = vpack.c.bf16 %v709_v38, %v708_v25  ;;  %v872_v62 = vpack.c.bf16 %v711_v49, %v710_v43  ;;  %v873_v63 = vpack.c.bf16 %v713_v53, %v712_v52 }
 0x265   :  { %v874_v1 = vpack.c.bf16 %v715_v56, %v714_v54  ;;  %v875_v2 = vpack.c.bf16 %v716_v60, %v716_v60  ;;  %796 = vst [vmem:[%s1348_s4] sm:$0xff] %v870_v55 }
 0x266   :  { %797 = vst [vmem:[%s1348_s4 + $0x8] sm:$0xff] %v871_v59  ;;  %798 = vst [vmem:[%s1348_s4 + $0x10] sm:$0xff] %v872_v62 }
 0x267   :  { %799 = vst [vmem:[%s1348_s4 + $0x18] sm:$0xff] %v873_v63  ;;  %800 = vst [vmem:[%s1348_s4 + $0x20] sm:$0xff] %v874_v1 }
 0x268   :  { %802 = vst.msk [vmem:[%s1348_s4 + $0x28] sm:$0xf] %vm801_vm4, %v875_v2 }

// kernel: discriminator_forward.12
= control target key start
LH: loop header
LB: loop body
LE: loop exit
PB: predicated region body
PF: predicated region fallthrough
CT: control target
= control target key end

     0   :  { %v635_v1 = vmov 0   ;;  %vm205_vm0 = vcmask 654336   ;;  %vm342_vm1 = vcmask 310272   ;;  %vm525_vm2 = vcmask 1043456   ;;  %s793_s0 = inlined_call_operand.vmem [shape: bf16[80,678], index: 0, kind: input, shape index: {}]   ;;  %s794_s1 = inlined_call_operand.vmem [shape: bf16[16,80], index: 1, kind: input, shape index: {}]   ;;  %s795_s2 = inlined_call_operand.vmem [shape: f32[16,1], index: 2, kind: input, shape index: {}]   ;;  %s796_s3 = inlined_call_operand.vmem [shape: f32[16,1], index: 3, kind: input, shape index: {}]   ;;  %s797_s4 = inlined_call_operand.vmem [shape: bf16[16,678], index: 4, kind: output, shape index: {}]  }
   0x1   :  { %v585_v0 = vld [vmem:[%s793_s0 + $0x4] ss:$24 sps:$4 sm:$0xff]   ;;  %241 = vmatprep.mubr.bf16.mxu0 %v635_v1  ;;  %284 = vmatprep.mubr.bf16.mxu1 %v635_v1  ;;  %v587_v2 = vld [vmem:[%s793_s0] ss:$24 sps:$4 sm:$0xff]   ;;  %v590_v4 = vld [vmem:[%s793_s0 + $0x34] ss:$24 sps:$4 sm:$0xff]  }
   0x2   :  { %584 = vset.pattern.permute.xlu1 %v635_v1  ;;  %583 = vset.pattern.permute.xlu0 %v635_v1  ;;  %v588_v3 = vld [vmem:[%s793_s0 + $0xc] ss:$24 sps:$4 sm:$0xff]   ;;  %v592_v5 = vld [vmem:[%s793_s0 + $0x8] ss:$24 sps:$4 sm:$0xff]   ;;  %v594_v7 = vld [vmem:[%s793_s0 + $0x3c] ss:$24 sps:$4 sm:$0xff]  }
   0x3   :  { %209 = vmatprep.subr.bf16.mxu0 %v585_v0  ;;  %v593_v6 = vld [vmem:[%s793_s0 + $0x30] ss:$24 sps:$4 sm:$0xff]   ;;  %252 = vmatprep.subr.bf16.mxu1 %v588_v3  ;;  %v596_v8 = vld [vmem:[%s793_s0 + $0x64] ss:$24 sps:$4 sm:$0xff]   ;;  %v599_v10 = vld [vmem:[%s793_s0 + $0x60] ss:$24 sps:$4 sm:$0xff]  }
   0x4   :  { %210 = vmatpush1.bf16.msra.mxu0 %v587_v2  ;;  %253 = vmatpush1.bf16.msra.mxu1 %v592_v5  ;;  %v598_v9 = vld [vmem:[%s793_s0 + $0x38] ss:$24 sps:$4 sm:$0xff]   ;;  %v600_v11 = vld [vmem:[%s793_s0 + $0x6c] ss:$24 sps:$4 sm:$0xff]   ;;  %v604_v13 = vld [vmem:[%s793_s0 + $0x68] ss:$24 sps:$4 sm:$0xff]  }
   0x5   :  { %211 = vmatprep.subr.bf16.mxu0 %v590_v4  ;;  %254 = vmatprep.subr.bf16.mxu1 %v594_v7  ;;  %v602_v12 = vld [vmem:[%s793_s0 + $0x94] ss:$24 sps:$4 sm:$0xff]   ;;  %v605_v15 = vld [vmem:[%s793_s0 + $0x90] ss:$24 sps:$4 sm:$0xff]   ;;  %v608_v16 = vld [vmem:[%s793_s0 + $0xc4] ss:$24 sps:$4 sm:$0xff]  }
   0x6   :  { %v606_v14 = vld [vmem:[%s793_s0 + $0x9c] ss:$24 sps:$4 sm:$0xff]   ;;  %v610_v17 = vld [vmem:[%s793_s0 + $0x98] ss:$24 sps:$4 sm:$0xff]   ;;  %v612_v18 = vld [vmem:[%s793_s0 + $0xcc] ss:$24 sps:$4 sm:$0xff]  }
   0x7   :  { %v611_v19 = vld [vmem:[%s793_s0 + $0xc0] ss:$24 sps:$4 sm:$0xff]   ;;  %v618_v20 = vld [vmem:[%s793_s0 + $0x14] ss:$24 sps:$4 sm:$0xff]   ;;  %v616_v23 = vld [vmem:[%s793_s0 + $0x10] ss:$24 sps:$4 sm:$0xff]  }
   0x8   :  { %212 = vmatpush1.bf16.msra.mxu0 %v593_v6  ;;  %255 = vmatpush1.bf16.msra.mxu1 %v598_v9  ;;  %v615_v21 = vld [vmem:[%s793_s0 + $0xc8] ss:$24 sps:$4 sm:$0xff]   ;;  %v621_v24 = vld [vmem:[%s793_s0 + $0x44] ss:$24 sps:$4 sm:$0xff]   ;;  %v624_v26 = vld [vmem:[%s793_s0 + $0x74] ss:$24 sps:$4 sm:$0xff]  }
   0x9   :  { %213 = vmatprep.subr.bf16.mxu0 %v596_v8  ;;  %256 = vmatprep.subr.bf16.mxu1 %v600_v11  ;;  %v614_v22 = vld [vmem:[%s794_s1] sm:$0xff]   ;;  %v622_v27 = vld [vmem:[%s793_s0 + $0x70] ss:$24 sps:$4 sm:$0xff]   ;;  %v630_v30 = vld [vmem:[%s793_s0 + $0xd4] ss:$24 sps:$4 sm:$0xff]   ;;  %vm526_vm3 = vcmask 310276  }
   0xa   :  { %v619_v25 = vld [vmem:[%s793_s0 + $0x40] ss:$24 sps:$4 sm:$0xff]   ;;  %v627_v28 = vld [vmem:[%s793_s0 + $0xa4] ss:$24 sps:$4 sm:$0xff]   ;;  %v628_v31 = vld [vmem:[%s793_s0 + $0xd0] ss:$24 sps:$4 sm:$0xff]  }
   0xb   :  { %v625_v29 = vld [vmem:[%s793_s0 + $0xa0] ss:$24 sps:$4 sm:$0xff]   ;;  %v416_v32 = vld [vmem:[%s795_s2 + $0x8] sm:$0xff]  ;;  %vm527_vm4 = vmor %vm526_vm3, %vm525_vm2 }
   0xc   :  { %214 = vmatpush1.bf16.msra.mxu0 %v599_v10  ;;  %257 = vmatpush1.bf16.msra.mxu1 %v604_v13  ;;  %v439_v33 = vld [vmem:[%s796_s3] sm:$0xff] }
   0xd   :  { %215 = vmatprep.subr.bf16.mxu0 %v602_v12  ;;  %258 = vmatprep.subr.bf16.mxu1 %v606_v14  ;;  %v415_v58 = vld [vmem:[%s795_s2] sm:$0xff] }
   0xe   :  { %424 = vperm.xlu1 %584, %v416_v32  }
  0x10   :  { %216 = vmatpush1.bf16.msra.mxu0 %v605_v15  ;;  %259 = vmatpush1.bf16.msra.mxu1 %v610_v17 }
  0x11   :  { %217 = vmatprep.subr.bf16.mxu0 %v608_v16  ;;  %260 = vmatprep.subr.bf16.mxu1 %v612_v18 }
  0x12   :  { %443 = vperm.xlu1 %584, %v439_v33  }
  0x14   :  { %218 = vmatpush1.bf16.msra.mxu0 %v611_v19  ;;  %261 = vmatpush1.bf16.msra.mxu1 %v615_v21 }
  0x15   :  { %295 = vmatprep.subr.bf16.mxu0 %v618_v20 }
  0x17   :  { %567 = vmatmul.mubr.msk.bf16.vlgmr.msra.gmra.mrb[0].mxu0 %vm205_vm0, %v614_v22  ;;  %568 = vmatmul.mubr.msk.bf16.vlgmr.msra.gmra.mrb[0].mxu1 %vm205_vm0, %v614_v22 }
  0x18   :  { %296 = vmatpush1.bf16.msra.mxu0 %v616_v23  ;;  %327 = vmatprep.mubr.bf16.mxu0 %v635_v1 }
  0x19   :  { %297 = vmatprep.subr.bf16.mxu0 %v621_v24 }
  0x1c   :  { %298 = vmatpush1.bf16.msra.mxu0 %v619_v25 }
  0x1d   :  { %299 = vmatprep.subr.bf16.mxu0 %v624_v26 }
  0x20   :  { %300 = vmatpush1.bf16.msra.mxu0 %v622_v27 }
  0x21   :  { %301 = vmatprep.subr.bf16.mxu0 %v627_v28 }
  0x24   :  { %302 = vmatpush1.bf16.msra.mxu0 %v625_v29 }
  0x25   :  { %303 = vmatprep.subr.bf16.mxu0 %v630_v30 }
  0x28   :  { %304 = vmatpush1.bf16.msra.mxu0 %v628_v31 }
  0x2b   :  { %569 = vmatmul.mubr.msk.bf16.vlgmr.msra.gmra.mrb[4].mxu0 %vm205_vm0, %v614_v22 }
  0xea   :  { %v243_v34 = vpop.f32.mrb[0].mxu0  ;;  %v286_v38 = vpop.f32.mrb[0].mxu1 }
  0xeb   :  { %v245_v35 = vpop.f32.mrb[1].mxu0  ;;  %v288_v40 = vpop.f32.mrb[1].mxu1 }
  0xec   :  { %v338_v36 = vadd.f32 %v245_v35, %v243_v34  ;;  %v247_v37 = vpop.f32.mrb[2].mxu0  ;;  %v290_v43 = vpop.f32.mrb[2].mxu1 }
  0xed   :  { %v249_v39 = vpop.f32.mrb[3].mxu0  ;;  %v292_v44 = vpop.f32.mrb[3].mxu1 }
  0xee   :  { %v347_v41 = vadd.f32 %v249_v39, %v247_v37  ;;  %v339_v42 = vadd.f32 %v338_v36, %v286_v38  ;;  %v425_v36 = vpop.permute.xlu1 %424 }
  0xf0   :  { %v340_v45 = vadd.f32 %v339_v42, %v288_v40  ;;  %v348_v46 = vadd.f32 %v347_v41, %v290_v43 }
  0xf2   :  { %v349_v47 = vadd.f32 %v348_v46, %v292_v44 }
  0xfe   :  { %v329_v48 = vpop.f32.mrb[4].mxu0 }
  0xff   :  { %v341_v49 = vadd.f32 %v340_v45, %v329_v48  ;;  %v331_v50 = vpop.f32.mrb[5].mxu0 }
 0x100   :  { %v333_v51 = vpop.f32.mrb[6].mxu0  ;;  %v343_v52 = vsel %vm342_vm1, %v331_v50, 0.0 }
 0x101   :  { %v350_v53 = vadd.f32 %v349_v47, %v333_v51  ;;  %v335_v54 = vpop.f32.mrb[7].mxu0  ;;  %v344_v55 = vadd.f32 %v343_v52, %v341_v49 }
 0x102   :  { %v351_v56 = vsel %vm342_vm1, %v335_v54, 0.0 }
 0x103   :  { %345 = vadd.xlane.f32.xlu0 %v344_v55  ;;  %v352_v57 = vadd.f32 %v351_v56, %v350_v53 }
 0x107   :  { %353 = vadd.xlane.f32.xlu0 %v352_v57 }
 0x11d   :  { %419 = vperm.xlu0 %583, %v415_v58  }
 0x190   :  { %v346_v59 = vpop.xlane.xlu0 %345 }
 0x191   :  { %v355_v60 = vmul.f32 0.0014749262, %v346_v59 }
 0x193   :  { %v357_v61 = vsub.f32 %v243_v34, %v355_v60  ;;  %v358_v62 = vsub.f32 %v245_v35, %v355_v60  ;;  %v359_v63 = vsub.f32 %v286_v38, %v355_v60  ;;  %v360_v1 = vsub.f32 %v288_v40, %v355_v60  ;;  %v440_v35 = vld [vmem:[%s796_s3 + $0x8] sm:$0xff] }
 0x194   :  { %v354_v0 = vpop.xlane.xlu0 %353  ;;  %v361_v5 = vsub.f32 %v329_v48, %v355_v60  ;;  %v362_v6 = vsub.f32 %v331_v50, %v355_v60 }
 0x195   :  { %v356_v2 = vmul.f32 0.0014749262, %v354_v0  ;;  %v369_v3 = vmul.f32 %v357_v61, %v357_v61  ;;  %v370_v4 = vmul.f32 %v358_v62, %v358_v62  ;;  %v371_v7 = vmul.f32 %v359_v63, %v359_v63 }
 0x196   :  { %v372_v12 = vmul.f32 %v360_v1, %v360_v1  ;;  %v373_v17 = vmul.f32 %v361_v5, %v361_v5  ;;  %v374_v18 = vmul.f32 %v362_v6, %v362_v6 }
 0x197   :  { %v381_v8 = vadd.f32 %v370_v4, %v369_v3  ;;  %v363_v9 = vsub.f32 %v247_v37, %v356_v2  ;;  %v364_v10 = vsub.f32 %v249_v39, %v356_v2  ;;  %v365_v11 = vsub.f32 %v290_v43, %v356_v2  ;;  %v444_v37 = vpop.permute.xlu1 %443 }
 0x198   :  { %v366_v14 = vsub.f32 %v292_v44, %v356_v2  ;;  %v368_v19 = vsub.f32 %v335_v54, %v356_v2  ;;  %v367_v21 = vsub.f32 %v333_v51, %v356_v2  ;;  %v385_v27 = vsel %vm342_vm1, %v374_v18, 0.0 }
 0x199   :  { %v382_v13 = vadd.f32 %v381_v8, %v371_v7  ;;  %v375_v15 = vmul.f32 %v363_v9, %v363_v9  ;;  %v376_v16 = vmul.f32 %v364_v10, %v364_v10  ;;  %v377_v22 = vmul.f32 %v365_v11, %v365_v11 }
 0x19a   :  { %v378_v25 = vmul.f32 %v366_v14, %v366_v14  ;;  %v380_v28 = vmul.f32 %v368_v19, %v368_v19  ;;  %v379_v30 = vmul.f32 %v367_v21, %v367_v21 }
 0x19b   :  { %v383_v20 = vadd.f32 %v382_v13, %v372_v12  ;;  %v389_v23 = vadd.f32 %v376_v16, %v375_v15 }
 0x19c   :  { %v393_v33 = vsel %vm342_vm1, %v380_v28, 0.0  ;;  %v420_v49 = vpop.permute.xlu0 %419 }
 0x19d   :  { %v384_v24 = vadd.f32 %v383_v20, %v373_v17  ;;  %v390_v26 = vadd.f32 %v389_v23, %v377_v22 }
 0x19f   :  { %v386_v29 = vadd.f32 %v385_v27, %v384_v24  ;;  %v391_v31 = vadd.f32 %v390_v26, %v378_v25 }
 0x1a1   :  { %387 = vadd.xlane.f32.xlu1 %v386_v29  ;;  %v392_v32 = vadd.f32 %v391_v31, %v379_v30 }
 0x1a3   :  { %v394_v34 = vadd.f32 %v393_v33, %v392_v32 }
 0x1a5   :  { %395 = vadd.xlane.f32.xlu1 %v394_v34 }
 0x1b6   :  { %448 = vperm.xlu1 %584, %v440_v35  }
 0x22e   :  { %v388_v38 = vpop.xlane.xlu1 %387 }
 0x22f   :  { %v397_v39 = vmul.f32 0.0014749262, %v388_v38 }
 0x231   :  { %v399_v40 = vadd.f32 1e-05, %v397_v39 }
 0x232   :  { %v396_v41 = vpop.xlane.xlu1 %395 }
 0x233   :  { %631 = vrsqrt.f32 %v399_v40  ;;  %v398_v42 = vmul.f32 0.0014749262, %v396_v41 }
 0x235   :  { %v400_v43 = vadd.f32 1e-05, %v398_v42 }
 0x236   :  { %v449_v7 = vpop.permute.xlu1 %448 }
 0x237   :  { %633 = vrsqrt.f32 %v400_v43 }
 0x23d   :  { %v632_v44 = vpop.eup %631 }
 0x23e   :  { %v403_v45 = vmul.f32 %v632_v44, %v357_v61  ;;  %v404_v46 = vmul.f32 %v632_v44, %v358_v62  ;;  %v405_v47 = vmul.f32 %v632_v44, %v359_v63  ;;  %v406_v48 = vmul.f32 %v632_v44, %v360_v1 }
 0x23f   :  { %v407_v50 = vmul.f32 %v632_v44, %v361_v5  ;;  %v408_v51 = vmul.f32 %v632_v44, %v362_v6 }
 0x240   :  { %v427_v53 = vmul.f32 %v420_v49, %v403_v45  ;;  %v428_v54 = vmul.f32 %v420_v49, %v404_v46  ;;  %v429_v55 = vmul.f32 %v420_v49, %v405_v47  ;;  %v430_v56 = vmul.f32 %v420_v49, %v406_v48 }
 0x241   :  { %v634_v52 = vpop.eup %633  ;;  %v431_v61 = vmul.f32 %v420_v49, %v407_v50  ;;  %v432_v62 = vmul.f32 %v420_v49, %v408_v51 }
 0x242   :  { %v409_v57 = vmul.f32 %v634_v52, %v363_v9  ;;  %v410_v58 = vmul.f32 %v634_v52, %v364_v10  ;;  %v411_v59 = vmul.f32 %v634_v52, %v365_v11  ;;  %v412_v60 = vmul.f32 %v634_v52, %v366_v14 }
 0x243   :  { %v413_v0 = vmul.f32 %v634_v52, %v367_v21  ;;  %v414_v2 = vmul.f32 %v634_v52, %v368_v19  ;;  %v451_v8 = vadd.f32 %v444_v37, %v427_v53  ;;  %v452_v12 = vadd.f32 %v444_v37, %v428_v54 }
 0x244   :  { %v433_v63 = vmul.f32 %v425_v36, %v409_v57  ;;  %v434_v1 = vmul.f32 %v425_v36, %v410_v58  ;;  %v435_v3 = vmul.f32 %v425_v36, %v411_v59  ;;  %v436_v4 = vmul.f32 %v425_v36, %v412_v60 }
 0x245   :  { %v437_v5 = vmul.f32 %v425_v36, %v413_v0  ;;  %v438_v6 = vmul.f32 %v425_v36, %v414_v2  ;;  %v453_v16 = vadd.f32 %v444_v37, %v429_v55  ;;  %v454_v17 = vadd.f32 %v444_v37, %v430_v56 }
 0x246   :  { %v457_v13 = vadd.f32 %v449_v7, %v433_v63  ;;  %v458_v9 = vadd.f32 %v449_v7, %v434_v1  ;;  %v459_v10 = vadd.f32 %v449_v7, %v435_v3  ;;  %v460_v11 = vadd.f32 %v449_v7, %v436_v4 }
 0x247   :  { %v461_v14 = vadd.f32 %v449_v7, %v437_v5  ;;  %v462_v15 = vadd.f32 %v449_v7, %v438_v6  ;;  %v455_v21 = vadd.f32 %v444_v37, %v431_v61  ;;  %v456_v25 = vadd.f32 %v444_v37, %v432_v62 }
 0x248   :  { %v469_v18 = vmul.f32 0.2, %v457_v13  ;;  %v470_v19 = vmul.f32 0.2, %v458_v9  ;;  %v471_v20 = vmul.f32 0.2, %v459_v10 }
 0x249   :  { %v472_v22 = vmul.f32 0.2, %v460_v11  ;;  %v473_v23 = vmul.f32 0.2, %v461_v14  ;;  %v474_v24 = vmul.f32 0.2, %v462_v15 }
 0x24a   :  { %v481_v26 = vmax.f32 %v457_v13, %v469_v18  ;;  %v482_v27 = vmax.f32 %v458_v9, %v470_v19  ;;  %v483_v28 = vmax.f32 %v459_v10, %v471_v20  ;;  %v463_v29 = vmul.f32 0.2, %v451_v8 }
 0x24b   :  { %v484_v30 = vmax.f32 %v460_v11, %v472_v22  ;;  %v485_v31 = vmax.f32 %v461_v14, %v473_v23  ;;  %v486_v32 = vmax.f32 %v462_v15, %v474_v24  ;;  %v464_v33 = vmul.f32 0.2, %v452_v12 }
 0x24c   :  { %v579_v34 = vpack.c.bf16 %v482_v27, %v481_v26  ;;  %v465_v35 = vmul.f32 0.2, %v453_v16  ;;  %v466_v36 = vmul.f32 0.2, %v454_v17  ;;  %v467_v38 = vmul.f32 0.2, %v455_v21 }
 0x24d   :  { %v580_v39 = vpack.c.bf16 %v484_v30, %v483_v28  ;;  %v581_v40 = vpack.c.bf16 %v486_v32, %v485_v31  ;;  %v468_v41 = vmul.f32 0.2, %v456_v25  ;;  %v475_v42 = vmax.f32 %v451_v8, %v463_v29 }
 0x24e   :  { %529 = vst [vmem:[%s797_s4 + $0x18] sm:$0xff] %v579_v34  ;;  %v476_v37 = vmax.f32 %v452_v12, %v464_v33  ;;  %v477_v43 = vmax.f32 %v453_v16, %v465_v35  ;;  %v478_v44 = vmax.f32 %v454_v17, %v466_v36  ;;  %v479_v45 = vmax.f32 %v455_v21, %v467_v38 }
 0x24f   :  { %530 = vst [vmem:[%s797_s4 + $0x20] sm:$0xff] %v580_v39  ;;  %531 = vst.msk [vmem:[%s797_s4 + $0x28] sm:$0xff] %vm527_vm4, %v581_v40  ;;  %v480_v46 = vmax.f32 %v456_v25, %v468_v41 }
 0x250   :  { %v576_v47 = vpack.c.bf16 %v476_v37, %v475_v42  ;;  %v577_v48 = vpack.c.bf16 %v478_v44, %v477_v43 }
 0x251   :  { %v578_v49 = vpack.c.bf16 %v480_v46, %v479_v45 }
 0x252   :  { %523 = vst [vmem:[%s797_s4] sm:$0xff] %v576_v47  ;;  %524 = vst [vmem:[%s797_s4 + $0x8] sm:$0xff] %v577_v48 }
 0x253   :  { %528 = vst.msk [vmem:[%s797_s4 + $0x10] sm:$0xff] %vm527_vm4, %v578_v49 }

// kernel: discriminator_forward.13
= control target key start
LH: loop header
LB: loop body
LE: loop exit
PB: predicated region body
PF: predicated region fallthrough
CT: control target
= control target key end

     0   :  { %v573_v1 = vmov 0   ;;  %vm132_vm0 = vcmask 654336   ;;  %vm470_vm1 = vcmask 650240   ;;  %s791_s0 = inlined_call_operand.vmem [shape: bf16[80,336], index: 0, kind: input, shape index: {}]   ;;  %s792_s1 = inlined_call_operand.vmem [shape: bf16[32,80], index: 1, kind: input, shape index: {}]   ;;  %s793_s2 = inlined_call_operand.vmem [shape: f32[32,1], index: 2, kind: input, shape index: {}]   ;;  %s794_s3 = inlined_call_operand.vmem [shape: f32[32,1], index: 3, kind: input, shape index: {}]   ;;  %s795_s4 = inlined_call_operand.vmem [shape: bf16[32,336], index: 4, kind: output, shape index: {}]  }
   0x1   :  { %v543_v0 = vld [vmem:[%s791_s0 + $0x4] ss:$12 sps:$4 sm:$0xff]   ;;  %171 = vmatprep.mubr.bf16.mxu0 %v573_v1  ;;  %542 = vset.pattern.permute.xlu1 %v573_v1  ;;  %v545_v2 = vld [vmem:[%s791_s0 + $0x8] ss:$12 sps:$4 sm:$0xff]   ;;  %v546_v3 = vld [vmem:[%s791_s0] ss:$12 sps:$4 sm:$0xff]  }
   0x2   :  { %541 = vset.pattern.permute.xlu0 %v573_v1  ;;  %139 = vmatprep.subr.bf16.mxu0 %v543_v0  ;;  %v547_v4 = vld [vmem:[%s791_s0 + $0x1c] ss:$12 sps:$4 sm:$0xff]   ;;  %v549_v5 = vld [vmem:[%s791_s0 + $0x20] ss:$12 sps:$4 sm:$0xff]   ;;  %v550_v6 = vld [vmem:[%s791_s0 + $0x18] ss:$12 sps:$4 sm:$0xff]  }
   0x3   :  { %526 = vmatprep.subr.bf16.mxu1 %v545_v2  ;;  %140 = vmatpush1.bf16.msra.mxu0 %v546_v3  ;;  %v551_v7 = vld [vmem:[%s791_s0 + $0x34] ss:$12 sps:$4 sm:$0xff]   ;;  %v553_v8 = vld [vmem:[%s791_s0 + $0x38] ss:$12 sps:$4 sm:$0xff]   ;;  %v554_v9 = vld [vmem:[%s791_s0 + $0x30] ss:$12 sps:$4 sm:$0xff]  }
   0x4   :  { %527 = vmatpush3.bf16.msra.mxu1 %v545_v2  ;;  %141 = vmatprep.subr.bf16.mxu0 %v547_v4  ;;  %v555_v10 = vld [vmem:[%s791_s0 + $0x4c] ss:$12 sps:$4 sm:$0xff]   ;;  %v557_v11 = vld [vmem:[%s791_s0 + $0x50] ss:$12 sps:$4 sm:$0xff]   ;;  %v558_v12 = vld [vmem:[%s791_s0 + $0x48] ss:$12 sps:$4 sm:$0xff]  }
   0x5   :  { %528 = vmatprep.subr.bf16.mxu1 %v549_v5  ;;  %v563_v13 = vld [vmem:[%s792_s1] sm:$0xff]   ;;  %v561_v15 = vld [vmem:[%s791_s0 + $0x68] ss:$12 sps:$4 sm:$0xff]  }
   0x6   :  { %v559_v14 = vld [vmem:[%s791_s0 + $0x64] ss:$12 sps:$4 sm:$0xff]   ;;  %536 = vmatprep.mubr.msk.bf16.mxu1 %vm132_vm0, %v563_v13  ;;  %v562_v16 = vld [vmem:[%s791_s0 + $0x60] ss:$12 sps:$4 sm:$0xff]  }
   0x7   :  { %142 = vmatpush1.bf16.msra.mxu0 %v550_v6  ;;  %v564_v17 = vld [vmem:[%s792_s1 + $0x8] sm:$0xff]  }
   0x8   :  { %529 = vmatpush3.bf16.msra.mxu1 %v549_v5  ;;  %143 = vmatprep.subr.bf16.mxu0 %v551_v7 }
   0x9   :  { %530 = vmatprep.subr.bf16.mxu1 %v553_v8 }
   0xb   :  { %144 = vmatpush1.bf16.msra.mxu0 %v554_v9 }
   0xc   :  { %531 = vmatpush3.bf16.msra.mxu1 %v553_v8  ;;  %145 = vmatprep.subr.bf16.mxu0 %v555_v10 }
   0xd   :  { %532 = vmatprep.subr.bf16.mxu1 %v557_v11 }
   0xf   :  { %146 = vmatpush1.bf16.msra.mxu0 %v558_v12  ;;  %v335_v12 = vld [vmem:[%s793_s2 + $0x10] sm:$0xff] }
  0x10   :  { %533 = vmatpush3.bf16.msra.mxu1 %v557_v11  ;;  %147 = vmatprep.subr.bf16.mxu0 %v559_v14  ;;  %v334_v11 = vld [vmem:[%s793_s2 + $0x8] sm:$0xff]  ;;  %v333_v14 = vld [vmem:[%s793_s2] sm:$0xff] }
  0x11   :  { %534 = vmatprep.subr.bf16.mxu1 %v561_v15 }
  0x13   :  { %148 = vmatpush1.bf16.msra.mxu0 %v562_v16  ;;  %v370_v16 = vld [vmem:[%s794_s3 + $0x8] sm:$0xff] }
  0x14   :  { %535 = vmatpush3.bf16.msra.mxu1 %v561_v15  ;;  %v369_v15 = vld [vmem:[%s794_s3] sm:$0xff] }
  0x16   :  { %499 = vmatmul.mubr.msk.bf16.vlgmr.msra.gmra.mrb[0].mxu0 %vm132_vm0, %v563_v13  ;;  %v336_v13 = vld [vmem:[%s793_s2 + $0x18] sm:$0xff] }
  0x17   :  { %537 = vmatmul.mubr.msk.bf16.vlgmr.msra.gmra.mrb[0].mxu1 %vm132_vm0, %v564_v17  ;;  %181 = vmatprep.mubr.bf16.mxu0 %v573_v1 }
  0x1e   :  { %500 = vmatmul.mubr.msk.bf16.gmra.mrb[4].mxu0 %vm132_vm0, %v564_v17  ;;  %v371_v17 = vld [vmem:[%s794_s3 + $0x10] sm:$0xff] }
  0xe9   :  { %v173_v18 = vpop.f32.mrb[0].mxu0 }
  0xea   :  { %v538_v19 = vpop.f32.mrb[0].mxu1  ;;  %v175_v20 = vpop.f32.mrb[1].mxu0 }
  0xeb   :  { %v226_v21 = vpop.f32.mrb[1].mxu1  ;;  %v241_v22 = vadd.f32 %v175_v20, %v173_v18  ;;  %v177_v23 = vpop.f32.mrb[2].mxu0  ;;  %v252_v37 = vsel %vm132_vm0, %v538_v19, 0.0 }
  0xec   :  { %v654_v24 = vpop.f32.mrb[2].mxu1  ;;  %v242_v25 = vsel %vm132_vm0, %v226_v21, 0.0  ;;  %v179_v26 = vpop.f32.mrb[3].mxu0 }
  0xed   :  { %v229_v27 = vpop.f32.mrb[3].mxu1  ;;  %v246_v28 = vadd.f32 %v179_v26, %v177_v23  ;;  %v243_v30 = vadd.f32 %v242_v25, %v241_v22  ;;  %v257_v40 = vsel %vm132_vm0, %v654_v24, 0.0 }
  0xee   :  { %v247_v29 = vsel %vm132_vm0, %v229_v27, 0.0 }
  0xef   :  { %244 = vadd.xlane.f32.xlu0 %v243_v30  ;;  %v248_v31 = vadd.f32 %v247_v29, %v246_v28  ;;  %v372_v30 = vld [vmem:[%s794_s3 + $0x18] sm:$0xff] }
  0xf1   :  { %v183_v32 = vpop.f32.mrb[4].mxu0 }
  0xf2   :  { %v185_v33 = vpop.f32.mrb[5].mxu0 }
  0xf3   :  { %v251_v34 = vadd.f32 %v185_v33, %v183_v32  ;;  %249 = vadd.xlane.f32.xlu0 %v248_v31  ;;  %v658_v35 = vpop.f32.mrb[6].mxu0 }
  0xf4   :  { %v660_v36 = vpop.f32.mrb[7].mxu0 }
  0xf5   :  { %v256_v38 = vadd.f32 %v660_v36, %v658_v35  ;;  %v253_v39 = vadd.f32 %v252_v37, %v251_v34 }
  0xf7   :  { %254 = vadd.xlane.f32.xlu1 %v253_v39  ;;  %v258_v41 = vadd.f32 %v257_v40, %v256_v38 }
  0xfb   :  { %259 = vadd.xlane.f32.xlu1 %v258_v41 }
 0x17c   :  { %v245_v42 = vpop.xlane.xlu0 %244 }
 0x17d   :  { %v261_v43 = vmul.f32 0.0029761905, %v245_v42 }
 0x17f   :  { %v667_v44 = vsub.f32 %v173_v18, %v261_v43  ;;  %v669_v45 = vsub.f32 %v175_v20, %v261_v43  ;;  %v671_v46 = vsub.f32 %v226_v21, %v261_v43 }
 0x180   :  { %v250_v47 = vpop.xlane.xlu0 %249 }
 0x181   :  { %v262_v48 = vmul.f32 0.0029761905, %v250_v47  ;;  %v277_v49 = vmul.f32 %v667_v44, %v667_v44  ;;  %v278_v50 = vmul.f32 %v669_v45, %v669_v45  ;;  %v279_v51 = vmul.f32 %v671_v46, %v671_v46 }
 0x183   :  { %v679_v52 = vsub.f32 %v177_v23, %v262_v48  ;;  %v681_v53 = vsub.f32 %v179_v26, %v262_v48  ;;  %v683_v54 = vsub.f32 %v229_v27, %v262_v48  ;;  %v289_v55 = vadd.f32 %v278_v50, %v277_v49 }
 0x184   :  { %v255_v56 = vpop.xlane.xlu1 %254  ;;  %v290_v57 = vsel %vm132_vm0, %v279_v51, 0.0 }
 0x185   :  { %v263_v58 = vmul.f32 0.0029761905, %v255_v56  ;;  %v291_v59 = vadd.f32 %v290_v57, %v289_v55  ;;  %v280_v60 = vmul.f32 %v679_v52, %v679_v52  ;;  %v281_v61 = vmul.f32 %v681_v53, %v681_v53 }
 0x186   :  { %v282_v62 = vmul.f32 %v683_v54, %v683_v54 }
 0x187   :  { %v692_v63 = vsub.f32 %v183_v32, %v263_v58  ;;  %v694_v0 = vsub.f32 %v185_v33, %v263_v58  ;;  %v696_v1 = vsub.f32 %v538_v19, %v263_v58  ;;  %292 = vadd.xlane.f32.xlu0 %v291_v59  ;;  %v294_v2 = vadd.f32 %v281_v61, %v280_v60 }
 0x188   :  { %v295_v3 = vsel %vm132_vm0, %v282_v62, 0.0  ;;  %v260_v18 = vpop.xlane.xlu1 %259 }
 0x189   :  { %v296_v4 = vadd.f32 %v295_v3, %v294_v2  ;;  %v283_v5 = vmul.f32 %v692_v63, %v692_v63  ;;  %v284_v6 = vmul.f32 %v694_v0, %v694_v0  ;;  %v285_v7 = vmul.f32 %v696_v1, %v696_v1 }
 0x18a   :  { %v264_v19 = vmul.f32 0.0029761905, %v260_v18 }
 0x18b   :  { %297 = vadd.xlane.f32.xlu1 %v296_v4  ;;  %v299_v8 = vadd.f32 %v284_v6, %v283_v5  ;;  %v300_v9 = vsel %vm132_vm0, %v285_v7, 0.0 }
 0x18c   :  { %v728_v20 = vsub.f32 %v658_v35, %v264_v19  ;;  %v731_v21 = vsub.f32 %v660_v36, %v264_v19  ;;  %v734_v22 = vsub.f32 %v654_v24, %v264_v19 }
 0x18d   :  { %v301_v10 = vadd.f32 %v300_v9, %v299_v8 }
 0x18e   :  { %v286_v23 = vmul.f32 %v728_v20, %v728_v20  ;;  %v287_v25 = vmul.f32 %v731_v21, %v731_v21  ;;  %v288_v26 = vmul.f32 %v734_v22, %v734_v22 }
 0x18f   :  { %302 = vadd.xlane.f32.xlu0 %v301_v10 }
 0x190   :  { %v304_v27 = vadd.f32 %v287_v25, %v286_v23  ;;  %v305_v28 = vsel %vm132_vm0, %v288_v26, 0.0 }
 0x192   :  { %v306_v29 = vadd.f32 %v305_v28, %v304_v27 }
 0x19c   :  { %344 = vperm.xlu1 %542, %v334_v11  }
 0x1a0   :  { %349 = vperm.xlu1 %542, %v335_v12  }
 0x1a4   :  { %354 = vperm.xlu1 %542, %v336_v13  }
 0x1a5   :  { %339 = vperm.xlu0 %541, %v333_v14  }
 0x1a8   :  { %375 = vperm.xlu1 %542, %v369_v15  }
 0x1ac   :  { %380 = vperm.xlu1 %542, %v370_v16  }
 0x1b0   :  { %385 = vperm.xlu1 %542, %v371_v17  }
 0x1d4   :  { %307 = vadd.xlane.f32.xlu1 %v306_v29 }
 0x1e5   :  { %390 = vperm.xlu1 %542, %v372_v30  }
 0x214   :  { %v293_v24 = vpop.xlane.xlu0 %292 }
 0x215   :  { %v309_v31 = vmul.f32 0.0029761905, %v293_v24 }
 0x217   :  { %v313_v32 = vadd.f32 1e-05, %v309_v31 }
 0x218   :  { %v298_v33 = vpop.xlane.xlu1 %297 }
 0x219   :  { %565 = vrsqrt.f32 %v313_v32  ;;  %v310_v34 = vmul.f32 0.0029761905, %v298_v33 }
 0x21b   :  { %v314_v35 = vadd.f32 1e-05, %v310_v34 }
 0x21c   :  { %v303_v36 = vpop.xlane.xlu0 %302  ;;  %v345_v37 = vpop.permute.xlu1 %344 }
 0x21d   :  { %567 = vrsqrt.f32 %v314_v35  ;;  %v311_v38 = vmul.f32 0.0029761905, %v303_v36 }
 0x21f   :  { %v315_v39 = vadd.f32 1e-05, %v311_v38 }
 0x220   :  { %v350_v40 = vpop.permute.xlu1 %349 }
 0x221   :  { %569 = vrsqrt.f32 %v315_v39 }
 0x223   :  { %v566_v41 = vpop.eup %565 }
 0x224   :  { %v746_v42 = vpop.permute.xlu1 %354  ;;  %v321_v43 = vmul.f32 %v566_v41, %v667_v44  ;;  %v322_v47 = vmul.f32 %v566_v41, %v669_v45  ;;  %v323_v48 = vmul.f32 %v566_v41, %v671_v46  ;;  %v340_v49 = vpop.permute.xlu0 %339 }
 0x226   :  { %v357_v50 = vmul.f32 %v340_v49, %v321_v43  ;;  %v358_v51 = vmul.f32 %v340_v49, %v322_v47  ;;  %v359_v55 = vmul.f32 %v340_v49, %v323_v48 }
 0x227   :  { %v568_v56 = vpop.eup %567 }
 0x228   :  { %v324_v57 = vmul.f32 %v568_v56, %v679_v52  ;;  %v325_v58 = vmul.f32 %v568_v56, %v681_v53  ;;  %v326_v59 = vmul.f32 %v568_v56, %v683_v54  ;;  %v376_v60 = vpop.permute.xlu1 %375 }
 0x229   :  { %v393_v61 = vadd.f32 %v376_v60, %v357_v50  ;;  %v394_v62 = vadd.f32 %v376_v60, %v358_v51  ;;  %v395_v2 = vadd.f32 %v376_v60, %v359_v55 }
 0x22a   :  { %v360_v44 = vmul.f32 %v345_v37, %v324_v57  ;;  %v361_v3 = vmul.f32 %v345_v37, %v325_v58  ;;  %v362_v4 = vmul.f32 %v345_v37, %v326_v59 }
 0x22b   :  { %v570_v45 = vpop.eup %569  ;;  %v405_v46 = vmul.f32 0.2, %v393_v61  ;;  %v406_v5 = vmul.f32 0.2, %v394_v62  ;;  %v407_v6 = vmul.f32 0.2, %v395_v2 }
 0x22c   :  { %v327_v7 = vmul.f32 %v570_v45, %v692_v63  ;;  %v328_v8 = vmul.f32 %v570_v45, %v694_v0  ;;  %v329_v52 = vmul.f32 %v570_v45, %v696_v1  ;;  %v381_v53 = vpop.permute.xlu1 %380 }
 0x22d   :  { %v417_v54 = vmax.f32 %v393_v61, %v405_v46  ;;  %v418_v9 = vmax.f32 %v394_v62, %v406_v5  ;;  %v419_v10 = vmax.f32 %v395_v2, %v407_v6  ;;  %v396_v11 = vadd.f32 %v381_v53, %v360_v44 }
 0x22e   :  { %v363_v12 = vmul.f32 %v350_v40, %v327_v7  ;;  %v364_v13 = vmul.f32 %v350_v40, %v328_v8  ;;  %v365_v14 = vmul.f32 %v350_v40, %v329_v52  ;;  %v397_v15 = vadd.f32 %v381_v53, %v361_v3 }
 0x22f   :  { %v511_v16 = vpack.c.bf16 %v418_v9, %v417_v54  ;;  %v512_v17 = vpack.c.bf16 %v419_v10, %v419_v10  ;;  %v398_v18 = vadd.f32 %v381_v53, %v362_v4  ;;  %v408_v19 = vmul.f32 0.2, %v396_v11 }
 0x230   :  { %v409_v23 = vmul.f32 0.2, %v397_v15  ;;  %v386_v63 = vpop.permute.xlu1 %385 }
 0x231   :  { %469 = vst [vmem:[%s795_s4] sm:$0xff] %v511_v16  ;;  %471 = vst.msk [vmem:[%s795_s4 + $0x8] sm:$0xf] %vm470_vm1, %v512_v17  ;;  %v410_v0 = vmul.f32 0.2, %v398_v18  ;;  %v420_v1 = vmax.f32 %v396_v11, %v408_v19  ;;  %v399_v25 = vadd.f32 %v386_v63, %v363_v12  ;;  %v400_v26 = vadd.f32 %v386_v63, %v364_v13 }
 0x232   :  { %v421_v27 = vmax.f32 %v397_v15, %v409_v23  ;;  %v401_v28 = vadd.f32 %v386_v63, %v365_v14 }
 0x233   :  { %v422_v29 = vmax.f32 %v398_v18, %v410_v0  ;;  %v411_v30 = vmul.f32 0.2, %v399_v25  ;;  %v412_v24 = vmul.f32 0.2, %v400_v26 }
 0x234   :  { %v513_v31 = vpack.c.bf16 %v421_v27, %v420_v1  ;;  %v413_v32 = vmul.f32 0.2, %v401_v28 }
 0x235   :  { %v514_v33 = vpack.c.bf16 %v422_v29, %v422_v29  ;;  %v423_v34 = vmax.f32 %v399_v25, %v411_v30  ;;  %v424_v35 = vmax.f32 %v400_v26, %v412_v24 }
 0x236   :  { %472 = vst [vmem:[%s795_s4 + $0xc] sm:$0xff] %v513_v31  ;;  %v425_v36 = vmax.f32 %v401_v28, %v413_v32 }
 0x237   :  { %473 = vst.msk [vmem:[%s795_s4 + $0x14] sm:$0xf] %vm470_vm1, %v514_v33  ;;  %v515_v37 = vpack.c.bf16 %v424_v35, %v423_v34 }
 0x238   :  { %v516_v38 = vpack.c.bf16 %v425_v36, %v425_v36 }
 0x239   :  { %474 = vst [vmem:[%s795_s4 + $0x18] sm:$0xff] %v515_v37 }
 0x23a   :  { %475 = vst.msk [vmem:[%s795_s4 + $0x20] sm:$0xf] %vm470_vm1, %v516_v38 }
 0x261   :  { %v308_v39 = vpop.xlane.xlu1 %307 }
 0x262   :  { %v312_v40 = vmul.f32 0.0029761905, %v308_v39 }
 0x264   :  { %v316_v41 = vadd.f32 1e-05, %v312_v40 }
 0x265   :  { %v391_v56 = vpop.permute.xlu1 %390 }
 0x266   :  { %571 = vrsqrt.f32 %v316_v41 }
 0x270   :  { %v572_v43 = vpop.eup %571 }
 0x271   :  { %v330_v47 = vmul.f32 %v572_v43, %v728_v20  ;;  %v331_v48 = vmul.f32 %v572_v43, %v731_v21  ;;  %v332_v49 = vmul.f32 %v572_v43, %v734_v22 }
 0x273   :  { %v366_v50 = vmul.f32 %v746_v42, %v330_v47  ;;  %v367_v51 = vmul.f32 %v746_v42, %v331_v48  ;;  %v368_v55 = vmul.f32 %v746_v42, %v332_v49 }
 0x275   :  { %v402_v57 = vadd.f32 %v391_v56, %v366_v50  ;;  %v403_v58 = vadd.f32 %v391_v56, %v367_v51  ;;  %v404_v59 = vadd.f32 %v391_v56, %v368_v55 }
 0x277   :  { %v414_v60 = vmul.f32 0.2, %v402_v57  ;;  %v415_v61 = vmul.f32 0.2, %v403_v58  ;;  %v416_v62 = vmul.f32 0.2, %v404_v59 }
 0x279   :  { %v426_v2 = vmax.f32 %v402_v57, %v414_v60  ;;  %v427_v44 = vmax.f32 %v403_v58, %v415_v61  ;;  %v428_v20 = vmax.f32 %v404_v59, %v416_v62 }
 0x27b   :  { %v517_v3 = vpack.c.bf16 %v427_v44, %v426_v2  ;;  %v518_v21 = vpack.c.bf16 %v428_v20, %v428_v20 }
 0x27d   :  { %476 = vst [vmem:[%s795_s4 + $0x24] sm:$0xff] %v517_v3  ;;  %477 = vst.msk [vmem:[%s795_s4 + $0x2c] sm:$0xf] %vm470_vm1, %v518_v21 }

// kernel: discriminator_forward.14
= control target key start
LH: loop header
LB: loop body
LE: loop exit
PB: predicated region body
PF: predicated region fallthrough
CT: control target
= control target key end

     0   :  { %v661_v1 = vmov 0   ;;  %vm118_vm0 = vcmask 785408   ;;  %vm204_vm1 = vcmask 310272   ;;  %vm557_vm2 = vcmask 1043456   ;;  %s1027_s0 = inlined_call_operand.vmem [shape: bf16[96,166], index: 0, kind: input, shape index: {}]   ;;  %s1028_s1 = inlined_call_operand.vmem [shape: bf16[64,96], index: 1, kind: input, shape index: {}]   ;;  %s1029_s2 = inlined_call_operand.vmem [shape: f32[64,1], index: 2, kind: input, shape index: {}]   ;;  %s1030_s3 = inlined_call_operand.vmem [shape: f32[64,1], index: 3, kind: input, shape index: {}]   ;;  %s1031_s4 = inlined_call_operand.vmem [shape: bf16[64,166], index: 4, kind: output, shape index: {}]  }
   0x1   :  { %v623_v0 = vld [vmem:[%s1027_s0 + $0x4] ss:$8 sps:$4 sm:$0xff]   ;;  %163 = vmatprep.mubr.bf16.mxu0 %v661_v1  ;;  %183 = vmatprep.mubr.bf16.mxu1 %v661_v1  ;;  %v625_v2 = vld [vmem:[%s1027_s0] ss:$8 sps:$4 sm:$0xff]   ;;  %v626_v3 = vld [vmem:[%s1027_s0 + $0x14] ss:$8 sps:$4 sm:$0xff]  }
   0x2   :  { %622 = vset.pattern.permute.xlu1 %v661_v1  ;;  %621 = vset.pattern.permute.xlu0 %v661_v1  ;;  %v628_v4 = vld [vmem:[%s1027_s0 + $0x10] ss:$8 sps:$4 sm:$0xff]   ;;  %v629_v5 = vld [vmem:[%s1027_s0 + $0x24] ss:$8 sps:$4 sm:$0xff]   ;;  %v631_v6 = vld [vmem:[%s1027_s0 + $0x20] ss:$8 sps:$4 sm:$0xff]  }
   0x3   :  { %131 = vmatprep.subr.bf16.mxu0 %v623_v0  ;;  %608 = vmatprep.subr.bf16.mxu1 %v623_v0  ;;  %v632_v7 = vld [vmem:[%s1027_s0 + $0x34] ss:$8 sps:$4 sm:$0xff]   ;;  %v634_v8 = vld [vmem:[%s1027_s0 + $0x30] ss:$8 sps:$4 sm:$0xff]   ;;  %v635_v9 = vld [vmem:[%s1027_s0 + $0x44] ss:$8 sps:$4 sm:$0xff]  }
   0x4   :  { %132 = vmatpush1.bf16.msra.mxu0 %v625_v2  ;;  %614 = vmatpush1.bf16.msra.mxu1 %v625_v2  ;;  %v637_v10 = vld [vmem:[%s1027_s0 + $0x40] ss:$8 sps:$4 sm:$0xff]   ;;  %v638_v11 = vld [vmem:[%s1027_s0 + $0x54] ss:$8 sps:$4 sm:$0xff]   ;;  %v640_v12 = vld [vmem:[%s1027_s0 + $0x50] ss:$8 sps:$4 sm:$0xff]  }
   0x5   :  { %133 = vmatprep.subr.bf16.mxu0 %v626_v3  ;;  %609 = vmatprep.subr.bf16.mxu1 %v626_v3  ;;  %v641_v13 = vld [vmem:[%s1028_s1] sm:$0xff]   ;;  %v642_v14 = vld [vmem:[%s1028_s1 + $0x10] sm:$0xff]   ;;  %v643_v15 = vld [vmem:[%s1028_s1 + $0x8] sm:$0xff]   ;;  %vm558_vm3 = vcmask 310276  }
   0x6   :  { %v644_v16 = vld [vmem:[%s1028_s1 + $0x18] sm:$0xff]   ;;  %v350_v49 = vld [vmem:[%s1029_s2 + $0x8] sm:$0xff]  ;;  %v351_v50 = vld [vmem:[%s1029_s2 + $0x10] sm:$0xff] }
   0x7   :  { %v352_v51 = vld [vmem:[%s1029_s2 + $0x18] sm:$0xff]  ;;  %v349_v52 = vld [vmem:[%s1029_s2] sm:$0xff]  ;;  %v414_v54 = vld [vmem:[%s1030_s3 + $0x8] sm:$0xff] }
   0x8   :  { %134 = vmatpush1.bf16.msra.mxu0 %v628_v4  ;;  %615 = vmatpush1.bf16.msra.mxu1 %v628_v4  ;;  %v353_v53 = vld [vmem:[%s1029_s2 + $0x20] sm:$0xff]  ;;  %v354_v55 = vld [vmem:[%s1029_s2 + $0x28] sm:$0xff]  ;;  %v416_v56 = vld [vmem:[%s1030_s3 + $0x18] sm:$0xff] }
   0x9   :  { %135 = vmatprep.subr.bf16.mxu0 %v629_v5  ;;  %610 = vmatprep.subr.bf16.mxu1 %v629_v5  ;;  %v355_v57 = vld [vmem:[%s1029_s2 + $0x30] sm:$0xff]  ;;  %v418_v58 = vld [vmem:[%s1030_s3 + $0x28] sm:$0xff]  ;;  %v356_v59 = vld [vmem:[%s1029_s2 + $0x38] sm:$0xff] }
   0xa   :  { %v413_v60 = vld [vmem:[%s1030_s3] sm:$0xff]  ;;  %v415_v61 = vld [vmem:[%s1030_s3 + $0x10] sm:$0xff]  ;;  %vm953_vm4 = vmor %vm558_vm3, %vm557_vm2 }
   0xb   :  { %v417_v62 = vld [vmem:[%s1030_s3 + $0x20] sm:$0xff] }
   0xc   :  { %136 = vmatpush1.bf16.msra.mxu0 %v631_v6  ;;  %616 = vmatpush1.bf16.msra.mxu1 %v631_v6 }
   0xd   :  { %137 = vmatprep.subr.bf16.mxu0 %v632_v7  ;;  %611 = vmatprep.subr.bf16.mxu1 %v632_v7 }
  0x10   :  { %138 = vmatpush1.bf16.msra.mxu0 %v634_v8  ;;  %617 = vmatpush1.bf16.msra.mxu1 %v634_v8 }
  0x11   :  { %139 = vmatprep.subr.bf16.mxu0 %v635_v9  ;;  %612 = vmatprep.subr.bf16.mxu1 %v635_v9 }
  0x14   :  { %140 = vmatpush1.bf16.msra.mxu0 %v637_v10  ;;  %618 = vmatpush1.bf16.msra.mxu1 %v637_v10 }
  0x15   :  { %141 = vmatprep.subr.bf16.mxu0 %v638_v11  ;;  %613 = vmatprep.subr.bf16.mxu1 %v638_v11 }
  0x18   :  { %142 = vmatpush1.bf16.msra.mxu0 %v640_v12  ;;  %619 = vmatpush1.bf16.msra.mxu1 %v640_v12 }
  0x1b   :  { %588 = vmatmul.mubr.msk.bf16.vlgmr.msra.gmra.mrb[0].mxu0 %vm118_vm0, %v641_v13  ;;  %590 = vmatmul.mubr.msk.bf16.vlgmr.msra.gmra.mrb[0].mxu1 %vm118_vm0, %v642_v14 }
  0x1c   :  { %173 = vmatprep.mubr.bf16.mxu0 %v661_v1  ;;  %193 = vmatprep.mubr.bf16.mxu1 %v661_v1 }
  0x23   :  { %589 = vmatmul.mubr.msk.bf16.gmra.mrb[4].mxu0 %vm118_vm0, %v643_v15  ;;  %591 = vmatmul.mubr.msk.bf16.gmra.mrb[4].mxu1 %vm118_vm0, %v644_v16 }
  0xee   :  { %v735_v17 = vpop.f32.mrb[0].mxu0  ;;  %v737_v18 = vpop.f32.mrb[0].mxu1 }
  0xef   :  { %v739_v19 = vpop.f32.mrb[1].mxu0  ;;  %v741_v20 = vpop.f32.mrb[1].mxu1 }
  0xf0   :  { %v221_v21 = vsel %vm204_vm1, %v741_v20, 0.0  ;;  %v745_v22 = vpop.f32.mrb[2].mxu0  ;;  %v747_v23 = vpop.f32.mrb[2].mxu1  ;;  %v205_v24 = vsel %vm204_vm1, %v739_v19, 0.0 }
  0xf1   :  { %v751_v25 = vpop.f32.mrb[3].mxu0  ;;  %v753_v26 = vpop.f32.mrb[3].mxu1  ;;  %v206_v27 = vadd.f32 %v205_v24, %v735_v17  ;;  %v222_v28 = vadd.f32 %v221_v21, %v737_v18 }
  0xf2   :  { %v209_v29 = vsel %vm204_vm1, %v751_v25, 0.0  ;;  %v225_v30 = vsel %vm204_vm1, %v753_v26, 0.0 }
  0xf3   :  { %207 = vadd.xlane.f32.xlu0 %v206_v27  ;;  %v226_v31 = vadd.f32 %v225_v30, %v747_v23  ;;  %v210_v32 = vadd.f32 %v209_v29, %v745_v22 }
  0xf5   :  { %227 = vadd.xlane.f32.xlu1 %v226_v31 }
  0xf6   :  { %v763_v33 = vpop.f32.mrb[4].mxu0  ;;  %v765_v34 = vpop.f32.mrb[4].mxu1 }
  0xf7   :  { %223 = vadd.xlane.f32.xlu0 %v222_v28  ;;  %v767_v35 = vpop.f32.mrb[5].mxu0  ;;  %v769_v36 = vpop.f32.mrb[5].mxu1 }
  0xf8   :  { %v213_v37 = vsel %vm204_vm1, %v767_v35, 0.0  ;;  %v773_v38 = vpop.f32.mrb[6].mxu0  ;;  %v229_v39 = vsel %vm204_vm1, %v769_v36, 0.0  ;;  %v777_v40 = vpop.f32.mrb[6].mxu1 }
  0xf9   :  { %v779_v41 = vpop.f32.mrb[7].mxu0  ;;  %v214_v42 = vadd.f32 %v213_v37, %v763_v33  ;;  %v230_v43 = vadd.f32 %v229_v39, %v765_v34  ;;  %v783_v44 = vpop.f32.mrb[7].mxu1 }
  0xfa   :  { %v217_v45 = vsel %vm204_vm1, %v779_v41, 0.0  ;;  %v233_v46 = vsel %vm204_vm1, %v783_v44, 0.0 }
  0xfb   :  { %211 = vadd.xlane.f32.xlu0 %v210_v32  ;;  %215 = vadd.xlane.f32.xlu1 %v214_v42  ;;  %v218_v47 = vadd.f32 %v217_v45, %v773_v38  ;;  %v234_v48 = vadd.f32 %v233_v46, %v777_v40 }
  0xff   :  { %231 = vadd.xlane.f32.xlu0 %v230_v43 }
 0x10c   :  { %364 = vperm.xlu1 %622, %v350_v49  }
 0x110   :  { %369 = vperm.xlu1 %622, %v351_v50  }
 0x114   :  { %374 = vperm.xlu1 %622, %v352_v51   ;;  %v420_v51 = vld [vmem:[%s1030_s3 + $0x38] sm:$0xff] }
 0x115   :  { %359 = vperm.xlu0 %621, %v349_v52  }
 0x118   :  { %379 = vperm.xlu1 %622, %v353_v53  }
 0x119   :  { %428 = vperm.xlu0 %621, %v414_v54  }
 0x11c   :  { %384 = vperm.xlu1 %622, %v354_v55  }
 0x11d   :  { %438 = vperm.xlu0 %621, %v416_v56  }
 0x120   :  { %389 = vperm.xlu1 %622, %v355_v57  }
 0x121   :  { %448 = vperm.xlu0 %621, %v418_v58  }
 0x124   :  { %394 = vperm.xlu1 %622, %v356_v59  }
 0x148   :  { %219 = vadd.xlane.f32.xlu1 %v218_v47 }
 0x14c   :  { %235 = vadd.xlane.f32.xlu1 %v234_v48 }
 0x15d   :  { %423 = vperm.xlu1 %622, %v413_v60  }
 0x161   :  { %433 = vperm.xlu1 %622, %v415_v61  }
 0x165   :  { %443 = vperm.xlu1 %622, %v417_v62  }
 0x180   :  { %v208_v63 = vpop.xlane.xlu0 %207 }
 0x181   :  { %v237_v0 = vmul.f32 0.006024096, %v208_v63 }
 0x182   :  { %v228_v3 = vpop.xlane.xlu1 %227 }
 0x183   :  { %v834_v1 = vsub.f32 %v735_v17, %v237_v0  ;;  %v837_v2 = vsub.f32 %v739_v19, %v237_v0  ;;  %v242_v7 = vmul.f32 0.006024096, %v228_v3 }
 0x184   :  { %v224_v4 = vpop.xlane.xlu0 %223 }
 0x185   :  { %v241_v5 = vmul.f32 0.006024096, %v224_v4  ;;  %v261_v6 = vmul.f32 %v834_v1, %v834_v1  ;;  %v262_v8 = vmul.f32 %v837_v2, %v837_v2  ;;  %v853_v19 = vsub.f32 %v753_v26, %v242_v7 }
 0x186   :  { %v870_v28 = vsub.f32 %v747_v23, %v242_v7 }
 0x187   :  { %v844_v9 = vsub.f32 %v737_v18, %v241_v5  ;;  %v847_v10 = vsub.f32 %v741_v20, %v241_v5  ;;  %v277_v13 = vsel %vm204_vm1, %v262_v8, 0.0  ;;  %v272_v23 = vmul.f32 %v853_v19, %v853_v19 }
 0x188   :  { %v212_v11 = vpop.xlane.xlu0 %211  ;;  %v216_v12 = vpop.xlane.xlu1 %215  ;;  %v278_v16 = vadd.f32 %v277_v13, %v261_v6 }
 0x189   :  { %v238_v14 = vmul.f32 0.006024096, %v212_v11  ;;  %v239_v15 = vmul.f32 0.006024096, %v216_v12  ;;  %v269_v17 = vmul.f32 %v844_v9, %v844_v9  ;;  %v270_v18 = vmul.f32 %v847_v10, %v847_v10 }
 0x18a   :  { %279 = vadd.xlane.f32.xlu0 %v278_v16  ;;  %v297_v48 = vsel %vm204_vm1, %v272_v23, 0.0 }
 0x18b   :  { %v858_v21 = vsub.f32 %v745_v22, %v238_v14  ;;  %v861_v20 = vsub.f32 %v751_v25, %v238_v14  ;;  %v864_v24 = vsub.f32 %v763_v33, %v239_v15  ;;  %v867_v27 = vsub.f32 %v767_v35, %v239_v15 }
 0x18c   :  { %v232_v26 = vpop.xlane.xlu0 %231  ;;  %v293_v29 = vsel %vm204_vm1, %v270_v18, 0.0  ;;  %v902_v52 = vpop.permute.xlu1 %364 }
 0x18d   :  { %v243_v30 = vmul.f32 0.006024096, %v232_v26  ;;  %v294_v31 = vadd.f32 %v293_v29, %v269_v17  ;;  %v265_v22 = vmul.f32 %v864_v24, %v864_v24  ;;  %v266_v25 = vmul.f32 %v867_v27, %v867_v27 }
 0x18e   :  { %v263_v32 = vmul.f32 %v858_v21, %v858_v21  ;;  %v264_v33 = vmul.f32 %v861_v20, %v861_v20 }
 0x18f   :  { %v884_v35 = vsub.f32 %v765_v34, %v243_v30  ;;  %v887_v37 = vsub.f32 %v769_v36, %v243_v30  ;;  %295 = vadd.xlane.f32.xlu0 %v294_v31  ;;  %v285_v39 = vsel %vm204_vm1, %v266_v25, 0.0  ;;  %v271_v34 = vmul.f32 %v870_v28, %v870_v28 }
 0x190   :  { %v286_v42 = vadd.f32 %v285_v39, %v265_v22  ;;  %v281_v43 = vsel %vm204_vm1, %v264_v33, 0.0  ;;  %v904_v53 = vpop.permute.xlu1 %369 }
 0x191   :  { %v282_v45 = vadd.f32 %v281_v43, %v263_v32  ;;  %v273_v46 = vmul.f32 %v884_v35, %v884_v35  ;;  %v274_v47 = vmul.f32 %v887_v37, %v887_v37  ;;  %v298_v50 = vadd.f32 %v297_v48, %v271_v34 }
 0x193   :  { %287 = vadd.xlane.f32.xlu0 %v286_v42  ;;  %283 = vadd.xlane.f32.xlu1 %v282_v45  ;;  %v301_v36 = vsel %vm204_vm1, %v274_v47, 0.0 }
 0x194   :  { %v302_v49 = vadd.f32 %v301_v36, %v273_v46  ;;  %v906_v54 = vpop.permute.xlu1 %374 }
 0x197   :  { %303 = vadd.xlane.f32.xlu0 %v302_v49  ;;  %299 = vadd.xlane.f32.xlu1 %v298_v50 }
 0x198   :  { %v908_v55 = vpop.permute.xlu1 %379 }
 0x19c   :  { %v910_v56 = vpop.permute.xlu1 %384 }
 0x1a0   :  { %v912_v57 = vpop.permute.xlu1 %389 }
 0x1a4   :  { %v914_v58 = vpop.permute.xlu1 %394 }
 0x1ad   :  { %458 = vperm.xlu0 %621, %v420_v51  }
 0x1d5   :  { %v220_v59 = vpop.xlane.xlu1 %219 }
 0x1d6   :  { %v240_v60 = vmul.f32 0.006024096, %v220_v59 }
 0x1d8   :  { %v917_v61 = vsub.f32 %v773_v38, %v240_v60  ;;  %v920_v62 = vsub.f32 %v779_v41, %v240_v60 }
 0x1d9   :  { %v236_v63 = vpop.xlane.xlu1 %235 }
 0x1da   :  { %v244_v0 = vmul.f32 0.006024096, %v236_v63  ;;  %v267_v3 = vmul.f32 %v917_v61, %v917_v61  ;;  %v268_v4 = vmul.f32 %v920_v62, %v920_v62 }
 0x1dc   :  { %v927_v5 = vsub.f32 %v777_v40, %v244_v0  ;;  %v930_v6 = vsub.f32 %v783_v44, %v244_v0  ;;  %v289_v38 = vsel %vm204_vm1, %v268_v4, 0.0  ;;  %v419_v40 = vld [vmem:[%s1030_s3 + $0x30] sm:$0xff]  ;;  %v360_v44 = vpop.permute.xlu0 %359 }
 0x1dd   :  { %v290_v7 = vadd.f32 %v289_v38, %v267_v3  ;;  %v424_v15 = vpop.permute.xlu1 %423 }
 0x1de   :  { %v275_v41 = vmul.f32 %v927_v5, %v927_v5  ;;  %v276_v8 = vmul.f32 %v930_v6, %v930_v6 }
 0x1df   :  { %291 = vadd.xlane.f32.xlu1 %v290_v7 }
 0x1e0   :  { %v305_v11 = vsel %vm204_vm1, %v276_v8, 0.0  ;;  %v941_v13 = vpop.permute.xlu0 %428 }
 0x1e1   :  { %v306_v12 = vadd.f32 %v305_v11, %v275_v41  ;;  %v434_v17 = vpop.permute.xlu1 %433 }
 0x1e3   :  { %307 = vadd.xlane.f32.xlu1 %v306_v12 }
 0x1e4   :  { %v943_v14 = vpop.permute.xlu0 %438 }
 0x1e5   :  { %v444_v30 = vpop.permute.xlu1 %443 }
 0x1e8   :  { %v945_v16 = vpop.permute.xlu0 %448 }
 0x1f4   :  { %453 = vperm.xlu1 %622, %v419_v40  }
 0x217   :  { %v280_v18 = vpop.xlane.xlu0 %279 }
 0x218   :  { %v309_v26 = vmul.f32 0.006024096, %v280_v18 }
 0x21a   :  { %v317_v29 = vadd.f32 1e-05, %v309_v26 }
 0x21c   :  { %v296_v31 = vpop.xlane.xlu0 %295  ;;  %645 = vrsqrt.f32 %v317_v29 }
 0x21d   :  { %v313_v22 = vmul.f32 0.006024096, %v296_v31 }
 0x21f   :  { %v321_v25 = vadd.f32 1e-05, %v313_v22 }
 0x220   :  { %v288_v32 = vpop.xlane.xlu0 %287  ;;  %v284_v33 = vpop.xlane.xlu1 %283 }
 0x221   :  { %647 = vrsqrt.f32 %v321_v25  ;;  %v311_v23 = vmul.f32 0.006024096, %v288_v32  ;;  %v310_v39 = vmul.f32 0.006024096, %v284_v33 }
 0x223   :  { %v319_v42 = vadd.f32 1e-05, %v311_v23  ;;  %v318_v43 = vadd.f32 1e-05, %v310_v39 }
 0x224   :  { %v300_v45 = vpop.xlane.xlu1 %299 }
 0x225   :  { %649 = vrsqrt.f32 %v319_v42  ;;  %v314_v46 = vmul.f32 0.006024096, %v300_v45 }
 0x226   :  { %651 = vrsqrt.f32 %v318_v43  ;;  %v646_v47 = vpop.eup %645 }
 0x227   :  { %v322_v34 = vadd.f32 1e-05, %v314_v46  ;;  %v333_v48 = vmul.f32 %v646_v47, %v834_v1  ;;  %v334_v36 = vmul.f32 %v646_v47, %v837_v2 }
 0x229   :  { %v397_v49 = vmul.f32 %v360_v44, %v333_v48  ;;  %v398_v50 = vmul.f32 %v360_v44, %v334_v36  ;;  %653 = vrsqrt.f32 %v322_v34 }
 0x22b   :  { %v648_v51 = vpop.eup %647  ;;  %v461_v59 = vadd.f32 %v424_v15, %v397_v49  ;;  %v462_v60 = vadd.f32 %v424_v15, %v398_v50 }
 0x22c   :  { %v341_v63 = vmul.f32 %v648_v51, %v844_v9  ;;  %v342_v0 = vmul.f32 %v648_v51, %v847_v10 }
 0x22d   :  { %v477_v3 = vmul.f32 0.2, %v461_v59  ;;  %v478_v4 = vmul.f32 0.2, %v462_v60 }
 0x22e   :  { %v405_v38 = vmul.f32 %v908_v55, %v341_v63  ;;  %v406_v1 = vmul.f32 %v908_v55, %v342_v0 }
 0x22f   :  { %v650_v7 = vpop.eup %649  ;;  %v493_v41 = vmax.f32 %v461_v59, %v477_v3  ;;  %v494_v8 = vmax.f32 %v462_v60, %v478_v4 }
 0x230   :  { %v652_v2 = vpop.eup %651  ;;  %v469_v11 = vadd.f32 %v444_v30, %v405_v38  ;;  %v470_v12 = vadd.f32 %v444_v30, %v406_v1  ;;  %v337_v9 = vmul.f32 %v650_v7, %v864_v24  ;;  %v338_v10 = vmul.f32 %v650_v7, %v867_v27 }
 0x231   :  { %v335_v44 = vmul.f32 %v652_v2, %v858_v21  ;;  %v336_v15 = vmul.f32 %v652_v2, %v861_v20  ;;  %v600_v18 = vpack.c.bf16 %v494_v8, %v493_v41 }
 0x232   :  { %v485_v55 = vmul.f32 0.2, %v469_v11  ;;  %v486_v26 = vmul.f32 0.2, %v470_v12  ;;  %v401_v29 = vmul.f32 %v904_v53, %v337_v9  ;;  %v402_v31 = vmul.f32 %v904_v53, %v338_v10 }
 0x233   :  { %v399_v30 = vmul.f32 %v902_v52, %v335_v44  ;;  %v400_v22 = vmul.f32 %v902_v52, %v336_v15  ;;  %v654_v25 = vpop.eup %653  ;;  %560 = vst.msk [vmem:[%s1031_s4] sm:$0xff] %vm953_vm4, %v600_v18 }
 0x234   :  { %v501_v21 = vmax.f32 %v469_v11, %v485_v55  ;;  %v502_v20 = vmax.f32 %v470_v12, %v486_v26  ;;  %v465_v24 = vadd.f32 %v434_v17, %v401_v29  ;;  %v466_v27 = vadd.f32 %v434_v17, %v402_v31 }
 0x235   :  { %v463_v32 = vadd.f32 %v941_v13, %v399_v30  ;;  %v464_v33 = vadd.f32 %v941_v13, %v400_v22  ;;  %v343_v23 = vmul.f32 %v654_v25, %v870_v28  ;;  %v344_v52 = vmul.f32 %v654_v25, %v853_v19 }
 0x236   :  { %v604_v53 = vpack.c.bf16 %v502_v20, %v501_v21  ;;  %v481_v39 = vmul.f32 0.2, %v465_v24  ;;  %v482_v42 = vmul.f32 0.2, %v466_v27 }
 0x237   :  { %v479_v43 = vmul.f32 0.2, %v463_v32  ;;  %v480_v45 = vmul.f32 0.2, %v464_v33  ;;  %v407_v17 = vmul.f32 %v910_v56, %v343_v23  ;;  %v408_v46 = vmul.f32 %v910_v56, %v344_v52 }
 0x238   :  { %564 = vst.msk [vmem:[%s1031_s4 + $0x20] sm:$0xff] %vm953_vm4, %v604_v53  ;;  %v497_v13 = vmax.f32 %v465_v24, %v481_v39  ;;  %v498_v47 = vmax.f32 %v466_v27, %v482_v42 }
 0x239   :  { %v495_v34 = vmax.f32 %v463_v32, %v479_v43  ;;  %v496_v28 = vmax.f32 %v464_v33, %v480_v45  ;;  %v471_v19 = vadd.f32 %v945_v16, %v407_v17  ;;  %v472_v48 = vadd.f32 %v945_v16, %v408_v46  ;;  %v304_v16 = vpop.xlane.xlu0 %303 }
 0x23a   :  { %v602_v36 = vpack.c.bf16 %v498_v47, %v497_v13  ;;  %v315_v63 = vmul.f32 0.006024096, %v304_v16 }
 0x23b   :  { %v601_v49 = vpack.c.bf16 %v496_v28, %v495_v34  ;;  %v487_v50 = vmul.f32 0.2, %v471_v19  ;;  %v488_v51 = vmul.f32 0.2, %v472_v48 }
 0x23c   :  { %562 = vst.msk [vmem:[%s1031_s4 + $0x10] sm:$0xff] %vm953_vm4, %v602_v36  ;;  %v323_v0 = vadd.f32 1e-05, %v315_v63 }
 0x23d   :  { %561 = vst.msk [vmem:[%s1031_s4 + $0x8] sm:$0xff] %vm953_vm4, %v601_v49  ;;  %v503_v56 = vmax.f32 %v471_v19, %v487_v50  ;;  %v504_v59 = vmax.f32 %v472_v48, %v488_v51  ;;  %v459_v53 = vpop.permute.xlu0 %458 }
 0x23e   :  { %655 = vrsqrt.f32 %v323_v0 }
 0x23f   :  { %v605_v60 = vpack.c.bf16 %v504_v59, %v503_v56 }
 0x241   :  { %565 = vst.msk [vmem:[%s1031_s4 + $0x28] sm:$0xff] %vm953_vm4, %v605_v60 }
 0x248   :  { %v656_v3 = vpop.eup %655 }
 0x249   :  { %v345_v7 = vmul.f32 %v656_v3, %v884_v35  ;;  %v346_v2 = vmul.f32 %v656_v3, %v887_v37 }
 0x24b   :  { %v409_v12 = vmul.f32 %v912_v57, %v345_v7  ;;  %v410_v9 = vmul.f32 %v912_v57, %v346_v2 }
 0x26c   :  { %v292_v4 = vpop.xlane.xlu1 %291 }
 0x26d   :  { %v312_v38 = vmul.f32 0.006024096, %v292_v4 }
 0x26f   :  { %v320_v1 = vadd.f32 1e-05, %v312_v38 }
 0x270   :  { %v308_v41 = vpop.xlane.xlu1 %307 }
 0x271   :  { %657 = vrsqrt.f32 %v320_v1  ;;  %v316_v8 = vmul.f32 0.006024096, %v308_v41 }
 0x273   :  { %v324_v11 = vadd.f32 1e-05, %v316_v8 }
 0x274   :  { %v454_v10 = vpop.permute.xlu1 %453 }
 0x275   :  { %659 = vrsqrt.f32 %v324_v11  ;;  %v473_v44 = vadd.f32 %v454_v10, %v409_v12  ;;  %v474_v15 = vadd.f32 %v454_v10, %v410_v9 }
 0x277   :  { %v489_v18 = vmul.f32 0.2, %v473_v44  ;;  %v490_v55 = vmul.f32 0.2, %v474_v15 }
 0x279   :  { %v505_v26 = vmax.f32 %v473_v44, %v489_v18  ;;  %v506_v29 = vmax.f32 %v474_v15, %v490_v55 }
 0x27b   :  { %v658_v31 = vpop.eup %657  ;;  %v606_v35 = vpack.c.bf16 %v506_v29, %v505_v26 }
 0x27c   :  { %v339_v37 = vmul.f32 %v658_v31, %v917_v61  ;;  %v340_v30 = vmul.f32 %v658_v31, %v920_v62 }
 0x27d   :  { %566 = vst.msk [vmem:[%s1031_s4 + $0x30] sm:$0xff] %vm953_vm4, %v606_v35 }
 0x27e   :  { %v403_v57 = vmul.f32 %v906_v54, %v339_v37  ;;  %v404_v22 = vmul.f32 %v906_v54, %v340_v30 }
 0x27f   :  { %v660_v25 = vpop.eup %659 }
 0x280   :  { %v467_v21 = vadd.f32 %v943_v14, %v403_v57  ;;  %v468_v20 = vadd.f32 %v943_v14, %v404_v22  ;;  %v347_v24 = vmul.f32 %v660_v25, %v927_v5  ;;  %v348_v61 = vmul.f32 %v660_v25, %v930_v6 }
 0x282   :  { %v483_v62 = vmul.f32 0.2, %v467_v21  ;;  %v484_v27 = vmul.f32 0.2, %v468_v20  ;;  %v411_v32 = vmul.f32 %v914_v58, %v347_v24  ;;  %v412_v33 = vmul.f32 %v914_v58, %v348_v61 }
 0x284   :  { %v499_v23 = vmax.f32 %v467_v21, %v483_v62  ;;  %v500_v52 = vmax.f32 %v468_v20, %v484_v27  ;;  %v475_v39 = vadd.f32 %v459_v53, %v411_v32  ;;  %v476_v54 = vadd.f32 %v459_v53, %v412_v33 }
 0x286   :  { %v603_v42 = vpack.c.bf16 %v500_v52, %v499_v23  ;;  %v491_v43 = vmul.f32 0.2, %v475_v39  ;;  %v492_v45 = vmul.f32 0.2, %v476_v54 }
 0x288   :  { %563 = vst.msk [vmem:[%s1031_s4 + $0x18] sm:$0xff] %vm953_vm4, %v603_v42  ;;  %v507_v5 = vmax.f32 %v475_v39, %v491_v43  ;;  %v508_v6 = vmax.f32 %v476_v54, %v492_v45 }
 0x28a   :  { %v607_v14 = vpack.c.bf16 %v508_v6, %v507_v5 }
 0x28c   :  { %567 = vst.msk [vmem:[%s1031_s4 + $0x38] sm:$0xff] %vm953_vm4, %v607_v14 }

// kernel: discriminator_forward.15
= control target key start
LH: loop header
LB: loop body
LE: loop exit
PB: predicated region body
PF: predicated region fallthrough
CT: control target
= control target key end

     0   :  { %v621_v0 = vmov 0   ;;  %vm158_vm0 = vcmask 523264   ;;  %vm236_vm1 = vcmask 670720   ;;  %vm501_vm2 = vcmask 666624   ;;  %s926_s0 = inlined_call_operand.vmem [shape: bf16[192,82], index: 0, kind: input, shape index: {}]   ;;  %s927_s1 = inlined_call_operand.vmem [shape: bf16[64,192], index: 1, kind: input, shape index: {}]   ;;  %s928_s2 = inlined_call_operand.vmem [shape: f32[64,1], index: 2, kind: input, shape index: {}]   ;;  %s929_s3 = inlined_call_operand.vmem [shape: f32[64,1], index: 3, kind: input, shape index: {}]   ;;  %s930_s4 = inlined_call_operand.vmem [shape: bf16[64,82], index: 4, kind: output, shape index: {}]  }
   0x1   :  { %171 = vmatprep.subr.bf16.mxu0 %v621_v0  ;;  %554 = vmatprep.subr.bf16.mxu1 %v621_v0  ;;  %v581_v1 = vld [vmem:[%s926_s0] sm:$0xff]   ;;  %v582_v2 = vld [vmem:[%s926_s0 + $0x8] sm:$0xff]   ;;  %v583_v3 = vld [vmem:[%s926_s0 + $0x10] sm:$0xff]  }
   0x2   :  { %580 = vset.pattern.permute.xlu1 %v621_v0  ;;  %579 = vset.pattern.permute.xlu0 %v621_v0  ;;  %v584_v4 = vld [vmem:[%s926_s0 + $0x18] sm:$0xff]   ;;  %v595_v5 = vld [vmem:[%s927_s1 + $0x4] ss:$8 sps:$4 sm:$0xff]   ;;  %v587_v9 = vld [vmem:[%s926_s0 + $0x30] sm:$0xff]  }
   0x3   :  { %172 = vmatpush1.bf16.msra.mxu0 %v581_v1  ;;  %566 = vmatpush1.bf16.msra.mxu1 %v581_v1  ;;  %v585_v6 = vld [vmem:[%s926_s0 + $0x20] sm:$0xff]   ;;  %v586_v8 = vld [vmem:[%s926_s0 + $0x28] sm:$0xff]   ;;  %v588_v10 = vld [vmem:[%s926_s0 + $0x38] sm:$0xff]  }
   0x4   :  { %173 = vmatprep.subr.bf16.mxu0 %v621_v0  ;;  %555 = vmatprep.subr.bf16.mxu1 %v621_v0  ;;  %v598_v7 = vld [vmem:[%s927_s1 + $0x24] ss:$8 sps:$4 sm:$0xff]   ;;  %v591_v13 = vld [vmem:[%s926_s0 + $0x50] sm:$0xff]   ;;  %v592_v14 = vld [vmem:[%s926_s0 + $0x58] sm:$0xff]  }
   0x5   :  { %534 = vmatprep.mubr.msk.bf16.mxu0 %vm158_vm0, %v595_v5  ;;  %536 = vmatprep.mubr.msk.bf16.mxu1 %vm158_vm0, %v598_v7  ;;  %v589_v11 = vld [vmem:[%s926_s0 + $0x40] sm:$0xff]   ;;  %v590_v12 = vld [vmem:[%s926_s0 + $0x48] sm:$0xff]   ;;  %v599_v17 = vld [vmem:[%s927_s1 + $0x14] ss:$8 sps:$4 sm:$0xff]  }
   0x6   :  { %v593_v15 = vld [vmem:[%s927_s1] ss:$8 sps:$4 sm:$0xff]   ;;  %v602_v18 = vld [vmem:[%s927_s1 + $0x34] ss:$8 sps:$4 sm:$0xff]   ;;  %v601_v19 = vld [vmem:[%s927_s1 + $0x10] ss:$8 sps:$4 sm:$0xff]  }
   0x7   :  { %174 = vmatpush1.bf16.msra.mxu0 %v582_v2  ;;  %567 = vmatpush1.bf16.msra.mxu1 %v582_v2  ;;  %v596_v16 = vld [vmem:[%s927_s1 + $0x20] ss:$8 sps:$4 sm:$0xff]   ;;  %v604_v20 = vld [vmem:[%s927_s1 + $0x30] ss:$8 sps:$4 sm:$0xff]  }
   0x8   :  { %175 = vmatprep.subr.bf16.mxu0 %v621_v0  ;;  %556 = vmatprep.subr.bf16.mxu1 %v621_v0  ;;  %v342_v43 = vld [vmem:[%s928_s2 + $0x8] sm:$0xff]  ;;  %v343_v44 = vld [vmem:[%s928_s2 + $0x10] sm:$0xff]  ;;  %v344_v45 = vld [vmem:[%s928_s2 + $0x18] sm:$0xff] }
   0x9   :  { %v341_v46 = vld [vmem:[%s928_s2] sm:$0xff]  ;;  %v398_v48 = vld [vmem:[%s929_s3 + $0x8] sm:$0xff]  ;;  %v400_v50 = vld [vmem:[%s929_s3 + $0x18] sm:$0xff] }
   0xa   :  { %v345_v47 = vld [vmem:[%s928_s2 + $0x20] sm:$0xff]  ;;  %v346_v49 = vld [vmem:[%s928_s2 + $0x28] sm:$0xff]  ;;  %v347_v51 = vld [vmem:[%s928_s2 + $0x30] sm:$0xff] }
   0xb   :  { %176 = vmatpush1.bf16.msra.mxu0 %v583_v3  ;;  %568 = vmatpush1.bf16.msra.mxu1 %v583_v3  ;;  %v402_v52 = vld [vmem:[%s929_s3 + $0x28] sm:$0xff]  ;;  %v348_v53 = vld [vmem:[%s928_s2 + $0x38] sm:$0xff]  ;;  %v397_v54 = vld [vmem:[%s929_s3] sm:$0xff] }
   0xc   :  { %177 = vmatprep.subr.bf16.mxu0 %v621_v0  ;;  %557 = vmatprep.subr.bf16.mxu1 %v621_v0  ;;  %v399_v57 = vld [vmem:[%s929_s3 + $0x10] sm:$0xff]  ;;  %v401_v58 = vld [vmem:[%s929_s3 + $0x20] sm:$0xff] }
   0xf   :  { %178 = vmatpush1.bf16.msra.mxu0 %v584_v4  ;;  %569 = vmatpush1.bf16.msra.mxu1 %v584_v4 }
  0x10   :  { %179 = vmatprep.subr.bf16.mxu0 %v621_v0  ;;  %558 = vmatprep.subr.bf16.mxu1 %v621_v0 }
  0x13   :  { %180 = vmatpush1.bf16.msra.mxu0 %v585_v6  ;;  %570 = vmatpush1.bf16.msra.mxu1 %v585_v6 }
  0x14   :  { %181 = vmatprep.subr.bf16.mxu0 %v621_v0  ;;  %559 = vmatprep.subr.bf16.mxu1 %v621_v0 }
  0x17   :  { %182 = vmatpush1.bf16.msra.mxu0 %v586_v8  ;;  %571 = vmatpush1.bf16.msra.mxu1 %v586_v8 }
  0x18   :  { %183 = vmatprep.subr.bf16.mxu0 %v621_v0  ;;  %560 = vmatprep.subr.bf16.mxu1 %v621_v0 }
  0x1b   :  { %184 = vmatpush1.bf16.msra.mxu0 %v587_v9  ;;  %572 = vmatpush1.bf16.msra.mxu1 %v587_v9 }
  0x1c   :  { %185 = vmatprep.subr.bf16.mxu0 %v621_v0  ;;  %561 = vmatprep.subr.bf16.mxu1 %v621_v0 }
  0x1f   :  { %186 = vmatpush1.bf16.msra.mxu0 %v588_v10  ;;  %573 = vmatpush1.bf16.msra.mxu1 %v588_v10 }
  0x20   :  { %187 = vmatprep.subr.bf16.mxu0 %v621_v0  ;;  %562 = vmatprep.subr.bf16.mxu1 %v621_v0 }
  0x23   :  { %188 = vmatpush1.bf16.msra.mxu0 %v589_v11  ;;  %574 = vmatpush1.bf16.msra.mxu1 %v589_v11 }
  0x24   :  { %189 = vmatprep.subr.bf16.mxu0 %v621_v0  ;;  %563 = vmatprep.subr.bf16.mxu1 %v621_v0 }
  0x27   :  { %190 = vmatpush1.bf16.msra.mxu0 %v590_v12  ;;  %575 = vmatpush1.bf16.msra.mxu1 %v590_v12 }
  0x28   :  { %191 = vmatprep.subr.bf16.mxu0 %v621_v0  ;;  %564 = vmatprep.subr.bf16.mxu1 %v621_v0 }
  0x2b   :  { %192 = vmatpush1.bf16.msra.mxu0 %v591_v13  ;;  %576 = vmatpush1.bf16.msra.mxu1 %v591_v13 }
  0x2c   :  { %193 = vmatprep.subr.bf16.mxu0 %v621_v0  ;;  %565 = vmatprep.subr.bf16.mxu1 %v621_v0 }
  0x2f   :  { %194 = vmatpush1.bf16.msra.mxu0 %v592_v14  ;;  %577 = vmatpush1.bf16.msra.mxu1 %v592_v14 }
  0x32   :  { %204 = vmatmul.mubr.bf16.vlgmr.msra.gmra.mrb[0].mxu0 %v593_v15  ;;  %220 = vmatmul.mubr.bf16.vlgmr.msra.gmra.mrb[0].mxu1 %v596_v16 }
  0x33   :  { %535 = vmatprep.mubr.msk.bf16.mxu0 %vm158_vm0, %v599_v17  ;;  %537 = vmatprep.mubr.msk.bf16.mxu1 %vm158_vm0, %v602_v18 }
  0x3a   :  { %212 = vmatmul.mubr.bf16.gmra.mrb[4].mxu0 %v601_v19  ;;  %228 = vmatmul.mubr.bf16.gmra.mrb[4].mxu1 %v604_v20 }
 0x105   :  { %v737_v21 = vpop.f32.mrb[0].mxu0  ;;  %v739_v22 = vpop.f32.mrb[0].mxu1 }
 0x106   :  { %v207_v23 = vpop.f32.mrb[1].mxu0  ;;  %v223_v24 = vpop.f32.mrb[1].mxu1  ;;  %v237_v25 = vsel %vm236_vm1, %v737_v21, 0.0  ;;  %v249_v31 = vsel %vm236_vm1, %v739_v22, 0.0 }
 0x107   :  { %v743_v26 = vpop.f32.mrb[2].mxu1  ;;  %238 = vadd.xlane.f32.xlu0 %v237_v25  ;;  %v745_v27 = vpop.f32.mrb[2].mxu0  ;;  %v404_v25 = vld [vmem:[%s929_s3 + $0x38] sm:$0xff] }
 0x108   :  { %v210_v28 = vpop.f32.mrb[3].mxu0  ;;  %v226_v29 = vpop.f32.mrb[3].mxu1  ;;  %v252_v30 = vsel %vm236_vm1, %v743_v26, 0.0  ;;  %v240_v35 = vsel %vm236_vm1, %v745_v27, 0.0 }
 0x109   :  { %253 = vadd.xlane.f32.xlu1 %v252_v30 }
 0x10b   :  { %250 = vadd.xlane.f32.xlu0 %v249_v31 }
 0x10d   :  { %v751_v32 = vpop.f32.mrb[4].mxu0  ;;  %v753_v33 = vpop.f32.mrb[4].mxu1 }
 0x10e   :  { %v215_v34 = vpop.f32.mrb[5].mxu0  ;;  %v243_v36 = vsel %vm236_vm1, %v751_v32, 0.0  ;;  %v231_v37 = vpop.f32.mrb[5].mxu1  ;;  %v255_v41 = vsel %vm236_vm1, %v753_v33, 0.0 }
 0x10f   :  { %241 = vadd.xlane.f32.xlu0 %v240_v35  ;;  %244 = vadd.xlane.f32.xlu1 %v243_v36  ;;  %v759_v38 = vpop.f32.mrb[6].mxu0  ;;  %v761_v39 = vpop.f32.mrb[6].mxu1 }
 0x110   :  { %v218_v40 = vpop.f32.mrb[7].mxu0  ;;  %v234_v42 = vpop.f32.mrb[7].mxu1  ;;  %v246_v55 = vsel %vm236_vm1, %v759_v38, 0.0  ;;  %v258_v56 = vsel %vm236_vm1, %v761_v39, 0.0 }
 0x113   :  { %256 = vadd.xlane.f32.xlu0 %v255_v41 }
 0x120   :  { %356 = vperm.xlu1 %580, %v342_v43  }
 0x124   :  { %361 = vperm.xlu1 %580, %v343_v44  }
 0x128   :  { %366 = vperm.xlu1 %580, %v344_v45  }
 0x129   :  { %351 = vperm.xlu0 %579, %v341_v46  }
 0x12c   :  { %371 = vperm.xlu1 %580, %v345_v47  }
 0x12d   :  { %412 = vperm.xlu0 %579, %v398_v48  }
 0x130   :  { %376 = vperm.xlu1 %580, %v346_v49  }
 0x131   :  { %422 = vperm.xlu0 %579, %v400_v50  }
 0x134   :  { %381 = vperm.xlu1 %580, %v347_v51  }
 0x135   :  { %432 = vperm.xlu0 %579, %v402_v52  }
 0x138   :  { %386 = vperm.xlu1 %580, %v348_v53  }
 0x13c   :  { %407 = vperm.xlu1 %580, %v397_v54  }
 0x160   :  { %247 = vadd.xlane.f32.xlu1 %v246_v55 }
 0x164   :  { %259 = vadd.xlane.f32.xlu1 %v258_v56 }
 0x175   :  { %417 = vperm.xlu1 %580, %v399_v57  }
 0x179   :  { %427 = vperm.xlu1 %580, %v401_v58  }
 0x194   :  { %v239_v59 = vpop.xlane.xlu0 %238 }
 0x195   :  { %v261_v60 = vmul.f32 0.0121951215, %v239_v59 }
 0x196   :  { %v254_v62 = vpop.xlane.xlu1 %253 }
 0x197   :  { %v812_v61 = vsub.f32 %v737_v21, %v261_v60  ;;  %v266_v2 = vmul.f32 0.0121951215, %v254_v62 }
 0x198   :  { %v251_v63 = vpop.xlane.xlu0 %250 }
 0x199   :  { %v265_v0 = vmul.f32 0.0121951215, %v251_v63  ;;  %v277_v1 = vmul.f32 %v812_v61, %v812_v61  ;;  %v823_v10 = vsub.f32 %v743_v26, %v266_v2 }
 0x19b   :  { %v817_v3 = vsub.f32 %v739_v22, %v265_v0  ;;  %v285_v4 = vsel %vm236_vm1, %v277_v1, 0.0  ;;  %v282_v21 = vmul.f32 %v823_v10, %v823_v10 }
 0x19c   :  { %286 = vadd.xlane.f32.xlu0 %v285_v4  ;;  %v242_v5 = vpop.xlane.xlu0 %241  ;;  %v245_v6 = vpop.xlane.xlu1 %244 }
 0x19d   :  { %v262_v7 = vmul.f32 0.0121951215, %v242_v5  ;;  %v263_v8 = vmul.f32 0.0121951215, %v245_v6  ;;  %v281_v9 = vmul.f32 %v817_v3, %v817_v3  ;;  %v300_v24 = vsel %vm236_vm1, %v282_v21, 0.0 }
 0x19f   :  { %v826_v11 = vsub.f32 %v745_v27, %v262_v7  ;;  %v829_v12 = vsub.f32 %v751_v32, %v263_v8  ;;  %v297_v13 = vsel %vm236_vm1, %v281_v9, 0.0 }
 0x1a0   :  { %298 = vadd.xlane.f32.xlu0 %v297_v13  ;;  %v257_v14 = vpop.xlane.xlu0 %256  ;;  %v850_v26 = vpop.permute.xlu1 %356 }
 0x1a1   :  { %v267_v15 = vmul.f32 0.0121951215, %v257_v14  ;;  %v279_v16 = vmul.f32 %v829_v12, %v829_v12  ;;  %v278_v17 = vmul.f32 %v826_v11, %v826_v11 }
 0x1a3   :  { %v837_v18 = vsub.f32 %v753_v33, %v267_v15  ;;  %v291_v19 = vsel %vm236_vm1, %v279_v16, 0.0  ;;  %v288_v20 = vsel %vm236_vm1, %v278_v17, 0.0 }
 0x1a4   :  { %292 = vadd.xlane.f32.xlu0 %v291_v19  ;;  %289 = vadd.xlane.f32.xlu1 %v288_v20  ;;  %v852_v27 = vpop.permute.xlu1 %361 }
 0x1a5   :  { %v283_v22 = vmul.f32 %v837_v18, %v837_v18 }
 0x1a7   :  { %v303_v23 = vsel %vm236_vm1, %v283_v22, 0.0 }
 0x1a8   :  { %304 = vadd.xlane.f32.xlu0 %v303_v23  ;;  %301 = vadd.xlane.f32.xlu1 %v300_v24  ;;  %v854_v28 = vpop.permute.xlu1 %366  ;;  %v352_v46 = vpop.permute.xlu0 %351 }
 0x1ac   :  { %v372_v29 = vpop.permute.xlu1 %371  ;;  %v413_v47 = vpop.permute.xlu0 %412 }
 0x1b0   :  { %v856_v30 = vpop.permute.xlu1 %376  ;;  %v877_v48 = vpop.permute.xlu0 %422 }
 0x1b4   :  { %v858_v31 = vpop.permute.xlu1 %381 }
 0x1b8   :  { %v860_v32 = vpop.permute.xlu1 %386 }
 0x1bc   :  { %v408_v33 = vpop.permute.xlu1 %407 }
 0x1be   :  { %442 = vperm.xlu0 %579, %v404_v25  }
 0x1ed   :  { %v248_v34 = vpop.xlane.xlu1 %247 }
 0x1ee   :  { %v264_v35 = vmul.f32 0.0121951215, %v248_v34 }
 0x1f0   :  { %v863_v36 = vsub.f32 %v759_v38, %v264_v35  ;;  %v403_v38 = vld [vmem:[%s929_s3 + $0x30] sm:$0xff] }
 0x1f1   :  { %v260_v37 = vpop.xlane.xlu1 %259 }
 0x1f2   :  { %v268_v40 = vmul.f32 0.0121951215, %v260_v37  ;;  %v280_v41 = vmul.f32 %v863_v36, %v863_v36 }
 0x1f4   :  { %v868_v42 = vsub.f32 %v761_v39, %v268_v40  ;;  %v294_v43 = vsel %vm236_vm1, %v280_v41, 0.0  ;;  %v433_v39 = vpop.permute.xlu0 %432 }
 0x1f5   :  { %295 = vadd.xlane.f32.xlu1 %v294_v43  ;;  %v418_v49 = vpop.permute.xlu1 %417 }
 0x1f6   :  { %v284_v44 = vmul.f32 %v868_v42, %v868_v42 }
 0x1f8   :  { %v306_v45 = vsel %vm236_vm1, %v284_v44, 0.0 }
 0x1f9   :  { %307 = vadd.xlane.f32.xlu1 %v306_v45  ;;  %v428_v53 = vpop.permute.xlu1 %427 }
 0x20a   :  { %437 = vperm.xlu1 %580, %v403_v38  }
 0x229   :  { %v287_v50 = vpop.xlane.xlu0 %286 }
 0x22a   :  { %v309_v51 = vmul.f32 0.0121951215, %v287_v50 }
 0x22c   :  { %v317_v52 = vadd.f32 1e-05, %v309_v51 }
 0x22d   :  { %v299_v54 = vpop.xlane.xlu0 %298 }
 0x22e   :  { %605 = vrsqrt.f32 %v317_v52  ;;  %v313_v55 = vmul.f32 0.0121951215, %v299_v54 }
 0x230   :  { %v321_v56 = vadd.f32 1e-05, %v313_v55 }
 0x231   :  { %v293_v57 = vpop.xlane.xlu0 %292  ;;  %v290_v58 = vpop.xlane.xlu1 %289 }
 0x232   :  { %607 = vrsqrt.f32 %v321_v56  ;;  %v311_v59 = vmul.f32 0.0121951215, %v293_v57  ;;  %v310_v60 = vmul.f32 0.0121951215, %v290_v58 }
 0x234   :  { %v319_v62 = vadd.f32 1e-05, %v311_v59  ;;  %v318_v63 = vadd.f32 1e-05, %v310_v60 }
 0x235   :  { %v302_v0 = vpop.xlane.xlu1 %301  ;;  %v305_v45 = vpop.xlane.xlu0 %304 }
 0x236   :  { %609 = vrsqrt.f32 %v319_v62  ;;  %v314_v1 = vmul.f32 0.0121951215, %v302_v0  ;;  %v315_v38 = vmul.f32 0.0121951215, %v305_v45 }
 0x237   :  { %611 = vrsqrt.f32 %v318_v63 }
 0x238   :  { %v606_v2 = vpop.eup %605  ;;  %v322_v4 = vadd.f32 1e-05, %v314_v1 }
 0x239   :  { %v333_v5 = vmul.f32 %v606_v2, %v812_v61 }
 0x23a   :  { %613 = vrsqrt.f32 %v322_v4 }
 0x23b   :  { %v389_v6 = vmul.f32 %v352_v46, %v333_v5  ;;  %v323_v46 = vadd.f32 1e-05, %v315_v38 }
 0x23c   :  { %v608_v7 = vpop.eup %607 }
 0x23d   :  { %v445_v8 = vadd.f32 %v408_v33, %v389_v6  ;;  %v337_v9 = vmul.f32 %v608_v7, %v817_v3  ;;  %615 = vrsqrt.f32 %v323_v46  ;;  %v443_v5 = vpop.permute.xlu0 %442 }
 0x23f   :  { %v453_v13 = vmul.f32 0.2, %v445_v8  ;;  %v393_v14 = vmul.f32 %v372_v29, %v337_v9 }
 0x240   :  { %v610_v15 = vpop.eup %609 }
 0x241   :  { %v612_v16 = vpop.eup %611  ;;  %v461_v17 = vmax.f32 %v445_v8, %v453_v13  ;;  %v449_v19 = vadd.f32 %v428_v53, %v393_v14  ;;  %v335_v20 = vmul.f32 %v610_v15, %v829_v12 }
 0x242   :  { %v334_v21 = vmul.f32 %v612_v16, %v826_v11 }
 0x243   :  { %v546_v22 = vpack.c.bf16 %v461_v17, %v461_v17  ;;  %v457_v23 = vmul.f32 0.2, %v449_v19  ;;  %v391_v61 = vmul.f32 %v852_v27, %v335_v20 }
 0x244   :  { %v390_v24 = vmul.f32 %v850_v26, %v334_v21  ;;  %v614_v25 = vpop.eup %613 }
 0x245   :  { %502 = vst.msk [vmem:[%s930_s4] sm:$0xf] %vm501_vm2, %v546_v22  ;;  %v465_v3 = vmax.f32 %v449_v19, %v457_v23  ;;  %v447_v29 = vadd.f32 %v418_v49, %v391_v61  ;;  %v338_v12 = vmul.f32 %v614_v25, %v823_v10 }
 0x246   :  { %v446_v33 = vadd.f32 %v413_v47, %v390_v24 }
 0x247   :  { %v550_v34 = vpack.c.bf16 %v465_v3, %v465_v3  ;;  %v455_v35 = vmul.f32 0.2, %v447_v29  ;;  %v394_v37 = vmul.f32 %v856_v30, %v338_v12  ;;  %v616_v47 = vpop.eup %615 }
 0x248   :  { %v454_v11 = vmul.f32 0.2, %v446_v33  ;;  %v339_v51 = vmul.f32 %v616_v47, %v837_v18 }
 0x249   :  { %506 = vst.msk [vmem:[%s930_s4 + $0x10] sm:$0xf] %vm501_vm2, %v550_v34  ;;  %v463_v26 = vmax.f32 %v447_v29, %v455_v35  ;;  %v450_v40 = vadd.f32 %v433_v39, %v394_v37 }
 0x24a   :  { %v462_v27 = vmax.f32 %v446_v33, %v454_v11  ;;  %v395_v55 = vmul.f32 %v858_v31, %v339_v51 }
 0x24b   :  { %v548_v41 = vpack.c.bf16 %v463_v26, %v463_v26  ;;  %v458_v44 = vmul.f32 0.2, %v450_v40 }
 0x24c   :  { %v547_v43 = vpack.c.bf16 %v462_v27, %v462_v27 }
 0x24d   :  { %504 = vst.msk [vmem:[%s930_s4 + $0x8] sm:$0xf] %vm501_vm2, %v548_v41  ;;  %v466_v10 = vmax.f32 %v450_v40, %v458_v44 }
 0x24e   :  { %503 = vst.msk [vmem:[%s930_s4 + $0x4] sm:$0xf] %vm501_vm2, %v547_v43 }
 0x24f   :  { %v551_v30 = vpack.c.bf16 %v466_v10, %v466_v10 }
 0x251   :  { %507 = vst.msk [vmem:[%s930_s4 + $0x14] sm:$0xf] %vm501_vm2, %v551_v30 }
 0x282   :  { %v296_v39 = vpop.xlane.xlu1 %295 }
 0x283   :  { %v312_v49 = vmul.f32 0.0121951215, %v296_v39 }
 0x285   :  { %v320_v50 = vadd.f32 1e-05, %v312_v49 }
 0x286   :  { %v308_v52 = vpop.xlane.xlu1 %307 }
 0x287   :  { %617 = vrsqrt.f32 %v320_v50  ;;  %v316_v53 = vmul.f32 0.0121951215, %v308_v52 }
 0x289   :  { %v324_v54 = vadd.f32 1e-05, %v316_v53 }
 0x28a   :  { %v438_v56 = vpop.permute.xlu1 %437 }
 0x28b   :  { %619 = vrsqrt.f32 %v324_v54  ;;  %v451_v57 = vadd.f32 %v438_v56, %v395_v55 }
 0x28d   :  { %v459_v58 = vmul.f32 0.2, %v451_v57 }
 0x28f   :  { %v467_v59 = vmax.f32 %v451_v57, %v459_v58 }
 0x291   :  { %v618_v60 = vpop.eup %617  ;;  %v552_v62 = vpack.c.bf16 %v467_v59, %v467_v59 }
 0x292   :  { %v336_v63 = vmul.f32 %v618_v60, %v863_v36 }
 0x293   :  { %508 = vst.msk [vmem:[%s930_s4 + $0x18] sm:$0xf] %vm501_vm2, %v552_v62 }
 0x294   :  { %v392_v18 = vmul.f32 %v854_v28, %v336_v63 }
 0x295   :  { %v620_v0 = vpop.eup %619 }
 0x296   :  { %v448_v1 = vadd.f32 %v877_v48, %v392_v18  ;;  %v340_v31 = vmul.f32 %v620_v0, %v868_v42 }
 0x298   :  { %v456_v2 = vmul.f32 0.2, %v448_v1  ;;  %v396_v4 = vmul.f32 %v860_v32, %v340_v31 }
 0x29a   :  { %v464_v6 = vmax.f32 %v448_v1, %v456_v2  ;;  %v452_v7 = vadd.f32 %v443_v5, %v396_v4 }
 0x29c   :  { %v549_v8 = vpack.c.bf16 %v464_v6, %v464_v6  ;;  %v460_v36 = vmul.f32 0.2, %v452_v7 }
 0x29e   :  { %505 = vst.msk [vmem:[%s930_s4 + $0xc] sm:$0xf] %vm501_vm2, %v549_v8  ;;  %v468_v9 = vmax.f32 %v452_v7, %v460_v36 }
 0x2a0   :  { %v553_v28 = vpack.c.bf16 %v468_v9, %v468_v9 }
 0x2a2   :  { %509 = vst.msk [vmem:[%s930_s4 + $0x1c] sm:$0xf] %vm501_vm2, %v553_v28 }

// kernel: discriminator_forward.16
= control target key start
LH: loop header
LB: loop body
LE: loop exit
PB: predicated region body
PF: predicated region fallthrough
CT: control target
= control target key end

     0   :  { %v621_v0 = vmov 0   ;;  %vm158_vm0 = vcmask 523264   ;;  %vm236_vm1 = vcmask 326656   ;;  %vm501_vm2 = vcmask 322560   ;;  %s926_s0 = inlined_call_operand.vmem [shape: bf16[192,40], index: 0, kind: input, shape index: {}]   ;;  %s927_s1 = inlined_call_operand.vmem [shape: bf16[64,192], index: 1, kind: input, shape index: {}]   ;;  %s928_s2 = inlined_call_operand.vmem [shape: f32[64,1], index: 2, kind: input, shape index: {}]   ;;  %s929_s3 = inlined_call_operand.vmem [shape: f32[64,1], index: 3, kind: input, shape index: {}]   ;;  %s930_s4 = inlined_call_operand.vmem [shape: bf16[64,40], index: 4, kind: output, shape index: {}]  }
   0x1   :  { %171 = vmatprep.subr.bf16.mxu0 %v621_v0  ;;  %554 = vmatprep.subr.bf16.mxu1 %v621_v0  ;;  %v581_v1 = vld [vmem:[%s926_s0] sm:$0xff]   ;;  %v582_v2 = vld [vmem:[%s926_s0 + $0x8] sm:$0xff]   ;;  %v583_v3 = vld [vmem:[%s926_s0 + $0x10] sm:$0xff]  }
   0x2   :  { %580 = vset.pattern.permute.xlu1 %v621_v0  ;;  %579 = vset.pattern.permute.xlu0 %v621_v0  ;;  %v584_v4 = vld [vmem:[%s926_s0 + $0x18] sm:$0xff]   ;;  %v595_v5 = vld [vmem:[%s927_s1 + $0x4] ss:$8 sps:$4 sm:$0xff]   ;;  %v587_v9 = vld [vmem:[%s926_s0 + $0x30] sm:$0xff]  }
   0x3   :  { %172 = vmatpush1.bf16.msra.mxu0 %v581_v1  ;;  %566 = vmatpush1.bf16.msra.mxu1 %v581_v1  ;;  %v585_v6 = vld [vmem:[%s926_s0 + $0x20] sm:$0xff]   ;;  %v586_v8 = vld [vmem:[%s926_s0 + $0x28] sm:$0xff]   ;;  %v588_v10 = vld [vmem:[%s926_s0 + $0x38] sm:$0xff]  }
   0x4   :  { %173 = vmatprep.subr.bf16.mxu0 %v621_v0  ;;  %555 = vmatprep.subr.bf16.mxu1 %v621_v0  ;;  %v598_v7 = vld [vmem:[%s927_s1 + $0x24] ss:$8 sps:$4 sm:$0xff]   ;;  %v591_v13 = vld [vmem:[%s926_s0 + $0x50] sm:$0xff]   ;;  %v592_v14 = vld [vmem:[%s926_s0 + $0x58] sm:$0xff]  }
   0x5   :  { %534 = vmatprep.mubr.msk.bf16.mxu0 %vm158_vm0, %v595_v5  ;;  %536 = vmatprep.mubr.msk.bf16.mxu1 %vm158_vm0, %v598_v7  ;;  %v589_v11 = vld [vmem:[%s926_s0 + $0x40] sm:$0xff]   ;;  %v590_v12 = vld [vmem:[%s926_s0 + $0x48] sm:$0xff]   ;;  %v599_v17 = vld [vmem:[%s927_s1 + $0x14] ss:$8 sps:$4 sm:$0xff]  }
   0x6   :  { %v593_v15 = vld [vmem:[%s927_s1] ss:$8 sps:$4 sm:$0xff]   ;;  %v602_v18 = vld [vmem:[%s927_s1 + $0x34] ss:$8 sps:$4 sm:$0xff]   ;;  %v601_v19 = vld [vmem:[%s927_s1 + $0x10] ss:$8 sps:$4 sm:$0xff]  }
   0x7   :  { %174 = vmatpush1.bf16.msra.mxu0 %v582_v2  ;;  %567 = vmatpush1.bf16.msra.mxu1 %v582_v2  ;;  %v596_v16 = vld [vmem:[%s927_s1 + $0x20] ss:$8 sps:$4 sm:$0xff]   ;;  %v604_v20 = vld [vmem:[%s927_s1 + $0x30] ss:$8 sps:$4 sm:$0xff]  }
   0x8   :  { %175 = vmatprep.subr.bf16.mxu0 %v621_v0  ;;  %556 = vmatprep.subr.bf16.mxu1 %v621_v0  ;;  %v342_v43 = vld [vmem:[%s928_s2 + $0x8] sm:$0xff]  ;;  %v343_v44 = vld [vmem:[%s928_s2 + $0x10] sm:$0xff]  ;;  %v344_v45 = vld [vmem:[%s928_s2 + $0x18] sm:$0xff] }
   0x9   :  { %v341_v46 = vld [vmem:[%s928_s2] sm:$0xff]  ;;  %v398_v48 = vld [vmem:[%s929_s3 + $0x8] sm:$0xff]  ;;  %v400_v50 = vld [vmem:[%s929_s3 + $0x18] sm:$0xff] }
   0xa   :  { %v345_v47 = vld [vmem:[%s928_s2 + $0x20] sm:$0xff]  ;;  %v346_v49 = vld [vmem:[%s928_s2 + $0x28] sm:$0xff]  ;;  %v347_v51 = vld [vmem:[%s928_s2 + $0x30] sm:$0xff] }
   0xb   :  { %176 = vmatpush1.bf16.msra.mxu0 %v583_v3  ;;  %568 = vmatpush1.bf16.msra.mxu1 %v583_v3  ;;  %v402_v52 = vld [vmem:[%s929_s3 + $0x28] sm:$0xff]  ;;  %v348_v53 = vld [vmem:[%s928_s2 + $0x38] sm:$0xff]  ;;  %v397_v54 = vld [vmem:[%s929_s3] sm:$0xff] }
   0xc   :  { %177 = vmatprep.subr.bf16.mxu0 %v621_v0  ;;  %557 = vmatprep.subr.bf16.mxu1 %v621_v0  ;;  %v399_v57 = vld [vmem:[%s929_s3 + $0x10] sm:$0xff]  ;;  %v401_v58 = vld [vmem:[%s929_s3 + $0x20] sm:$0xff] }
   0xf   :  { %178 = vmatpush1.bf16.msra.mxu0 %v584_v4  ;;  %569 = vmatpush1.bf16.msra.mxu1 %v584_v4 }
  0x10   :  { %179 = vmatprep.subr.bf16.mxu0 %v621_v0  ;;  %558 = vmatprep.subr.bf16.mxu1 %v621_v0 }
  0x13   :  { %180 = vmatpush1.bf16.msra.mxu0 %v585_v6  ;;  %570 = vmatpush1.bf16.msra.mxu1 %v585_v6 }
  0x14   :  { %181 = vmatprep.subr.bf16.mxu0 %v621_v0  ;;  %559 = vmatprep.subr.bf16.mxu1 %v621_v0 }
  0x17   :  { %182 = vmatpush1.bf16.msra.mxu0 %v586_v8  ;;  %571 = vmatpush1.bf16.msra.mxu1 %v586_v8 }
  0x18   :  { %183 = vmatprep.subr.bf16.mxu0 %v621_v0  ;;  %560 = vmatprep.subr.bf16.mxu1 %v621_v0 }
  0x1b   :  { %184 = vmatpush1.bf16.msra.mxu0 %v587_v9  ;;  %572 = vmatpush1.bf16.msra.mxu1 %v587_v9 }
  0x1c   :  { %185 = vmatprep.subr.bf16.mxu0 %v621_v0  ;;  %561 = vmatprep.subr.bf16.mxu1 %v621_v0 }
  0x1f   :  { %186 = vmatpush1.bf16.msra.mxu0 %v588_v10  ;;  %573 = vmatpush1.bf16.msra.mxu1 %v588_v10 }
  0x20   :  { %187 = vmatprep.subr.bf16.mxu0 %v621_v0  ;;  %562 = vmatprep.subr.bf16.mxu1 %v621_v0 }
  0x23   :  { %188 = vmatpush1.bf16.msra.mxu0 %v589_v11  ;;  %574 = vmatpush1.bf16.msra.mxu1 %v589_v11 }
  0x24   :  { %189 = vmatprep.subr.bf16.mxu0 %v621_v0  ;;  %563 = vmatprep.subr.bf16.mxu1 %v621_v0 }
  0x27   :  { %190 = vmatpush1.bf16.msra.mxu0 %v590_v12  ;;  %575 = vmatpush1.bf16.msra.mxu1 %v590_v12 }
  0x28   :  { %191 = vmatprep.subr.bf16.mxu0 %v621_v0  ;;  %564 = vmatprep.subr.bf16.mxu1 %v621_v0 }
  0x2b   :  { %192 = vmatpush1.bf16.msra.mxu0 %v591_v13  ;;  %576 = vmatpush1.bf16.msra.mxu1 %v591_v13 }
  0x2c   :  { %193 = vmatprep.subr.bf16.mxu0 %v621_v0  ;;  %565 = vmatprep.subr.bf16.mxu1 %v621_v0 }
  0x2f   :  { %194 = vmatpush1.bf16.msra.mxu0 %v592_v14  ;;  %577 = vmatpush1.bf16.msra.mxu1 %v592_v14 }
  0x32   :  { %204 = vmatmul.mubr.bf16.vlgmr.msra.gmra.mrb[0].mxu0 %v593_v15  ;;  %220 = vmatmul.mubr.bf16.vlgmr.msra.gmra.mrb[0].mxu1 %v596_v16 }
  0x33   :  { %535 = vmatprep.mubr.msk.bf16.mxu0 %vm158_vm0, %v599_v17  ;;  %537 = vmatprep.mubr.msk.bf16.mxu1 %vm158_vm0, %v602_v18 }
  0x3a   :  { %212 = vmatmul.mubr.bf16.gmra.mrb[4].mxu0 %v601_v19  ;;  %228 = vmatmul.mubr.bf16.gmra.mrb[4].mxu1 %v604_v20 }
 0x105   :  { %v737_v21 = vpop.f32.mrb[0].mxu0  ;;  %v739_v22 = vpop.f32.mrb[0].mxu1 }
 0x106   :  { %v207_v23 = vpop.f32.mrb[1].mxu0  ;;  %v223_v24 = vpop.f32.mrb[1].mxu1  ;;  %v237_v25 = vsel %vm236_vm1, %v737_v21, 0.0  ;;  %v249_v31 = vsel %vm236_vm1, %v739_v22, 0.0 }
 0x107   :  { %v743_v26 = vpop.f32.mrb[2].mxu1  ;;  %238 = vadd.xlane.f32.xlu0 %v237_v25  ;;  %v745_v27 = vpop.f32.mrb[2].mxu0  ;;  %v404_v25 = vld [vmem:[%s929_s3 + $0x38] sm:$0xff] }
 0x108   :  { %v210_v28 = vpop.f32.mrb[3].mxu0  ;;  %v226_v29 = vpop.f32.mrb[3].mxu1  ;;  %v252_v30 = vsel %vm236_vm1, %v743_v26, 0.0  ;;  %v240_v35 = vsel %vm236_vm1, %v745_v27, 0.0 }
 0x109   :  { %253 = vadd.xlane.f32.xlu1 %v252_v30 }
 0x10b   :  { %250 = vadd.xlane.f32.xlu0 %v249_v31 }
 0x10d   :  { %v751_v32 = vpop.f32.mrb[4].mxu0  ;;  %v753_v33 = vpop.f32.mrb[4].mxu1 }
 0x10e   :  { %v215_v34 = vpop.f32.mrb[5].mxu0  ;;  %v243_v36 = vsel %vm236_vm1, %v751_v32, 0.0  ;;  %v231_v37 = vpop.f32.mrb[5].mxu1  ;;  %v255_v41 = vsel %vm236_vm1, %v753_v33, 0.0 }
 0x10f   :  { %241 = vadd.xlane.f32.xlu0 %v240_v35  ;;  %244 = vadd.xlane.f32.xlu1 %v243_v36  ;;  %v759_v38 = vpop.f32.mrb[6].mxu0  ;;  %v761_v39 = vpop.f32.mrb[6].mxu1 }
 0x110   :  { %v218_v40 = vpop.f32.mrb[7].mxu0  ;;  %v234_v42 = vpop.f32.mrb[7].mxu1  ;;  %v246_v55 = vsel %vm236_vm1, %v759_v38, 0.0  ;;  %v258_v56 = vsel %vm236_vm1, %v761_v39, 0.0 }
 0x113   :  { %256 = vadd.xlane.f32.xlu0 %v255_v41 }
 0x120   :  { %356 = vperm.xlu1 %580, %v342_v43  }
 0x124   :  { %361 = vperm.xlu1 %580, %v343_v44  }
 0x128   :  { %366 = vperm.xlu1 %580, %v344_v45  }
 0x129   :  { %351 = vperm.xlu0 %579, %v341_v46  }
 0x12c   :  { %371 = vperm.xlu1 %580, %v345_v47  }
 0x12d   :  { %412 = vperm.xlu0 %579, %v398_v48  }
 0x130   :  { %376 = vperm.xlu1 %580, %v346_v49  }
 0x131   :  { %422 = vperm.xlu0 %579, %v400_v50  }
 0x134   :  { %381 = vperm.xlu1 %580, %v347_v51  }
 0x135   :  { %432 = vperm.xlu0 %579, %v402_v52  }
 0x138   :  { %386 = vperm.xlu1 %580, %v348_v53  }
 0x13c   :  { %407 = vperm.xlu1 %580, %v397_v54  }
 0x160   :  { %247 = vadd.xlane.f32.xlu1 %v246_v55 }
 0x164   :  { %259 = vadd.xlane.f32.xlu1 %v258_v56 }
 0x175   :  { %417 = vperm.xlu1 %580, %v399_v57  }
 0x179   :  { %427 = vperm.xlu1 %580, %v401_v58  }
 0x194   :  { %v239_v59 = vpop.xlane.xlu0 %238 }
 0x195   :  { %v261_v60 = vmul.f32 0.025, %v239_v59 }
 0x196   :  { %v254_v62 = vpop.xlane.xlu1 %253 }
 0x197   :  { %v812_v61 = vsub.f32 %v737_v21, %v261_v60  ;;  %v266_v2 = vmul.f32 0.025, %v254_v62 }
 0x198   :  { %v251_v63 = vpop.xlane.xlu0 %250 }
 0x199   :  { %v265_v0 = vmul.f32 0.025, %v251_v63  ;;  %v277_v1 = vmul.f32 %v812_v61, %v812_v61  ;;  %v823_v10 = vsub.f32 %v743_v26, %v266_v2 }
 0x19b   :  { %v817_v3 = vsub.f32 %v739_v22, %v265_v0  ;;  %v285_v4 = vsel %vm236_vm1, %v277_v1, 0.0  ;;  %v282_v21 = vmul.f32 %v823_v10, %v823_v10 }
 0x19c   :  { %286 = vadd.xlane.f32.xlu0 %v285_v4  ;;  %v242_v5 = vpop.xlane.xlu0 %241  ;;  %v245_v6 = vpop.xlane.xlu1 %244 }
 0x19d   :  { %v262_v7 = vmul.f32 0.025, %v242_v5  ;;  %v263_v8 = vmul.f32 0.025, %v245_v6  ;;  %v281_v9 = vmul.f32 %v817_v3, %v817_v3  ;;  %v300_v24 = vsel %vm236_vm1, %v282_v21, 0.0 }
 0x19f   :  { %v826_v11 = vsub.f32 %v745_v27, %v262_v7  ;;  %v829_v12 = vsub.f32 %v751_v32, %v263_v8  ;;  %v297_v13 = vsel %vm236_vm1, %v281_v9, 0.0 }
 0x1a0   :  { %298 = vadd.xlane.f32.xlu0 %v297_v13  ;;  %v257_v14 = vpop.xlane.xlu0 %256  ;;  %v850_v26 = vpop.permute.xlu1 %356 }
 0x1a1   :  { %v267_v15 = vmul.f32 0.025, %v257_v14  ;;  %v279_v16 = vmul.f32 %v829_v12, %v829_v12  ;;  %v278_v17 = vmul.f32 %v826_v11, %v826_v11 }
 0x1a3   :  { %v837_v18 = vsub.f32 %v753_v33, %v267_v15  ;;  %v291_v19 = vsel %vm236_vm1, %v279_v16, 0.0  ;;  %v288_v20 = vsel %vm236_vm1, %v278_v17, 0.0 }
 0x1a4   :  { %292 = vadd.xlane.f32.xlu0 %v291_v19  ;;  %289 = vadd.xlane.f32.xlu1 %v288_v20  ;;  %v852_v27 = vpop.permute.xlu1 %361 }
 0x1a5   :  { %v283_v22 = vmul.f32 %v837_v18, %v837_v18 }
 0x1a7   :  { %v303_v23 = vsel %vm236_vm1, %v283_v22, 0.0 }
 0x1a8   :  { %304 = vadd.xlane.f32.xlu0 %v303_v23  ;;  %301 = vadd.xlane.f32.xlu1 %v300_v24  ;;  %v854_v28 = vpop.permute.xlu1 %366  ;;  %v352_v46 = vpop.permute.xlu0 %351 }
 0x1ac   :  { %v372_v29 = vpop.permute.xlu1 %371  ;;  %v413_v47 = vpop.permute.xlu0 %412 }
 0x1b0   :  { %v856_v30 = vpop.permute.xlu1 %376  ;;  %v877_v48 = vpop.permute.xlu0 %422 }
 0x1b4   :  { %v858_v31 = vpop.permute.xlu1 %381 }
 0x1b8   :  { %v860_v32 = vpop.permute.xlu1 %386 }
 0x1bc   :  { %v408_v33 = vpop.permute.xlu1 %407 }
 0x1be   :  { %442 = vperm.xlu0 %579, %v404_v25  }
 0x1ed   :  { %v248_v34 = vpop.xlane.xlu1 %247 }
 0x1ee   :  { %v264_v35 = vmul.f32 0.025, %v248_v34 }
 0x1f0   :  { %v863_v36 = vsub.f32 %v759_v38, %v264_v35  ;;  %v403_v38 = vld [vmem:[%s929_s3 + $0x30] sm:$0xff] }
 0x1f1   :  { %v260_v37 = vpop.xlane.xlu1 %259 }
 0x1f2   :  { %v268_v40 = vmul.f32 0.025, %v260_v37  ;;  %v280_v41 = vmul.f32 %v863_v36, %v863_v36 }
 0x1f4   :  { %v868_v42 = vsub.f32 %v761_v39, %v268_v40  ;;  %v294_v43 = vsel %vm236_vm1, %v280_v41, 0.0  ;;  %v433_v39 = vpop.permute.xlu0 %432 }
 0x1f5   :  { %295 = vadd.xlane.f32.xlu1 %v294_v43  ;;  %v418_v49 = vpop.permute.xlu1 %417 }
 0x1f6   :  { %v284_v44 = vmul.f32 %v868_v42, %v868_v42 }
 0x1f8   :  { %v306_v45 = vsel %vm236_vm1, %v284_v44, 0.0 }
 0x1f9   :  { %307 = vadd.xlane.f32.xlu1 %v306_v45  ;;  %v428_v53 = vpop.permute.xlu1 %427 }
 0x20a   :  { %437 = vperm.xlu1 %580, %v403_v38  }
 0x229   :  { %v287_v50 = vpop.xlane.xlu0 %286 }
 0x22a   :  { %v309_v51 = vmul.f32 0.025, %v287_v50 }
 0x22c   :  { %v317_v52 = vadd.f32 1e-05, %v309_v51 }
 0x22d   :  { %v299_v54 = vpop.xlane.xlu0 %298 }
 0x22e   :  { %605 = vrsqrt.f32 %v317_v52  ;;  %v313_v55 = vmul.f32 0.025, %v299_v54 }
 0x230   :  { %v321_v56 = vadd.f32 1e-05, %v313_v55 }
 0x231   :  { %v293_v57 = vpop.xlane.xlu0 %292  ;;  %v290_v58 = vpop.xlane.xlu1 %289 }
 0x232   :  { %607 = vrsqrt.f32 %v321_v56  ;;  %v311_v59 = vmul.f32 0.025, %v293_v57  ;;  %v310_v60 = vmul.f32 0.025, %v290_v58 }
 0x234   :  { %v319_v62 = vadd.f32 1e-05, %v311_v59  ;;  %v318_v63 = vadd.f32 1e-05, %v310_v60 }
 0x235   :  { %v302_v0 = vpop.xlane.xlu1 %301  ;;  %v305_v45 = vpop.xlane.xlu0 %304 }
 0x236   :  { %609 = vrsqrt.f32 %v319_v62  ;;  %v314_v1 = vmul.f32 0.025, %v302_v0  ;;  %v315_v38 = vmul.f32 0.025, %v305_v45 }
 0x237   :  { %611 = vrsqrt.f32 %v318_v63 }
 0x238   :  { %v606_v2 = vpop.eup %605  ;;  %v322_v4 = vadd.f32 1e-05, %v314_v1 }
 0x239   :  { %v333_v5 = vmul.f32 %v606_v2, %v812_v61 }
 0x23a   :  { %613 = vrsqrt.f32 %v322_v4 }
 0x23b   :  { %v389_v6 = vmul.f32 %v352_v46, %v333_v5  ;;  %v323_v46 = vadd.f32 1e-05, %v315_v38 }
 0x23c   :  { %v608_v7 = vpop.eup %607 }
 0x23d   :  { %v445_v8 = vadd.f32 %v408_v33, %v389_v6  ;;  %v337_v9 = vmul.f32 %v608_v7, %v817_v3  ;;  %615 = vrsqrt.f32 %v323_v46  ;;  %v443_v5 = vpop.permute.xlu0 %442 }
 0x23f   :  { %v453_v13 = vmul.f32 0.2, %v445_v8  ;;  %v393_v14 = vmul.f32 %v372_v29, %v337_v9 }
 0x240   :  { %v610_v15 = vpop.eup %609 }
 0x241   :  { %v612_v16 = vpop.eup %611  ;;  %v461_v17 = vmax.f32 %v445_v8, %v453_v13  ;;  %v449_v19 = vadd.f32 %v428_v53, %v393_v14  ;;  %v335_v20 = vmul.f32 %v610_v15, %v829_v12 }
 0x242   :  { %v334_v21 = vmul.f32 %v612_v16, %v826_v11 }
 0x243   :  { %v546_v22 = vpack.c.bf16 %v461_v17, %v461_v17  ;;  %v457_v23 = vmul.f32 0.2, %v449_v19  ;;  %v391_v61 = vmul.f32 %v852_v27, %v335_v20 }
 0x244   :  { %v390_v24 = vmul.f32 %v850_v26, %v334_v21  ;;  %v614_v25 = vpop.eup %613 }
 0x245   :  { %502 = vst.msk [vmem:[%s930_s4] sm:$0xf] %vm501_vm2, %v546_v22  ;;  %v465_v3 = vmax.f32 %v449_v19, %v457_v23  ;;  %v447_v29 = vadd.f32 %v418_v49, %v391_v61  ;;  %v338_v12 = vmul.f32 %v614_v25, %v823_v10 }
 0x246   :  { %v446_v33 = vadd.f32 %v413_v47, %v390_v24 }
 0x247   :  { %v550_v34 = vpack.c.bf16 %v465_v3, %v465_v3  ;;  %v455_v35 = vmul.f32 0.2, %v447_v29  ;;  %v394_v37 = vmul.f32 %v856_v30, %v338_v12  ;;  %v616_v47 = vpop.eup %615 }
 0x248   :  { %v454_v11 = vmul.f32 0.2, %v446_v33  ;;  %v339_v51 = vmul.f32 %v616_v47, %v837_v18 }
 0x249   :  { %506 = vst.msk [vmem:[%s930_s4 + $0x10] sm:$0xf] %vm501_vm2, %v550_v34  ;;  %v463_v26 = vmax.f32 %v447_v29, %v455_v35  ;;  %v450_v40 = vadd.f32 %v433_v39, %v394_v37 }
 0x24a   :  { %v462_v27 = vmax.f32 %v446_v33, %v454_v11  ;;  %v395_v55 = vmul.f32 %v858_v31, %v339_v51 }
 0x24b   :  { %v548_v41 = vpack.c.bf16 %v463_v26, %v463_v26  ;;  %v458_v44 = vmul.f32 0.2, %v450_v40 }
 0x24c   :  { %v547_v43 = vpack.c.bf16 %v462_v27, %v462_v27 }
 0x24d   :  { %504 = vst.msk [vmem:[%s930_s4 + $0x8] sm:$0xf] %vm501_vm2, %v548_v41  ;;  %v466_v10 = vmax.f32 %v450_v40, %v458_v44 }
 0x24e   :  { %503 = vst.msk [vmem:[%s930_s4 + $0x4] sm:$0xf] %vm501_vm2, %v547_v43 }
 0x24f   :  { %v551_v30 = vpack.c.bf16 %v466_v10, %v466_v10 }
 0x251   :  { %507 = vst.msk [vmem:[%s930_s4 + $0x14] sm:$0xf] %vm501_vm2, %v551_v30 }
 0x282   :  { %v296_v39 = vpop.xlane.xlu1 %295 }
 0x283   :  { %v312_v49 = vmul.f32 0.025, %v296_v39 }
 0x285   :  { %v320_v50 = vadd.f32 1e-05, %v312_v49 }
 0x286   :  { %v308_v52 = vpop.xlane.xlu1 %307 }
 0x287   :  { %617 = vrsqrt.f32 %v320_v50  ;;  %v316_v53 = vmul.f32 0.025, %v308_v52 }
 0x289   :  { %v324_v54 = vadd.f32 1e-05, %v316_v53 }
 0x28a   :  { %v438_v56 = vpop.permute.xlu1 %437 }
 0x28b   :  { %619 = vrsqrt.f32 %v324_v54  ;;  %v451_v57 = vadd.f32 %v438_v56, %v395_v55 }
 0x28d   :  { %v459_v58 = vmul.f32 0.2, %v451_v57 }
 0x28f   :  { %v467_v59 = vmax.f32 %v451_v57, %v459_v58 }
 0x291   :  { %v618_v60 = vpop.eup %617  ;;  %v552_v62 = vpack.c.bf16 %v467_v59, %v467_v59 }
 0x292   :  { %v336_v63 = vmul.f32 %v618_v60, %v863_v36 }
 0x293   :  { %508 = vst.msk [vmem:[%s930_s4 + $0x18] sm:$0xf] %vm501_vm2, %v552_v62 }
 0x294   :  { %v392_v18 = vmul.f32 %v854_v28, %v336_v63 }
 0x295   :  { %v620_v0 = vpop.eup %619 }
 0x296   :  { %v448_v1 = vadd.f32 %v877_v48, %v392_v18  ;;  %v340_v31 = vmul.f32 %v620_v0, %v868_v42 }
 0x298   :  { %v456_v2 = vmul.f32 0.2, %v448_v1  ;;  %v396_v4 = vmul.f32 %v860_v32, %v340_v31 }
 0x29a   :  { %v464_v6 = vmax.f32 %v448_v1, %v456_v2  ;;  %v452_v7 = vadd.f32 %v443_v5, %v396_v4 }
 0x29c   :  { %v549_v8 = vpack.c.bf16 %v464_v6, %v464_v6  ;;  %v460_v36 = vmul.f32 0.2, %v452_v7 }
 0x29e   :  { %505 = vst.msk [vmem:[%s930_s4 + $0xc] sm:$0xf] %vm501_vm2, %v549_v8  ;;  %v468_v9 = vmax.f32 %v452_v7, %v460_v36 }
 0x2a0   :  { %v553_v28 = vpack.c.bf16 %v468_v9, %v468_v9 }
 0x2a2   :  { %509 = vst.msk [vmem:[%s930_s4 + $0x1c] sm:$0xf] %vm501_vm2, %v553_v28 }

// kernel: discriminator_forward.17
= control target key start
LH: loop header
LB: loop body
LE: loop exit
PB: predicated region body
PF: predicated region fallthrough
CT: control target
= control target key end

     0   :  { %v1259_v21 = vmov 1966171168   ;;  %v198_v23 = vlaneseq  ;;  %vm965_vm0 = vcmask 517120   ;;  %vm977_vm1 = vcmask 1024   ;;  %s1563_s1 = inlined_call_operand.vmem [shape: bf16[1280,64], index: 1, kind: input, shape index: {}]   ;;  %s1564_s0 = inlined_call_operand.vmem [shape: bf16[2,1280], index: 0, kind: input, shape index: {}]   ;;  %s1565_s4 = inlined_call_operand.<no memory space> [shape: f32[1,1], index: 4, kind: input, shape index: {}]   ;;  %s1566_s2 = inlined_call_operand.vmem [shape: f32[1,64], index: 2, kind: input, shape index: {}]   ;;  %s1567_s3 = inlined_call_operand.vmem [shape: f32[1,64], index: 3, kind: input, shape index: {}]   ;;  %s1568_s5 = inlined_call_operand.vmem [shape: f32[2,1], index: 5, kind: output, shape index: {}]  }
   0x1   :  { %v1178_v0 = vld [vmem:[%s1563_s1 + $0x40] sm:$0xff]   ;;  %v1182_v4 = vld [vmem:[%s1563_s1 + $0x48] sm:$0xff]   ;;  %v1186_v8 = vld [vmem:[%s1563_s1 + $0x50] sm:$0xff]   ;;  %v196_v22 = vunpack.c.l.s4 %v1259_v21 }
   0x2   :  { %v1179_v1 = vld [vmem:[%s1563_s1] sm:$0xff]   ;;  %1067 = vmatprep.subr.bf16.mxu0 %v1178_v0  ;;  %v1183_v5 = vld [vmem:[%s1563_s1 + $0x8] sm:$0xff]   ;;  %v1187_v9 = vld [vmem:[%s1563_s1 + $0x10] sm:$0xff]   ;;  %v199_v29 = vshrl.u32 %v198_v23, 7 }
   0x3   :  { %v1180_v2 = vld [vmem:[%s1563_s1 + $0xc0] sm:$0xff]   ;;  %1068 = vmatpush3.bf16.msra.mxu0 %v1179_v1  ;;  %v1184_v6 = vld [vmem:[%s1563_s1 + $0xc8] sm:$0xff]   ;;  %v1188_v10 = vld [vmem:[%s1563_s1 + $0xd0] sm:$0xff]   ;;  %v197_v28 = vunpack.c.0.s8 %v196_v22 }
   0x4   :  { %v1181_v3 = vld [vmem:[%s1563_s1 + $0x80] sm:$0xff]   ;;  %1089 = vmatprep.subr.bf16.mxu1 %v1180_v2  ;;  %1069 = vmatprep.subr.bf16.mxu0 %v1182_v4  ;;  %v1185_v7 = vld [vmem:[%s1563_s1 + $0x88] sm:$0xff]   ;;  %v1189_v11 = vld [vmem:[%s1563_s1 + $0x90] sm:$0xff]  }
   0x5   :  { %1090 = vmatpush3.bf16.msra.mxu1 %v1181_v3  ;;  %v1190_v12 = vld [vmem:[%s1563_s1 + $0x58] sm:$0xff]   ;;  %v1194_v16 = vld [vmem:[%s1563_s1 + $0x60] sm:$0xff]   ;;  %v1198_v20 = vld [vmem:[%s1563_s1 + $0x68] sm:$0xff]   ;;  %v1377_v34 = vsub.s32 %v197_v28, %v199_v29 }
   0x6   :  { %1091 = vmatprep.subr.bf16.mxu1 %v1184_v6  ;;  %v1191_v13 = vld [vmem:[%s1563_s1 + $0x18] sm:$0xff]   ;;  %v1195_v17 = vld [vmem:[%s1563_s1 + $0x20] sm:$0xff]   ;;  %v1199_v24 = vld [vmem:[%s1563_s1 + $0x28] sm:$0xff]  }
   0x7   :  { %1070 = vmatpush3.bf16.msra.mxu0 %v1183_v5  ;;  %v1192_v14 = vld [vmem:[%s1563_s1 + $0xd8] sm:$0xff]   ;;  %v1196_v18 = vld [vmem:[%s1563_s1 + $0xe0] sm:$0xff]   ;;  %v1200_v25 = vld [vmem:[%s1563_s1 + $0xe8] sm:$0xff]  }
   0x8   :  { %1071 = vmatprep.subr.bf16.mxu0 %v1186_v8  ;;  %v1193_v15 = vld [vmem:[%s1563_s1 + $0x98] sm:$0xff]   ;;  %v1197_v19 = vld [vmem:[%s1563_s1 + $0xa0] sm:$0xff]   ;;  %v1201_v26 = vld [vmem:[%s1563_s1 + $0xa8] sm:$0xff]  }
   0x9   :  { %1092 = vmatpush3.bf16.msra.mxu1 %v1185_v7  ;;  %v1202_v27 = vld [vmem:[%s1563_s1 + $0x70] sm:$0xff]   ;;  %v1206_v33 = vld [vmem:[%s1563_s1 + $0x78] sm:$0xff]   ;;  %v23_v37 = vld [vmem:[%s1564_s0] sm:$0xff] }
   0xa   :  { %1093 = vmatprep.subr.bf16.mxu1 %v1188_v10  ;;  %v1203_v30 = vld [vmem:[%s1563_s1 + $0x30] sm:$0xff]   ;;  %v1207_v35 = vld [vmem:[%s1563_s1 + $0x38] sm:$0xff]   ;;  %v194_v38 = vcombine.high %v23_v37, %v23_v37  ;;  %v201_v39 = vrot.slane %v23_v37, %v1377_v34  ;;  %v1211_v41 = vld [vmem:[%s1563_s1 + $0x140] sm:$0xff]  }
   0xb   :  { %1072 = vmatpush3.bf16.msra.mxu0 %v1187_v9  ;;  %v1204_v31 = vld [vmem:[%s1563_s1 + $0xf0] sm:$0xff]   ;;  %v1208_v36 = vld [vmem:[%s1563_s1 + $0xf8] sm:$0xff]   ;;  %v1213_v45 = vld [vmem:[%s1563_s1 + $0x1c0] sm:$0xff]  }
   0xc   :  { %1073 = vmatprep.subr.bf16.mxu0 %v1190_v12  ;;  %v1205_v32 = vld [vmem:[%s1563_s1 + $0xb0] sm:$0xff]   ;;  %v1210_v40 = vld [vmem:[%s1563_s1 + $0xb8] sm:$0xff]   ;;  %v209_v42 = vcombine.high %v201_v39, %v201_v39  ;;  %v217_v43 = vrot.slane %v201_v39, %v1377_v34  ;;  %v1397_v44 = vrot.slane %v194_v38, %v1377_v34  ;;  %v1212_v47 = vld [vmem:[%s1563_s1 + $0x100] sm:$0xff]  }
   0xd   :  { %1094 = vmatpush3.bf16.msra.mxu1 %v1189_v11  ;;  %v1215_v50 = vld [vmem:[%s1563_s1 + $0x148] sm:$0xff]   ;;  %v1214_v52 = vld [vmem:[%s1563_s1 + $0x180] sm:$0xff]   ;;  %v1219_v57 = vld [vmem:[%s1563_s1 + $0x150] sm:$0xff]  }
   0xe   :  { %1095 = vmatprep.subr.bf16.mxu1 %v1192_v14  ;;  %v231_v46 = vrot.slane %v209_v42, %v1377_v34  ;;  %v210_v48 = vcombine.high %v1397_v44, %v1397_v44  ;;  %v239_v49 = vcombine.high %v217_v43, %v217_v43  ;;  %v1217_v54 = vld [vmem:[%s1563_s1 + $0x1c8] sm:$0xff]   ;;  %v1221_v59 = vld [vmem:[%s1563_s1 + $0x1d0] sm:$0xff]   ;;  %v1223_v61 = vld [vmem:[%s1563_s1 + $0x158] sm:$0xff]  }
   0xf   :  { %1074 = vmatpush3.bf16.msra.mxu0 %v1191_v13  ;;  %v1216_v55 = vld [vmem:[%s1563_s1 + $0x108] sm:$0xff]   ;;  %v1220_v60 = vld [vmem:[%s1563_s1 + $0x110] sm:$0xff]   ;;  %v1225_v63 = vld [vmem:[%s1563_s1 + $0x1d8] sm:$0xff]  }
  0x10   :  { %1075 = vmatprep.subr.bf16.mxu0 %v1194_v16  ;;  %787 = vmatprep.mubr.bf16.mxu0 %v231_v46  ;;  %v241_v51 = vcombine.high %v231_v46, %v231_v46  ;;  %v238_v53 = vrot.slane %v210_v48, %v1377_v34  ;;  %v1218_v58 = vld [vmem:[%s1563_s1 + $0x188] sm:$0xff]   ;;  %v1222_v62 = vld [vmem:[%s1563_s1 + $0x190] sm:$0xff]   ;;  %v1224_v0 = vld [vmem:[%s1563_s1 + $0x118] sm:$0xff]  }
  0x11   :  { %1096 = vmatpush3.bf16.msra.mxu1 %v1193_v15  ;;  %v1227_v1 = vld [vmem:[%s1563_s1 + $0x160] sm:$0xff]   ;;  %v1226_v2 = vld [vmem:[%s1563_s1 + $0x198] sm:$0xff]   ;;  %v1231_v5 = vld [vmem:[%s1563_s1 + $0x168] sm:$0xff]  }
  0x12   :  { %1097 = vmatprep.subr.bf16.mxu1 %v1196_v18  ;;  %827 = vmatprep.mubr.bf16.mxu1 %v241_v51  ;;  %v242_v56 = vcombine.high %v238_v53, %v238_v53  ;;  %v1229_v3 = vld [vmem:[%s1563_s1 + $0x1e0] sm:$0xff]   ;;  %v1233_v7 = vld [vmem:[%s1563_s1 + $0x1e8] sm:$0xff]   ;;  %v1235_v9 = vld [vmem:[%s1563_s1 + $0x170] sm:$0xff]  }
  0x13   :  { %1076 = vmatpush3.bf16.msra.mxu0 %v1195_v17  ;;  %v1228_v4 = vld [vmem:[%s1563_s1 + $0x120] sm:$0xff]   ;;  %v1232_v8 = vld [vmem:[%s1563_s1 + $0x128] sm:$0xff]   ;;  %v1237_v11 = vld [vmem:[%s1563_s1 + $0x1f0] sm:$0xff]   ;;  %v224_v17 = vrot.slane %v1397_v44, %v1377_v34 }
  0x14   :  { %1077 = vmatprep.subr.bf16.mxu0 %v1198_v20  ;;  %v1230_v6 = vld [vmem:[%s1563_s1 + $0x1a0] sm:$0xff]   ;;  %v1234_v10 = vld [vmem:[%s1563_s1 + $0x1a8] sm:$0xff]   ;;  %v1236_v12 = vld [vmem:[%s1563_s1 + $0x130] sm:$0xff]  }
  0x15   :  { %1098 = vmatpush3.bf16.msra.mxu1 %v1197_v19  ;;  %v1239_v13 = vld [vmem:[%s1563_s1 + $0x178] sm:$0xff]   ;;  %v1238_v14 = vld [vmem:[%s1563_s1 + $0x1b0] sm:$0xff]   ;;  %v1243_v18 = vld [vmem:[%s1563_s1 + $0x240] sm:$0xff]   ;;  %v240_v21 = vcombine.high %v224_v17, %v224_v17 }
  0x16   :  { %1099 = vmatprep.subr.bf16.mxu1 %v1200_v25  ;;  %v1241_v15 = vld [vmem:[%s1563_s1 + $0x1f8] sm:$0xff]   ;;  %v1244_v20 = vld [vmem:[%s1563_s1 + $0x200] sm:$0xff]   ;;  %v1245_v22 = vld [vmem:[%s1563_s1 + $0x248] sm:$0xff]  }
  0x17   :  { %1078 = vmatpush3.bf16.msra.mxu0 %v1199_v24  ;;  %v1240_v16 = vld [vmem:[%s1563_s1 + $0x138] sm:$0xff]   ;;  %v1246_v23 = vld [vmem:[%s1563_s1 + $0x208] sm:$0xff]   ;;  %v1247_v24 = vld [vmem:[%s1563_s1 + $0x250] sm:$0xff]  }
  0x18   :  { %1079 = vmatprep.subr.bf16.mxu0 %v1202_v27  ;;  %v1242_v19 = vld [vmem:[%s1563_s1 + $0x1b8] sm:$0xff]   ;;  %v1248_v25 = vld [vmem:[%s1563_s1 + $0x210] sm:$0xff]   ;;  %v984_v28 = vld.sshfl [vmem:[%s1564_s0 + $0x8] sm:$0x11 pattern:$0x75316420] }
  0x19   :  { %1100 = vmatpush3.bf16.msra.mxu1 %v1201_v26  ;;  %v1249_v26 = vld [vmem:[%s1563_s1 + $0x258] sm:$0xff]   ;;  %v1251_v29 = vld [vmem:[%s1563_s1 + $0x260] sm:$0xff]   ;;  %v1256_v37 = vld [vmem:[%s1563_s1 + $0x230] sm:$0xff]  }
  0x1a   :  { %1101 = vmatprep.subr.bf16.mxu1 %v1204_v31  ;;  %v1250_v27 = vld [vmem:[%s1563_s1 + $0x218] sm:$0xff]  }
  0x1b   :  { %1080 = vmatpush3.bf16.msra.mxu0 %v1203_v30  ;;  %v250_v30 = vcombine.high %v984_v28, %v984_v28  ;;  %v1257_v38 = vld [vmem:[%s1563_s1 + $0x278] sm:$0xff]  }
  0x1c   :  { %1081 = vmatprep.subr.bf16.mxu0 %v1206_v33  ;;  %v1253_v33 = vld [vmem:[%s1563_s1 + $0x268] sm:$0xff]   ;;  %v1258_v39 = vld [vmem:[%s1563_s1 + $0x238] sm:$0xff]  }
  0x1d   :  { %1102 = vmatpush3.bf16.msra.mxu1 %v1205_v32  ;;  %v264_v31 = vrot.slane %v250_v30, %v1377_v34  ;;  %v1252_v32 = vld [vmem:[%s1563_s1 + $0x220] sm:$0xff]  }
  0x1e   :  { %1103 = vmatprep.subr.bf16.mxu1 %v1208_v36  ;;  %v1255_v36 = vld [vmem:[%s1563_s1 + $0x270] sm:$0xff]  }
  0x1f   :  { %1082 = vmatpush3.bf16.msra.mxu0 %v1207_v35  ;;  %v1254_v35 = vld [vmem:[%s1563_s1 + $0x228] sm:$0xff]  }
  0x20   :  { %1111 = vmatprep.subr.bf16.mxu0 %v1211_v41  ;;  %v10_v41 = vstv %s1565_s4 }
  0x21   :  { %1104 = vmatpush3.bf16.msra.mxu1 %v1210_v40  ;;  %v257_v40 = vrot.slane %v984_v28, %v1377_v34  ;;  %11 = vst [vmem:[#allocation2] sm:$0x1] %v10_v41 }
  0x22   :  { %1133 = vmatprep.subr.bf16.mxu1 %v1213_v45  ;;  %788 = vmatmul.mubr.bf16.vlgmr.msra.gmra.mrb[0].mxu0 %v217_v43  ;;  %v983_v43 = vld [vmem:[%s1566_s2] ss:$0 sm:$0xff] }
  0x23   :  { %1112 = vmatpush3.bf16.msra.mxu0 %v1212_v47  ;;  %867 = vmatprep.mubr.bf16.mxu0 %v238_v53 }
  0x24   :  { %828 = vmatmul.mubr.bf16.vlgmr.msra.gmra.mrb[0].mxu1 %v239_v49  ;;  %1113 = vmatprep.subr.bf16.mxu0 %v1215_v50 }
  0x25   :  { %1134 = vmatpush3.bf16.msra.mxu1 %v1214_v52  ;;  %907 = vmatprep.mubr.bf16.mxu1 %v242_v56 }
  0x26   :  { %1135 = vmatprep.subr.bf16.mxu1 %v1217_v54 }
  0x27   :  { %1114 = vmatpush3.bf16.msra.mxu0 %v1216_v55 }
  0x28   :  { %1115 = vmatprep.subr.bf16.mxu0 %v1219_v57 }
  0x29   :  { %1136 = vmatpush3.bf16.msra.mxu1 %v1218_v58 }
  0x2a   :  { %1137 = vmatprep.subr.bf16.mxu1 %v1221_v59 }
  0x2b   :  { %1116 = vmatpush3.bf16.msra.mxu0 %v1220_v60 }
  0x2c   :  { %1117 = vmatprep.subr.bf16.mxu0 %v1223_v61 }
  0x2d   :  { %1138 = vmatpush3.bf16.msra.mxu1 %v1222_v62 }
  0x2e   :  { %1139 = vmatprep.subr.bf16.mxu1 %v1225_v63 }
  0x2f   :  { %1118 = vmatpush3.bf16.msra.mxu0 %v1224_v0 }
  0x30   :  { %1119 = vmatprep.subr.bf16.mxu0 %v1227_v1 }
  0x31   :  { %1140 = vmatpush3.bf16.msra.mxu1 %v1226_v2 }
  0x32   :  { %1141 = vmatprep.subr.bf16.mxu1 %v1229_v3 }
  0x33   :  { %1120 = vmatpush3.bf16.msra.mxu0 %v1228_v4 }
  0x34   :  { %1121 = vmatprep.subr.bf16.mxu0 %v1231_v5 }
  0x35   :  { %1142 = vmatpush3.bf16.msra.mxu1 %v1230_v6 }
  0x36   :  { %1143 = vmatprep.subr.bf16.mxu1 %v1233_v7 }
  0x37   :  { %1122 = vmatpush3.bf16.msra.mxu0 %v1232_v8 }
  0x38   :  { %1123 = vmatprep.subr.bf16.mxu0 %v1235_v9  ;;  %v1065_v9 = vld [vmem:[%s1567_s3] ss:$0 sm:$0xff] }
  0x39   :  { %1144 = vmatpush3.bf16.msra.mxu1 %v1234_v10 }
  0x3a   :  { %1145 = vmatprep.subr.bf16.mxu1 %v1237_v11 }
  0x3b   :  { %1124 = vmatpush3.bf16.msra.mxu0 %v1236_v12 }
  0x3c   :  { %1125 = vmatprep.subr.bf16.mxu0 %v1239_v13  ;;  %v1066_v13 = vld [vmem:[#allocation2] ss:$0 sm:$0xff] }
  0x3d   :  { %1146 = vmatpush3.bf16.msra.mxu1 %v1238_v14 }
  0x3e   :  { %1147 = vmatprep.subr.bf16.mxu1 %v1241_v15 }
  0x3f   :  { %1126 = vmatpush3.bf16.msra.mxu0 %v1240_v16 }
  0x40   :  { %1155 = vmatprep.subr.bf16.mxu0 %v1243_v18 }
  0x41   :  { %1148 = vmatpush3.bf16.msra.mxu1 %v1242_v19 }
  0x42   :  { %868 = vmatmul.mubr.bf16.vlgmr.msra.gmra.mrb[4].mxu0 %v224_v17 }
  0x43   :  { %1156 = vmatpush3.bf16.msra.mxu0 %v1244_v20  ;;  %947 = vmatprep.mubr.bf16.mxu0 %v264_v31 }
  0x44   :  { %908 = vmatmul.mubr.bf16.vlgmr.msra.gmra.mrb[4].mxu1 %v240_v21  ;;  %1157 = vmatprep.subr.bf16.mxu0 %v1245_v22 }
  0x47   :  { %1158 = vmatpush3.bf16.msra.mxu0 %v1246_v23 }
  0x48   :  { %1159 = vmatprep.subr.bf16.mxu0 %v1247_v24 }
  0x4b   :  { %1160 = vmatpush3.bf16.msra.mxu0 %v1248_v25 }
  0x4c   :  { %1161 = vmatprep.subr.bf16.mxu0 %v1249_v26 }
  0x4f   :  { %1162 = vmatpush3.bf16.msra.mxu0 %v1250_v27 }
  0x50   :  { %1163 = vmatprep.subr.bf16.mxu0 %v1251_v29 }
  0x53   :  { %1164 = vmatpush3.bf16.msra.mxu0 %v1252_v32 }
  0x54   :  { %1165 = vmatprep.subr.bf16.mxu0 %v1253_v33 }
  0x57   :  { %1166 = vmatpush3.bf16.msra.mxu0 %v1254_v35 }
  0x58   :  { %1167 = vmatprep.subr.bf16.mxu0 %v1255_v36 }
  0x5b   :  { %1168 = vmatpush3.bf16.msra.mxu0 %v1256_v37 }
  0x5c   :  { %1169 = vmatprep.subr.bf16.mxu0 %v1257_v38 }
  0x5f   :  { %1170 = vmatpush3.bf16.msra.mxu0 %v1258_v39 }
  0x62   :  { %948 = vmatmul.mubr.bf16.vlgmr.msra.gmra.mrb[8].mxu0 %v257_v40 }
  0xf5   :  { %v1083_v42 = vpop.f32.mrb[0].mxu0 }
  0xf6   :  { %v1084_v44 = vpop.f32.mrb[1].mxu0 }
  0xf7   :  { %v1085_v45 = vadd.f32 %v1084_v44, %v1083_v42  ;;  %v1086_v46 = vpop.f32.mrb[2].mxu0  ;;  %v1105_v47 = vpop.f32.mrb[0].mxu1 }
  0xf8   :  { %v1087_v48 = vpop.f32.mrb[3].mxu0  ;;  %v1106_v49 = vpop.f32.mrb[1].mxu1 }
  0xf9   :  { %v790_v50 = vadd.f32 %v1085_v45, %v983_v43  ;;  %v1107_v34 = vadd.f32 %v1106_v49, %v1105_v47  ;;  %v1108_v51 = vpop.f32.mrb[2].mxu1 }
  0xfa   :  { %v1109_v52 = vpop.f32.mrb[3].mxu1 }
  0xfb   :  { %v830_v53 = vadd.f32 %v1107_v34, %v790_v50 }
 0x115   :  { %v1127_v54 = vpop.f32.mrb[4].mxu0 }
 0x116   :  { %v1128_v55 = vpop.f32.mrb[5].mxu0 }
 0x117   :  { %v1129_v56 = vadd.f32 %v1128_v55, %v1127_v54  ;;  %v1130_v57 = vpop.f32.mrb[6].mxu0  ;;  %v1149_v58 = vpop.f32.mrb[4].mxu1 }
 0x118   :  { %v1131_v59 = vpop.f32.mrb[7].mxu0  ;;  %v1150_v60 = vpop.f32.mrb[5].mxu1 }
 0x119   :  { %v870_v61 = vadd.f32 %v1129_v56, %v830_v53  ;;  %v1151_v62 = vadd.f32 %v1150_v60, %v1149_v58  ;;  %v1152_v63 = vpop.f32.mrb[6].mxu1 }
 0x11a   :  { %v1153_v0 = vpop.f32.mrb[7].mxu1 }
 0x11b   :  { %v910_v1 = vadd.f32 %v1151_v62, %v870_v61 }
 0x135   :  { %v1171_v2 = vpop.f32.mrb[8].mxu0 }
 0x136   :  { %v1172_v3 = vpop.f32.mrb[9].mxu0 }
 0x137   :  { %v1173_v4 = vadd.f32 %v1172_v3, %v1171_v2  ;;  %v1174_v5 = vpop.f32.mrb[10].mxu0 }
 0x138   :  { %v1175_v6 = vpop.f32.mrb[11].mxu0 }
 0x139   :  { %v950_v7 = vadd.f32 %v1173_v4, %v910_v1 }
 0x13b   :  { %v955_v8 = vmul.f32 0.2, %v950_v7 }
 0x13d   :  { %v956_v10 = vmax.f32 %v950_v7, %v955_v8 }
 0x13f   :  { %v964_v11 = vmul.f32 %v1065_v9, %v956_v10 }
 0x141   :  { %v966_v12 = vsel %vm965_vm0, %v964_v11, 0.0 }
 0x142   :  { %967 = vadd.xlane.f32.xlu0 %v966_v12 }
 0x1cf   :  { %v968_v14 = vpop.xlane.xlu0 %967 }
 0x1d0   :  { %v976_v15 = vadd.f32 %v1066_v13, %v968_v14 }
 0x1d2   :  { %978 = vst.msk [vmem:[%s1568_s5] sm:$0x3] %vm977_vm1, %v976_v15 }

</bundles_post_ra>
